<compile_context>
chip_gen: v7x
topology: tpu7x:2x2x1
jax: 0.10.0
libtpu: 0.0.40
codegen_flags: <defaults>
</compile_context>

<pallas_src>
import numpy as np

import jax
import jax.numpy as jnp
from jax.experimental import pallas as pl
from jax.experimental.pallas import tpu as pltpu

K = 5                              # conv kernel size
PAD = 2                            # "same" padding for 5x5
H = W = 16
HW = H * W                         # 256 -- lane-dense spatial axis (2 x 128)
CIN = (1, 6, 16, 32)               # true in-channels per conv
COUT = (6, 16, 32, 4)              # true out-channels per conv
CIN_PAD = (8, 8, 16, 32)           # in-channels padded to multiples of 8
COUT_PAD = (8, 16, 32, 4)          # out-channels padded to feed next CIN_PAD
C_OUT = COUT[-1]
MAX_ROWS = K * K * max(CIN_PAD)    # widest im2col slab (conv4: 800 rows)
B_MAX = 8                          # images per grid step (VMEM / vreg cap)


def _net_kernel(x_ref, m_ref,
                w1_ref, b1_ref, w2_ref, b2_ref,
                w3_ref, b3_ref, w4_ref, b4_ref,
                o_ref, patch_ref):
    # x_ref:     (1, 1, B*HW)      f32  B flattened images, lane-concatenated
    # m_ref:     (25, B*HW)        f32  per-tap boundary masks, tiled per image
    # w*_ref:    (CoutP, 25*CinP)  bf16 im2col weights (zero-padded channels)
    # b*_ref:    (CoutP, 1)        f32  (zero-padded)
    # o_ref:     (1, 4, B*HW)      f32
    # patch_ref: (25*32, B*HW)     bf16 im2col scratch (sized for conv4)
    bhw = m_ref.shape[1]

    def conv5x5(x, w_ref, b_ref, cin_p, relu):
        # x: (cin_p, B*HW) f32.  Scratch row t*cin_p + ci holds input channel
        # ci shifted by tap t = kh*5 + kw, zeroed wherever that tap reads
        # outside its own image ("same" zero padding; also kills cross-image
        # bleed from rolling the concatenated lane axis).
        for kh in range(K):
            for kw in range(K):
                dh, dw = kh - PAD, kw - PAD
                t = kh * K + kw
                s = dh * W + dw                            # flat spatial shift
                if s == 0:
                    shifted = x
                else:
                    shifted = pltpu.roll(x, (-s) % bhw, axis=1)
                if dh == 0 and dw == 0:                    # interior tap: mask == 1
                    tap = shifted
                else:
                    tap = shifted * m_ref[t:t + 1, :]
                patch_ref[t * cin_p:(t + 1) * cin_p, :] = tap.astype(jnp.bfloat16)
        acc = jnp.dot(w_ref[...], patch_ref[0:K * K * cin_p, :],
                      preferred_element_type=jnp.float32)  # (cout_p, B*HW) f32
        acc = acc + b_ref[...]                             # (cout_p, 1) bcast
        if relu:
            acc = jnp.maximum(acc, 0.0)
        return acc

    x = x_ref[0]                                           # (1, B*HW) f32
    # Pad the single input channel to CIN_PAD[0]=8 rows of zeros so conv1's
    # tap stores are 8-row aligned (the zero rows hit zero weight columns).
    x = jnp.concatenate(
        [x, jnp.zeros((CIN_PAD[0] - 1, bhw), jnp.float32)], axis=0)

    a = conv5x5(x, w1_ref, b1_ref, CIN_PAD[0], relu=True)
    a = conv5x5(a, w2_ref, b2_ref, CIN_PAD[1], relu=True)
    a = conv5x5(a, w3_ref, b3_ref, CIN_PAD[2], relu=True)
    a = conv5x5(a, w4_ref, b4_ref, CIN_PAD[3], relu=False)
    o_ref[0] = a                                           # (4, B*HW) f32


def _boundary_masks():
    """mask[t, h*W + w] = 1 if tap t=(kh,kw) reads inside the image at output
    position (h, w), else 0 (the zero 'same' padding)."""
    m = np.zeros((K * K, HW), np.float32)
    hh, ww = np.meshgrid(np.arange(H), np.arange(W), indexing="ij")
    for kh in range(K):
        for kw in range(K):
            dh, dw = kh - PAD, kw - PAD
            valid = ((hh + dh >= 0) & (hh + dh < H)
                     & (ww + dw >= 0) & (ww + dw < W))
            m[kh * K + kw] = valid.reshape(HW).astype(np.float32)
    return jnp.asarray(m)


def init_params(key):
    """PyTorch Conv2d-style init (U(+-1/sqrt(fan_in))) in OIHW.  Returns
    (ref_params, kern_params): f32 OIHW weights/biases for the XLA reference,
    and kernel-layout params: bf16 (CoutP, 25*CinP) im2col matrices (column
    order (kh*5+kw)*CinP + ci, padded channels zeroed) and f32 (CoutP,1)
    zero-padded biases."""
    ref_params, kern_params = [], []
    for cin, cout, cin_p, cout_p in zip(CIN, COUT, CIN_PAD, COUT_PAD):
        key, kw_, kb_ = jax.random.split(key, 3)
        bound = 1.0 / np.sqrt(cin * K * K)
        w = jax.random.uniform(kw_, (cout, cin, K, K), jnp.float32,
                               -bound, bound)
        b = jax.random.uniform(kb_, (cout,), jnp.float32, -bound, bound)
        ref_params.append((w, b))

        w_t = jnp.transpose(w, (0, 2, 3, 1))               # (cout, 5, 5, cin)
        w_t = jnp.pad(w_t, ((0, cout_p - cout), (0, 0), (0, 0),
                            (0, cin_p - cin)))             # zero-pad channels
        w2d = w_t.reshape(cout_p, K * K * cin_p).astype(jnp.bfloat16)
        b_p = jnp.pad(b, (0, cout_p - cout)).reshape(cout_p, 1)
        kern_params.append((w2d, b_p))
    return ref_params, kern_params


@jax.jit
def net_forward(x_nchw, kern_params, masks1):
    """Forward pass matching PyTorch Net.forward. Input/output NCHW f32."""
    N = x_nchw.shape[0]
    # Images per grid step: amortize per-step overhead, but keep >= 2 grid
    # steps whenever N >= 2 so v7x's two TensorCores both get work.
    B = min(B_MAX, max(1, (N + 1) // 2))
    G = -(-N // B)
    n_pad = G * B

    x = x_nchw.reshape(N, HW)                      # Cin = 1
    if n_pad != N:
        x = jnp.concatenate([x, jnp.zeros((n_pad - N, HW), x.dtype)], axis=0)
    x = x.reshape(G, 1, B * HW)                    # lane-concatenate B images
    masks = jnp.tile(masks1, (1, B))               # (25, B*HW), per-image copy

    (w1, b1), (w2, b2), (w3, b3), (w4, b4) = kern_params

    def resident(shape):
        return pl.BlockSpec(shape, lambda g: (0,) * len(shape))

    flops = 2 * sum(co * K * K * ci for co, ci in zip(COUT, CIN)) * HW * n_pad
    bytes_accessed = ((x.size + masks.size) * 4 + n_pad * C_OUT * HW * 4
                      + sum(wi.size * 2 + bi.size * 4 for wi, bi in kern_params))

    out = pl.pallas_call(
        _net_kernel,
        out_shape=jax.ShapeDtypeStruct((G, C_OUT, B * HW), jnp.float32),
        grid_spec=pltpu.PrefetchScalarGridSpec(
            num_scalar_prefetch=0,
            grid=(G,),
            in_specs=[
                pl.BlockSpec((1, 1, B * HW), lambda g: (g, 0, 0)),
                resident((K * K, B * HW)),           # boundary masks
                resident(w1.shape), resident(b1.shape),
                resident(w2.shape), resident(b2.shape),
                resident(w3.shape), resident(b3.shape),
                resident(w4.shape), resident(b4.shape),
            ],
            out_specs=pl.BlockSpec((1, C_OUT, B * HW), lambda g: (g, 0, 0)),
            scratch_shapes=[
                pltpu.VMEM((MAX_ROWS, B * HW), jnp.bfloat16),
            ],
        ),
        compiler_params=pltpu.CompilerParams(
            dimension_semantics=("parallel",),
        ),
        cost_estimate=pl.CostEstimate(
            flops=flops, transcendentals=0, bytes_accessed=bytes_accessed),
    )(x, masks, w1, b1, w2, b2, w3, b3, w4, b4)

    # (G, 4, B*HW) channel-major per step  ->  NCHW
    out = (out.reshape(G, C_OUT, B, HW)
              .swapaxes(1, 2)
              .reshape(n_pad, C_OUT, H, W))
    return out[:N]


def ref_forward(x_nchw, ref_params):
    """Pure-XLA reference (f32) for correctness validation."""
    y = x_nchw
    for i, (w, b) in enumerate(ref_params):
        y = jax.lax.conv_general_dilated(
            y, w, window_strides=(1, 1), padding="SAME",
            dimension_numbers=("NCHW", "OIHW", "NCHW"))
        y = y + b.reshape(1, -1, 1, 1)
        if i < len(ref_params) - 1:
            y = jnp.maximum(y, 0.0)
    return y


if __name__ == "__main__":
    key = jax.random.PRNGKey(0)
    k_x, k_p = jax.random.split(key)

    # Small shapes consistent with the module: 1 input channel, 16x16 images.
    # N=4 exercises the lane-batched path (B=2 images per step) across a
    # 2-step grid (both v7x TensorCores busy).
    N = 4
    x = jax.random.normal(k_x, (N, 1, H, W), jnp.float32)
    ref_params, kern_params = init_params(k_p)
    masks1 = _boundary_masks()

    out = jax.block_until_ready(net_forward(x, kern_params, masks1))
    ref = jax.block_until_ready(ref_forward(x, ref_params))

    assert out.shape == (N, C_OUT, H, W), out.shape
    # bf16 MXU operands (f32 accumulation, f32 activations) vs pure-f32
    # reference -> loosened tolerance; indexing bugs would be orders larger.
    err = float(jnp.max(jnp.abs(out - ref)))
    assert jnp.allclose(out, ref, atol=2e-2, rtol=2e-2), err

    print("KERNEL_OK")
</pallas_src>

<mosaic_0001>
module attributes {stable_mosaic.version = 11 : i64} {
  func.func @_net_kernel(%arg0: i32, %arg1: memref<1x1x512xf32, #tpu.memory_space<vmem>>, %arg2: memref<25x512xf32, #tpu.memory_space<vmem>>, %arg3: memref<8x200xbf16, #tpu.memory_space<vmem>>, %arg4: memref<8x1xf32, #tpu.memory_space<vmem>>, %arg5: memref<16x200xbf16, #tpu.memory_space<vmem>>, %arg6: memref<16x1xf32, #tpu.memory_space<vmem>>, %arg7: memref<32x400xbf16, #tpu.memory_space<vmem>>, %arg8: memref<32x1xf32, #tpu.memory_space<vmem>>, %arg9: memref<4x800xbf16, #tpu.memory_space<vmem>>, %arg10: memref<4x1xf32, #tpu.memory_space<vmem>>, %arg11: memref<1x4x512xf32, #tpu.memory_space<vmem>>, %arg12: memref<800x512xbf16, #tpu.memory_space<vmem>>) attributes {dimension_semantics = [#tpu.dimension_semantics<parallel>], iteration_bounds = array<i64: 2>, scalar_prefetch = 0 : i64, scratch_operands = 1 : i64, tpu.core_type = #tpu.core_type<tc>, window_params = [{transform_indices = @transform_0, window_bounds = array<i64: 1, 1, 512>}, {pipeline_mode = #tpu.pipeline_mode<synchronous>, transform_indices = @transform_1, window_bounds = array<i64: 25, 512>}, {pipeline_mode = #tpu.pipeline_mode<synchronous>, transform_indices = @transform_2, window_bounds = array<i64: 8, 200>}, {pipeline_mode = #tpu.pipeline_mode<synchronous>, transform_indices = @transform_3, window_bounds = array<i64: 8, 1>}, {pipeline_mode = #tpu.pipeline_mode<synchronous>, transform_indices = @transform_4, window_bounds = array<i64: 16, 200>}, {pipeline_mode = #tpu.pipeline_mode<synchronous>, transform_indices = @transform_5, window_bounds = array<i64: 16, 1>}, {pipeline_mode = #tpu.pipeline_mode<synchronous>, transform_indices = @transform_6, window_bounds = array<i64: 32, 400>}, {pipeline_mode = #tpu.pipeline_mode<synchronous>, transform_indices = @transform_7, window_bounds = array<i64: 32, 1>}, {pipeline_mode = #tpu.pipeline_mode<synchronous>, transform_indices = @transform_8, window_bounds = array<i64: 4, 800>}, {pipeline_mode = #tpu.pipeline_mode<synchronous>, transform_indices = @transform_9, window_bounds = array<i64: 4, 1>}, {transform_indices = @transform_10, window_bounds = array<i64: 1, 4, 512>}]} {
    %c0 = arith.constant 0 : index
    %c0_0 = arith.constant 0 : index
    %c0_1 = arith.constant 0 : index
    %0 = vector.load %arg1[%c0, %c0_0, %c0_1] : memref<1x1x512xf32, #tpu.memory_space<vmem>>, vector<1x1x512xf32>
    %1 = vector.shape_cast %0 : vector<1x1x512xf32> to vector<1x512xf32>
    %cst = arith.constant 0.000000e+00 : f32
    %2 = vector.broadcast %cst : f32 to vector<7x512xf32>
    %3 = tpu.concatenate %1, %2 in 0 : vector<1x512xf32>, vector<7x512xf32> -> vector<8x512xf32>
    %c34_i32 = arith.constant 34 : i32
    %4 = tpu.dynamic_rotate %3 by %c34_i32 dim 1 : vector<8x512xf32>, i32 -> vector<8x512xf32>
    %c0_2 = arith.constant 0 : index
    %c0_3 = arith.constant 0 : index
    %5 = vector.load %arg2[%c0_2, %c0_3] : memref<25x512xf32, #tpu.memory_space<vmem>>, vector<1x512xf32>
    %6 = vector.broadcast %5 : vector<1x512xf32> to vector<8x512xf32>
    %7 = arith.mulf %4, %6 : vector<8x512xf32>
    %8 = arith.truncf %7 : vector<8x512xf32> to vector<8x512xbf16>
    %c0_4 = arith.constant 0 : index
    %c0_5 = arith.constant 0 : index
    %9 = vector.load %arg12[%c0_4, %c0_5] : memref<800x512xbf16, #tpu.memory_space<vmem>>, vector<8x512xbf16>
    tpu.vector_store %arg12[%c0_4, %c0_5], %8 {strides = array<i32>} : memref<800x512xbf16, #tpu.memory_space<vmem>>, vector<8x512xbf16>,
    %c33_i32 = arith.constant 33 : i32
    %10 = tpu.dynamic_rotate %3 by %c33_i32 dim 1 : vector<8x512xf32>, i32 -> vector<8x512xf32>
    %c1 = arith.constant 1 : index
    %c0_6 = arith.constant 0 : index
    %11 = vector.load %arg2[%c1, %c0_6] : memref<25x512xf32, #tpu.memory_space<vmem>>, vector<1x512xf32>
    %12 = vector.broadcast %11 : vector<1x512xf32> to vector<8x512xf32>
    %13 = arith.mulf %10, %12 : vector<8x512xf32>
    %14 = arith.truncf %13 : vector<8x512xf32> to vector<8x512xbf16>
    %c8 = arith.constant 8 : index
    %c0_7 = arith.constant 0 : index
    %15 = vector.load %arg12[%c8, %c0_7] : memref<800x512xbf16, #tpu.memory_space<vmem>>, vector<8x512xbf16>
    tpu.vector_store %arg12[%c8, %c0_7], %14 {strides = array<i32>} : memref<800x512xbf16, #tpu.memory_space<vmem>>, vector<8x512xbf16>,
    %c32_i32 = arith.constant 32 : i32
    %16 = tpu.dynamic_rotate %3 by %c32_i32 dim 1 : vector<8x512xf32>, i32 -> vector<8x512xf32>
    %c2 = arith.constant 2 : index
    %c0_8 = arith.constant 0 : index
    %17 = vector.load %arg2[%c2, %c0_8] : memref<25x512xf32, #tpu.memory_space<vmem>>, vector<1x512xf32>
    %18 = vector.broadcast %17 : vector<1x512xf32> to vector<8x512xf32>
    %19 = arith.mulf %16, %18 : vector<8x512xf32>
    %20 = arith.truncf %19 : vector<8x512xf32> to vector<8x512xbf16>
    %c16 = arith.constant 16 : index
    %c0_9 = arith.constant 0 : index
    %21 = vector.load %arg12[%c16, %c0_9] : memref<800x512xbf16, #tpu.memory_space<vmem>>, vector<8x512xbf16>
    tpu.vector_store %arg12[%c16, %c0_9], %20 {strides = array<i32>} : memref<800x512xbf16, #tpu.memory_space<vmem>>, vector<8x512xbf16>,
    %c31_i32 = arith.constant 31 : i32
    %22 = tpu.dynamic_rotate %3 by %c31_i32 dim 1 : vector<8x512xf32>, i32 -> vector<8x512xf32>
    %c3 = arith.constant 3 : index
    %c0_10 = arith.constant 0 : index
    %23 = vector.load %arg2[%c3, %c0_10] : memref<25x512xf32, #tpu.memory_space<vmem>>, vector<1x512xf32>
    %24 = vector.broadcast %23 : vector<1x512xf32> to vector<8x512xf32>
    %25 = arith.mulf %22, %24 : vector<8x512xf32>
    %26 = arith.truncf %25 : vector<8x512xf32> to vector<8x512xbf16>
    %c24 = arith.constant 24 : index
    %c0_11 = arith.constant 0 : index
    %27 = vector.load %arg12[%c24, %c0_11] : memref<800x512xbf16, #tpu.memory_space<vmem>>, vector<8x512xbf16>
    tpu.vector_store %arg12[%c24, %c0_11], %26 {strides = array<i32>} : memref<800x512xbf16, #tpu.memory_space<vmem>>, vector<8x512xbf16>,
    %c30_i32 = arith.constant 30 : i32
    %28 = tpu.dynamic_rotate %3 by %c30_i32 dim 1 : vector<8x512xf32>, i32 -> vector<8x512xf32>
    %c4 = arith.constant 4 : index
    %c0_12 = arith.constant 0 : index
    %29 = vector.load %arg2[%c4, %c0_12] : memref<25x512xf32, #tpu.memory_space<vmem>>, vector<1x512xf32>
    %30 = vector.broadcast %29 : vector<1x512xf32> to vector<8x512xf32>
    %31 = arith.mulf %28, %30 : vector<8x512xf32>
    %32 = arith.truncf %31 : vector<8x512xf32> to vector<8x512xbf16>
    %c32 = arith.constant 32 : index
    %c0_13 = arith.constant 0 : index
    %33 = vector.load %arg12[%c32, %c0_13] : memref<800x512xbf16, #tpu.memory_space<vmem>>, vector<8x512xbf16>
    tpu.vector_store %arg12[%c32, %c0_13], %32 {strides = array<i32>} : memref<800x512xbf16, #tpu.memory_space<vmem>>, vector<8x512xbf16>,
    %c18_i32 = arith.constant 18 : i32
    %34 = tpu.dynamic_rotate %3 by %c18_i32 dim 1 : vector<8x512xf32>, i32 -> vector<8x512xf32>
    %c5 = arith.constant 5 : index
    %c0_14 = arith.constant 0 : index
    %35 = vector.load %arg2[%c5, %c0_14] : memref<25x512xf32, #tpu.memory_space<vmem>>, vector<1x512xf32>
    %36 = vector.broadcast %35 : vector<1x512xf32> to vector<8x512xf32>
    %37 = arith.mulf %34, %36 : vector<8x512xf32>
    %38 = arith.truncf %37 : vector<8x512xf32> to vector<8x512xbf16>
    %c40 = arith.constant 40 : index
    %c0_15 = arith.constant 0 : index
    %39 = vector.load %arg12[%c40, %c0_15] : memref<800x512xbf16, #tpu.memory_space<vmem>>, vector<8x512xbf16>
    tpu.vector_store %arg12[%c40, %c0_15], %38 {strides = array<i32>} : memref<800x512xbf16, #tpu.memory_space<vmem>>, vector<8x512xbf16>,
    %c17_i32 = arith.constant 17 : i32
    %40 = tpu.dynamic_rotate %3 by %c17_i32 dim 1 : vector<8x512xf32>, i32 -> vector<8x512xf32>
    %c6 = arith.constant 6 : index
    %c0_16 = arith.constant 0 : index
    %41 = vector.load %arg2[%c6, %c0_16] : memref<25x512xf32, #tpu.memory_space<vmem>>, vector<1x512xf32>
    %42 = vector.broadcast %41 : vector<1x512xf32> to vector<8x512xf32>
    %43 = arith.mulf %40, %42 : vector<8x512xf32>
    %44 = arith.truncf %43 : vector<8x512xf32> to vector<8x512xbf16>
    %c48 = arith.constant 48 : index
    %c0_17 = arith.constant 0 : index
    %45 = vector.load %arg12[%c48, %c0_17] : memref<800x512xbf16, #tpu.memory_space<vmem>>, vector<8x512xbf16>
    tpu.vector_store %arg12[%c48, %c0_17], %44 {strides = array<i32>} : memref<800x512xbf16, #tpu.memory_space<vmem>>, vector<8x512xbf16>,
    %c16_i32 = arith.constant 16 : i32
    %46 = tpu.dynamic_rotate %3 by %c16_i32 dim 1 : vector<8x512xf32>, i32 -> vector<8x512xf32>
    %c7 = arith.constant 7 : index
    %c0_18 = arith.constant 0 : index
    %47 = vector.load %arg2[%c7, %c0_18] : memref<25x512xf32, #tpu.memory_space<vmem>>, vector<1x512xf32>
    %48 = vector.broadcast %47 : vector<1x512xf32> to vector<8x512xf32>
    %49 = arith.mulf %46, %48 : vector<8x512xf32>
    %50 = arith.truncf %49 : vector<8x512xf32> to vector<8x512xbf16>
    %c56 = arith.constant 56 : index
    %c0_19 = arith.constant 0 : index
    %51 = vector.load %arg12[%c56, %c0_19] : memref<800x512xbf16, #tpu.memory_space<vmem>>, vector<8x512xbf16>
    tpu.vector_store %arg12[%c56, %c0_19], %50 {strides = array<i32>} : memref<800x512xbf16, #tpu.memory_space<vmem>>, vector<8x512xbf16>,
    %c15_i32 = arith.constant 15 : i32
    %52 = tpu.dynamic_rotate %3 by %c15_i32 dim 1 : vector<8x512xf32>, i32 -> vector<8x512xf32>
    %c8_20 = arith.constant 8 : index
    %c0_21 = arith.constant 0 : index
    %53 = vector.load %arg2[%c8_20, %c0_21] : memref<25x512xf32, #tpu.memory_space<vmem>>, vector<1x512xf32>
    %54 = vector.broadcast %53 : vector<1x512xf32> to vector<8x512xf32>
    %55 = arith.mulf %52, %54 : vector<8x512xf32>
    %56 = arith.truncf %55 : vector<8x512xf32> to vector<8x512xbf16>
    %c64 = arith.constant 64 : index
    %c0_22 = arith.constant 0 : index
    %57 = vector.load %arg12[%c64, %c0_22] : memref<800x512xbf16, #tpu.memory_space<vmem>>, vector<8x512xbf16>
    tpu.vector_store %arg12[%c64, %c0_22], %56 {strides = array<i32>} : memref<800x512xbf16, #tpu.memory_space<vmem>>, vector<8x512xbf16>,
    %c14_i32 = arith.constant 14 : i32
    %58 = tpu.dynamic_rotate %3 by %c14_i32 dim 1 : vector<8x512xf32>, i32 -> vector<8x512xf32>
    %c9 = arith.constant 9 : index
    %c0_23 = arith.constant 0 : index
    %59 = vector.load %arg2[%c9, %c0_23] : memref<25x512xf32, #tpu.memory_space<vmem>>, vector<1x512xf32>
    %60 = vector.broadcast %59 : vector<1x512xf32> to vector<8x512xf32>
    %61 = arith.mulf %58, %60 : vector<8x512xf32>
    %62 = arith.truncf %61 : vector<8x512xf32> to vector<8x512xbf16>
    %c72 = arith.constant 72 : index
    %c0_24 = arith.constant 0 : index
    %63 = vector.load %arg12[%c72, %c0_24] : memref<800x512xbf16, #tpu.memory_space<vmem>>, vector<8x512xbf16>
    tpu.vector_store %arg12[%c72, %c0_24], %62 {strides = array<i32>} : memref<800x512xbf16, #tpu.memory_space<vmem>>, vector<8x512xbf16>,
    %c2_i32 = arith.constant 2 : i32
    %64 = tpu.dynamic_rotate %3 by %c2_i32 dim 1 : vector<8x512xf32>, i32 -> vector<8x512xf32>
    %c10 = arith.constant 10 : index
    %c0_25 = arith.constant 0 : index
    %65 = vector.load %arg2[%c10, %c0_25] : memref<25x512xf32, #tpu.memory_space<vmem>>, vector<1x512xf32>
    %66 = vector.broadcast %65 : vector<1x512xf32> to vector<8x512xf32>
    %67 = arith.mulf %64, %66 : vector<8x512xf32>
    %68 = arith.truncf %67 : vector<8x512xf32> to vector<8x512xbf16>
    %c80 = arith.constant 80 : index
    %c0_26 = arith.constant 0 : index
    %69 = vector.load %arg12[%c80, %c0_26] : memref<800x512xbf16, #tpu.memory_space<vmem>>, vector<8x512xbf16>
    tpu.vector_store %arg12[%c80, %c0_26], %68 {strides = array<i32>} : memref<800x512xbf16, #tpu.memory_space<vmem>>, vector<8x512xbf16>,
    %c1_i32 = arith.constant 1 : i32
    %70 = tpu.dynamic_rotate %3 by %c1_i32 dim 1 : vector<8x512xf32>, i32 -> vector<8x512xf32>
    %c11 = arith.constant 11 : index
    %c0_27 = arith.constant 0 : index
    %71 = vector.load %arg2[%c11, %c0_27] : memref<25x512xf32, #tpu.memory_space<vmem>>, vector<1x512xf32>
    %72 = vector.broadcast %71 : vector<1x512xf32> to vector<8x512xf32>
    %73 = arith.mulf %70, %72 : vector<8x512xf32>
    %74 = arith.truncf %73 : vector<8x512xf32> to vector<8x512xbf16>
    %c88 = arith.constant 88 : index
    %c0_28 = arith.constant 0 : index
    %75 = vector.load %arg12[%c88, %c0_28] : memref<800x512xbf16, #tpu.memory_space<vmem>>, vector<8x512xbf16>
    tpu.vector_store %arg12[%c88, %c0_28], %74 {strides = array<i32>} : memref<800x512xbf16, #tpu.memory_space<vmem>>, vector<8x512xbf16>,
    %76 = arith.truncf %3 : vector<8x512xf32> to vector<8x512xbf16>
    %c96 = arith.constant 96 : index
    %c0_29 = arith.constant 0 : index
    %77 = vector.load %arg12[%c96, %c0_29] : memref<800x512xbf16, #tpu.memory_space<vmem>>, vector<8x512xbf16>
    tpu.vector_store %arg12[%c96, %c0_29], %76 {strides = array<i32>} : memref<800x512xbf16, #tpu.memory_space<vmem>>, vector<8x512xbf16>,
    %c511_i32 = arith.constant 511 : i32
    %78 = tpu.dynamic_rotate %3 by %c511_i32 dim 1 : vector<8x512xf32>, i32 -> vector<8x512xf32>
    %c13 = arith.constant 13 : index
    %c0_30 = arith.constant 0 : index
    %79 = vector.load %arg2[%c13, %c0_30] : memref<25x512xf32, #tpu.memory_space<vmem>>, vector<1x512xf32>
    %80 = vector.broadcast %79 : vector<1x512xf32> to vector<8x512xf32>
    %81 = arith.mulf %78, %80 : vector<8x512xf32>
    %82 = arith.truncf %81 : vector<8x512xf32> to vector<8x512xbf16>
    %c104 = arith.constant 104 : index
    %c0_31 = arith.constant 0 : index
    %83 = vector.load %arg12[%c104, %c0_31] : memref<800x512xbf16, #tpu.memory_space<vmem>>, vector<8x512xbf16>
    tpu.vector_store %arg12[%c104, %c0_31], %82 {strides = array<i32>} : memref<800x512xbf16, #tpu.memory_space<vmem>>, vector<8x512xbf16>,
    %c510_i32 = arith.constant 510 : i32
    %84 = tpu.dynamic_rotate %3 by %c510_i32 dim 1 : vector<8x512xf32>, i32 -> vector<8x512xf32>
    %c14 = arith.constant 14 : index
    %c0_32 = arith.constant 0 : index
    %85 = vector.load %arg2[%c14, %c0_32] : memref<25x512xf32, #tpu.memory_space<vmem>>, vector<1x512xf32>
    %86 = vector.broadcast %85 : vector<1x512xf32> to vector<8x512xf32>
    %87 = arith.mulf %84, %86 : vector<8x512xf32>
    %88 = arith.truncf %87 : vector<8x512xf32> to vector<8x512xbf16>
    %c112 = arith.constant 112 : index
    %c0_33 = arith.constant 0 : index
    %89 = vector.load %arg12[%c112, %c0_33] : memref<800x512xbf16, #tpu.memory_space<vmem>>, vector<8x512xbf16>
    tpu.vector_store %arg12[%c112, %c0_33], %88 {strides = array<i32>} : memref<800x512xbf16, #tpu.memory_space<vmem>>, vector<8x512xbf16>,
    %c498_i32 = arith.constant 498 : i32
    %90 = tpu.dynamic_rotate %3 by %c498_i32 dim 1 : vector<8x512xf32>, i32 -> vector<8x512xf32>
    %c15 = arith.constant 15 : index
    %c0_34 = arith.constant 0 : index
    %91 = vector.load %arg2[%c15, %c0_34] : memref<25x512xf32, #tpu.memory_space<vmem>>, vector<1x512xf32>
    %92 = vector.broadcast %91 : vector<1x512xf32> to vector<8x512xf32>
    %93 = arith.mulf %90, %92 : vector<8x512xf32>
    %94 = arith.truncf %93 : vector<8x512xf32> to vector<8x512xbf16>
    %c120 = arith.constant 120 : index
    %c0_35 = arith.constant 0 : index
    %95 = vector.load %arg12[%c120, %c0_35] : memref<800x512xbf16, #tpu.memory_space<vmem>>, vector<8x512xbf16>
    tpu.vector_store %arg12[%c120, %c0_35], %94 {strides = array<i32>} : memref<800x512xbf16, #tpu.memory_space<vmem>>, vector<8x512xbf16>,
    %c497_i32 = arith.constant 497 : i32
    %96 = tpu.dynamic_rotate %3 by %c497_i32 dim 1 : vector<8x512xf32>, i32 -> vector<8x512xf32>
    %c16_36 = arith.constant 16 : index
    %c0_37 = arith.constant 0 : index
    %97 = vector.load %arg2[%c16_36, %c0_37] : memref<25x512xf32, #tpu.memory_space<vmem>>, vector<1x512xf32>
    %98 = vector.broadcast %97 : vector<1x512xf32> to vector<8x512xf32>
    %99 = arith.mulf %96, %98 : vector<8x512xf32>
    %100 = arith.truncf %99 : vector<8x512xf32> to vector<8x512xbf16>
    %c128 = arith.constant 128 : index
    %c0_38 = arith.constant 0 : index
    %101 = vector.load %arg12[%c128, %c0_38] : memref<800x512xbf16, #tpu.memory_space<vmem>>, vector<8x512xbf16>
    tpu.vector_store %arg12[%c128, %c0_38], %100 {strides = array<i32>} : memref<800x512xbf16, #tpu.memory_space<vmem>>, vector<8x512xbf16>,
    %c496_i32 = arith.constant 496 : i32
    %102 = tpu.dynamic_rotate %3 by %c496_i32 dim 1 : vector<8x512xf32>, i32 -> vector<8x512xf32>
    %c17 = arith.constant 17 : index
    %c0_39 = arith.constant 0 : index
    %103 = vector.load %arg2[%c17, %c0_39] : memref<25x512xf32, #tpu.memory_space<vmem>>, vector<1x512xf32>
    %104 = vector.broadcast %103 : vector<1x512xf32> to vector<8x512xf32>
    %105 = arith.mulf %102, %104 : vector<8x512xf32>
    %106 = arith.truncf %105 : vector<8x512xf32> to vector<8x512xbf16>
    %c136 = arith.constant 136 : index
    %c0_40 = arith.constant 0 : index
    %107 = vector.load %arg12[%c136, %c0_40] : memref<800x512xbf16, #tpu.memory_space<vmem>>, vector<8x512xbf16>
    tpu.vector_store %arg12[%c136, %c0_40], %106 {strides = array<i32>} : memref<800x512xbf16, #tpu.memory_space<vmem>>, vector<8x512xbf16>,
    %c495_i32 = arith.constant 495 : i32
    %108 = tpu.dynamic_rotate %3 by %c495_i32 dim 1 : vector<8x512xf32>, i32 -> vector<8x512xf32>
    %c18 = arith.constant 18 : index
    %c0_41 = arith.constant 0 : index
    %109 = vector.load %arg2[%c18, %c0_41] : memref<25x512xf32, #tpu.memory_space<vmem>>, vector<1x512xf32>
    %110 = vector.broadcast %109 : vector<1x512xf32> to vector<8x512xf32>
    %111 = arith.mulf %108, %110 : vector<8x512xf32>
    %112 = arith.truncf %111 : vector<8x512xf32> to vector<8x512xbf16>
    %c144 = arith.constant 144 : index
    %c0_42 = arith.constant 0 : index
    %113 = vector.load %arg12[%c144, %c0_42] : memref<800x512xbf16, #tpu.memory_space<vmem>>, vector<8x512xbf16>
    tpu.vector_store %arg12[%c144, %c0_42], %112 {strides = array<i32>} : memref<800x512xbf16, #tpu.memory_space<vmem>>, vector<8x512xbf16>,
    %c494_i32 = arith.constant 494 : i32
    %114 = tpu.dynamic_rotate %3 by %c494_i32 dim 1 : vector<8x512xf32>, i32 -> vector<8x512xf32>
    %c19 = arith.constant 19 : index
    %c0_43 = arith.constant 0 : index
    %115 = vector.load %arg2[%c19, %c0_43] : memref<25x512xf32, #tpu.memory_space<vmem>>, vector<1x512xf32>
    %116 = vector.broadcast %115 : vector<1x512xf32> to vector<8x512xf32>
    %117 = arith.mulf %114, %116 : vector<8x512xf32>
    %118 = arith.truncf %117 : vector<8x512xf32> to vector<8x512xbf16>
    %c152 = arith.constant 152 : index
    %c0_44 = arith.constant 0 : index
    %119 = vector.load %arg12[%c152, %c0_44] : memref<800x512xbf16, #tpu.memory_space<vmem>>, vector<8x512xbf16>
    tpu.vector_store %arg12[%c152, %c0_44], %118 {strides = array<i32>} : memref<800x512xbf16, #tpu.memory_space<vmem>>, vector<8x512xbf16>,
    %c482_i32 = arith.constant 482 : i32
    %120 = tpu.dynamic_rotate %3 by %c482_i32 dim 1 : vector<8x512xf32>, i32 -> vector<8x512xf32>
    %c20 = arith.constant 20 : index
    %c0_45 = arith.constant 0 : index
    %121 = vector.load %arg2[%c20, %c0_45] : memref<25x512xf32, #tpu.memory_space<vmem>>, vector<1x512xf32>
    %122 = vector.broadcast %121 : vector<1x512xf32> to vector<8x512xf32>
    %123 = arith.mulf %120, %122 : vector<8x512xf32>
    %124 = arith.truncf %123 : vector<8x512xf32> to vector<8x512xbf16>
    %c160 = arith.constant 160 : index
    %c0_46 = arith.constant 0 : index
    %125 = vector.load %arg12[%c160, %c0_46] : memref<800x512xbf16, #tpu.memory_space<vmem>>, vector<8x512xbf16>
    tpu.vector_store %arg12[%c160, %c0_46], %124 {strides = array<i32>} : memref<800x512xbf16, #tpu.memory_space<vmem>>, vector<8x512xbf16>,
    %c481_i32 = arith.constant 481 : i32
    %126 = tpu.dynamic_rotate %3 by %c481_i32 dim 1 : vector<8x512xf32>, i32 -> vector<8x512xf32>
    %c21 = arith.constant 21 : index
    %c0_47 = arith.constant 0 : index
    %127 = vector.load %arg2[%c21, %c0_47] : memref<25x512xf32, #tpu.memory_space<vmem>>, vector<1x512xf32>
    %128 = vector.broadcast %127 : vector<1x512xf32> to vector<8x512xf32>
    %129 = arith.mulf %126, %128 : vector<8x512xf32>
    %130 = arith.truncf %129 : vector<8x512xf32> to vector<8x512xbf16>
    %c168 = arith.constant 168 : index
    %c0_48 = arith.constant 0 : index
    %131 = vector.load %arg12[%c168, %c0_48] : memref<800x512xbf16, #tpu.memory_space<vmem>>, vector<8x512xbf16>
    tpu.vector_store %arg12[%c168, %c0_48], %130 {strides = array<i32>} : memref<800x512xbf16, #tpu.memory_space<vmem>>, vector<8x512xbf16>,
    %c480_i32 = arith.constant 480 : i32
    %132 = tpu.dynamic_rotate %3 by %c480_i32 dim 1 : vector<8x512xf32>, i32 -> vector<8x512xf32>
    %c22 = arith.constant 22 : index
    %c0_49 = arith.constant 0 : index
    %133 = vector.load %arg2[%c22, %c0_49] : memref<25x512xf32, #tpu.memory_space<vmem>>, vector<1x512xf32>
    %134 = vector.broadcast %133 : vector<1x512xf32> to vector<8x512xf32>
    %135 = arith.mulf %132, %134 : vector<8x512xf32>
    %136 = arith.truncf %135 : vector<8x512xf32> to vector<8x512xbf16>
    %c176 = arith.constant 176 : index
    %c0_50 = arith.constant 0 : index
    %137 = vector.load %arg12[%c176, %c0_50] : memref<800x512xbf16, #tpu.memory_space<vmem>>, vector<8x512xbf16>
    tpu.vector_store %arg12[%c176, %c0_50], %136 {strides = array<i32>} : memref<800x512xbf16, #tpu.memory_space<vmem>>, vector<8x512xbf16>,
    %c479_i32 = arith.constant 479 : i32
    %138 = tpu.dynamic_rotate %3 by %c479_i32 dim 1 : vector<8x512xf32>, i32 -> vector<8x512xf32>
    %c23 = arith.constant 23 : index
    %c0_51 = arith.constant 0 : index
    %139 = vector.load %arg2[%c23, %c0_51] : memref<25x512xf32, #tpu.memory_space<vmem>>, vector<1x512xf32>
    %140 = vector.broadcast %139 : vector<1x512xf32> to vector<8x512xf32>
    %141 = arith.mulf %138, %140 : vector<8x512xf32>
    %142 = arith.truncf %141 : vector<8x512xf32> to vector<8x512xbf16>
    %c184 = arith.constant 184 : index
    %c0_52 = arith.constant 0 : index
    %143 = vector.load %arg12[%c184, %c0_52] : memref<800x512xbf16, #tpu.memory_space<vmem>>, vector<8x512xbf16>
    tpu.vector_store %arg12[%c184, %c0_52], %142 {strides = array<i32>} : memref<800x512xbf16, #tpu.memory_space<vmem>>, vector<8x512xbf16>,
    %c478_i32 = arith.constant 478 : i32
    %144 = tpu.dynamic_rotate %3 by %c478_i32 dim 1 : vector<8x512xf32>, i32 -> vector<8x512xf32>
    %c24_53 = arith.constant 24 : index
    %c0_54 = arith.constant 0 : index
    %145 = vector.load %arg2[%c24_53, %c0_54] : memref<25x512xf32, #tpu.memory_space<vmem>>, vector<1x512xf32>
    %146 = vector.broadcast %145 : vector<1x512xf32> to vector<8x512xf32>
    %147 = arith.mulf %144, %146 : vector<8x512xf32>
    %148 = arith.truncf %147 : vector<8x512xf32> to vector<8x512xbf16>
    %c192 = arith.constant 192 : index
    %c0_55 = arith.constant 0 : index
    %149 = vector.load %arg12[%c192, %c0_55] : memref<800x512xbf16, #tpu.memory_space<vmem>>, vector<8x512xbf16>
    tpu.vector_store %arg12[%c192, %c0_55], %148 {strides = array<i32>} : memref<800x512xbf16, #tpu.memory_space<vmem>>, vector<8x512xbf16>,
    %c0_56 = arith.constant 0 : index
    %c0_57 = arith.constant 0 : index
    %150 = vector.load %arg3[%c0_56, %c0_57] : memref<8x200xbf16, #tpu.memory_space<vmem>>, vector<8x200xbf16>
    %c0_58 = arith.constant 0 : index
    %c0_59 = arith.constant 0 : index
    %151 = vector.load %arg12[%c0_58, %c0_59] : memref<800x512xbf16, #tpu.memory_space<vmem>>, vector<200x512xbf16>
    %cst_60 = arith.constant dense<0.000000e+00> : vector<8x512xf32>
    %152 = tpu.matmul %150, %151, %cst_60 {dimension_numbers = #tpu.dot_dimension_numbers<[1], [0], [0], [1], [0, 0, 1, 1], [], []>} : vector<8x200xbf16>, vector<200x512xbf16>, vector<8x512xf32> -> vector<8x512xf32>
    %c0_61 = arith.constant 0 : index
    %c0_62 = arith.constant 0 : index
    %153 = vector.load %arg4[%c0_61, %c0_62] : memref<8x1xf32, #tpu.memory_space<vmem>>, vector<8x1xf32>
    %154 = vector.broadcast %153 : vector<8x1xf32> to vector<8x512xf32>
    %155 = arith.addf %152, %154 : vector<8x512xf32>
    %cst_63 = arith.constant 0.000000e+00 : f32
    %156 = vector.broadcast %cst_63 : f32 to vector<8x512xf32>
    %157 = arith.maximumf %155, %156 : vector<8x512xf32>
    %c34_i32_64 = arith.constant 34 : i32
    %158 = tpu.dynamic_rotate %157 by %c34_i32_64 dim 1 : vector<8x512xf32>, i32 -> vector<8x512xf32>
    %c0_65 = arith.constant 0 : index
    %c0_66 = arith.constant 0 : index
    %159 = vector.load %arg2[%c0_65, %c0_66] : memref<25x512xf32, #tpu.memory_space<vmem>>, vector<1x512xf32>
    %160 = vector.broadcast %159 : vector<1x512xf32> to vector<8x512xf32>
    %161 = arith.mulf %158, %160 : vector<8x512xf32>
    %162 = arith.truncf %161 : vector<8x512xf32> to vector<8x512xbf16>
    %c0_67 = arith.constant 0 : index
    %c0_68 = arith.constant 0 : index
    %163 = vector.load %arg12[%c0_67, %c0_68] : memref<800x512xbf16, #tpu.memory_space<vmem>>, vector<8x512xbf16>
    tpu.vector_store %arg12[%c0_67, %c0_68], %162 {strides = array<i32>} : memref<800x512xbf16, #tpu.memory_space<vmem>>, vector<8x512xbf16>,
    %c33_i32_69 = arith.constant 33 : i32
    %164 = tpu.dynamic_rotate %157 by %c33_i32_69 dim 1 : vector<8x512xf32>, i32 -> vector<8x512xf32>
    %c1_70 = arith.constant 1 : index
    %c0_71 = arith.constant 0 : index
    %165 = vector.load %arg2[%c1_70, %c0_71] : memref<25x512xf32, #tpu.memory_space<vmem>>, vector<1x512xf32>
    %166 = vector.broadcast %165 : vector<1x512xf32> to vector<8x512xf32>
    %167 = arith.mulf %164, %166 : vector<8x512xf32>
    %168 = arith.truncf %167 : vector<8x512xf32> to vector<8x512xbf16>
    %c8_72 = arith.constant 8 : index
    %c0_73 = arith.constant 0 : index
    %169 = vector.load %arg12[%c8_72, %c0_73] : memref<800x512xbf16, #tpu.memory_space<vmem>>, vector<8x512xbf16>
    tpu.vector_store %arg12[%c8_72, %c0_73], %168 {strides = array<i32>} : memref<800x512xbf16, #tpu.memory_space<vmem>>, vector<8x512xbf16>,
    %c32_i32_74 = arith.constant 32 : i32
    %170 = tpu.dynamic_rotate %157 by %c32_i32_74 dim 1 : vector<8x512xf32>, i32 -> vector<8x512xf32>
    %c2_75 = arith.constant 2 : index
    %c0_76 = arith.constant 0 : index
    %171 = vector.load %arg2[%c2_75, %c0_76] : memref<25x512xf32, #tpu.memory_space<vmem>>, vector<1x512xf32>
    %172 = vector.broadcast %171 : vector<1x512xf32> to vector<8x512xf32>
    %173 = arith.mulf %170, %172 : vector<8x512xf32>
    %174 = arith.truncf %173 : vector<8x512xf32> to vector<8x512xbf16>
    %c16_77 = arith.constant 16 : index
    %c0_78 = arith.constant 0 : index
    %175 = vector.load %arg12[%c16_77, %c0_78] : memref<800x512xbf16, #tpu.memory_space<vmem>>, vector<8x512xbf16>
    tpu.vector_store %arg12[%c16_77, %c0_78], %174 {strides = array<i32>} : memref<800x512xbf16, #tpu.memory_space<vmem>>, vector<8x512xbf16>,
    %c31_i32_79 = arith.constant 31 : i32
    %176 = tpu.dynamic_rotate %157 by %c31_i32_79 dim 1 : vector<8x512xf32>, i32 -> vector<8x512xf32>
    %c3_80 = arith.constant 3 : index
    %c0_81 = arith.constant 0 : index
    %177 = vector.load %arg2[%c3_80, %c0_81] : memref<25x512xf32, #tpu.memory_space<vmem>>, vector<1x512xf32>
    %178 = vector.broadcast %177 : vector<1x512xf32> to vector<8x512xf32>
    %179 = arith.mulf %176, %178 : vector<8x512xf32>
    %180 = arith.truncf %179 : vector<8x512xf32> to vector<8x512xbf16>
    %c24_82 = arith.constant 24 : index
    %c0_83 = arith.constant 0 : index
    %181 = vector.load %arg12[%c24_82, %c0_83] : memref<800x512xbf16, #tpu.memory_space<vmem>>, vector<8x512xbf16>
    tpu.vector_store %arg12[%c24_82, %c0_83], %180 {strides = array<i32>} : memref<800x512xbf16, #tpu.memory_space<vmem>>, vector<8x512xbf16>,
    %c30_i32_84 = arith.constant 30 : i32
    %182 = tpu.dynamic_rotate %157 by %c30_i32_84 dim 1 : vector<8x512xf32>, i32 -> vector<8x512xf32>
    %c4_85 = arith.constant 4 : index
    %c0_86 = arith.constant 0 : index
    %183 = vector.load %arg2[%c4_85, %c0_86] : memref<25x512xf32, #tpu.memory_space<vmem>>, vector<1x512xf32>
    %184 = vector.broadcast %183 : vector<1x512xf32> to vector<8x512xf32>
    %185 = arith.mulf %182, %184 : vector<8x512xf32>
    %186 = arith.truncf %185 : vector<8x512xf32> to vector<8x512xbf16>
    %c32_87 = arith.constant 32 : index
    %c0_88 = arith.constant 0 : index
    %187 = vector.load %arg12[%c32_87, %c0_88] : memref<800x512xbf16, #tpu.memory_space<vmem>>, vector<8x512xbf16>
    tpu.vector_store %arg12[%c32_87, %c0_88], %186 {strides = array<i32>} : memref<800x512xbf16, #tpu.memory_space<vmem>>, vector<8x512xbf16>,
    %c18_i32_89 = arith.constant 18 : i32
    %188 = tpu.dynamic_rotate %157 by %c18_i32_89 dim 1 : vector<8x512xf32>, i32 -> vector<8x512xf32>
    %c5_90 = arith.constant 5 : index
    %c0_91 = arith.constant 0 : index
    %189 = vector.load %arg2[%c5_90, %c0_91] : memref<25x512xf32, #tpu.memory_space<vmem>>, vector<1x512xf32>
    %190 = vector.broadcast %189 : vector<1x512xf32> to vector<8x512xf32>
    %191 = arith.mulf %188, %190 : vector<8x512xf32>
    %192 = arith.truncf %191 : vector<8x512xf32> to vector<8x512xbf16>
    %c40_92 = arith.constant 40 : index
    %c0_93 = arith.constant 0 : index
    %193 = vector.load %arg12[%c40_92, %c0_93] : memref<800x512xbf16, #tpu.memory_space<vmem>>, vector<8x512xbf16>
    tpu.vector_store %arg12[%c40_92, %c0_93], %192 {strides = array<i32>} : memref<800x512xbf16, #tpu.memory_space<vmem>>, vector<8x512xbf16>,
    %c17_i32_94 = arith.constant 17 : i32
    %194 = tpu.dynamic_rotate %157 by %c17_i32_94 dim 1 : vector<8x512xf32>, i32 -> vector<8x512xf32>
    %c6_95 = arith.constant 6 : index
    %c0_96 = arith.constant 0 : index
    %195 = vector.load %arg2[%c6_95, %c0_96] : memref<25x512xf32, #tpu.memory_space<vmem>>, vector<1x512xf32>
    %196 = vector.broadcast %195 : vector<1x512xf32> to vector<8x512xf32>
    %197 = arith.mulf %194, %196 : vector<8x512xf32>
    %198 = arith.truncf %197 : vector<8x512xf32> to vector<8x512xbf16>
    %c48_97 = arith.constant 48 : index
    %c0_98 = arith.constant 0 : index
    %199 = vector.load %arg12[%c48_97, %c0_98] : memref<800x512xbf16, #tpu.memory_space<vmem>>, vector<8x512xbf16>
    tpu.vector_store %arg12[%c48_97, %c0_98], %198 {strides = array<i32>} : memref<800x512xbf16, #tpu.memory_space<vmem>>, vector<8x512xbf16>,
    %c16_i32_99 = arith.constant 16 : i32
    %200 = tpu.dynamic_rotate %157 by %c16_i32_99 dim 1 : vector<8x512xf32>, i32 -> vector<8x512xf32>
    %c7_100 = arith.constant 7 : index
    %c0_101 = arith.constant 0 : index
    %201 = vector.load %arg2[%c7_100, %c0_101] : memref<25x512xf32, #tpu.memory_space<vmem>>, vector<1x512xf32>
    %202 = vector.broadcast %201 : vector<1x512xf32> to vector<8x512xf32>
    %203 = arith.mulf %200, %202 : vector<8x512xf32>
    %204 = arith.truncf %203 : vector<8x512xf32> to vector<8x512xbf16>
    %c56_102 = arith.constant 56 : index
    %c0_103 = arith.constant 0 : index
    %205 = vector.load %arg12[%c56_102, %c0_103] : memref<800x512xbf16, #tpu.memory_space<vmem>>, vector<8x512xbf16>
    tpu.vector_store %arg12[%c56_102, %c0_103], %204 {strides = array<i32>} : memref<800x512xbf16, #tpu.memory_space<vmem>>, vector<8x512xbf16>,
    %c15_i32_104 = arith.constant 15 : i32
    %206 = tpu.dynamic_rotate %157 by %c15_i32_104 dim 1 : vector<8x512xf32>, i32 -> vector<8x512xf32>
    %c8_105 = arith.constant 8 : index
    %c0_106 = arith.constant 0 : index
    %207 = vector.load %arg2[%c8_105, %c0_106] : memref<25x512xf32, #tpu.memory_space<vmem>>, vector<1x512xf32>
    %208 = vector.broadcast %207 : vector<1x512xf32> to vector<8x512xf32>
    %209 = arith.mulf %206, %208 : vector<8x512xf32>
    %210 = arith.truncf %209 : vector<8x512xf32> to vector<8x512xbf16>
    %c64_107 = arith.constant 64 : index
    %c0_108 = arith.constant 0 : index
    %211 = vector.load %arg12[%c64_107, %c0_108] : memref<800x512xbf16, #tpu.memory_space<vmem>>, vector<8x512xbf16>
    tpu.vector_store %arg12[%c64_107, %c0_108], %210 {strides = array<i32>} : memref<800x512xbf16, #tpu.memory_space<vmem>>, vector<8x512xbf16>,
    %c14_i32_109 = arith.constant 14 : i32
    %212 = tpu.dynamic_rotate %157 by %c14_i32_109 dim 1 : vector<8x512xf32>, i32 -> vector<8x512xf32>
    %c9_110 = arith.constant 9 : index
    %c0_111 = arith.constant 0 : index
    %213 = vector.load %arg2[%c9_110, %c0_111] : memref<25x512xf32, #tpu.memory_space<vmem>>, vector<1x512xf32>
    %214 = vector.broadcast %213 : vector<1x512xf32> to vector<8x512xf32>
    %215 = arith.mulf %212, %214 : vector<8x512xf32>
    %216 = arith.truncf %215 : vector<8x512xf32> to vector<8x512xbf16>
    %c72_112 = arith.constant 72 : index
    %c0_113 = arith.constant 0 : index
    %217 = vector.load %arg12[%c72_112, %c0_113] : memref<800x512xbf16, #tpu.memory_space<vmem>>, vector<8x512xbf16>
    tpu.vector_store %arg12[%c72_112, %c0_113], %216 {strides = array<i32>} : memref<800x512xbf16, #tpu.memory_space<vmem>>, vector<8x512xbf16>,
    %c2_i32_114 = arith.constant 2 : i32
    %218 = tpu.dynamic_rotate %157 by %c2_i32_114 dim 1 : vector<8x512xf32>, i32 -> vector<8x512xf32>
    %c10_115 = arith.constant 10 : index
    %c0_116 = arith.constant 0 : index
    %219 = vector.load %arg2[%c10_115, %c0_116] : memref<25x512xf32, #tpu.memory_space<vmem>>, vector<1x512xf32>
    %220 = vector.broadcast %219 : vector<1x512xf32> to vector<8x512xf32>
    %221 = arith.mulf %218, %220 : vector<8x512xf32>
    %222 = arith.truncf %221 : vector<8x512xf32> to vector<8x512xbf16>
    %c80_117 = arith.constant 80 : index
    %c0_118 = arith.constant 0 : index
    %223 = vector.load %arg12[%c80_117, %c0_118] : memref<800x512xbf16, #tpu.memory_space<vmem>>, vector<8x512xbf16>
    tpu.vector_store %arg12[%c80_117, %c0_118], %222 {strides = array<i32>} : memref<800x512xbf16, #tpu.memory_space<vmem>>, vector<8x512xbf16>,
    %c1_i32_119 = arith.constant 1 : i32
    %224 = tpu.dynamic_rotate %157 by %c1_i32_119 dim 1 : vector<8x512xf32>, i32 -> vector<8x512xf32>
    %c11_120 = arith.constant 11 : index
    %c0_121 = arith.constant 0 : index
    %225 = vector.load %arg2[%c11_120, %c0_121] : memref<25x512xf32, #tpu.memory_space<vmem>>, vector<1x512xf32>
    %226 = vector.broadcast %225 : vector<1x512xf32> to vector<8x512xf32>
    %227 = arith.mulf %224, %226 : vector<8x512xf32>
    %228 = arith.truncf %227 : vector<8x512xf32> to vector<8x512xbf16>
    %c88_122 = arith.constant 88 : index
    %c0_123 = arith.constant 0 : index
    %229 = vector.load %arg12[%c88_122, %c0_123] : memref<800x512xbf16, #tpu.memory_space<vmem>>, vector<8x512xbf16>
    tpu.vector_store %arg12[%c88_122, %c0_123], %228 {strides = array<i32>} : memref<800x512xbf16, #tpu.memory_space<vmem>>, vector<8x512xbf16>,
    %230 = arith.truncf %157 : vector<8x512xf32> to vector<8x512xbf16>
    %c96_124 = arith.constant 96 : index
    %c0_125 = arith.constant 0 : index
    %231 = vector.load %arg12[%c96_124, %c0_125] : memref<800x512xbf16, #tpu.memory_space<vmem>>, vector<8x512xbf16>
    tpu.vector_store %arg12[%c96_124, %c0_125], %230 {strides = array<i32>} : memref<800x512xbf16, #tpu.memory_space<vmem>>, vector<8x512xbf16>,
    %c511_i32_126 = arith.constant 511 : i32
    %232 = tpu.dynamic_rotate %157 by %c511_i32_126 dim 1 : vector<8x512xf32>, i32 -> vector<8x512xf32>
    %c13_127 = arith.constant 13 : index
    %c0_128 = arith.constant 0 : index
    %233 = vector.load %arg2[%c13_127, %c0_128] : memref<25x512xf32, #tpu.memory_space<vmem>>, vector<1x512xf32>
    %234 = vector.broadcast %233 : vector<1x512xf32> to vector<8x512xf32>
    %235 = arith.mulf %232, %234 : vector<8x512xf32>
    %236 = arith.truncf %235 : vector<8x512xf32> to vector<8x512xbf16>
    %c104_129 = arith.constant 104 : index
    %c0_130 = arith.constant 0 : index
    %237 = vector.load %arg12[%c104_129, %c0_130] : memref<800x512xbf16, #tpu.memory_space<vmem>>, vector<8x512xbf16>
    tpu.vector_store %arg12[%c104_129, %c0_130], %236 {strides = array<i32>} : memref<800x512xbf16, #tpu.memory_space<vmem>>, vector<8x512xbf16>,
    %c510_i32_131 = arith.constant 510 : i32
    %238 = tpu.dynamic_rotate %157 by %c510_i32_131 dim 1 : vector<8x512xf32>, i32 -> vector<8x512xf32>
    %c14_132 = arith.constant 14 : index
    %c0_133 = arith.constant 0 : index
    %239 = vector.load %arg2[%c14_132, %c0_133] : memref<25x512xf32, #tpu.memory_space<vmem>>, vector<1x512xf32>
    %240 = vector.broadcast %239 : vector<1x512xf32> to vector<8x512xf32>
    %241 = arith.mulf %238, %240 : vector<8x512xf32>
    %242 = arith.truncf %241 : vector<8x512xf32> to vector<8x512xbf16>
    %c112_134 = arith.constant 112 : index
    %c0_135 = arith.constant 0 : index
    %243 = vector.load %arg12[%c112_134, %c0_135] : memref<800x512xbf16, #tpu.memory_space<vmem>>, vector<8x512xbf16>
    tpu.vector_store %arg12[%c112_134, %c0_135], %242 {strides = array<i32>} : memref<800x512xbf16, #tpu.memory_space<vmem>>, vector<8x512xbf16>,
    %c498_i32_136 = arith.constant 498 : i32
    %244 = tpu.dynamic_rotate %157 by %c498_i32_136 dim 1 : vector<8x512xf32>, i32 -> vector<8x512xf32>
    %c15_137 = arith.constant 15 : index
    %c0_138 = arith.constant 0 : index
    %245 = vector.load %arg2[%c15_137, %c0_138] : memref<25x512xf32, #tpu.memory_space<vmem>>, vector<1x512xf32>
    %246 = vector.broadcast %245 : vector<1x512xf32> to vector<8x512xf32>
    %247 = arith.mulf %244, %246 : vector<8x512xf32>
    %248 = arith.truncf %247 : vector<8x512xf32> to vector<8x512xbf16>
    %c120_139 = arith.constant 120 : index
    %c0_140 = arith.constant 0 : index
    %249 = vector.load %arg12[%c120_139, %c0_140] : memref<800x512xbf16, #tpu.memory_space<vmem>>, vector<8x512xbf16>
    tpu.vector_store %arg12[%c120_139, %c0_140], %248 {strides = array<i32>} : memref<800x512xbf16, #tpu.memory_space<vmem>>, vector<8x512xbf16>,
    %c497_i32_141 = arith.constant 497 : i32
    %250 = tpu.dynamic_rotate %157 by %c497_i32_141 dim 1 : vector<8x512xf32>, i32 -> vector<8x512xf32>
    %c16_142 = arith.constant 16 : index
    %c0_143 = arith.constant 0 : index
    %251 = vector.load %arg2[%c16_142, %c0_143] : memref<25x512xf32, #tpu.memory_space<vmem>>, vector<1x512xf32>
    %252 = vector.broadcast %251 : vector<1x512xf32> to vector<8x512xf32>
    %253 = arith.mulf %250, %252 : vector<8x512xf32>
    %254 = arith.truncf %253 : vector<8x512xf32> to vector<8x512xbf16>
    %c128_144 = arith.constant 128 : index
    %c0_145 = arith.constant 0 : index
    %255 = vector.load %arg12[%c128_144, %c0_145] : memref<800x512xbf16, #tpu.memory_space<vmem>>, vector<8x512xbf16>
    tpu.vector_store %arg12[%c128_144, %c0_145], %254 {strides = array<i32>} : memref<800x512xbf16, #tpu.memory_space<vmem>>, vector<8x512xbf16>,
    %c496_i32_146 = arith.constant 496 : i32
    %256 = tpu.dynamic_rotate %157 by %c496_i32_146 dim 1 : vector<8x512xf32>, i32 -> vector<8x512xf32>
    %c17_147 = arith.constant 17 : index
    %c0_148 = arith.constant 0 : index
    %257 = vector.load %arg2[%c17_147, %c0_148] : memref<25x512xf32, #tpu.memory_space<vmem>>, vector<1x512xf32>
    %258 = vector.broadcast %257 : vector<1x512xf32> to vector<8x512xf32>
    %259 = arith.mulf %256, %258 : vector<8x512xf32>
    %260 = arith.truncf %259 : vector<8x512xf32> to vector<8x512xbf16>
    %c136_149 = arith.constant 136 : index
    %c0_150 = arith.constant 0 : index
    %261 = vector.load %arg12[%c136_149, %c0_150] : memref<800x512xbf16, #tpu.memory_space<vmem>>, vector<8x512xbf16>
    tpu.vector_store %arg12[%c136_149, %c0_150], %260 {strides = array<i32>} : memref<800x512xbf16, #tpu.memory_space<vmem>>, vector<8x512xbf16>,
    %c495_i32_151 = arith.constant 495 : i32
    %262 = tpu.dynamic_rotate %157 by %c495_i32_151 dim 1 : vector<8x512xf32>, i32 -> vector<8x512xf32>
    %c18_152 = arith.constant 18 : index
    %c0_153 = arith.constant 0 : index
    %263 = vector.load %arg2[%c18_152, %c0_153] : memref<25x512xf32, #tpu.memory_space<vmem>>, vector<1x512xf32>
    %264 = vector.broadcast %263 : vector<1x512xf32> to vector<8x512xf32>
    %265 = arith.mulf %262, %264 : vector<8x512xf32>
    %266 = arith.truncf %265 : vector<8x512xf32> to vector<8x512xbf16>
    %c144_154 = arith.constant 144 : index
    %c0_155 = arith.constant 0 : index
    %267 = vector.load %arg12[%c144_154, %c0_155] : memref<800x512xbf16, #tpu.memory_space<vmem>>, vector<8x512xbf16>
    tpu.vector_store %arg12[%c144_154, %c0_155], %266 {strides = array<i32>} : memref<800x512xbf16, #tpu.memory_space<vmem>>, vector<8x512xbf16>,
    %c494_i32_156 = arith.constant 494 : i32
    %268 = tpu.dynamic_rotate %157 by %c494_i32_156 dim 1 : vector<8x512xf32>, i32 -> vector<8x512xf32>
    %c19_157 = arith.constant 19 : index
    %c0_158 = arith.constant 0 : index
    %269 = vector.load %arg2[%c19_157, %c0_158] : memref<25x512xf32, #tpu.memory_space<vmem>>, vector<1x512xf32>
    %270 = vector.broadcast %269 : vector<1x512xf32> to vector<8x512xf32>
    %271 = arith.mulf %268, %270 : vector<8x512xf32>
    %272 = arith.truncf %271 : vector<8x512xf32> to vector<8x512xbf16>
    %c152_159 = arith.constant 152 : index
    %c0_160 = arith.constant 0 : index
    %273 = vector.load %arg12[%c152_159, %c0_160] : memref<800x512xbf16, #tpu.memory_space<vmem>>, vector<8x512xbf16>
    tpu.vector_store %arg12[%c152_159, %c0_160], %272 {strides = array<i32>} : memref<800x512xbf16, #tpu.memory_space<vmem>>, vector<8x512xbf16>,
    %c482_i32_161 = arith.constant 482 : i32
    %274 = tpu.dynamic_rotate %157 by %c482_i32_161 dim 1 : vector<8x512xf32>, i32 -> vector<8x512xf32>
    %c20_162 = arith.constant 20 : index
    %c0_163 = arith.constant 0 : index
    %275 = vector.load %arg2[%c20_162, %c0_163] : memref<25x512xf32, #tpu.memory_space<vmem>>, vector<1x512xf32>
    %276 = vector.broadcast %275 : vector<1x512xf32> to vector<8x512xf32>
    %277 = arith.mulf %274, %276 : vector<8x512xf32>
    %278 = arith.truncf %277 : vector<8x512xf32> to vector<8x512xbf16>
    %c160_164 = arith.constant 160 : index
    %c0_165 = arith.constant 0 : index
    %279 = vector.load %arg12[%c160_164, %c0_165] : memref<800x512xbf16, #tpu.memory_space<vmem>>, vector<8x512xbf16>
    tpu.vector_store %arg12[%c160_164, %c0_165], %278 {strides = array<i32>} : memref<800x512xbf16, #tpu.memory_space<vmem>>, vector<8x512xbf16>,
    %c481_i32_166 = arith.constant 481 : i32
    %280 = tpu.dynamic_rotate %157 by %c481_i32_166 dim 1 : vector<8x512xf32>, i32 -> vector<8x512xf32>
    %c21_167 = arith.constant 21 : index
    %c0_168 = arith.constant 0 : index
    %281 = vector.load %arg2[%c21_167, %c0_168] : memref<25x512xf32, #tpu.memory_space<vmem>>, vector<1x512xf32>
    %282 = vector.broadcast %281 : vector<1x512xf32> to vector<8x512xf32>
    %283 = arith.mulf %280, %282 : vector<8x512xf32>
    %284 = arith.truncf %283 : vector<8x512xf32> to vector<8x512xbf16>
    %c168_169 = arith.constant 168 : index
    %c0_170 = arith.constant 0 : index
    %285 = vector.load %arg12[%c168_169, %c0_170] : memref<800x512xbf16, #tpu.memory_space<vmem>>, vector<8x512xbf16>
    tpu.vector_store %arg12[%c168_169, %c0_170], %284 {strides = array<i32>} : memref<800x512xbf16, #tpu.memory_space<vmem>>, vector<8x512xbf16>,
    %c480_i32_171 = arith.constant 480 : i32
    %286 = tpu.dynamic_rotate %157 by %c480_i32_171 dim 1 : vector<8x512xf32>, i32 -> vector<8x512xf32>
    %c22_172 = arith.constant 22 : index
    %c0_173 = arith.constant 0 : index
    %287 = vector.load %arg2[%c22_172, %c0_173] : memref<25x512xf32, #tpu.memory_space<vmem>>, vector<1x512xf32>
    %288 = vector.broadcast %287 : vector<1x512xf32> to vector<8x512xf32>
    %289 = arith.mulf %286, %288 : vector<8x512xf32>
    %290 = arith.truncf %289 : vector<8x512xf32> to vector<8x512xbf16>
    %c176_174 = arith.constant 176 : index
    %c0_175 = arith.constant 0 : index
    %291 = vector.load %arg12[%c176_174, %c0_175] : memref<800x512xbf16, #tpu.memory_space<vmem>>, vector<8x512xbf16>
    tpu.vector_store %arg12[%c176_174, %c0_175], %290 {strides = array<i32>} : memref<800x512xbf16, #tpu.memory_space<vmem>>, vector<8x512xbf16>,
    %c479_i32_176 = arith.constant 479 : i32
    %292 = tpu.dynamic_rotate %157 by %c479_i32_176 dim 1 : vector<8x512xf32>, i32 -> vector<8x512xf32>
    %c23_177 = arith.constant 23 : index
    %c0_178 = arith.constant 0 : index
    %293 = vector.load %arg2[%c23_177, %c0_178] : memref<25x512xf32, #tpu.memory_space<vmem>>, vector<1x512xf32>
    %294 = vector.broadcast %293 : vector<1x512xf32> to vector<8x512xf32>
    %295 = arith.mulf %292, %294 : vector<8x512xf32>
    %296 = arith.truncf %295 : vector<8x512xf32> to vector<8x512xbf16>
    %c184_179 = arith.constant 184 : index
    %c0_180 = arith.constant 0 : index
    %297 = vector.load %arg12[%c184_179, %c0_180] : memref<800x512xbf16, #tpu.memory_space<vmem>>, vector<8x512xbf16>
    tpu.vector_store %arg12[%c184_179, %c0_180], %296 {strides = array<i32>} : memref<800x512xbf16, #tpu.memory_space<vmem>>, vector<8x512xbf16>,
    %c478_i32_181 = arith.constant 478 : i32
    %298 = tpu.dynamic_rotate %157 by %c478_i32_181 dim 1 : vector<8x512xf32>, i32 -> vector<8x512xf32>
    %c24_182 = arith.constant 24 : index
    %c0_183 = arith.constant 0 : index
    %299 = vector.load %arg2[%c24_182, %c0_183] : memref<25x512xf32, #tpu.memory_space<vmem>>, vector<1x512xf32>
    %300 = vector.broadcast %299 : vector<1x512xf32> to vector<8x512xf32>
    %301 = arith.mulf %298, %300 : vector<8x512xf32>
    %302 = arith.truncf %301 : vector<8x512xf32> to vector<8x512xbf16>
    %c192_184 = arith.constant 192 : index
    %c0_185 = arith.constant 0 : index
    %303 = vector.load %arg12[%c192_184, %c0_185] : memref<800x512xbf16, #tpu.memory_space<vmem>>, vector<8x512xbf16>
    tpu.vector_store %arg12[%c192_184, %c0_185], %302 {strides = array<i32>} : memref<800x512xbf16, #tpu.memory_space<vmem>>, vector<8x512xbf16>,
    %c0_186 = arith.constant 0 : index
    %c0_187 = arith.constant 0 : index
    %304 = vector.load %arg5[%c0_186, %c0_187] : memref<16x200xbf16, #tpu.memory_space<vmem>>, vector<16x200xbf16>
    %c0_188 = arith.constant 0 : index
    %c0_189 = arith.constant 0 : index
    %305 = vector.load %arg12[%c0_188, %c0_189] : memref<800x512xbf16, #tpu.memory_space<vmem>>, vector<200x512xbf16>
    %cst_190 = arith.constant dense<0.000000e+00> : vector<16x512xf32>
    %306 = tpu.matmul %304, %305, %cst_190 {dimension_numbers = #tpu.dot_dimension_numbers<[1], [0], [0], [1], [0, 0, 1, 1], [], []>} : vector<16x200xbf16>, vector<200x512xbf16>, vector<16x512xf32> -> vector<16x512xf32>
    %c0_191 = arith.constant 0 : index
    %c0_192 = arith.constant 0 : index
    %307 = vector.load %arg6[%c0_191, %c0_192] : memref<16x1xf32, #tpu.memory_space<vmem>>, vector<16x1xf32>
    %308 = vector.broadcast %307 : vector<16x1xf32> to vector<16x512xf32>
    %309 = arith.addf %306, %308 : vector<16x512xf32>
    %cst_193 = arith.constant 0.000000e+00 : f32
    %310 = vector.broadcast %cst_193 : f32 to vector<16x512xf32>
    %311 = arith.maximumf %309, %310 : vector<16x512xf32>
    %c34_i32_194 = arith.constant 34 : i32
    %312 = tpu.dynamic_rotate %311 by %c34_i32_194 dim 1 : vector<16x512xf32>, i32 -> vector<16x512xf32>
    %c0_195 = arith.constant 0 : index
    %c0_196 = arith.constant 0 : index
    %313 = vector.load %arg2[%c0_195, %c0_196] : memref<25x512xf32, #tpu.memory_space<vmem>>, vector<1x512xf32>
    %314 = vector.broadcast %313 : vector<1x512xf32> to vector<16x512xf32>
    %315 = arith.mulf %312, %314 : vector<16x512xf32>
    %316 = arith.truncf %315 : vector<16x512xf32> to vector<16x512xbf16>
    %c0_197 = arith.constant 0 : index
    %c0_198 = arith.constant 0 : index
    %317 = vector.load %arg12[%c0_197, %c0_198] : memref<800x512xbf16, #tpu.memory_space<vmem>>, vector<16x512xbf16>
    tpu.vector_store %arg12[%c0_197, %c0_198], %316 {strides = array<i32>} : memref<800x512xbf16, #tpu.memory_space<vmem>>, vector<16x512xbf16>,
    %c33_i32_199 = arith.constant 33 : i32
    %318 = tpu.dynamic_rotate %311 by %c33_i32_199 dim 1 : vector<16x512xf32>, i32 -> vector<16x512xf32>
    %c1_200 = arith.constant 1 : index
    %c0_201 = arith.constant 0 : index
    %319 = vector.load %arg2[%c1_200, %c0_201] : memref<25x512xf32, #tpu.memory_space<vmem>>, vector<1x512xf32>
    %320 = vector.broadcast %319 : vector<1x512xf32> to vector<16x512xf32>
    %321 = arith.mulf %318, %320 : vector<16x512xf32>
    %322 = arith.truncf %321 : vector<16x512xf32> to vector<16x512xbf16>
    %c16_202 = arith.constant 16 : index
    %c0_203 = arith.constant 0 : index
    %323 = vector.load %arg12[%c16_202, %c0_203] : memref<800x512xbf16, #tpu.memory_space<vmem>>, vector<16x512xbf16>
    tpu.vector_store %arg12[%c16_202, %c0_203], %322 {strides = array<i32>} : memref<800x512xbf16, #tpu.memory_space<vmem>>, vector<16x512xbf16>,
    %c32_i32_204 = arith.constant 32 : i32
    %324 = tpu.dynamic_rotate %311 by %c32_i32_204 dim 1 : vector<16x512xf32>, i32 -> vector<16x512xf32>
    %c2_205 = arith.constant 2 : index
    %c0_206 = arith.constant 0 : index
    %325 = vector.load %arg2[%c2_205, %c0_206] : memref<25x512xf32, #tpu.memory_space<vmem>>, vector<1x512xf32>
    %326 = vector.broadcast %325 : vector<1x512xf32> to vector<16x512xf32>
    %327 = arith.mulf %324, %326 : vector<16x512xf32>
    %328 = arith.truncf %327 : vector<16x512xf32> to vector<16x512xbf16>
    %c32_207 = arith.constant 32 : index
    %c0_208 = arith.constant 0 : index
    %329 = vector.load %arg12[%c32_207, %c0_208] : memref<800x512xbf16, #tpu.memory_space<vmem>>, vector<16x512xbf16>
    tpu.vector_store %arg12[%c32_207, %c0_208], %328 {strides = array<i32>} : memref<800x512xbf16, #tpu.memory_space<vmem>>, vector<16x512xbf16>,
    %c31_i32_209 = arith.constant 31 : i32
    %330 = tpu.dynamic_rotate %311 by %c31_i32_209 dim 1 : vector<16x512xf32>, i32 -> vector<16x512xf32>
    %c3_210 = arith.constant 3 : index
    %c0_211 = arith.constant 0 : index
    %331 = vector.load %arg2[%c3_210, %c0_211] : memref<25x512xf32, #tpu.memory_space<vmem>>, vector<1x512xf32>
    %332 = vector.broadcast %331 : vector<1x512xf32> to vector<16x512xf32>
    %333 = arith.mulf %330, %332 : vector<16x512xf32>
    %334 = arith.truncf %333 : vector<16x512xf32> to vector<16x512xbf16>
    %c48_212 = arith.constant 48 : index
    %c0_213 = arith.constant 0 : index
    %335 = vector.load %arg12[%c48_212, %c0_213] : memref<800x512xbf16, #tpu.memory_space<vmem>>, vector<16x512xbf16>
    tpu.vector_store %arg12[%c48_212, %c0_213], %334 {strides = array<i32>} : memref<800x512xbf16, #tpu.memory_space<vmem>>, vector<16x512xbf16>,
    %c30_i32_214 = arith.constant 30 : i32
    %336 = tpu.dynamic_rotate %311 by %c30_i32_214 dim 1 : vector<16x512xf32>, i32 -> vector<16x512xf32>
    %c4_215 = arith.constant 4 : index
    %c0_216 = arith.constant 0 : index
    %337 = vector.load %arg2[%c4_215, %c0_216] : memref<25x512xf32, #tpu.memory_space<vmem>>, vector<1x512xf32>
    %338 = vector.broadcast %337 : vector<1x512xf32> to vector<16x512xf32>
    %339 = arith.mulf %336, %338 : vector<16x512xf32>
    %340 = arith.truncf %339 : vector<16x512xf32> to vector<16x512xbf16>
    %c64_217 = arith.constant 64 : index
    %c0_218 = arith.constant 0 : index
    %341 = vector.load %arg12[%c64_217, %c0_218] : memref<800x512xbf16, #tpu.memory_space<vmem>>, vector<16x512xbf16>
    tpu.vector_store %arg12[%c64_217, %c0_218], %340 {strides = array<i32>} : memref<800x512xbf16, #tpu.memory_space<vmem>>, vector<16x512xbf16>,
    %c18_i32_219 = arith.constant 18 : i32
    %342 = tpu.dynamic_rotate %311 by %c18_i32_219 dim 1 : vector<16x512xf32>, i32 -> vector<16x512xf32>
    %c5_220 = arith.constant 5 : index
    %c0_221 = arith.constant 0 : index
    %343 = vector.load %arg2[%c5_220, %c0_221] : memref<25x512xf32, #tpu.memory_space<vmem>>, vector<1x512xf32>
    %344 = vector.broadcast %343 : vector<1x512xf32> to vector<16x512xf32>
    %345 = arith.mulf %342, %344 : vector<16x512xf32>
    %346 = arith.truncf %345 : vector<16x512xf32> to vector<16x512xbf16>
    %c80_222 = arith.constant 80 : index
    %c0_223 = arith.constant 0 : index
    %347 = vector.load %arg12[%c80_222, %c0_223] : memref<800x512xbf16, #tpu.memory_space<vmem>>, vector<16x512xbf16>
    tpu.vector_store %arg12[%c80_222, %c0_223], %346 {strides = array<i32>} : memref<800x512xbf16, #tpu.memory_space<vmem>>, vector<16x512xbf16>,
    %c17_i32_224 = arith.constant 17 : i32
    %348 = tpu.dynamic_rotate %311 by %c17_i32_224 dim 1 : vector<16x512xf32>, i32 -> vector<16x512xf32>
    %c6_225 = arith.constant 6 : index
    %c0_226 = arith.constant 0 : index
    %349 = vector.load %arg2[%c6_225, %c0_226] : memref<25x512xf32, #tpu.memory_space<vmem>>, vector<1x512xf32>
    %350 = vector.broadcast %349 : vector<1x512xf32> to vector<16x512xf32>
    %351 = arith.mulf %348, %350 : vector<16x512xf32>
    %352 = arith.truncf %351 : vector<16x512xf32> to vector<16x512xbf16>
    %c96_227 = arith.constant 96 : index
    %c0_228 = arith.constant 0 : index
    %353 = vector.load %arg12[%c96_227, %c0_228] : memref<800x512xbf16, #tpu.memory_space<vmem>>, vector<16x512xbf16>
    tpu.vector_store %arg12[%c96_227, %c0_228], %352 {strides = array<i32>} : memref<800x512xbf16, #tpu.memory_space<vmem>>, vector<16x512xbf16>,
    %c16_i32_229 = arith.constant 16 : i32
    %354 = tpu.dynamic_rotate %311 by %c16_i32_229 dim 1 : vector<16x512xf32>, i32 -> vector<16x512xf32>
    %c7_230 = arith.constant 7 : index
    %c0_231 = arith.constant 0 : index
    %355 = vector.load %arg2[%c7_230, %c0_231] : memref<25x512xf32, #tpu.memory_space<vmem>>, vector<1x512xf32>
    %356 = vector.broadcast %355 : vector<1x512xf32> to vector<16x512xf32>
    %357 = arith.mulf %354, %356 : vector<16x512xf32>
    %358 = arith.truncf %357 : vector<16x512xf32> to vector<16x512xbf16>
    %c112_232 = arith.constant 112 : index
    %c0_233 = arith.constant 0 : index
    %359 = vector.load %arg12[%c112_232, %c0_233] : memref<800x512xbf16, #tpu.memory_space<vmem>>, vector<16x512xbf16>
    tpu.vector_store %arg12[%c112_232, %c0_233], %358 {strides = array<i32>} : memref<800x512xbf16, #tpu.memory_space<vmem>>, vector<16x512xbf16>,
    %c15_i32_234 = arith.constant 15 : i32
    %360 = tpu.dynamic_rotate %311 by %c15_i32_234 dim 1 : vector<16x512xf32>, i32 -> vector<16x512xf32>
    %c8_235 = arith.constant 8 : index
    %c0_236 = arith.constant 0 : index
    %361 = vector.load %arg2[%c8_235, %c0_236] : memref<25x512xf32, #tpu.memory_space<vmem>>, vector<1x512xf32>
    %362 = vector.broadcast %361 : vector<1x512xf32> to vector<16x512xf32>
    %363 = arith.mulf %360, %362 : vector<16x512xf32>
    %364 = arith.truncf %363 : vector<16x512xf32> to vector<16x512xbf16>
    %c128_237 = arith.constant 128 : index
    %c0_238 = arith.constant 0 : index
    %365 = vector.load %arg12[%c128_237, %c0_238] : memref<800x512xbf16, #tpu.memory_space<vmem>>, vector<16x512xbf16>
    tpu.vector_store %arg12[%c128_237, %c0_238], %364 {strides = array<i32>} : memref<800x512xbf16, #tpu.memory_space<vmem>>, vector<16x512xbf16>,
    %c14_i32_239 = arith.constant 14 : i32
    %366 = tpu.dynamic_rotate %311 by %c14_i32_239 dim 1 : vector<16x512xf32>, i32 -> vector<16x512xf32>
    %c9_240 = arith.constant 9 : index
    %c0_241 = arith.constant 0 : index
    %367 = vector.load %arg2[%c9_240, %c0_241] : memref<25x512xf32, #tpu.memory_space<vmem>>, vector<1x512xf32>
    %368 = vector.broadcast %367 : vector<1x512xf32> to vector<16x512xf32>
    %369 = arith.mulf %366, %368 : vector<16x512xf32>
    %370 = arith.truncf %369 : vector<16x512xf32> to vector<16x512xbf16>
    %c144_242 = arith.constant 144 : index
    %c0_243 = arith.constant 0 : index
    %371 = vector.load %arg12[%c144_242, %c0_243] : memref<800x512xbf16, #tpu.memory_space<vmem>>, vector<16x512xbf16>
    tpu.vector_store %arg12[%c144_242, %c0_243], %370 {strides = array<i32>} : memref<800x512xbf16, #tpu.memory_space<vmem>>, vector<16x512xbf16>,
    %c2_i32_244 = arith.constant 2 : i32
    %372 = tpu.dynamic_rotate %311 by %c2_i32_244 dim 1 : vector<16x512xf32>, i32 -> vector<16x512xf32>
    %c10_245 = arith.constant 10 : index
    %c0_246 = arith.constant 0 : index
    %373 = vector.load %arg2[%c10_245, %c0_246] : memref<25x512xf32, #tpu.memory_space<vmem>>, vector<1x512xf32>
    %374 = vector.broadcast %373 : vector<1x512xf32> to vector<16x512xf32>
    %375 = arith.mulf %372, %374 : vector<16x512xf32>
    %376 = arith.truncf %375 : vector<16x512xf32> to vector<16x512xbf16>
    %c160_247 = arith.constant 160 : index
    %c0_248 = arith.constant 0 : index
    %377 = vector.load %arg12[%c160_247, %c0_248] : memref<800x512xbf16, #tpu.memory_space<vmem>>, vector<16x512xbf16>
    tpu.vector_store %arg12[%c160_247, %c0_248], %376 {strides = array<i32>} : memref<800x512xbf16, #tpu.memory_space<vmem>>, vector<16x512xbf16>,
    %c1_i32_249 = arith.constant 1 : i32
    %378 = tpu.dynamic_rotate %311 by %c1_i32_249 dim 1 : vector<16x512xf32>, i32 -> vector<16x512xf32>
    %c11_250 = arith.constant 11 : index
    %c0_251 = arith.constant 0 : index
    %379 = vector.load %arg2[%c11_250, %c0_251] : memref<25x512xf32, #tpu.memory_space<vmem>>, vector<1x512xf32>
    %380 = vector.broadcast %379 : vector<1x512xf32> to vector<16x512xf32>
    %381 = arith.mulf %378, %380 : vector<16x512xf32>
    %382 = arith.truncf %381 : vector<16x512xf32> to vector<16x512xbf16>
    %c176_252 = arith.constant 176 : index
    %c0_253 = arith.constant 0 : index
    %383 = vector.load %arg12[%c176_252, %c0_253] : memref<800x512xbf16, #tpu.memory_space<vmem>>, vector<16x512xbf16>
    tpu.vector_store %arg12[%c176_252, %c0_253], %382 {strides = array<i32>} : memref<800x512xbf16, #tpu.memory_space<vmem>>, vector<16x512xbf16>,
    %384 = arith.truncf %311 : vector<16x512xf32> to vector<16x512xbf16>
    %c192_254 = arith.constant 192 : index
    %c0_255 = arith.constant 0 : index
    %385 = vector.load %arg12[%c192_254, %c0_255] : memref<800x512xbf16, #tpu.memory_space<vmem>>, vector<16x512xbf16>
    tpu.vector_store %arg12[%c192_254, %c0_255], %384 {strides = array<i32>} : memref<800x512xbf16, #tpu.memory_space<vmem>>, vector<16x512xbf16>,
    %c511_i32_256 = arith.constant 511 : i32
    %386 = tpu.dynamic_rotate %311 by %c511_i32_256 dim 1 : vector<16x512xf32>, i32 -> vector<16x512xf32>
    %c13_257 = arith.constant 13 : index
    %c0_258 = arith.constant 0 : index
    %387 = vector.load %arg2[%c13_257, %c0_258] : memref<25x512xf32, #tpu.memory_space<vmem>>, vector<1x512xf32>
    %388 = vector.broadcast %387 : vector<1x512xf32> to vector<16x512xf32>
    %389 = arith.mulf %386, %388 : vector<16x512xf32>
    %390 = arith.truncf %389 : vector<16x512xf32> to vector<16x512xbf16>
    %c208 = arith.constant 208 : index
    %c0_259 = arith.constant 0 : index
    %391 = vector.load %arg12[%c208, %c0_259] : memref<800x512xbf16, #tpu.memory_space<vmem>>, vector<16x512xbf16>
    tpu.vector_store %arg12[%c208, %c0_259], %390 {strides = array<i32>} : memref<800x512xbf16, #tpu.memory_space<vmem>>, vector<16x512xbf16>,
    %c510_i32_260 = arith.constant 510 : i32
    %392 = tpu.dynamic_rotate %311 by %c510_i32_260 dim 1 : vector<16x512xf32>, i32 -> vector<16x512xf32>
    %c14_261 = arith.constant 14 : index
    %c0_262 = arith.constant 0 : index
    %393 = vector.load %arg2[%c14_261, %c0_262] : memref<25x512xf32, #tpu.memory_space<vmem>>, vector<1x512xf32>
    %394 = vector.broadcast %393 : vector<1x512xf32> to vector<16x512xf32>
    %395 = arith.mulf %392, %394 : vector<16x512xf32>
    %396 = arith.truncf %395 : vector<16x512xf32> to vector<16x512xbf16>
    %c224 = arith.constant 224 : index
    %c0_263 = arith.constant 0 : index
    %397 = vector.load %arg12[%c224, %c0_263] : memref<800x512xbf16, #tpu.memory_space<vmem>>, vector<16x512xbf16>
    tpu.vector_store %arg12[%c224, %c0_263], %396 {strides = array<i32>} : memref<800x512xbf16, #tpu.memory_space<vmem>>, vector<16x512xbf16>,
    %c498_i32_264 = arith.constant 498 : i32
    %398 = tpu.dynamic_rotate %311 by %c498_i32_264 dim 1 : vector<16x512xf32>, i32 -> vector<16x512xf32>
    %c15_265 = arith.constant 15 : index
    %c0_266 = arith.constant 0 : index
    %399 = vector.load %arg2[%c15_265, %c0_266] : memref<25x512xf32, #tpu.memory_space<vmem>>, vector<1x512xf32>
    %400 = vector.broadcast %399 : vector<1x512xf32> to vector<16x512xf32>
    %401 = arith.mulf %398, %400 : vector<16x512xf32>
    %402 = arith.truncf %401 : vector<16x512xf32> to vector<16x512xbf16>
    %c240 = arith.constant 240 : index
    %c0_267 = arith.constant 0 : index
    %403 = vector.load %arg12[%c240, %c0_267] : memref<800x512xbf16, #tpu.memory_space<vmem>>, vector<16x512xbf16>
    tpu.vector_store %arg12[%c240, %c0_267], %402 {strides = array<i32>} : memref<800x512xbf16, #tpu.memory_space<vmem>>, vector<16x512xbf16>,
    %c497_i32_268 = arith.constant 497 : i32
    %404 = tpu.dynamic_rotate %311 by %c497_i32_268 dim 1 : vector<16x512xf32>, i32 -> vector<16x512xf32>
    %c16_269 = arith.constant 16 : index
    %c0_270 = arith.constant 0 : index
    %405 = vector.load %arg2[%c16_269, %c0_270] : memref<25x512xf32, #tpu.memory_space<vmem>>, vector<1x512xf32>
    %406 = vector.broadcast %405 : vector<1x512xf32> to vector<16x512xf32>
    %407 = arith.mulf %404, %406 : vector<16x512xf32>
    %408 = arith.truncf %407 : vector<16x512xf32> to vector<16x512xbf16>
    %c256 = arith.constant 256 : index
    %c0_271 = arith.constant 0 : index
    %409 = vector.load %arg12[%c256, %c0_271] : memref<800x512xbf16, #tpu.memory_space<vmem>>, vector<16x512xbf16>
    tpu.vector_store %arg12[%c256, %c0_271], %408 {strides = array<i32>} : memref<800x512xbf16, #tpu.memory_space<vmem>>, vector<16x512xbf16>,
    %c496_i32_272 = arith.constant 496 : i32
    %410 = tpu.dynamic_rotate %311 by %c496_i32_272 dim 1 : vector<16x512xf32>, i32 -> vector<16x512xf32>
    %c17_273 = arith.constant 17 : index
    %c0_274 = arith.constant 0 : index
    %411 = vector.load %arg2[%c17_273, %c0_274] : memref<25x512xf32, #tpu.memory_space<vmem>>, vector<1x512xf32>
    %412 = vector.broadcast %411 : vector<1x512xf32> to vector<16x512xf32>
    %413 = arith.mulf %410, %412 : vector<16x512xf32>
    %414 = arith.truncf %413 : vector<16x512xf32> to vector<16x512xbf16>
    %c272 = arith.constant 272 : index
    %c0_275 = arith.constant 0 : index
    %415 = vector.load %arg12[%c272, %c0_275] : memref<800x512xbf16, #tpu.memory_space<vmem>>, vector<16x512xbf16>
    tpu.vector_store %arg12[%c272, %c0_275], %414 {strides = array<i32>} : memref<800x512xbf16, #tpu.memory_space<vmem>>, vector<16x512xbf16>,
    %c495_i32_276 = arith.constant 495 : i32
    %416 = tpu.dynamic_rotate %311 by %c495_i32_276 dim 1 : vector<16x512xf32>, i32 -> vector<16x512xf32>
    %c18_277 = arith.constant 18 : index
    %c0_278 = arith.constant 0 : index
    %417 = vector.load %arg2[%c18_277, %c0_278] : memref<25x512xf32, #tpu.memory_space<vmem>>, vector<1x512xf32>
    %418 = vector.broadcast %417 : vector<1x512xf32> to vector<16x512xf32>
    %419 = arith.mulf %416, %418 : vector<16x512xf32>
    %420 = arith.truncf %419 : vector<16x512xf32> to vector<16x512xbf16>
    %c288 = arith.constant 288 : index
    %c0_279 = arith.constant 0 : index
    %421 = vector.load %arg12[%c288, %c0_279] : memref<800x512xbf16, #tpu.memory_space<vmem>>, vector<16x512xbf16>
    tpu.vector_store %arg12[%c288, %c0_279], %420 {strides = array<i32>} : memref<800x512xbf16, #tpu.memory_space<vmem>>, vector<16x512xbf16>,
    %c494_i32_280 = arith.constant 494 : i32
    %422 = tpu.dynamic_rotate %311 by %c494_i32_280 dim 1 : vector<16x512xf32>, i32 -> vector<16x512xf32>
    %c19_281 = arith.constant 19 : index
    %c0_282 = arith.constant 0 : index
    %423 = vector.load %arg2[%c19_281, %c0_282] : memref<25x512xf32, #tpu.memory_space<vmem>>, vector<1x512xf32>
    %424 = vector.broadcast %423 : vector<1x512xf32> to vector<16x512xf32>
    %425 = arith.mulf %422, %424 : vector<16x512xf32>
    %426 = arith.truncf %425 : vector<16x512xf32> to vector<16x512xbf16>
    %c304 = arith.constant 304 : index
    %c0_283 = arith.constant 0 : index
    %427 = vector.load %arg12[%c304, %c0_283] : memref<800x512xbf16, #tpu.memory_space<vmem>>, vector<16x512xbf16>
    tpu.vector_store %arg12[%c304, %c0_283], %426 {strides = array<i32>} : memref<800x512xbf16, #tpu.memory_space<vmem>>, vector<16x512xbf16>,
    %c482_i32_284 = arith.constant 482 : i32
    %428 = tpu.dynamic_rotate %311 by %c482_i32_284 dim 1 : vector<16x512xf32>, i32 -> vector<16x512xf32>
    %c20_285 = arith.constant 20 : index
    %c0_286 = arith.constant 0 : index
    %429 = vector.load %arg2[%c20_285, %c0_286] : memref<25x512xf32, #tpu.memory_space<vmem>>, vector<1x512xf32>
    %430 = vector.broadcast %429 : vector<1x512xf32> to vector<16x512xf32>
    %431 = arith.mulf %428, %430 : vector<16x512xf32>
    %432 = arith.truncf %431 : vector<16x512xf32> to vector<16x512xbf16>
    %c320 = arith.constant 320 : index
    %c0_287 = arith.constant 0 : index
    %433 = vector.load %arg12[%c320, %c0_287] : memref<800x512xbf16, #tpu.memory_space<vmem>>, vector<16x512xbf16>
    tpu.vector_store %arg12[%c320, %c0_287], %432 {strides = array<i32>} : memref<800x512xbf16, #tpu.memory_space<vmem>>, vector<16x512xbf16>,
    %c481_i32_288 = arith.constant 481 : i32
    %434 = tpu.dynamic_rotate %311 by %c481_i32_288 dim 1 : vector<16x512xf32>, i32 -> vector<16x512xf32>
    %c21_289 = arith.constant 21 : index
    %c0_290 = arith.constant 0 : index
    %435 = vector.load %arg2[%c21_289, %c0_290] : memref<25x512xf32, #tpu.memory_space<vmem>>, vector<1x512xf32>
    %436 = vector.broadcast %435 : vector<1x512xf32> to vector<16x512xf32>
    %437 = arith.mulf %434, %436 : vector<16x512xf32>
    %438 = arith.truncf %437 : vector<16x512xf32> to vector<16x512xbf16>
    %c336 = arith.constant 336 : index
    %c0_291 = arith.constant 0 : index
    %439 = vector.load %arg12[%c336, %c0_291] : memref<800x512xbf16, #tpu.memory_space<vmem>>, vector<16x512xbf16>
    tpu.vector_store %arg12[%c336, %c0_291], %438 {strides = array<i32>} : memref<800x512xbf16, #tpu.memory_space<vmem>>, vector<16x512xbf16>,
    %c480_i32_292 = arith.constant 480 : i32
    %440 = tpu.dynamic_rotate %311 by %c480_i32_292 dim 1 : vector<16x512xf32>, i32 -> vector<16x512xf32>
    %c22_293 = arith.constant 22 : index
    %c0_294 = arith.constant 0 : index
    %441 = vector.load %arg2[%c22_293, %c0_294] : memref<25x512xf32, #tpu.memory_space<vmem>>, vector<1x512xf32>
    %442 = vector.broadcast %441 : vector<1x512xf32> to vector<16x512xf32>
    %443 = arith.mulf %440, %442 : vector<16x512xf32>
    %444 = arith.truncf %443 : vector<16x512xf32> to vector<16x512xbf16>
    %c352 = arith.constant 352 : index
    %c0_295 = arith.constant 0 : index
    %445 = vector.load %arg12[%c352, %c0_295] : memref<800x512xbf16, #tpu.memory_space<vmem>>, vector<16x512xbf16>
    tpu.vector_store %arg12[%c352, %c0_295], %444 {strides = array<i32>} : memref<800x512xbf16, #tpu.memory_space<vmem>>, vector<16x512xbf16>,
    %c479_i32_296 = arith.constant 479 : i32
    %446 = tpu.dynamic_rotate %311 by %c479_i32_296 dim 1 : vector<16x512xf32>, i32 -> vector<16x512xf32>
    %c23_297 = arith.constant 23 : index
    %c0_298 = arith.constant 0 : index
    %447 = vector.load %arg2[%c23_297, %c0_298] : memref<25x512xf32, #tpu.memory_space<vmem>>, vector<1x512xf32>
    %448 = vector.broadcast %447 : vector<1x512xf32> to vector<16x512xf32>
    %449 = arith.mulf %446, %448 : vector<16x512xf32>
    %450 = arith.truncf %449 : vector<16x512xf32> to vector<16x512xbf16>
    %c368 = arith.constant 368 : index
    %c0_299 = arith.constant 0 : index
    %451 = vector.load %arg12[%c368, %c0_299] : memref<800x512xbf16, #tpu.memory_space<vmem>>, vector<16x512xbf16>
    tpu.vector_store %arg12[%c368, %c0_299], %450 {strides = array<i32>} : memref<800x512xbf16, #tpu.memory_space<vmem>>, vector<16x512xbf16>,
    %c478_i32_300 = arith.constant 478 : i32
    %452 = tpu.dynamic_rotate %311 by %c478_i32_300 dim 1 : vector<16x512xf32>, i32 -> vector<16x512xf32>
    %c24_301 = arith.constant 24 : index
    %c0_302 = arith.constant 0 : index
    %453 = vector.load %arg2[%c24_301, %c0_302] : memref<25x512xf32, #tpu.memory_space<vmem>>, vector<1x512xf32>
    %454 = vector.broadcast %453 : vector<1x512xf32> to vector<16x512xf32>
    %455 = arith.mulf %452, %454 : vector<16x512xf32>
    %456 = arith.truncf %455 : vector<16x512xf32> to vector<16x512xbf16>
    %c384 = arith.constant 384 : index
    %c0_303 = arith.constant 0 : index
    %457 = vector.load %arg12[%c384, %c0_303] : memref<800x512xbf16, #tpu.memory_space<vmem>>, vector<16x512xbf16>
    tpu.vector_store %arg12[%c384, %c0_303], %456 {strides = array<i32>} : memref<800x512xbf16, #tpu.memory_space<vmem>>, vector<16x512xbf16>,
    %c0_304 = arith.constant 0 : index
    %c0_305 = arith.constant 0 : index
    %458 = vector.load %arg7[%c0_304, %c0_305] : memref<32x400xbf16, #tpu.memory_space<vmem>>, vector<32x400xbf16>
    %c0_306 = arith.constant 0 : index
    %c0_307 = arith.constant 0 : index
    %459 = vector.load %arg12[%c0_306, %c0_307] : memref<800x512xbf16, #tpu.memory_space<vmem>>, vector<400x512xbf16>
    %cst_308 = arith.constant dense<0.000000e+00> : vector<32x512xf32>
    %460 = tpu.matmul %458, %459, %cst_308 {dimension_numbers = #tpu.dot_dimension_numbers<[1], [0], [0], [1], [0, 0, 1, 1], [], []>} : vector<32x400xbf16>, vector<400x512xbf16>, vector<32x512xf32> -> vector<32x512xf32>
    %c0_309 = arith.constant 0 : index
    %c0_310 = arith.constant 0 : index
    %461 = vector.load %arg8[%c0_309, %c0_310] : memref<32x1xf32, #tpu.memory_space<vmem>>, vector<32x1xf32>
    %462 = vector.broadcast %461 : vector<32x1xf32> to vector<32x512xf32>
    %463 = arith.addf %460, %462 : vector<32x512xf32>
    %cst_311 = arith.constant 0.000000e+00 : f32
    %464 = vector.broadcast %cst_311 : f32 to vector<32x512xf32>
    %465 = arith.maximumf %463, %464 : vector<32x512xf32>
    %c34_i32_312 = arith.constant 34 : i32
    %466 = tpu.dynamic_rotate %465 by %c34_i32_312 dim 1 : vector<32x512xf32>, i32 -> vector<32x512xf32>
    %c0_313 = arith.constant 0 : index
    %c0_314 = arith.constant 0 : index
    %467 = vector.load %arg2[%c0_313, %c0_314] : memref<25x512xf32, #tpu.memory_space<vmem>>, vector<1x512xf32>
    %468 = vector.broadcast %467 : vector<1x512xf32> to vector<32x512xf32>
    %469 = arith.mulf %466, %468 : vector<32x512xf32>
    %470 = arith.truncf %469 : vector<32x512xf32> to vector<32x512xbf16>
    %c0_315 = arith.constant 0 : index
    %c0_316 = arith.constant 0 : index
    %471 = vector.load %arg12[%c0_315, %c0_316] : memref<800x512xbf16, #tpu.memory_space<vmem>>, vector<32x512xbf16>
    tpu.vector_store %arg12[%c0_315, %c0_316], %470 {strides = array<i32>} : memref<800x512xbf16, #tpu.memory_space<vmem>>, vector<32x512xbf16>,
    %c33_i32_317 = arith.constant 33 : i32
    %472 = tpu.dynamic_rotate %465 by %c33_i32_317 dim 1 : vector<32x512xf32>, i32 -> vector<32x512xf32>
    %c1_318 = arith.constant 1 : index
    %c0_319 = arith.constant 0 : index
    %473 = vector.load %arg2[%c1_318, %c0_319] : memref<25x512xf32, #tpu.memory_space<vmem>>, vector<1x512xf32>
    %474 = vector.broadcast %473 : vector<1x512xf32> to vector<32x512xf32>
    %475 = arith.mulf %472, %474 : vector<32x512xf32>
    %476 = arith.truncf %475 : vector<32x512xf32> to vector<32x512xbf16>
    %c32_320 = arith.constant 32 : index
    %c0_321 = arith.constant 0 : index
    %477 = vector.load %arg12[%c32_320, %c0_321] : memref<800x512xbf16, #tpu.memory_space<vmem>>, vector<32x512xbf16>
    tpu.vector_store %arg12[%c32_320, %c0_321], %476 {strides = array<i32>} : memref<800x512xbf16, #tpu.memory_space<vmem>>, vector<32x512xbf16>,
    %c32_i32_322 = arith.constant 32 : i32
    %478 = tpu.dynamic_rotate %465 by %c32_i32_322 dim 1 : vector<32x512xf32>, i32 -> vector<32x512xf32>
    %c2_323 = arith.constant 2 : index
    %c0_324 = arith.constant 0 : index
    %479 = vector.load %arg2[%c2_323, %c0_324] : memref<25x512xf32, #tpu.memory_space<vmem>>, vector<1x512xf32>
    %480 = vector.broadcast %479 : vector<1x512xf32> to vector<32x512xf32>
    %481 = arith.mulf %478, %480 : vector<32x512xf32>
    %482 = arith.truncf %481 : vector<32x512xf32> to vector<32x512xbf16>
    %c64_325 = arith.constant 64 : index
    %c0_326 = arith.constant 0 : index
    %483 = vector.load %arg12[%c64_325, %c0_326] : memref<800x512xbf16, #tpu.memory_space<vmem>>, vector<32x512xbf16>
    tpu.vector_store %arg12[%c64_325, %c0_326], %482 {strides = array<i32>} : memref<800x512xbf16, #tpu.memory_space<vmem>>, vector<32x512xbf16>,
    %c31_i32_327 = arith.constant 31 : i32
    %484 = tpu.dynamic_rotate %465 by %c31_i32_327 dim 1 : vector<32x512xf32>, i32 -> vector<32x512xf32>
    %c3_328 = arith.constant 3 : index
    %c0_329 = arith.constant 0 : index
    %485 = vector.load %arg2[%c3_328, %c0_329] : memref<25x512xf32, #tpu.memory_space<vmem>>, vector<1x512xf32>
    %486 = vector.broadcast %485 : vector<1x512xf32> to vector<32x512xf32>
    %487 = arith.mulf %484, %486 : vector<32x512xf32>
    %488 = arith.truncf %487 : vector<32x512xf32> to vector<32x512xbf16>
    %c96_330 = arith.constant 96 : index
    %c0_331 = arith.constant 0 : index
    %489 = vector.load %arg12[%c96_330, %c0_331] : memref<800x512xbf16, #tpu.memory_space<vmem>>, vector<32x512xbf16>
    tpu.vector_store %arg12[%c96_330, %c0_331], %488 {strides = array<i32>} : memref<800x512xbf16, #tpu.memory_space<vmem>>, vector<32x512xbf16>,
    %c30_i32_332 = arith.constant 30 : i32
    %490 = tpu.dynamic_rotate %465 by %c30_i32_332 dim 1 : vector<32x512xf32>, i32 -> vector<32x512xf32>
    %c4_333 = arith.constant 4 : index
    %c0_334 = arith.constant 0 : index
    %491 = vector.load %arg2[%c4_333, %c0_334] : memref<25x512xf32, #tpu.memory_space<vmem>>, vector<1x512xf32>
    %492 = vector.broadcast %491 : vector<1x512xf32> to vector<32x512xf32>
    %493 = arith.mulf %490, %492 : vector<32x512xf32>
    %494 = arith.truncf %493 : vector<32x512xf32> to vector<32x512xbf16>
    %c128_335 = arith.constant 128 : index
    %c0_336 = arith.constant 0 : index
    %495 = vector.load %arg12[%c128_335, %c0_336] : memref<800x512xbf16, #tpu.memory_space<vmem>>, vector<32x512xbf16>
    tpu.vector_store %arg12[%c128_335, %c0_336], %494 {strides = array<i32>} : memref<800x512xbf16, #tpu.memory_space<vmem>>, vector<32x512xbf16>,
    %c18_i32_337 = arith.constant 18 : i32
    %496 = tpu.dynamic_rotate %465 by %c18_i32_337 dim 1 : vector<32x512xf32>, i32 -> vector<32x512xf32>
    %c5_338 = arith.constant 5 : index
    %c0_339 = arith.constant 0 : index
    %497 = vector.load %arg2[%c5_338, %c0_339] : memref<25x512xf32, #tpu.memory_space<vmem>>, vector<1x512xf32>
    %498 = vector.broadcast %497 : vector<1x512xf32> to vector<32x512xf32>
    %499 = arith.mulf %496, %498 : vector<32x512xf32>
    %500 = arith.truncf %499 : vector<32x512xf32> to vector<32x512xbf16>
    %c160_340 = arith.constant 160 : index
    %c0_341 = arith.constant 0 : index
    %501 = vector.load %arg12[%c160_340, %c0_341] : memref<800x512xbf16, #tpu.memory_space<vmem>>, vector<32x512xbf16>
    tpu.vector_store %arg12[%c160_340, %c0_341], %500 {strides = array<i32>} : memref<800x512xbf16, #tpu.memory_space<vmem>>, vector<32x512xbf16>,
    %c17_i32_342 = arith.constant 17 : i32
    %502 = tpu.dynamic_rotate %465 by %c17_i32_342 dim 1 : vector<32x512xf32>, i32 -> vector<32x512xf32>
    %c6_343 = arith.constant 6 : index
    %c0_344 = arith.constant 0 : index
    %503 = vector.load %arg2[%c6_343, %c0_344] : memref<25x512xf32, #tpu.memory_space<vmem>>, vector<1x512xf32>
    %504 = vector.broadcast %503 : vector<1x512xf32> to vector<32x512xf32>
    %505 = arith.mulf %502, %504 : vector<32x512xf32>
    %506 = arith.truncf %505 : vector<32x512xf32> to vector<32x512xbf16>
    %c192_345 = arith.constant 192 : index
    %c0_346 = arith.constant 0 : index
    %507 = vector.load %arg12[%c192_345, %c0_346] : memref<800x512xbf16, #tpu.memory_space<vmem>>, vector<32x512xbf16>
    tpu.vector_store %arg12[%c192_345, %c0_346], %506 {strides = array<i32>} : memref<800x512xbf16, #tpu.memory_space<vmem>>, vector<32x512xbf16>,
    %c16_i32_347 = arith.constant 16 : i32
    %508 = tpu.dynamic_rotate %465 by %c16_i32_347 dim 1 : vector<32x512xf32>, i32 -> vector<32x512xf32>
    %c7_348 = arith.constant 7 : index
    %c0_349 = arith.constant 0 : index
    %509 = vector.load %arg2[%c7_348, %c0_349] : memref<25x512xf32, #tpu.memory_space<vmem>>, vector<1x512xf32>
    %510 = vector.broadcast %509 : vector<1x512xf32> to vector<32x512xf32>
    %511 = arith.mulf %508, %510 : vector<32x512xf32>
    %512 = arith.truncf %511 : vector<32x512xf32> to vector<32x512xbf16>
    %c224_350 = arith.constant 224 : index
    %c0_351 = arith.constant 0 : index
    %513 = vector.load %arg12[%c224_350, %c0_351] : memref<800x512xbf16, #tpu.memory_space<vmem>>, vector<32x512xbf16>
    tpu.vector_store %arg12[%c224_350, %c0_351], %512 {strides = array<i32>} : memref<800x512xbf16, #tpu.memory_space<vmem>>, vector<32x512xbf16>,
    %c15_i32_352 = arith.constant 15 : i32
    %514 = tpu.dynamic_rotate %465 by %c15_i32_352 dim 1 : vector<32x512xf32>, i32 -> vector<32x512xf32>
    %c8_353 = arith.constant 8 : index
    %c0_354 = arith.constant 0 : index
    %515 = vector.load %arg2[%c8_353, %c0_354] : memref<25x512xf32, #tpu.memory_space<vmem>>, vector<1x512xf32>
    %516 = vector.broadcast %515 : vector<1x512xf32> to vector<32x512xf32>
    %517 = arith.mulf %514, %516 : vector<32x512xf32>
    %518 = arith.truncf %517 : vector<32x512xf32> to vector<32x512xbf16>
    %c256_355 = arith.constant 256 : index
    %c0_356 = arith.constant 0 : index
    %519 = vector.load %arg12[%c256_355, %c0_356] : memref<800x512xbf16, #tpu.memory_space<vmem>>, vector<32x512xbf16>
    tpu.vector_store %arg12[%c256_355, %c0_356], %518 {strides = array<i32>} : memref<800x512xbf16, #tpu.memory_space<vmem>>, vector<32x512xbf16>,
    %c14_i32_357 = arith.constant 14 : i32
    %520 = tpu.dynamic_rotate %465 by %c14_i32_357 dim 1 : vector<32x512xf32>, i32 -> vector<32x512xf32>
    %c9_358 = arith.constant 9 : index
    %c0_359 = arith.constant 0 : index
    %521 = vector.load %arg2[%c9_358, %c0_359] : memref<25x512xf32, #tpu.memory_space<vmem>>, vector<1x512xf32>
    %522 = vector.broadcast %521 : vector<1x512xf32> to vector<32x512xf32>
    %523 = arith.mulf %520, %522 : vector<32x512xf32>
    %524 = arith.truncf %523 : vector<32x512xf32> to vector<32x512xbf16>
    %c288_360 = arith.constant 288 : index
    %c0_361 = arith.constant 0 : index
    %525 = vector.load %arg12[%c288_360, %c0_361] : memref<800x512xbf16, #tpu.memory_space<vmem>>, vector<32x512xbf16>
    tpu.vector_store %arg12[%c288_360, %c0_361], %524 {strides = array<i32>} : memref<800x512xbf16, #tpu.memory_space<vmem>>, vector<32x512xbf16>,
    %c2_i32_362 = arith.constant 2 : i32
    %526 = tpu.dynamic_rotate %465 by %c2_i32_362 dim 1 : vector<32x512xf32>, i32 -> vector<32x512xf32>
    %c10_363 = arith.constant 10 : index
    %c0_364 = arith.constant 0 : index
    %527 = vector.load %arg2[%c10_363, %c0_364] : memref<25x512xf32, #tpu.memory_space<vmem>>, vector<1x512xf32>
    %528 = vector.broadcast %527 : vector<1x512xf32> to vector<32x512xf32>
    %529 = arith.mulf %526, %528 : vector<32x512xf32>
    %530 = arith.truncf %529 : vector<32x512xf32> to vector<32x512xbf16>
    %c320_365 = arith.constant 320 : index
    %c0_366 = arith.constant 0 : index
    %531 = vector.load %arg12[%c320_365, %c0_366] : memref<800x512xbf16, #tpu.memory_space<vmem>>, vector<32x512xbf16>
    tpu.vector_store %arg12[%c320_365, %c0_366], %530 {strides = array<i32>} : memref<800x512xbf16, #tpu.memory_space<vmem>>, vector<32x512xbf16>,
    %c1_i32_367 = arith.constant 1 : i32
    %532 = tpu.dynamic_rotate %465 by %c1_i32_367 dim 1 : vector<32x512xf32>, i32 -> vector<32x512xf32>
    %c11_368 = arith.constant 11 : index
    %c0_369 = arith.constant 0 : index
    %533 = vector.load %arg2[%c11_368, %c0_369] : memref<25x512xf32, #tpu.memory_space<vmem>>, vector<1x512xf32>
    %534 = vector.broadcast %533 : vector<1x512xf32> to vector<32x512xf32>
    %535 = arith.mulf %532, %534 : vector<32x512xf32>
    %536 = arith.truncf %535 : vector<32x512xf32> to vector<32x512xbf16>
    %c352_370 = arith.constant 352 : index
    %c0_371 = arith.constant 0 : index
    %537 = vector.load %arg12[%c352_370, %c0_371] : memref<800x512xbf16, #tpu.memory_space<vmem>>, vector<32x512xbf16>
    tpu.vector_store %arg12[%c352_370, %c0_371], %536 {strides = array<i32>} : memref<800x512xbf16, #tpu.memory_space<vmem>>, vector<32x512xbf16>,
    %538 = arith.truncf %465 : vector<32x512xf32> to vector<32x512xbf16>
    %c384_372 = arith.constant 384 : index
    %c0_373 = arith.constant 0 : index
    %539 = vector.load %arg12[%c384_372, %c0_373] : memref<800x512xbf16, #tpu.memory_space<vmem>>, vector<32x512xbf16>
    tpu.vector_store %arg12[%c384_372, %c0_373], %538 {strides = array<i32>} : memref<800x512xbf16, #tpu.memory_space<vmem>>, vector<32x512xbf16>,
    %c511_i32_374 = arith.constant 511 : i32
    %540 = tpu.dynamic_rotate %465 by %c511_i32_374 dim 1 : vector<32x512xf32>, i32 -> vector<32x512xf32>
    %c13_375 = arith.constant 13 : index
    %c0_376 = arith.constant 0 : index
    %541 = vector.load %arg2[%c13_375, %c0_376] : memref<25x512xf32, #tpu.memory_space<vmem>>, vector<1x512xf32>
    %542 = vector.broadcast %541 : vector<1x512xf32> to vector<32x512xf32>
    %543 = arith.mulf %540, %542 : vector<32x512xf32>
    %544 = arith.truncf %543 : vector<32x512xf32> to vector<32x512xbf16>
    %c416 = arith.constant 416 : index
    %c0_377 = arith.constant 0 : index
    %545 = vector.load %arg12[%c416, %c0_377] : memref<800x512xbf16, #tpu.memory_space<vmem>>, vector<32x512xbf16>
    tpu.vector_store %arg12[%c416, %c0_377], %544 {strides = array<i32>} : memref<800x512xbf16, #tpu.memory_space<vmem>>, vector<32x512xbf16>,
    %c510_i32_378 = arith.constant 510 : i32
    %546 = tpu.dynamic_rotate %465 by %c510_i32_378 dim 1 : vector<32x512xf32>, i32 -> vector<32x512xf32>
    %c14_379 = arith.constant 14 : index
    %c0_380 = arith.constant 0 : index
    %547 = vector.load %arg2[%c14_379, %c0_380] : memref<25x512xf32, #tpu.memory_space<vmem>>, vector<1x512xf32>
    %548 = vector.broadcast %547 : vector<1x512xf32> to vector<32x512xf32>
    %549 = arith.mulf %546, %548 : vector<32x512xf32>
    %550 = arith.truncf %549 : vector<32x512xf32> to vector<32x512xbf16>
    %c448 = arith.constant 448 : index
    %c0_381 = arith.constant 0 : index
    %551 = vector.load %arg12[%c448, %c0_381] : memref<800x512xbf16, #tpu.memory_space<vmem>>, vector<32x512xbf16>
    tpu.vector_store %arg12[%c448, %c0_381], %550 {strides = array<i32>} : memref<800x512xbf16, #tpu.memory_space<vmem>>, vector<32x512xbf16>,
    %c498_i32_382 = arith.constant 498 : i32
    %552 = tpu.dynamic_rotate %465 by %c498_i32_382 dim 1 : vector<32x512xf32>, i32 -> vector<32x512xf32>
    %c15_383 = arith.constant 15 : index
    %c0_384 = arith.constant 0 : index
    %553 = vector.load %arg2[%c15_383, %c0_384] : memref<25x512xf32, #tpu.memory_space<vmem>>, vector<1x512xf32>
    %554 = vector.broadcast %553 : vector<1x512xf32> to vector<32x512xf32>
    %555 = arith.mulf %552, %554 : vector<32x512xf32>
    %556 = arith.truncf %555 : vector<32x512xf32> to vector<32x512xbf16>
    %c480 = arith.constant 480 : index
    %c0_385 = arith.constant 0 : index
    %557 = vector.load %arg12[%c480, %c0_385] : memref<800x512xbf16, #tpu.memory_space<vmem>>, vector<32x512xbf16>
    tpu.vector_store %arg12[%c480, %c0_385], %556 {strides = array<i32>} : memref<800x512xbf16, #tpu.memory_space<vmem>>, vector<32x512xbf16>,
    %c497_i32_386 = arith.constant 497 : i32
    %558 = tpu.dynamic_rotate %465 by %c497_i32_386 dim 1 : vector<32x512xf32>, i32 -> vector<32x512xf32>
    %c16_387 = arith.constant 16 : index
    %c0_388 = arith.constant 0 : index
    %559 = vector.load %arg2[%c16_387, %c0_388] : memref<25x512xf32, #tpu.memory_space<vmem>>, vector<1x512xf32>
    %560 = vector.broadcast %559 : vector<1x512xf32> to vector<32x512xf32>
    %561 = arith.mulf %558, %560 : vector<32x512xf32>
    %562 = arith.truncf %561 : vector<32x512xf32> to vector<32x512xbf16>
    %c512 = arith.constant 512 : index
    %c0_389 = arith.constant 0 : index
    %563 = vector.load %arg12[%c512, %c0_389] : memref<800x512xbf16, #tpu.memory_space<vmem>>, vector<32x512xbf16>
    tpu.vector_store %arg12[%c512, %c0_389], %562 {strides = array<i32>} : memref<800x512xbf16, #tpu.memory_space<vmem>>, vector<32x512xbf16>,
    %c496_i32_390 = arith.constant 496 : i32
    %564 = tpu.dynamic_rotate %465 by %c496_i32_390 dim 1 : vector<32x512xf32>, i32 -> vector<32x512xf32>
    %c17_391 = arith.constant 17 : index
    %c0_392 = arith.constant 0 : index
    %565 = vector.load %arg2[%c17_391, %c0_392] : memref<25x512xf32, #tpu.memory_space<vmem>>, vector<1x512xf32>
    %566 = vector.broadcast %565 : vector<1x512xf32> to vector<32x512xf32>
    %567 = arith.mulf %564, %566 : vector<32x512xf32>
    %568 = arith.truncf %567 : vector<32x512xf32> to vector<32x512xbf16>
    %c544 = arith.constant 544 : index
    %c0_393 = arith.constant 0 : index
    %569 = vector.load %arg12[%c544, %c0_393] : memref<800x512xbf16, #tpu.memory_space<vmem>>, vector<32x512xbf16>
    tpu.vector_store %arg12[%c544, %c0_393], %568 {strides = array<i32>} : memref<800x512xbf16, #tpu.memory_space<vmem>>, vector<32x512xbf16>,
    %c495_i32_394 = arith.constant 495 : i32
    %570 = tpu.dynamic_rotate %465 by %c495_i32_394 dim 1 : vector<32x512xf32>, i32 -> vector<32x512xf32>
    %c18_395 = arith.constant 18 : index
    %c0_396 = arith.constant 0 : index
    %571 = vector.load %arg2[%c18_395, %c0_396] : memref<25x512xf32, #tpu.memory_space<vmem>>, vector<1x512xf32>
    %572 = vector.broadcast %571 : vector<1x512xf32> to vector<32x512xf32>
    %573 = arith.mulf %570, %572 : vector<32x512xf32>
    %574 = arith.truncf %573 : vector<32x512xf32> to vector<32x512xbf16>
    %c576 = arith.constant 576 : index
    %c0_397 = arith.constant 0 : index
    %575 = vector.load %arg12[%c576, %c0_397] : memref<800x512xbf16, #tpu.memory_space<vmem>>, vector<32x512xbf16>
    tpu.vector_store %arg12[%c576, %c0_397], %574 {strides = array<i32>} : memref<800x512xbf16, #tpu.memory_space<vmem>>, vector<32x512xbf16>,
    %c494_i32_398 = arith.constant 494 : i32
    %576 = tpu.dynamic_rotate %465 by %c494_i32_398 dim 1 : vector<32x512xf32>, i32 -> vector<32x512xf32>
    %c19_399 = arith.constant 19 : index
    %c0_400 = arith.constant 0 : index
    %577 = vector.load %arg2[%c19_399, %c0_400] : memref<25x512xf32, #tpu.memory_space<vmem>>, vector<1x512xf32>
    %578 = vector.broadcast %577 : vector<1x512xf32> to vector<32x512xf32>
    %579 = arith.mulf %576, %578 : vector<32x512xf32>
    %580 = arith.truncf %579 : vector<32x512xf32> to vector<32x512xbf16>
    %c608 = arith.constant 608 : index
    %c0_401 = arith.constant 0 : index
    %581 = vector.load %arg12[%c608, %c0_401] : memref<800x512xbf16, #tpu.memory_space<vmem>>, vector<32x512xbf16>
    tpu.vector_store %arg12[%c608, %c0_401], %580 {strides = array<i32>} : memref<800x512xbf16, #tpu.memory_space<vmem>>, vector<32x512xbf16>,
    %c482_i32_402 = arith.constant 482 : i32
    %582 = tpu.dynamic_rotate %465 by %c482_i32_402 dim 1 : vector<32x512xf32>, i32 -> vector<32x512xf32>
    %c20_403 = arith.constant 20 : index
    %c0_404 = arith.constant 0 : index
    %583 = vector.load %arg2[%c20_403, %c0_404] : memref<25x512xf32, #tpu.memory_space<vmem>>, vector<1x512xf32>
    %584 = vector.broadcast %583 : vector<1x512xf32> to vector<32x512xf32>
    %585 = arith.mulf %582, %584 : vector<32x512xf32>
    %586 = arith.truncf %585 : vector<32x512xf32> to vector<32x512xbf16>
    %c640 = arith.constant 640 : index
    %c0_405 = arith.constant 0 : index
    %587 = vector.load %arg12[%c640, %c0_405] : memref<800x512xbf16, #tpu.memory_space<vmem>>, vector<32x512xbf16>
    tpu.vector_store %arg12[%c640, %c0_405], %586 {strides = array<i32>} : memref<800x512xbf16, #tpu.memory_space<vmem>>, vector<32x512xbf16>,
    %c481_i32_406 = arith.constant 481 : i32
    %588 = tpu.dynamic_rotate %465 by %c481_i32_406 dim 1 : vector<32x512xf32>, i32 -> vector<32x512xf32>
    %c21_407 = arith.constant 21 : index
    %c0_408 = arith.constant 0 : index
    %589 = vector.load %arg2[%c21_407, %c0_408] : memref<25x512xf32, #tpu.memory_space<vmem>>, vector<1x512xf32>
    %590 = vector.broadcast %589 : vector<1x512xf32> to vector<32x512xf32>
    %591 = arith.mulf %588, %590 : vector<32x512xf32>
    %592 = arith.truncf %591 : vector<32x512xf32> to vector<32x512xbf16>
    %c672 = arith.constant 672 : index
    %c0_409 = arith.constant 0 : index
    %593 = vector.load %arg12[%c672, %c0_409] : memref<800x512xbf16, #tpu.memory_space<vmem>>, vector<32x512xbf16>
    tpu.vector_store %arg12[%c672, %c0_409], %592 {strides = array<i32>} : memref<800x512xbf16, #tpu.memory_space<vmem>>, vector<32x512xbf16>,
    %c480_i32_410 = arith.constant 480 : i32
    %594 = tpu.dynamic_rotate %465 by %c480_i32_410 dim 1 : vector<32x512xf32>, i32 -> vector<32x512xf32>
    %c22_411 = arith.constant 22 : index
    %c0_412 = arith.constant 0 : index
    %595 = vector.load %arg2[%c22_411, %c0_412] : memref<25x512xf32, #tpu.memory_space<vmem>>, vector<1x512xf32>
    %596 = vector.broadcast %595 : vector<1x512xf32> to vector<32x512xf32>
    %597 = arith.mulf %594, %596 : vector<32x512xf32>
    %598 = arith.truncf %597 : vector<32x512xf32> to vector<32x512xbf16>
    %c704 = arith.constant 704 : index
    %c0_413 = arith.constant 0 : index
    %599 = vector.load %arg12[%c704, %c0_413] : memref<800x512xbf16, #tpu.memory_space<vmem>>, vector<32x512xbf16>
    tpu.vector_store %arg12[%c704, %c0_413], %598 {strides = array<i32>} : memref<800x512xbf16, #tpu.memory_space<vmem>>, vector<32x512xbf16>,
    %c479_i32_414 = arith.constant 479 : i32
    %600 = tpu.dynamic_rotate %465 by %c479_i32_414 dim 1 : vector<32x512xf32>, i32 -> vector<32x512xf32>
    %c23_415 = arith.constant 23 : index
    %c0_416 = arith.constant 0 : index
    %601 = vector.load %arg2[%c23_415, %c0_416] : memref<25x512xf32, #tpu.memory_space<vmem>>, vector<1x512xf32>
    %602 = vector.broadcast %601 : vector<1x512xf32> to vector<32x512xf32>
    %603 = arith.mulf %600, %602 : vector<32x512xf32>
    %604 = arith.truncf %603 : vector<32x512xf32> to vector<32x512xbf16>
    %c736 = arith.constant 736 : index
    %c0_417 = arith.constant 0 : index
    %605 = vector.load %arg12[%c736, %c0_417] : memref<800x512xbf16, #tpu.memory_space<vmem>>, vector<32x512xbf16>
    tpu.vector_store %arg12[%c736, %c0_417], %604 {strides = array<i32>} : memref<800x512xbf16, #tpu.memory_space<vmem>>, vector<32x512xbf16>,
    %c478_i32_418 = arith.constant 478 : i32
    %606 = tpu.dynamic_rotate %465 by %c478_i32_418 dim 1 : vector<32x512xf32>, i32 -> vector<32x512xf32>
    %c24_419 = arith.constant 24 : index
    %c0_420 = arith.constant 0 : index
    %607 = vector.load %arg2[%c24_419, %c0_420] : memref<25x512xf32, #tpu.memory_space<vmem>>, vector<1x512xf32>
    %608 = vector.broadcast %607 : vector<1x512xf32> to vector<32x512xf32>
    %609 = arith.mulf %606, %608 : vector<32x512xf32>
    %610 = arith.truncf %609 : vector<32x512xf32> to vector<32x512xbf16>
    %c768 = arith.constant 768 : index
    %c0_421 = arith.constant 0 : index
    %611 = vector.load %arg12[%c768, %c0_421] : memref<800x512xbf16, #tpu.memory_space<vmem>>, vector<32x512xbf16>
    tpu.vector_store %arg12[%c768, %c0_421], %610 {strides = array<i32>} : memref<800x512xbf16, #tpu.memory_space<vmem>>, vector<32x512xbf16>,
    %c0_422 = arith.constant 0 : index
    %c0_423 = arith.constant 0 : index
    %612 = vector.load %arg9[%c0_422, %c0_423] : memref<4x800xbf16, #tpu.memory_space<vmem>>, vector<4x800xbf16>
    %c0_424 = arith.constant 0 : index
    %c0_425 = arith.constant 0 : index
    %613 = vector.load %arg12[%c0_424, %c0_425] : memref<800x512xbf16, #tpu.memory_space<vmem>>, vector<800x512xbf16>
    %cst_426 = arith.constant dense<0.000000e+00> : vector<4x512xf32>
    %614 = tpu.matmul %612, %613, %cst_426 {dimension_numbers = #tpu.dot_dimension_numbers<[1], [0], [0], [1], [0, 0, 1, 1], [], []>} : vector<4x800xbf16>, vector<800x512xbf16>, vector<4x512xf32> -> vector<4x512xf32>
    %c0_427 = arith.constant 0 : index
    %c0_428 = arith.constant 0 : index
    %615 = vector.load %arg10[%c0_427, %c0_428] : memref<4x1xf32, #tpu.memory_space<vmem>>, vector<4x1xf32>
    %616 = vector.broadcast %615 : vector<4x1xf32> to vector<4x512xf32>
    %617 = arith.addf %614, %616 : vector<4x512xf32>
    %c0_429 = arith.constant 0 : index
    %c0_430 = arith.constant 0 : index
    %c0_431 = arith.constant 0 : index
    %618 = vector.load %arg11[%c0_429, %c0_430, %c0_431] : memref<1x4x512xf32, #tpu.memory_space<vmem>>, vector<1x4x512xf32>
    %619 = vector.shape_cast %618 : vector<1x4x512xf32> to vector<4x512xf32>
    %620 = vector.shape_cast %617 : vector<4x512xf32> to vector<1x4x512xf32>
    tpu.vector_store %arg11[%c0_429, %c0_430, %c0_431], %620 {strides = array<i32>} : memref<1x4x512xf32, #tpu.memory_space<vmem>>, vector<1x4x512xf32>,
    return
  }
  func.func @transform_0(%arg0: i32) -> (i32, i32, i32) {
    %c0_i32 = arith.constant 0 : i32
    %c0_i32_0 = arith.constant 0 : i32
    %c0_i32_1 = arith.constant 0 : i32
    return %arg0, %c0_i32, %c0_i32_0 : i32, i32, i32
  }
  func.func @transform_1(%arg0: i32) -> (i32, i32) {
    %c0_i32 = arith.constant 0 : i32
    %c0_i32_0 = arith.constant 0 : i32
    %c0_i32_1 = arith.constant 0 : i32
    return %c0_i32, %c0_i32_0 : i32, i32
  }
  func.func @transform_2(%arg0: i32) -> (i32, i32) {
    %c0_i32 = arith.constant 0 : i32
    %c0_i32_0 = arith.constant 0 : i32
    %c0_i32_1 = arith.constant 0 : i32
    return %c0_i32, %c0_i32_0 : i32, i32
  }
  func.func @transform_3(%arg0: i32) -> (i32, i32) {
    %c0_i32 = arith.constant 0 : i32
    %c0_i32_0 = arith.constant 0 : i32
    %c0_i32_1 = arith.constant 0 : i32
    return %c0_i32, %c0_i32_0 : i32, i32
  }
  func.func @transform_4(%arg0: i32) -> (i32, i32) {
    %c0_i32 = arith.constant 0 : i32
    %c0_i32_0 = arith.constant 0 : i32
    %c0_i32_1 = arith.constant 0 : i32
    return %c0_i32, %c0_i32_0 : i32, i32
  }
  func.func @transform_5(%arg0: i32) -> (i32, i32) {
    %c0_i32 = arith.constant 0 : i32
    %c0_i32_0 = arith.constant 0 : i32
    %c0_i32_1 = arith.constant 0 : i32
    return %c0_i32, %c0_i32_0 : i32, i32
  }
  func.func @transform_6(%arg0: i32) -> (i32, i32) {
    %c0_i32 = arith.constant 0 : i32
    %c0_i32_0 = arith.constant 0 : i32
    %c0_i32_1 = arith.constant 0 : i32
    return %c0_i32, %c0_i32_0 : i32, i32
  }
  func.func @transform_7(%arg0: i32) -> (i32, i32) {
    %c0_i32 = arith.constant 0 : i32
    %c0_i32_0 = arith.constant 0 : i32
    %c0_i32_1 = arith.constant 0 : i32
    return %c0_i32, %c0_i32_0 : i32, i32
  }
  func.func @transform_8(%arg0: i32) -> (i32, i32) {
    %c0_i32 = arith.constant 0 : i32
    %c0_i32_0 = arith.constant 0 : i32
    %c0_i32_1 = arith.constant 0 : i32
    return %c0_i32, %c0_i32_0 : i32, i32
  }
  func.func @transform_9(%arg0: i32) -> (i32, i32) {
    %c0_i32 = arith.constant 0 : i32
    %c0_i32_0 = arith.constant 0 : i32
    %c0_i32_1 = arith.constant 0 : i32
    return %c0_i32, %c0_i32_0 : i32, i32
  }
  func.func @transform_10(%arg0: i32) -> (i32, i32, i32) {
    %c0_i32 = arith.constant 0 : i32
    %c0_i32_0 = arith.constant 0 : i32
    %c0_i32_1 = arith.constant 0 : i32
    return %arg0, %c0_i32, %c0_i32_0 : i32, i32, i32
  }
}

</mosaic_0001>

<bundles_post_ra>
// kernel: net_forward.1
= control target key start
LH: loop header
LB: loop body
LE: loop exit
PB: predicated region body
PF: predicated region fallthrough
CT: control target
= control target key end

     0   :  { %s8650_s13 = smov 0   ;;  %s14127_s0 = inlined_call_operand.vmem [shape: f32[2,1,512], index: 0, kind: input, shape index: {}]   ;;  %s14128_s1 = inlined_call_operand.vmem [shape: f32[25,512], index: 1, kind: input, shape index: {}]   ;;  %s14129_s2 = inlined_call_operand.vmem [shape: bf16[8,200], index: 2, kind: input, shape index: {}]   ;;  %s14130_s3 = inlined_call_operand.vmem [shape: f32[8,1], index: 3, kind: input, shape index: {}]   ;;  %s14131_s4 = inlined_call_operand.vmem [shape: bf16[16,200], index: 4, kind: input, shape index: {}]   ;;  %s14132_s5 = inlined_call_operand.vmem [shape: f32[16,1], index: 5, kind: input, shape index: {}]   ;;  %s14133_s6 = inlined_call_operand.vmem [shape: bf16[32,400], index: 6, kind: input, shape index: {}]   ;;  %s14134_s7 = inlined_call_operand.vmem [shape: f32[32,1], index: 7, kind: input, shape index: {}]   ;;  %s14135_s8 = inlined_call_operand.vmem [shape: bf16[4,800], index: 8, kind: input, shape index: {}]   ;;  %s14136_s9 = inlined_call_operand.vmem [shape: f32[4,1], index: 9, kind: input, shape index: {}]   ;;  %s14137_s10 = inlined_call_operand.vmem [shape: f32[2,4,512], index: 10, kind: output, shape index: {}]  }
   0x1   :  { %14459 = sst [smem:[#allocation102_spill]] %s14127_s0 }
   0x2   :  { %14460 = sst [smem:[#allocation103_spill]] %s14129_s2 }
   0x3   :  { %14461 = sst [smem:[#allocation104_spill]] %s14130_s3 }
   0x4   :  { %14462 = sst [smem:[#allocation105_spill]] %s14131_s4 }
   0x5   :  { %14463 = sst [smem:[#allocation106_spill]] %s14132_s5 }
   0x6   :  { %14464 = sst [smem:[#allocation107_spill]] %s14134_s7 }
   0x7   :  { %14465 = sst [smem:[#allocation108_spill]] %s14136_s9 }
   0x8   :  { %14466 = sst [smem:[#allocation109_spill]] %s14137_s10 }
   0x9 LB: > { %14467 = sst [smem:[#allocation3_spill]] %s8567_s13  ;;  %s8309_s14 = sadd.s32 4294967295, %s8567_s13   ;;  %s8567_s13 = sphi %s8650_s13, %s20_s13  }
   0xa   : > { %p8313_p0 = scmp.ge.s32.totalorder %s8567_s13, 1  ;;  %p311_p1 = scmp.lt.s32.totalorder %s8567_s13, 3 }
   0xc   : > { %p312_p2 = pnand %p8313_p0, %p311_p1 }
   0xe   : > { %315 = sbr.rel (%p312_p2) target bundleno = 2931 (0xb73), region = 60 }
  0x15   : > { %p348_p3 = scmp.lt.s32.totalorder %s8309_s14, 1  ;;  %v360_v0 = vlaneseq  ;;  %s14474_s0 = sld [smem:[#allocation102_spill]]  ;;  %vm380_vm0 = vcmask 1040384   ;;  %v8317_v20 = vld [vmem:[%s14128_s1 + $0x1] ss:$8 sm:$0xf] }
  0x16   : > { %s14194_s19 = smov 33   ;;  %s14196_s20 = smov 34   ;;  %v400_v29 = vld [vmem:[%s14128_s1] ss:$8 sm:$0xf]  ;;  %vm1755_vm11 = vcmask 588800  }
  0x17   : > { %s15217_s14 = smov (!%p348_p3, %s8309_s14), 1  ;;  %v8661_v1 = vshrl.u32 %v360_v0, 7  ;;  %s14190_s21 = smov 31   ;;  %v8816_v19 = vand.u32 127, %v360_v0 }
  0x18   : > { %14468 = sst [smem:[#allocation4_spill]] %s15217_s14  ;;  %s8314_s15 = sshll.u32 %s15217_s14, 2  ;;  %v8319_v54 = vld [vmem:[%s14128_s1 + $0x3] ss:$8 sm:$0xf] }
  0x19   : > { %14469 = vst [vmem:[#allocation5_spill] sm:$0xff] %v8661_v1  ;;  %v8665_v2 = vsub.s32 2, %v8661_v1  ;;  %v8668_v3 = vsub.s32 0, %v8661_v1  ;;  %v8671_v4 = vsub.s32 3, %v8661_v1  ;;  %v8674_v5 = vsub.s32 1, %v8661_v1  ;;  %s14192_s22 = smov 32  }
  0x1a   : > { %s14184_s23 = smov 18   ;;  %s14188_s24 = smov 30   ;;  %vm442_vm1 = vcmp.lt.s32.totalorder %v8816_v19, 33  ;;  %vm395_vm2 = vcmp.lt.s32.totalorder %v8816_v19, 34  ;;  %vm550_vm3 = vcmp.lt.s32.totalorder %v8816_v19, 31  ;;  %vm502_vm4 = vcmp.lt.s32.totalorder %v8816_v19, 32 }
  0x1b   : > { %14470 = vst [vmem:[#allocation6_spill] sm:$0xff] %v8665_v2  ;;  %14471 = vst [vmem:[#allocation7_spill] sm:$0xff] %v8668_v3  ;;  %s351_s18 = scalar_lea.vmem %s14474_s0, %s8314_s15  ;;  %s14180_s25 = smov 16   ;;  %v453_v23 = vrot.slane %v8317_v20, %v8668_v3  ;;  %v465_v24 = vrot.slane %v8317_v20, %v8671_v4  ;;  %v457_v25 = vrot.slane %v8317_v20, %v8674_v5  ;;  %vm658_vm5 = vcmp.lt.s32.totalorder %v8816_v19, 18 }
  0x1c   : > { %14472 = vst [vmem:[#allocation8_spill] sm:$0xff] %v8671_v4  ;;  %14473 = vst [vmem:[#allocation9_spill] sm:$0xff] %v8674_v5  ;;  %v358_v6 = vld [vmem:[%s351_s18] sm:$0xf]  ;;  %s14182_s26 = smov 17   ;;  %s14176_s27 = smov 14   ;;  %v461_v26 = vrot.slane %v8317_v20, %v8665_v2  ;;  %v409_v38 = vrot.slane %v400_v29, %v8674_v5  ;;  %v405_v46 = vrot.slane %v400_v29, %v8668_v3 }
  0x1d   : > { %v371_v7 = vrot.slane %v358_v6, %v8665_v2  ;;  %v363_v8 = vrot.slane %v358_v6, %v8668_v3  ;;  %v375_v9 = vrot.slane %v358_v6, %v8671_v4  ;;  %v367_v10 = vrot.slane %v358_v6, %v8674_v5  ;;  %s14178_s28 = smov 15   ;;  %s14172_s29 = smov 1  }
  0x1e   : > { %s14174_s30 = smov 2   ;;  %s14170_s11 = smov 127   ;;  %v413_v47 = vrot.slane %v400_v29, %v8665_v2  ;;  %v417_v48 = vrot.slane %v400_v29, %v8671_v4  ;;  %v565_v0 = vrot.slane %v8319_v54, %v8674_v5  ;;  %v573_v20 = vrot.slane %v8319_v54, %v8671_v4 }
  0x1f   : > { %v8683_v11 = vsel %vm380_vm0, %v371_v7, 0.0  ;;  %v8685_v12 = vsel %vm380_vm0, %v363_v8, 0.0  ;;  %v8691_v13 = vsel %vm380_vm0, %v375_v9, 0.0  ;;  %v8693_v14 = vsel %vm380_vm0, %v367_v10, 0.0  ;;  %s14154_s12 = smov 114   ;;  %s14156_s15 = smov 126  }
  0x20   : > { %438 = vrot.lane.b32.xlu1 %v8683_v11, %s14194_s19  ;;  %434 = vrot.lane.b32.xlu0 %v8685_v12, %s14194_s19  ;;  %v1034_v15 = vpack.c.bf16 %v8685_v12, %v8685_v12  ;;  %v1035_v16 = vpack.c.bf16 %v8693_v14, %v8693_v14  ;;  %v1037_v17 = vpack.c.bf16 %v8691_v13, %v8691_v13  ;;  %s14138_s17 = smov 112   ;;  %s14140_s18 = smov 113   ;;  %vm610_vm6 = vcmp.lt.s32.totalorder %v8816_v19, 30 }
  0x21   : > { %v1036_v18 = vpack.c.bf16 %v8683_v11, %v8683_v11  ;;  %vm766_vm7 = vcmp.lt.s32.totalorder %v8816_v19, 16  ;;  %vm718_vm8 = vcmp.lt.s32.totalorder %v8816_v19, 17  ;;  %vm874_vm9 = vcmp.lt.s32.totalorder %v8816_v19, 14  ;;  %s14475_s2 = sld [smem:[#allocation103_spill]]  ;;  %s14476_s3 = sld [smem:[#allocation104_spill]] }
  0x22   : > { %1038 = vst [vmem:[#allocation2 + $0xc0] sm:$0xf] %v1034_v15  ;;  %1039 = vst [vmem:[#allocation2 + $0xc8] sm:$0xf] %v1035_v16  ;;  %vm826_vm10 = vcmp.lt.s32.totalorder %v8816_v19, 15  ;;  %vm14187_vm12 = vcmp.lt.s32.totalorder %v8816_v19, 1 }
  0x23   : > { %1041 = vst [vmem:[#allocation2 + $0xd8] sm:$0xf] %v1037_v17  ;;  %1040 = vst [vmem:[#allocation2 + $0xd0] sm:$0xf] %v1036_v18  ;;  %v561_v17 = vrot.slane %v8319_v54, %v8668_v3  ;;  %v569_v18 = vrot.slane %v8319_v54, %v8665_v2  ;;  %s14477_s5 = sld [smem:[#allocation106_spill]]  ;;  %s14478_s7 = sld [smem:[#allocation107_spill]] }
  0x24   : > { %440 = vrot.lane.b32.xlu1 %v8691_v13, %s14194_s19  ;;  %436 = vrot.lane.b32.xlu0 %v8693_v14, %s14194_s19  ;;  %vm14271_vm13 = vcmp.lt.s32.totalorder %v8816_v19, 2  ;;  %vm14186_vm14 = vcmp.lt.s32.totalorder %v8816_v19, 127  ;;  %vm14160_vm15 = vcmp.lt.s32.totalorder %v8816_v19, 114  ;;  %vm14161_vm0 = vcmp.lt.s32.totalorder %v8816_v19, 126  ;;  %s14494_s4 = sld [smem:[#allocation105_spill]]  ;;  %s14530_s16 = smov 17  }
  0x25   : > { %s14536_s0 = smov 127   ;;  %s15213_s13 = sld [smem:[#allocation4_spill]] }
  0x28   : > { %387 = vrot.lane.b32.xlu1 %v8693_v14, %s14196_s20  ;;  %385 = vrot.lane.b32.xlu0 %v8685_v12, %s14196_s20 }
  0x2c   : > { %391 = vrot.lane.b32.xlu1 %v8691_v13, %s14196_s20  ;;  %389 = vrot.lane.b32.xlu0 %v8683_v11, %s14196_s20 }
  0x30   : > { %544 = vrot.lane.b32.xlu1 %v8693_v14, %s14190_s21  ;;  %542 = vrot.lane.b32.xlu0 %v8685_v12, %s14190_s21 }
  0x34   : > { %548 = vrot.lane.b32.xlu1 %v8691_v13, %s14190_s21  ;;  %546 = vrot.lane.b32.xlu0 %v8683_v11, %s14190_s21 }
  0x38   : > { %496 = vrot.lane.b32.xlu1 %v8693_v14, %s14192_s22  ;;  %494 = vrot.lane.b32.xlu0 %v8685_v12, %s14192_s22 }
  0x3c   : > { %500 = vrot.lane.b32.xlu1 %v8691_v13, %s14192_s22  ;;  %498 = vrot.lane.b32.xlu0 %v8683_v11, %s14192_s22 }
  0x40   : > { %652 = vrot.lane.b32.xlu1 %v8693_v14, %s14184_s23  ;;  %650 = vrot.lane.b32.xlu0 %v8685_v12, %s14184_s23 }
  0x44   : > { %656 = vrot.lane.b32.xlu1 %v8691_v13, %s14184_s23  ;;  %654 = vrot.lane.b32.xlu0 %v8683_v11, %s14184_s23 }
  0x48   : > { %604 = vrot.lane.b32.xlu1 %v8693_v14, %s14188_s24  ;;  %602 = vrot.lane.b32.xlu0 %v8685_v12, %s14188_s24 }
  0x4c   : > { %608 = vrot.lane.b32.xlu1 %v8691_v13, %s14188_s24  ;;  %606 = vrot.lane.b32.xlu0 %v8683_v11, %s14188_s24 }
  0x50   : > { %760 = vrot.lane.b32.xlu1 %v8693_v14, %s14180_s25  ;;  %758 = vrot.lane.b32.xlu0 %v8685_v12, %s14180_s25 }
  0x54   : > { %764 = vrot.lane.b32.xlu1 %v8691_v13, %s14180_s25  ;;  %762 = vrot.lane.b32.xlu0 %v8683_v11, %s14180_s25 }
  0x58   : > { %712 = vrot.lane.b32.xlu1 %v8693_v14, %s14182_s26  ;;  %710 = vrot.lane.b32.xlu0 %v8685_v12, %s14182_s26 }
  0x5c   : > { %716 = vrot.lane.b32.xlu1 %v8691_v13, %s14182_s26  ;;  %714 = vrot.lane.b32.xlu0 %v8683_v11, %s14182_s26 }
  0x60   : > { %868 = vrot.lane.b32.xlu1 %v8693_v14, %s14176_s27  ;;  %866 = vrot.lane.b32.xlu0 %v8685_v12, %s14176_s27 }
  0x64   : > { %872 = vrot.lane.b32.xlu1 %v8691_v13, %s14176_s27  ;;  %870 = vrot.lane.b32.xlu0 %v8683_v11, %s14176_s27 }
  0x68   : > { %820 = vrot.lane.b32.xlu1 %v8693_v14, %s14178_s28  ;;  %818 = vrot.lane.b32.xlu0 %v8685_v12, %s14178_s28 }
  0x6c   : > { %824 = vrot.lane.b32.xlu1 %v8691_v13, %s14178_s28  ;;  %822 = vrot.lane.b32.xlu0 %v8683_v11, %s14178_s28 }
  0x70   : > { %976 = vrot.lane.b32.xlu1 %v8693_v14, %s14172_s29  ;;  %974 = vrot.lane.b32.xlu0 %v8685_v12, %s14172_s29 }
  0x74   : > { %980 = vrot.lane.b32.xlu1 %v8691_v13, %s14172_s29  ;;  %978 = vrot.lane.b32.xlu0 %v8683_v11, %s14172_s29 }
  0x78   : > { %928 = vrot.lane.b32.xlu1 %v8693_v14, %s14174_s30  ;;  %926 = vrot.lane.b32.xlu0 %v8685_v12, %s14174_s30 }
  0x7c   : > { %932 = vrot.lane.b32.xlu1 %v8691_v13, %s14174_s30  ;;  %930 = vrot.lane.b32.xlu0 %v8683_v11, %s14174_s30 }
  0x80   : > { %1044 = vrot.lane.b32.xlu1 %v8693_v14, %s14170_s11  ;;  %1042 = vrot.lane.b32.xlu0 %v8685_v12, %s14170_s11 }
  0x84   : > { %1048 = vrot.lane.b32.xlu1 %v8691_v13, %s14170_s11  ;;  %1046 = vrot.lane.b32.xlu0 %v8683_v11, %s14170_s11 }
  0x88   : > { %1152 = vrot.lane.b32.xlu1 %v8693_v14, %s14154_s12  ;;  %1150 = vrot.lane.b32.xlu0 %v8685_v12, %s14154_s12 }
  0x8c   : > { %1156 = vrot.lane.b32.xlu1 %v8691_v13, %s14154_s12  ;;  %1154 = vrot.lane.b32.xlu0 %v8683_v11, %s14154_s12  ;;  %s14479_s12 = smov 126  }
  0x90   : > { %1104 = vrot.lane.b32.xlu1 %v8693_v14, %s14156_s15  ;;  %1102 = vrot.lane.b32.xlu0 %v8685_v12, %s14156_s15 }
  0x92   : > { %v439_v21 = vpop.permute.xlu1 %438  ;;  %v435_v22 = vpop.permute.xlu0 %434 }
  0x94   : > { %1108 = vrot.lane.b32.xlu1 %v8691_v13, %s14156_s15  ;;  %1106 = vrot.lane.b32.xlu0 %v8683_v11, %s14156_s15  ;;  %s14482_s15 = smov 114  }
  0x96   : > { %v441_v27 = vpop.permute.xlu1 %440  ;;  %v437_v28 = vpop.permute.xlu0 %436 }
  0x97   : > { %v443_v30 = vsel %vm442_vm1, %v439_v21, %v441_v27  ;;  %v446_v31 = vsel %vm442_vm1, %v441_v27, %v435_v22  ;;  %v444_v32 = vsel %vm442_vm1, %v437_v28, %v439_v21  ;;  %v445_v33 = vsel %vm442_vm1, %v435_v22, %v437_v28  ;;  %v8318_v21 = vld [vmem:[%s14128_s1 + $0x2] ss:$8 sm:$0xf] }
  0x98   : > { %v470_v34 = vmul.f32 %v453_v23, %v446_v31  ;;  %v473_v35 = vmul.f32 %v465_v24, %v443_v30  ;;  %v471_v36 = vmul.f32 %v457_v25, %v445_v33  ;;  %v472_v37 = vmul.f32 %v461_v26, %v444_v32  ;;  %1260 = vrot.lane.b32.xlu1 %v8693_v14, %s14138_s17 }
  0x99   : > { %1258 = vrot.lane.b32.xlu0 %v8685_v12, %s14138_s17  ;;  %v517_v28 = vrot.slane %v8318_v21, %v8674_v5 }
  0x9a   : > { %v474_v39 = vpack.c.bf16 %v470_v34, %v470_v34  ;;  %v477_v40 = vpack.c.bf16 %v473_v35, %v473_v35  ;;  %v475_v41 = vpack.c.bf16 %v471_v36, %v471_v36  ;;  %v476_v42 = vpack.c.bf16 %v472_v37, %v472_v37  ;;  %v388_v43 = vpop.permute.xlu1 %387  ;;  %v386_v44 = vpop.permute.xlu0 %385 }
  0x9b   : > { %v398_v45 = vsel %vm395_vm2, %v386_v44, %v388_v43 }
  0x9c   : > { %v482_v49 = vrot.slane %v474_v39, 4  ;;  %v485_v50 = vrot.slane %v477_v40, 4  ;;  %v483_v51 = vrot.slane %v475_v41, 4  ;;  %v484_v52 = vrot.slane %v476_v42, 4  ;;  %1264 = vrot.lane.b32.xlu1 %v8691_v13, %s14138_s17 }
  0x9d   : > { %v423_v53 = vmul.f32 %v409_v38, %v398_v45  ;;  %1262 = vrot.lane.b32.xlu0 %v8683_v11, %s14138_s17  ;;  %s14142_s17 = smov 110   ;;  %v525_v45 = vrot.slane %v8318_v21, %v8671_v4 }
  0x9e   : > { %490 = vst [vmem:[#allocation2] sm:$0xf0] %v482_v49  ;;  %493 = vst [vmem:[#allocation2 + $0x18] sm:$0xf0] %v485_v50  ;;  %v392_v55 = vpop.permute.xlu1 %391  ;;  %v390_v56 = vpop.permute.xlu0 %389 }
  0x9f   : > { %491 = vst [vmem:[#allocation2 + $0x8] sm:$0xf0] %v483_v51  ;;  %492 = vst [vmem:[#allocation2 + $0x10] sm:$0xf0] %v484_v52  ;;  %v427_v57 = vpack.c.bf16 %v423_v53, %v423_v53  ;;  %v399_v58 = vsel %vm395_vm2, %v392_v55, %v386_v44  ;;  %v396_v59 = vsel %vm395_vm2, %v390_v56, %v392_v55 }
  0xa0   : > { %v397_v60 = vsel %vm395_vm2, %v388_v43, %v390_v56  ;;  %v422_v61 = vmul.f32 %v405_v46, %v399_v58  ;;  %v425_v63 = vmul.f32 %v417_v48, %v396_v59  ;;  %1212 = vrot.lane.b32.xlu1 %v8693_v14, %s14140_s18  ;;  %v513_v43 = vrot.slane %v8318_v21, %v8668_v3  ;;  %v8321_v50 = vld [vmem:[%s14128_s1 + $0x5] ss:$8 sm:$0xf] }
  0xa1   : > { %v424_v62 = vmul.f32 %v413_v47, %v397_v60  ;;  %431 = vst [vmem:[#allocation2 + $0x8] sm:$0xf] %v427_v57  ;;  %1210 = vrot.lane.b32.xlu0 %v8685_v12, %s14140_s18  ;;  %v521_v44 = vrot.slane %v8318_v21, %v8665_v2  ;;  %v673_v60 = vrot.slane %v8321_v50, %v8674_v5 }
  0xa2   : > { %v426_v6 = vpack.c.bf16 %v422_v61, %v422_v61  ;;  %v429_v8 = vpack.c.bf16 %v425_v63, %v425_v63  ;;  %v545_v9 = vpop.permute.xlu1 %544  ;;  %v543_v10 = vpop.permute.xlu0 %542 }
  0xa3   : > { %v428_v7 = vpack.c.bf16 %v424_v62, %v424_v62  ;;  %v553_v15 = vsel %vm550_vm3, %v543_v10, %v545_v9 }
  0xa4   : > { %430 = vst [vmem:[#allocation2] sm:$0xf] %v426_v6  ;;  %433 = vst [vmem:[#allocation2 + $0x18] sm:$0xf] %v429_v8  ;;  %v579_v16 = vmul.f32 %v565_v0, %v553_v15  ;;  %1216 = vrot.lane.b32.xlu1 %v8691_v13, %s14140_s18  ;;  %v681_v15 = vrot.slane %v8321_v50, %v8671_v4 }
  0xa5   : > { %432 = vst [vmem:[#allocation2 + $0x10] sm:$0xf] %v428_v7  ;;  %1214 = vrot.lane.b32.xlu0 %v8683_v11, %s14140_s18  ;;  %s14144_s18 = smov 111  }
  0xa6   : > { %v583_v22 = vpack.c.bf16 %v579_v16, %v579_v16  ;;  %v549_v23 = vpop.permute.xlu1 %548  ;;  %v547_v24 = vpop.permute.xlu0 %546  ;;  %v8320_v16 = vld [vmem:[%s14128_s1 + $0x4] ss:$8 sm:$0xf] }
  0xa7   : > { %v554_v25 = vsel %vm550_vm3, %v549_v23, %v543_v10  ;;  %v551_v26 = vsel %vm550_vm3, %v547_v24, %v549_v23  ;;  %v552_v27 = vsel %vm550_vm3, %v545_v9, %v547_v24  ;;  %v669_v9 = vrot.slane %v8321_v50, %v8668_v3 }
  0xa8   : > { %v591_v29 = vrot.slane %v583_v22, 4  ;;  %v578_v30 = vmul.f32 %v561_v17, %v554_v25  ;;  %v580_v31 = vmul.f32 %v569_v18, %v552_v27  ;;  %v581_v32 = vmul.f32 %v573_v20, %v551_v26  ;;  %1368 = vrot.lane.b32.xlu1 %v8693_v14, %s14142_s17  ;;  %v1692_v33 = vld [vmem:[#allocation2 + $0x8] sm:$0xff] }
  0xa9   : > { %1366 = vrot.lane.b32.xlu0 %v8685_v12, %s14142_s17  ;;  %1772 = vmatprep.subr.bf16.mxu0 %v1692_v33  ;;  %v677_v10 = vrot.slane %v8321_v50, %v8665_v2  ;;  %v625_v25 = vrot.slane %v8320_v16, %v8674_v5 }
  0xaa   : > { %599 = vst [vmem:[#allocation2 + $0x28] sm:$0xf0] %v591_v29  ;;  %v582_v34 = vpack.c.bf16 %v578_v30, %v578_v30  ;;  %v584_v35 = vpack.c.bf16 %v580_v31, %v580_v31  ;;  %v585_v36 = vpack.c.bf16 %v581_v32, %v581_v32  ;;  %v497_v37 = vpop.permute.xlu1 %496  ;;  %v495_v38 = vpop.permute.xlu0 %494 }
  0xab   : > { %v505_v39 = vsel %vm502_vm4, %v495_v38, %v497_v37  ;;  %v1691_v40 = vld [vmem:[#allocation2] sm:$0xff]  ;;  %v1694_v41 = vld [vmem:[#allocation2 + $0x18] sm:$0xff] }
  0xac   : > { %v1693_v42 = vld [vmem:[#allocation2 + $0x10] sm:$0xff]  ;;  %v590_v46 = vrot.slane %v582_v34, 4  ;;  %v592_v47 = vrot.slane %v584_v35, 4  ;;  %v593_v48 = vrot.slane %v585_v36, 4  ;;  %v531_v49 = vmul.f32 %v517_v28, %v505_v39  ;;  %1372 = vrot.lane.b32.xlu1 %v8691_v13, %s14142_s17  ;;  %1773 = vmatpush1.bf16.msra.mxu0 %v1691_v40 }
  0xad   : > { %1370 = vrot.lane.b32.xlu0 %v8683_v11, %s14142_s17  ;;  %1813 = vmatprep.subr.bf16.mxu1 %v1694_v41  ;;  %s14146_s17 = smov 97   ;;  %v621_v39 = vrot.slane %v8320_v16, %v8668_v3  ;;  %v629_v40 = vrot.slane %v8320_v16, %v8665_v2  ;;  %v633_v41 = vrot.slane %v8320_v16, %v8671_v4 }
  0xae   : > { %598 = vst [vmem:[#allocation2 + $0x20] sm:$0xf0] %v590_v46  ;;  %600 = vst [vmem:[#allocation2 + $0x30] sm:$0xf0] %v592_v47  ;;  %v535_v51 = vpack.c.bf16 %v531_v49, %v531_v49  ;;  %1814 = vmatpush1.bf16.msra.mxu1 %v1693_v42  ;;  %v501_v52 = vpop.permute.xlu1 %500  ;;  %v499_v53 = vpop.permute.xlu0 %498 }
  0xaf   : > { %601 = vst [vmem:[#allocation2 + $0x38] sm:$0xf0] %v593_v48  ;;  %v506_v54 = vsel %vm502_vm4, %v501_v52, %v495_v38  ;;  %v503_v55 = vsel %vm502_vm4, %v499_v53, %v501_v52  ;;  %v504_v56 = vsel %vm502_vm4, %v497_v37, %v499_v53  ;;  %v8323_v46 = vld [vmem:[%s14128_s1 + $0x7] ss:$8 sm:$0xf] }
  0xb0   : > { %539 = vst [vmem:[#allocation2 + $0x28] sm:$0xf] %v535_v51  ;;  %v530_v57 = vmul.f32 %v513_v43, %v506_v54  ;;  %v532_v58 = vmul.f32 %v521_v44, %v504_v56  ;;  %v533_v59 = vmul.f32 %v525_v45, %v503_v55  ;;  %1320 = vrot.lane.b32.xlu1 %v8693_v14, %s14144_s18 }
  0xb1   : > { %1318 = vrot.lane.b32.xlu0 %v8685_v12, %s14144_s18  ;;  %v781_v56 = vrot.slane %v8323_v46, %v8674_v5 }
  0xb2   : > { %v534_v61 = vpack.c.bf16 %v530_v57, %v530_v57  ;;  %v536_v62 = vpack.c.bf16 %v532_v58, %v532_v58  ;;  %v537_v63 = vpack.c.bf16 %v533_v59, %v533_v59  ;;  %v653_v0 = vpop.permute.xlu1 %652  ;;  %v651_v6 = vpop.permute.xlu0 %650 }
  0xb3   : > { %v661_v7 = vsel %vm658_vm5, %v651_v6, %v653_v0 }
  0xb4   : > { %538 = vst [vmem:[#allocation2 + $0x20] sm:$0xf] %v534_v61  ;;  %540 = vst [vmem:[#allocation2 + $0x30] sm:$0xf] %v536_v62  ;;  %v687_v8 = vmul.f32 %v673_v60, %v661_v7  ;;  %1324 = vrot.lane.b32.xlu1 %v8691_v13, %s14144_s18  ;;  %v789_v7 = vrot.slane %v8323_v46, %v8671_v4 }
  0xb5   : > { %541 = vst [vmem:[#allocation2 + $0x38] sm:$0xf] %v537_v63  ;;  %1322 = vrot.lane.b32.xlu0 %v8683_v11, %s14144_s18  ;;  %s14148_s18 = smov 98  }
  0xb6   : > { %v691_v17 = vpack.c.bf16 %v687_v8, %v687_v8  ;;  %v657_v18 = vpop.permute.xlu1 %656  ;;  %v655_v20 = vpop.permute.xlu0 %654  ;;  %v8322_v8 = vld [vmem:[%s14128_s1 + $0x6] ss:$8 sm:$0xf] }
  0xb7   : > { %v662_v21 = vsel %vm658_vm5, %v657_v18, %v651_v6  ;;  %v659_v22 = vsel %vm658_vm5, %v655_v20, %v657_v18  ;;  %v660_v23 = vsel %vm658_vm5, %v653_v0, %v655_v20  ;;  %v1696_v24 = vld [vmem:[#allocation2 + $0x28] sm:$0xff]  ;;  %v777_v0 = vrot.slane %v8323_v46, %v8668_v3 }
  0xb8   : > { %v699_v26 = vrot.slane %v691_v17, 4  ;;  %v686_v27 = vmul.f32 %v669_v9, %v662_v21  ;;  %v688_v28 = vmul.f32 %v677_v10, %v660_v23  ;;  %v689_v29 = vmul.f32 %v681_v15, %v659_v22  ;;  %1476 = vrot.lane.b32.xlu1 %v8693_v14, %s14146_s17  ;;  %1774 = vmatprep.subr.bf16.mxu0 %v1696_v24 }
  0xb9   : > { %1474 = vrot.lane.b32.xlu0 %v8685_v12, %s14146_s17  ;;  %v785_v6 = vrot.slane %v8323_v46, %v8665_v2  ;;  %v733_v21 = vrot.slane %v8322_v8, %v8674_v5 }
  0xba   : > { %707 = vst [vmem:[#allocation2 + $0x48] sm:$0xf0] %v699_v26  ;;  %v690_v30 = vpack.c.bf16 %v686_v27, %v686_v27  ;;  %v692_v31 = vpack.c.bf16 %v688_v28, %v688_v28  ;;  %v693_v32 = vpack.c.bf16 %v689_v29, %v689_v29  ;;  %v605_v33 = vpop.permute.xlu1 %604  ;;  %v603_v34 = vpop.permute.xlu0 %602 }
  0xbb   : > { %v613_v35 = vsel %vm610_vm6, %v603_v34, %v605_v33  ;;  %v1695_v36 = vld [vmem:[#allocation2 + $0x20] sm:$0xff]  ;;  %v1697_v38 = vld [vmem:[#allocation2 + $0x30] sm:$0xff] }
  0xbc   : > { %v1698_v37 = vld [vmem:[#allocation2 + $0x38] sm:$0xff]  ;;  %v698_v42 = vrot.slane %v690_v30, 4  ;;  %v700_v43 = vrot.slane %v692_v31, 4  ;;  %v701_v44 = vrot.slane %v693_v32, 4  ;;  %v639_v45 = vmul.f32 %v625_v25, %v613_v35  ;;  %1480 = vrot.lane.b32.xlu1 %v8691_v13, %s14146_s17  ;;  %1775 = vmatpush1.bf16.msra.mxu0 %v1695_v36 }
  0xbd   : > { %1478 = vrot.lane.b32.xlu0 %v8683_v11, %s14146_s17  ;;  %1815 = vmatprep.subr.bf16.mxu1 %v1698_v37  ;;  %s14150_s17 = smov 95   ;;  %v729_v35 = vrot.slane %v8322_v8, %v8668_v3  ;;  %v737_v36 = vrot.slane %v8322_v8, %v8665_v2  ;;  %v741_v37 = vrot.slane %v8322_v8, %v8671_v4 }
  0xbe   : > { %706 = vst [vmem:[#allocation2 + $0x40] sm:$0xf0] %v698_v42  ;;  %708 = vst [vmem:[#allocation2 + $0x50] sm:$0xf0] %v700_v43  ;;  %v643_v47 = vpack.c.bf16 %v639_v45, %v639_v45  ;;  %1816 = vmatpush1.bf16.msra.mxu1 %v1697_v38  ;;  %v609_v48 = vpop.permute.xlu1 %608  ;;  %v607_v49 = vpop.permute.xlu0 %606 }
  0xbf   : > { %709 = vst [vmem:[#allocation2 + $0x58] sm:$0xf0] %v701_v44  ;;  %v614_v50 = vsel %vm610_vm6, %v609_v48, %v603_v34  ;;  %v611_v51 = vsel %vm610_vm6, %v607_v49, %v609_v48  ;;  %v612_v52 = vsel %vm610_vm6, %v605_v33, %v607_v49  ;;  %v8325_v42 = vld [vmem:[%s14128_s1 + $0x21] ss:$8 sm:$0xf] }
  0xc0   : > { %647 = vst [vmem:[#allocation2 + $0x48] sm:$0xf] %v643_v47  ;;  %v638_v53 = vmul.f32 %v621_v39, %v614_v50  ;;  %v640_v54 = vmul.f32 %v629_v40, %v612_v52  ;;  %v641_v55 = vmul.f32 %v633_v41, %v611_v51  ;;  %1428 = vrot.lane.b32.xlu1 %v8693_v14, %s14148_s18 }
  0xc1   : > { %1426 = vrot.lane.b32.xlu0 %v8685_v12, %s14148_s18  ;;  %v889_v52 = vrot.slane %v8325_v42, %v8674_v5 }
  0xc2   : > { %v642_v57 = vpack.c.bf16 %v638_v53, %v638_v53  ;;  %v644_v58 = vpack.c.bf16 %v640_v54, %v640_v54  ;;  %v645_v59 = vpack.c.bf16 %v641_v55, %v641_v55  ;;  %v761_v60 = vpop.permute.xlu1 %760  ;;  %v759_v61 = vpop.permute.xlu0 %758 }
  0xc3   : > { %v769_v62 = vsel %vm766_vm7, %v759_v61, %v761_v60 }
  0xc4   : > { %646 = vst [vmem:[#allocation2 + $0x40] sm:$0xf] %v642_v57  ;;  %648 = vst [vmem:[#allocation2 + $0x50] sm:$0xf] %v644_v58  ;;  %v795_v63 = vmul.f32 %v781_v56, %v769_v62  ;;  %1432 = vrot.lane.b32.xlu1 %v8691_v13, %s14148_s18  ;;  %v897_v62 = vrot.slane %v8325_v42, %v8671_v4 }
  0xc5   : > { %649 = vst [vmem:[#allocation2 + $0x58] sm:$0xf] %v645_v59  ;;  %1430 = vrot.lane.b32.xlu0 %v8683_v11, %s14148_s18  ;;  %s14152_s18 = smov 96  }
  0xc6   : > { %v799_v9 = vpack.c.bf16 %v795_v63, %v795_v63  ;;  %v765_v10 = vpop.permute.xlu1 %764  ;;  %v763_v15 = vpop.permute.xlu0 %762  ;;  %v8324_v63 = vld [vmem:[%s14128_s1 + $0x20] ss:$8 sm:$0xf] }
  0xc7   : > { %v770_v16 = vsel %vm766_vm7, %v765_v10, %v759_v61  ;;  %v767_v17 = vsel %vm766_vm7, %v763_v15, %v765_v10  ;;  %v768_v18 = vsel %vm766_vm7, %v761_v60, %v763_v15  ;;  %v1700_v20 = vld [vmem:[#allocation2 + $0x48] sm:$0xff]  ;;  %v885_v60 = vrot.slane %v8325_v42, %v8668_v3 }
  0xc8   : > { %v807_v22 = vrot.slane %v799_v9, 4  ;;  %v794_v23 = vmul.f32 %v777_v0, %v770_v16  ;;  %v796_v24 = vmul.f32 %v785_v6, %v768_v18  ;;  %v797_v25 = vmul.f32 %v789_v7, %v767_v17  ;;  %1584 = vrot.lane.b32.xlu1 %v8693_v14, %s14150_s17  ;;  %1776 = vmatprep.subr.bf16.mxu0 %v1700_v20 }
  0xc9   : > { %1582 = vrot.lane.b32.xlu0 %v8685_v12, %s14150_s17  ;;  %v893_v61 = vrot.slane %v8325_v42, %v8665_v2  ;;  %v841_v16 = vrot.slane %v8324_v63, %v8674_v5 }
  0xca   : > { %815 = vst [vmem:[#allocation2 + $0x68] sm:$0xf0] %v807_v22  ;;  %v798_v26 = vpack.c.bf16 %v794_v23, %v794_v23  ;;  %v800_v27 = vpack.c.bf16 %v796_v24, %v796_v24  ;;  %v801_v28 = vpack.c.bf16 %v797_v25, %v797_v25  ;;  %v713_v29 = vpop.permute.xlu1 %712  ;;  %v711_v30 = vpop.permute.xlu0 %710 }
  0xcb   : > { %v721_v31 = vsel %vm718_vm8, %v711_v30, %v713_v29  ;;  %v1699_v32 = vld [vmem:[#allocation2 + $0x40] sm:$0xff]  ;;  %v1701_v34 = vld [vmem:[#allocation2 + $0x50] sm:$0xff] }
  0xcc   : > { %v1702_v33 = vld [vmem:[#allocation2 + $0x58] sm:$0xff]  ;;  %v806_v38 = vrot.slane %v798_v26, 4  ;;  %v808_v39 = vrot.slane %v800_v27, 4  ;;  %v809_v40 = vrot.slane %v801_v28, 4  ;;  %v747_v41 = vmul.f32 %v733_v21, %v721_v31  ;;  %1588 = vrot.lane.b32.xlu1 %v8691_v13, %s14150_s17  ;;  %1777 = vmatpush1.bf16.msra.mxu0 %v1699_v32 }
  0xcd   : > { %1586 = vrot.lane.b32.xlu0 %v8683_v11, %s14150_s17  ;;  %1817 = vmatprep.subr.bf16.mxu1 %v1702_v33  ;;  %s14158_s17 = smov 94   ;;  %v837_v31 = vrot.slane %v8324_v63, %v8668_v3  ;;  %v849_v32 = vrot.slane %v8324_v63, %v8671_v4 }
  0xce   : > { %814 = vst [vmem:[#allocation2 + $0x60] sm:$0xf0] %v806_v38  ;;  %816 = vst [vmem:[#allocation2 + $0x70] sm:$0xf0] %v808_v39  ;;  %v751_v43 = vpack.c.bf16 %v747_v41, %v747_v41  ;;  %1818 = vmatpush1.bf16.msra.mxu1 %v1701_v34  ;;  %v717_v44 = vpop.permute.xlu1 %716  ;;  %v715_v45 = vpop.permute.xlu0 %714 }
  0xcf   : > { %817 = vst [vmem:[#allocation2 + $0x78] sm:$0xf0] %v809_v40  ;;  %v722_v46 = vsel %vm718_vm8, %v717_v44, %v711_v30  ;;  %v719_v47 = vsel %vm718_vm8, %v715_v45, %v717_v44  ;;  %v720_v48 = vsel %vm718_vm8, %v713_v29, %v715_v45 }
  0xd0   : > { %755 = vst [vmem:[#allocation2 + $0x68] sm:$0xf] %v751_v43  ;;  %v746_v49 = vmul.f32 %v729_v35, %v722_v46  ;;  %v748_v50 = vmul.f32 %v737_v36, %v720_v48  ;;  %v749_v51 = vmul.f32 %v741_v37, %v719_v47  ;;  %1536 = vrot.lane.b32.xlu1 %v8693_v14, %s14152_s18  ;;  %v8327_v36 = vld [vmem:[%s14128_s1 + $0x23] ss:$8 sm:$0xf] }
  0xd1   : > { %1534 = vrot.lane.b32.xlu0 %v8685_v12, %s14152_s18  ;;  %v9054_v37 = vld [vmem:[%s14475_s2] sm:$0xff]  ;;  %v997_v43 = vrot.slane %v8327_v36, %v8674_v5  ;;  %s14541_s2 = smov 34  }
  0xd2   : > { %v750_v53 = vpack.c.bf16 %v746_v49, %v746_v49  ;;  %v752_v54 = vpack.c.bf16 %v748_v50, %v748_v50  ;;  %v753_v55 = vpack.c.bf16 %v749_v51, %v749_v51  ;;  %v869_v56 = vpop.permute.xlu1 %868  ;;  %v867_v57 = vpop.permute.xlu0 %866  ;;  %v8341_v40 = vcombine.high %v9054_v37, %v9054_v37  ;;  %v1743_v47 = vld [vmem:[%s14476_s3] sm:$0xff]  ;;  %s14546_s3 = smov 33  }
  0xd3   : > { %v877_v58 = vsel %vm874_vm9, %v867_v57, %v869_v56 }
  0xd4   : > { %754 = vst [vmem:[#allocation2 + $0x60] sm:$0xf] %v750_v53  ;;  %756 = vst [vmem:[#allocation2 + $0x70] sm:$0xf] %v752_v54  ;;  %v903_v59 = vmul.f32 %v889_v52, %v877_v58  ;;  %1540 = vrot.lane.b32.xlu1 %v8691_v13, %s14152_s18  ;;  %8343 = vmatprep.mubr.msk.bf16.mxu0 %vm1755_vm11, %v8341_v40  ;;  %v14198_v53 = vmov 0   ;;  %v3169_v54 = vld [vmem:[%s14477_s5 + $0x8] sm:$0xff]  ;;  %v993_v58 = vrot.slane %v8327_v36, %v8668_v3 }
  0xd5   : > { %757 = vst [vmem:[#allocation2 + $0x78] sm:$0xf] %v753_v55  ;;  %1538 = vrot.lane.b32.xlu0 %v8683_v11, %s14152_s18  ;;  %8345 = vmatprep.mubr.msk.bf16.mxu1 %vm1755_vm11, %v8341_v40  ;;  %s14487_s18 = smov 111  }
  0xd6   : > { %v907_v0 = vpack.c.bf16 %v903_v59, %v903_v59  ;;  %v873_v6 = vpop.permute.xlu1 %872  ;;  %v871_v7 = vpop.permute.xlu0 %870  ;;  %8532 = vset.pattern.permute.xlu0 %v14198_v53  ;;  %8533 = vset.pattern.permute.xlu1 %v14198_v53  ;;  %v1001_v59 = vrot.slane %v8327_v36, %v8665_v2 }
  0xd7   : > { %v878_v8 = vsel %vm874_vm9, %v873_v6, %v867_v57  ;;  %v875_v9 = vsel %vm874_vm9, %v871_v7, %v873_v6  ;;  %v876_v10 = vsel %vm874_vm9, %v869_v56, %v871_v7  ;;  %v1704_v15 = vld [vmem:[#allocation2 + $0x68] sm:$0xff] }
  0xd8   : > { %v915_v17 = vrot.slane %v907_v0, 4  ;;  %v902_v18 = vmul.f32 %v885_v60, %v878_v8  ;;  %v904_v20 = vmul.f32 %v893_v61, %v876_v10  ;;  %v905_v21 = vmul.f32 %v897_v62, %v875_v9  ;;  %1644 = vrot.lane.b32.xlu1 %v8693_v14, %s14158_s17  ;;  %1778 = vmatprep.subr.bf16.mxu0 %v1704_v15  ;;  %v9081_v56 = vld [vmem:[%s14128_s1 + $0x22] ss:$8 sm:$0xf] }
  0xd9   : > { %1642 = vrot.lane.b32.xlu0 %v8685_v12, %s14158_s17  ;;  %v845_v14 = vrot.slane %v8324_v63, %v8665_v2  ;;  %v1005_v60 = vrot.slane %v8327_v36, %v8671_v4  ;;  %v3168_v61 = vld [vmem:[%s14477_s5] sm:$0xff]  ;;  %v4903_v62 = vld [vmem:[%s14478_s7 + $0x8] sm:$0xff]  ;;  %v949_v7 = vrot.slane %v9081_v56, %v8674_v5  ;;  %s14556_s5 = smov 31  }
  0xda   : > { %923 = vst [vmem:[#allocation2 + $0x88] sm:$0xf0] %v915_v17  ;;  %v906_v22 = vpack.c.bf16 %v902_v18, %v902_v18  ;;  %v908_v23 = vpack.c.bf16 %v904_v20, %v904_v20  ;;  %v909_v24 = vpack.c.bf16 %v905_v21, %v905_v21  ;;  %v821_v25 = vpop.permute.xlu1 %820  ;;  %v819_v26 = vpop.permute.xlu0 %818  ;;  %v4902_v21 = vld [vmem:[%s14478_s7] sm:$0xff] }
  0xdb   : > { %v829_v27 = vsel %vm826_vm10, %v819_v26, %v821_v25  ;;  %v1703_v28 = vld [vmem:[#allocation2 + $0x60] sm:$0xff]  ;;  %v1705_v30 = vld [vmem:[#allocation2 + $0x70] sm:$0xff] }
  0xdc   : > { %v1706_v29 = vld [vmem:[#allocation2 + $0x78] sm:$0xff]  ;;  %v914_v33 = vrot.slane %v906_v22, 4  ;;  %v916_v12 = vrot.slane %v908_v23, 4  ;;  %v917_v34 = vrot.slane %v909_v24, 4  ;;  %v855_v35 = vmul.f32 %v841_v16, %v829_v27  ;;  %1648 = vrot.lane.b32.xlu1 %v8691_v13, %s14158_s17  ;;  %1779 = vmatpush1.bf16.msra.mxu0 %v1703_v28 }
  0xdd   : > { %1646 = vrot.lane.b32.xlu0 %v8683_v11, %s14158_s17  ;;  %1819 = vmatprep.subr.bf16.mxu1 %v1706_v29  ;;  %v4905_v22 = vld [vmem:[%s14478_s7 + $0x18] sm:$0xff]  ;;  %v945_v28 = vrot.slane %v9081_v56, %v8668_v3  ;;  %s14485_s17 = smov 113  }
  0xde   : > { %922 = vst [vmem:[#allocation2 + $0x80] sm:$0xf0] %v914_v33  ;;  %924 = vst [vmem:[#allocation2 + $0x90] sm:$0xf0] %v916_v12  ;;  %v859_v38 = vpack.c.bf16 %v855_v35, %v855_v35  ;;  %1820 = vmatpush1.bf16.msra.mxu1 %v1705_v30  ;;  %v825_v13 = vpop.permute.xlu1 %824  ;;  %v823_v39 = vpop.permute.xlu0 %822  ;;  %v957_v33 = vrot.slane %v9081_v56, %v8671_v4 }
  0xdf   : > { %925 = vst [vmem:[#allocation2 + $0x98] sm:$0xf0] %v917_v34  ;;  %v830_v11 = vsel %vm826_vm10, %v825_v13, %v819_v26  ;;  %v827_v41 = vsel %vm826_vm10, %v823_v39, %v825_v13  ;;  %v828_v42 = vsel %vm826_vm10, %v821_v25, %v823_v39  ;;  %v8328_v13 = vld [vmem:[%s14128_s1 + $0x25] ss:$8 sm:$0xf] }
  0xe0   : > { %863 = vst [vmem:[#allocation2 + $0x88] sm:$0xf] %v859_v38  ;;  %v854_v44 = vmul.f32 %v837_v31, %v830_v11  ;;  %v856_v45 = vmul.f32 %v845_v14, %v828_v42  ;;  %v857_v46 = vmul.f32 %v849_v32, %v827_v41  ;;  %3177 = vperm.xlu1 %8533, %v3169_v54   ;;  %v4904_v38 = vld [vmem:[%s14478_s7 + $0x10] sm:$0xff]  ;;  %s14561_s7 = smov 30  }
  0xe1   : > { %1746 = vperm.xlu0 %8532, %v1743_v47   ;;  %v953_v32 = vrot.slane %v9081_v56, %v8665_v2  ;;  %v1061_v47 = vrot.slane %v8328_v13, %v8668_v3  ;;  %v1073_v56 = vrot.slane %v8328_v13, %v8671_v4 }
  0xe2   : > { %v858_v48 = vpack.c.bf16 %v854_v44, %v854_v44  ;;  %v860_v49 = vpack.c.bf16 %v856_v45, %v856_v45  ;;  %v861_v50 = vpack.c.bf16 %v857_v46, %v857_v46  ;;  %v977_v51 = vpop.permute.xlu1 %976  ;;  %v975_v52 = vpop.permute.xlu0 %974 }
  0xe3   : > { %v985_v55 = vsel %vm14187_vm12, %v975_v52, %v977_v51 }
  0xe4   : > { %862 = vst [vmem:[#allocation2 + $0x80] sm:$0xf] %v858_v48  ;;  %864 = vst [vmem:[#allocation2 + $0x90] sm:$0xf] %v860_v49  ;;  %v1011_v57 = vmul.f32 %v997_v43, %v985_v55  ;;  %4913 = vperm.xlu1 %8533, %v4903_v62  }
  0xe5   : > { %865 = vst [vmem:[#allocation2 + $0x98] sm:$0xf] %v861_v50  ;;  %3172 = vperm.xlu0 %8532, %v3168_v61  }
  0xe6   : > { %v1015_v63 = vpack.c.bf16 %v1011_v57, %v1011_v57  ;;  %v981_v0 = vpop.permute.xlu1 %980  ;;  %v979_v6 = vpop.permute.xlu0 %978  ;;  %v1065_v57 = vrot.slane %v8328_v13, %v8674_v5 }
  0xe7   : > { %v986_v8 = vsel %vm14187_vm12, %v981_v0, %v975_v52  ;;  %v983_v9 = vsel %vm14187_vm12, %v979_v6, %v981_v0  ;;  %v984_v10 = vsel %vm14187_vm12, %v977_v51, %v979_v6  ;;  %v1708_v15 = vld [vmem:[#allocation2 + $0x88] sm:$0xff] }
  0xe8   : > { %v1023_v16 = vrot.slane %v1015_v63, 4  ;;  %v1010_v17 = vmul.f32 %v993_v58, %v986_v8  ;;  %v1012_v18 = vmul.f32 %v1001_v59, %v984_v10  ;;  %v1013_v20 = vmul.f32 %v1005_v60, %v983_v9  ;;  %1780 = vmatprep.subr.bf16.mxu0 %v1708_v15  ;;  %4923 = vperm.xlu1 %8533, %v4905_v22   ;;  %v8330_v59 = vld [vmem:[%s14128_s1 + $0x27] ss:$8 sm:$0xf] }
  0xe9   : > { %4908 = vperm.xlu0 %8532, %v4902_v21   ;;  %v1069_v58 = vrot.slane %v8328_v13, %v8665_v2  ;;  %v1169_v8 = vrot.slane %v8330_v59, %v8668_v3 }
  0xea   : > { %1031 = vst [vmem:[#allocation2 + $0xa8] sm:$0xf0] %v1023_v16  ;;  %v1014_v23 = vpack.c.bf16 %v1010_v17, %v1010_v17  ;;  %v1016_v24 = vpack.c.bf16 %v1012_v18, %v1012_v18  ;;  %v1017_v25 = vpack.c.bf16 %v1013_v20, %v1013_v20  ;;  %v929_v26 = vpop.permute.xlu1 %928  ;;  %v927_v27 = vpop.permute.xlu0 %926 }
  0xeb   : > { %v937_v29 = vsel %vm14271_vm13, %v927_v27, %v929_v26  ;;  %v1707_v30 = vld [vmem:[#allocation2 + $0x80] sm:$0xff]  ;;  %v1709_v14 = vld [vmem:[#allocation2 + $0x90] sm:$0xff] }
  0xec   : > { %v1710_v31 = vld [vmem:[#allocation2 + $0x98] sm:$0xff]  ;;  %v1022_v12 = vrot.slane %v1014_v23, 4  ;;  %v1024_v34 = vrot.slane %v1016_v24, 4  ;;  %v1025_v35 = vrot.slane %v1017_v25, 4  ;;  %v963_v36 = vmul.f32 %v949_v7, %v937_v29  ;;  %1781 = vmatpush1.bf16.msra.mxu0 %v1707_v30 }
  0xed   : > { %1821 = vmatprep.subr.bf16.mxu1 %v1710_v31  ;;  %4918 = vperm.xlu0 %8532, %v4904_v38   ;;  %v1177_v29 = vrot.slane %v8330_v59, %v8665_v2 }
  0xee   : > { %1822 = vmatpush1.bf16.msra.mxu1 %v1709_v14  ;;  %1030 = vst [vmem:[#allocation2 + $0xa0] sm:$0xf0] %v1022_v12  ;;  %1032 = vst [vmem:[#allocation2 + $0xb0] sm:$0xf0] %v1024_v34  ;;  %v967_v39 = vpack.c.bf16 %v963_v36, %v963_v36  ;;  %v933_v40 = vpop.permute.xlu1 %932  ;;  %v931_v11 = vpop.permute.xlu0 %930 }
  0xef   : > { %1033 = vst [vmem:[#allocation2 + $0xb8] sm:$0xf0] %v1025_v35  ;;  %v938_v41 = vsel %vm14271_vm13, %v933_v40, %v927_v27  ;;  %v935_v42 = vsel %vm14271_vm13, %v931_v11, %v933_v40  ;;  %v936_v43 = vsel %vm14271_vm13, %v929_v26, %v931_v11  ;;  %v1181_v27 = vrot.slane %v8330_v59, %v8671_v4 }
  0xf0   : > { %971 = vst [vmem:[#allocation2 + $0xa8] sm:$0xf] %v967_v39  ;;  %v962_v44 = vmul.f32 %v945_v28, %v938_v41  ;;  %v964_v45 = vmul.f32 %v953_v32, %v936_v43  ;;  %v965_v46 = vmul.f32 %v957_v33, %v935_v42  ;;  %v1173_v28 = vrot.slane %v8330_v59, %v8674_v5  ;;  %v8329_v33 = vld [vmem:[%s14128_s1 + $0x26] ss:$8 sm:$0xf] }
  0xf1   : > { %v1121_v39 = vrot.slane %v8329_v33, %v8668_v3 }
  0xf2   : > { %v966_v48 = vpack.c.bf16 %v962_v44, %v962_v44  ;;  %v968_v49 = vpack.c.bf16 %v964_v45, %v964_v45  ;;  %v969_v50 = vpack.c.bf16 %v965_v46, %v965_v46  ;;  %v1045_v51 = vpop.permute.xlu1 %1044  ;;  %v1043_v52 = vpop.permute.xlu0 %1042 }
  0xf3   : > { %v1053_v54 = vsel %vm14186_vm14, %v1043_v52, %v1045_v51 }
  0xf4   : > { %970 = vst [vmem:[#allocation2 + $0xa0] sm:$0xf] %v966_v48  ;;  %972 = vst [vmem:[#allocation2 + $0xb0] sm:$0xf] %v968_v49  ;;  %v1078_v55 = vmul.f32 %v1061_v47, %v1053_v54  ;;  %v1133_v49 = vrot.slane %v8329_v33, %v8671_v4 }
  0xf5   : > { %973 = vst [vmem:[#allocation2 + $0xb8] sm:$0xf] %v969_v50  ;;  %v1125_v50 = vrot.slane %v8329_v33, %v8674_v5 }
  0xf6   : > { %v1082_v60 = vpack.c.bf16 %v1078_v55, %v1078_v55  ;;  %v1049_v61 = vpop.permute.xlu1 %1048  ;;  %v1047_v62 = vpop.permute.xlu0 %1046 }
  0xf7   : > { %v1054_v63 = vsel %vm14186_vm14, %v1049_v61, %v1043_v52  ;;  %v1051_v0 = vsel %vm14186_vm14, %v1047_v62, %v1049_v61  ;;  %v1052_v6 = vsel %vm14186_vm14, %v1045_v51, %v1047_v62  ;;  %v1712_v7 = vld [vmem:[#allocation2 + $0xa8] sm:$0xff]  ;;  %v1129_v51 = vrot.slane %v8329_v33, %v8665_v2 }
  0xf8   : > { %v1090_v9 = vrot.slane %v1082_v60, 4  ;;  %v1081_v10 = vmul.f32 %v1073_v56, %v1054_v63  ;;  %v1079_v15 = vmul.f32 %v1065_v57, %v1052_v6  ;;  %v1080_v16 = vmul.f32 %v1069_v58, %v1051_v0  ;;  %1782 = vmatprep.subr.bf16.mxu0 %v1712_v7  ;;  %v8332_v0 = vld [vmem:[%s14128_s1 + $0x41] ss:$8 sm:$0xf] }
  0xfa   : > { %1098 = vst [vmem:[#allocation2 + $0xc0] sm:$0xf0] %v1090_v9  ;;  %v1085_v17 = vpack.c.bf16 %v1081_v10, %v1081_v10  ;;  %v1083_v18 = vpack.c.bf16 %v1079_v15, %v1079_v15  ;;  %v1084_v20 = vpack.c.bf16 %v1080_v16, %v1080_v16  ;;  %v1153_v21 = vpop.permute.xlu1 %1152  ;;  %v1151_v22 = vpop.permute.xlu0 %1150  ;;  %v1277_v16 = vrot.slane %v8332_v0, %v8668_v3 }
  0xfb   : > { %v1161_v23 = vsel %vm14160_vm15, %v1151_v22, %v1153_v21  ;;  %v1711_v24 = vld [vmem:[#allocation2 + $0xa0] sm:$0xff]  ;;  %v1713_v26 = vld [vmem:[#allocation2 + $0xb0] sm:$0xff] }
  0xfc   : > { %v1714_v25 = vld [vmem:[#allocation2 + $0xb8] sm:$0xff]  ;;  %v1093_v30 = vrot.slane %v1085_v17, 4  ;;  %v1091_v31 = vrot.slane %v1083_v18, 4  ;;  %v1092_v14 = vrot.slane %v1084_v20, 4  ;;  %v1186_v32 = vmul.f32 %v1169_v8, %v1161_v23  ;;  %1783 = vmatpush1.bf16.msra.mxu0 %v1711_v24 }
  0xfd   : > { %1823 = vmatprep.subr.bf16.mxu1 %v1714_v25  ;;  %v1289_v24 = vrot.slane %v8332_v0, %v8671_v4 }
  0xfe   : > { %1824 = vmatpush1.bf16.msra.mxu1 %v1713_v26  ;;  %1101 = vst [vmem:[#allocation2 + $0xd8] sm:$0xf0] %v1093_v30  ;;  %1099 = vst [vmem:[#allocation2 + $0xc8] sm:$0xf0] %v1091_v31  ;;  %v1190_v12 = vpack.c.bf16 %v1186_v32, %v1186_v32  ;;  %v1157_v34 = vpop.permute.xlu1 %1156  ;;  %v1155_v35 = vpop.permute.xlu0 %1154  ;;  %v1281_v26 = vrot.slane %v8332_v0, %v8674_v5 }
  0xff   : > { %1100 = vst [vmem:[#allocation2 + $0xd0] sm:$0xf0] %v1092_v14  ;;  %v1162_v36 = vsel %vm14160_vm15, %v1157_v34, %v1151_v22  ;;  %v1159_v38 = vsel %vm14160_vm15, %v1155_v35, %v1157_v34  ;;  %v1160_v13 = vsel %vm14160_vm15, %v1153_v21, %v1155_v35  ;;  %vm14162_vm15 = vcmp.lt.s32.totalorder %v8816_v19, 112 }
 0x100   : > { %v1198_v40 = vrot.slane %v1190_v12, 4  ;;  %v1189_v11 = vmul.f32 %v1181_v27, %v1162_v36  ;;  %v1187_v41 = vmul.f32 %v1173_v28, %v1160_v13  ;;  %v1188_v42 = vmul.f32 %v1177_v29, %v1159_v38  ;;  %v8331_v29 = vld [vmem:[%s14128_s1 + $0x40] ss:$8 sm:$0xf] }
 0x101   : > { %v1715_v63 = vld [vmem:[#allocation2 + $0xc0] sm:$0xff]  ;;  %v1285_v27 = vrot.slane %v8332_v0, %v8665_v2  ;;  %v1229_v38 = vrot.slane %v8331_v29, %v8668_v3 }
 0x102   : > { %1206 = vst [vmem:[#allocation2 + $0xe0] sm:$0xf0] %v1198_v40  ;;  %v1193_v43 = vpack.c.bf16 %v1189_v11, %v1189_v11  ;;  %v1191_v44 = vpack.c.bf16 %v1187_v41, %v1187_v41  ;;  %v1192_v45 = vpack.c.bf16 %v1188_v42, %v1188_v42  ;;  %v1105_v46 = vpop.permute.xlu1 %1104  ;;  %v1103_v47 = vpop.permute.xlu0 %1102 }
 0x103   : > { %v1113_v48 = vsel %vm14161_vm0, %v1103_v47, %v1105_v46 }
 0x104   : > { %v1201_v52 = vrot.slane %v1193_v43, 4  ;;  %v1199_v54 = vrot.slane %v1191_v44, 4  ;;  %v1200_v55 = vrot.slane %v1192_v45, 4  ;;  %v1138_v56 = vmul.f32 %v1121_v39, %v1113_v48 }
 0x105   : > { %v1716_v57 = vld [vmem:[#allocation2 + $0xc8] sm:$0xff]  ;;  %v1718_v58 = vld [vmem:[#allocation2 + $0xd8] sm:$0xff]  ;;  %v1241_v48 = vrot.slane %v8331_v29, %v8671_v4 }
 0x106   : > { %v1717_v59 = vld [vmem:[#allocation2 + $0xd0] sm:$0xff]  ;;  %1209 = vst [vmem:[#allocation2 + $0xf8] sm:$0xf0] %v1201_v52  ;;  %1207 = vst [vmem:[#allocation2 + $0xe8] sm:$0xf0] %v1199_v54  ;;  %v1142_v60 = vpack.c.bf16 %v1138_v56, %v1138_v56  ;;  %v1109_v61 = vpop.permute.xlu1 %1108  ;;  %1784 = vmatprep.subr.bf16.mxu0 %v1716_v57  ;;  %1825 = vmatprep.subr.bf16.mxu1 %v1718_v58  ;;  %v1107_v62 = vpop.permute.xlu0 %1106  ;;  %v1237_v54 = vrot.slane %v8331_v29, %v8665_v2 }
 0x107   : > { %1208 = vst [vmem:[#allocation2 + $0xf0] sm:$0xf0] %v1200_v55  ;;  %v1114_v6 = vsel %vm14161_vm0, %v1109_v61, %v1103_v47  ;;  %v1111_v7 = vsel %vm14161_vm0, %v1107_v62, %v1109_v61  ;;  %v1112_v8 = vsel %vm14161_vm0, %v1105_v46, %v1107_v62  ;;  %1785 = vmatpush1.bf16.msra.mxu0 %v1715_v63  ;;  %vm14163_vm0 = vcmp.lt.s32.totalorder %v8816_v19, 113  ;;  %v8334_v56 = vld [vmem:[%s14128_s1 + $0x43] ss:$8 sm:$0xf] }
 0x108   : > { %1826 = vmatpush1.bf16.msra.mxu1 %v1717_v59  ;;  %1146 = vst [vmem:[#allocation2 + $0xe0] sm:$0xf] %v1142_v60  ;;  %v1141_v9 = vmul.f32 %v1133_v49, %v1114_v6  ;;  %v1139_v10 = vmul.f32 %v1125_v50, %v1112_v8  ;;  %v1140_v15 = vmul.f32 %v1129_v51, %v1111_v7 }
 0x109   : > { %v1233_v49 = vrot.slane %v8331_v29, %v8674_v5  ;;  %v1385_v6 = vrot.slane %v8334_v56, %v8668_v3 }
 0x10a   : > { %v1145_v17 = vpack.c.bf16 %v1141_v9, %v1141_v9  ;;  %v1143_v18 = vpack.c.bf16 %v1139_v10, %v1139_v10  ;;  %v1144_v20 = vpack.c.bf16 %v1140_v15, %v1140_v15  ;;  %v1261_v21 = vpop.permute.xlu1 %1260 }
 0x10b   : > { %v1259_v22 = vpop.permute.xlu0 %1258 }
 0x10c   : > { %1149 = vst [vmem:[#allocation2 + $0xf8] sm:$0xf] %v1145_v17  ;;  %1147 = vst [vmem:[#allocation2 + $0xe8] sm:$0xf] %v1143_v18  ;;  %v1269_v23 = vsel %vm14162_vm15, %v1259_v22, %v1261_v21  ;;  %v1397_v17 = vrot.slane %v8334_v56, %v8671_v4 }
 0x10d   : > { %1148 = vst [vmem:[#allocation2 + $0xf0] sm:$0xf] %v1144_v20  ;;  %v1294_v25 = vmul.f32 %v1277_v16, %v1269_v23  ;;  %v1389_v20 = vrot.slane %v8334_v56, %v8674_v5  ;;  %v8333_v23 = vld [vmem:[%s14128_s1 + $0x42] ss:$8 sm:$0xf] }
 0x10e   : > { %v1265_v28 = vpop.permute.xlu1 %1264 }
 0x10f   : > { %v1298_v30 = vpack.c.bf16 %v1294_v25, %v1294_v25  ;;  %v1270_v31 = vsel %vm14162_vm15, %v1265_v28, %v1259_v22  ;;  %v1263_v14 = vpop.permute.xlu0 %1262  ;;  %v1719_v47 = vld [vmem:[#allocation2 + $0xe0] sm:$0xff] }
 0x110   : > { %v1297_v32 = vmul.f32 %v1289_v24, %v1270_v31  ;;  %v1267_v33 = vsel %vm14162_vm15, %v1263_v14, %v1265_v28  ;;  %v1268_v12 = vsel %vm14162_vm15, %v1261_v21, %v1263_v14  ;;  %vm14164_vm15 = vcmp.lt.s32.totalorder %v8816_v19, 110 }
 0x111   : > { %v1306_v34 = vrot.slane %v1298_v30, 4  ;;  %v1295_v35 = vmul.f32 %v1281_v26, %v1268_v12  ;;  %v1296_v36 = vmul.f32 %v1285_v27, %v1267_v33  ;;  %v1393_v21 = vrot.slane %v8334_v56, %v8665_v2 }
 0x112   : > { %v1301_v13 = vpack.c.bf16 %v1297_v32, %v1297_v32  ;;  %v1213_v39 = vpop.permute.xlu1 %1212  ;;  %v1337_v32 = vrot.slane %v8333_v23, %v8668_v3 }
 0x113   : > { %1314 = vst [vmem:[#allocation2 + $0x100] sm:$0xf0] %v1306_v34  ;;  %v1299_v40 = vpack.c.bf16 %v1295_v35, %v1295_v35  ;;  %v1300_v11 = vpack.c.bf16 %v1296_v36, %v1296_v36  ;;  %v1211_v41 = vpop.permute.xlu0 %1210  ;;  %v1720_v42 = vld [vmem:[#allocation2 + $0xe8] sm:$0xff]  ;;  %v1722_v43 = vld [vmem:[#allocation2 + $0xf8] sm:$0xff] }
 0x114   : > { %v1721_v44 = vld [vmem:[#allocation2 + $0xf0] sm:$0xff]  ;;  %v1309_v45 = vrot.slane %v1301_v13, 4  ;;  %v1221_v46 = vsel %vm14163_vm0, %v1211_v41, %v1213_v39  ;;  %1786 = vmatprep.subr.bf16.mxu0 %v1720_v42  ;;  %1827 = vmatprep.subr.bf16.mxu1 %v1722_v43  ;;  %v1341_v42 = vrot.slane %v8333_v23, %v8674_v5 }
 0x115   : > { %v1307_v50 = vrot.slane %v1299_v40, 4  ;;  %v1308_v51 = vrot.slane %v1300_v11, 4  ;;  %v1246_v52 = vmul.f32 %v1229_v38, %v1221_v46  ;;  %1787 = vmatpush1.bf16.msra.mxu0 %v1719_v47  ;;  %1828 = vmatpush1.bf16.msra.mxu1 %v1721_v44  ;;  %v1345_v47 = vrot.slane %v8333_v23, %v8665_v2 }
 0x116   : > { %1317 = vst [vmem:[#allocation2 + $0x118] sm:$0xf0] %v1309_v45  ;;  %v1217_v55 = vpop.permute.xlu1 %1216 }
 0x117   : > { %1315 = vst [vmem:[#allocation2 + $0x108] sm:$0xf0] %v1307_v50  ;;  %1316 = vst [vmem:[#allocation2 + $0x110] sm:$0xf0] %v1308_v51  ;;  %v1250_v57 = vpack.c.bf16 %v1246_v52, %v1246_v52  ;;  %v1222_v58 = vsel %vm14163_vm0, %v1217_v55, %v1211_v41  ;;  %v1215_v59 = vpop.permute.xlu0 %1214  ;;  %v1349_v41 = vrot.slane %v8333_v23, %v8671_v4 }
 0x118   : > { %v1249_v60 = vmul.f32 %v1241_v48, %v1222_v58  ;;  %v1219_v61 = vsel %vm14163_vm0, %v1215_v59, %v1217_v55  ;;  %v1220_v62 = vsel %vm14163_vm0, %v1213_v39, %v1215_v59  ;;  %vm14165_vm0 = vcmp.lt.s32.totalorder %v8816_v19, 111 }
 0x119   : > { %1254 = vst [vmem:[#allocation2 + $0x100] sm:$0xf] %v1250_v57  ;;  %v1247_v63 = vmul.f32 %v1233_v49, %v1220_v62  ;;  %v1248_v0 = vmul.f32 %v1237_v54, %v1219_v61  ;;  %v8336_v49 = vld [vmem:[%s14128_s1 + $0x45] ss:$8 sm:$0xf] }
 0x11a   : > { %v1253_v7 = vpack.c.bf16 %v1249_v60, %v1249_v60  ;;  %v1369_v8 = vpop.permute.xlu1 %1368  ;;  %v1493_v59 = vrot.slane %v8336_v49, %v8668_v3 }
 0x11b   : > { %v1251_v9 = vpack.c.bf16 %v1247_v63, %v1247_v63  ;;  %v1252_v10 = vpack.c.bf16 %v1248_v0, %v1248_v0  ;;  %v1367_v15 = vpop.permute.xlu0 %1366 }
 0x11c   : > { %1257 = vst [vmem:[#allocation2 + $0x118] sm:$0xf] %v1253_v7  ;;  %v1377_v16 = vsel %vm14164_vm15, %v1367_v15, %v1369_v8  ;;  %v1505_v7 = vrot.slane %v8336_v49, %v8671_v4 }
 0x11d   : > { %1255 = vst [vmem:[#allocation2 + $0x108] sm:$0xf] %v1251_v9  ;;  %1256 = vst [vmem:[#allocation2 + $0x110] sm:$0xf] %v1252_v10  ;;  %v1402_v18 = vmul.f32 %v1385_v6, %v1377_v16  ;;  %v1497_v9 = vrot.slane %v8336_v49, %v8674_v5  ;;  %v1501_v10 = vrot.slane %v8336_v49, %v8665_v2 }
 0x11e   : > { %v1373_v22 = vpop.permute.xlu1 %1372  ;;  %v8335_v16 = vld [vmem:[%s14128_s1 + $0x44] ss:$8 sm:$0xf] }
 0x11f   : > { %v1406_v24 = vpack.c.bf16 %v1402_v18, %v1402_v18  ;;  %v1378_v25 = vsel %vm14164_vm15, %v1373_v22, %v1367_v15  ;;  %v1371_v26 = vpop.permute.xlu0 %1370 }
 0x120   : > { %v1405_v27 = vmul.f32 %v1397_v17, %v1378_v25  ;;  %v1375_v28 = vsel %vm14164_vm15, %v1371_v26, %v1373_v22  ;;  %v1376_v29 = vsel %vm14164_vm15, %v1369_v8, %v1371_v26  ;;  %v1723_v46 = vld [vmem:[#allocation2 + $0x100] sm:$0xff]  ;;  %vm14166_vm15 = vcmp.lt.s32.totalorder %v8816_v19, 97 }
 0x121   : > { %v1414_v30 = vrot.slane %v1406_v24, 4  ;;  %v1403_v31 = vmul.f32 %v1389_v20, %v1376_v29  ;;  %v1404_v14 = vmul.f32 %v1393_v21, %v1375_v28 }
 0x122   : > { %v1409_v33 = vpack.c.bf16 %v1405_v27, %v1405_v27  ;;  %v1321_v12 = vpop.permute.xlu1 %1320  ;;  %v1445_v27 = vrot.slane %v8335_v16, %v8668_v3 }
 0x123   : > { %1422 = vst [vmem:[#allocation2 + $0x120] sm:$0xf0] %v1414_v30  ;;  %v1407_v34 = vpack.c.bf16 %v1403_v31, %v1403_v31  ;;  %v1408_v35 = vpack.c.bf16 %v1404_v14, %v1404_v14  ;;  %v1319_v36 = vpop.permute.xlu0 %1318  ;;  %v1726_v38 = vld [vmem:[#allocation2 + $0x118] sm:$0xff] }
 0x124   : > { %v1417_v13 = vrot.slane %v1409_v33, 4  ;;  %v1329_v39 = vsel %vm14165_vm0, %v1319_v36, %v1321_v12  ;;  %v1724_v40 = vld [vmem:[#allocation2 + $0x108] sm:$0xff]  ;;  %1829 = vmatprep.subr.bf16.mxu1 %v1726_v38  ;;  %v1725_v11 = vld [vmem:[#allocation2 + $0x110] sm:$0xff]  ;;  %v1449_v38 = vrot.slane %v8335_v16, %v8674_v5 }
 0x125   : > { %v1415_v43 = vrot.slane %v1407_v34, 4  ;;  %v1416_v44 = vrot.slane %v1408_v35, 4  ;;  %v1354_v45 = vmul.f32 %v1337_v32, %v1329_v39  ;;  %1788 = vmatprep.subr.bf16.mxu0 %v1724_v40  ;;  %1830 = vmatpush1.bf16.msra.mxu1 %v1725_v11 }
 0x126   : > { %1425 = vst [vmem:[#allocation2 + $0x138] sm:$0xf0] %v1417_v13  ;;  %1789 = vmatpush1.bf16.msra.mxu0 %v1723_v46  ;;  %v1325_v48 = vpop.permute.xlu1 %1324 }
 0x127   : > { %1423 = vst [vmem:[#allocation2 + $0x128] sm:$0xf0] %v1415_v43  ;;  %1424 = vst [vmem:[#allocation2 + $0x130] sm:$0xf0] %v1416_v44  ;;  %v1358_v50 = vpack.c.bf16 %v1354_v45, %v1354_v45  ;;  %v1330_v51 = vsel %vm14165_vm0, %v1325_v48, %v1319_v36  ;;  %v1323_v52 = vpop.permute.xlu0 %1322  ;;  %v1457_v36 = vrot.slane %v8335_v16, %v8671_v4 }
 0x128   : > { %v1357_v54 = vmul.f32 %v1349_v41, %v1330_v51  ;;  %v1327_v55 = vsel %vm14165_vm0, %v1323_v52, %v1325_v48  ;;  %v1328_v56 = vsel %vm14165_vm0, %v1321_v12, %v1323_v52  ;;  %vm14167_vm0 = vcmp.lt.s32.totalorder %v8816_v19, 98  ;;  %v8338_v43 = vld [vmem:[%s14128_s1 + $0x47] ss:$8 sm:$0xf] }
 0x129   : > { %1362 = vst [vmem:[#allocation2 + $0x120] sm:$0xf] %v1358_v50  ;;  %v1355_v57 = vmul.f32 %v1341_v42, %v1328_v56  ;;  %v1356_v58 = vmul.f32 %v1345_v47, %v1327_v55  ;;  %v1453_v41 = vrot.slane %v8335_v16, %v8665_v2  ;;  %v1601_v52 = vrot.slane %v8338_v43, %v8668_v3 }
 0x12a   : > { %v1361_v60 = vpack.c.bf16 %v1357_v54, %v1357_v54  ;;  %v1477_v61 = vpop.permute.xlu1 %1476 }
 0x12b   : > { %v1359_v62 = vpack.c.bf16 %v1355_v57, %v1355_v57  ;;  %v1360_v63 = vpack.c.bf16 %v1356_v58, %v1356_v58  ;;  %v1475_v0 = vpop.permute.xlu0 %1474 }
 0x12c   : > { %1365 = vst [vmem:[#allocation2 + $0x138] sm:$0xf] %v1361_v60  ;;  %v1485_v6 = vsel %vm14166_vm15, %v1475_v0, %v1477_v61  ;;  %v1613_v60 = vrot.slane %v8338_v43, %v8671_v4 }
 0x12d   : > { %1363 = vst [vmem:[#allocation2 + $0x128] sm:$0xf] %v1359_v62  ;;  %1364 = vst [vmem:[#allocation2 + $0x130] sm:$0xf] %v1360_v63  ;;  %v1510_v8 = vmul.f32 %v1493_v59, %v1485_v6  ;;  %v1605_v62 = vrot.slane %v8338_v43, %v8674_v5  ;;  %v1609_v63 = vrot.slane %v8338_v43, %v8665_v2 }
 0x12e   : > { %v1481_v15 = vpop.permute.xlu1 %1480  ;;  %v8337_v6 = vld [vmem:[%s14128_s1 + $0x46] ss:$8 sm:$0xf] }
 0x12f   : > { %v1514_v17 = vpack.c.bf16 %v1510_v8, %v1510_v8  ;;  %v1486_v18 = vsel %vm14166_vm15, %v1481_v15, %v1475_v0  ;;  %v1479_v20 = vpop.permute.xlu0 %1478 }
 0x130   : > { %v1513_v21 = vmul.f32 %v1505_v7, %v1486_v18  ;;  %v1483_v22 = vsel %vm14166_vm15, %v1479_v20, %v1481_v15  ;;  %v1484_v23 = vsel %vm14166_vm15, %v1477_v61, %v1479_v20  ;;  %v1727_v11 = vld [vmem:[#allocation2 + $0x120] sm:$0xff]  ;;  %vm14168_vm15 = vcmp.lt.s32.totalorder %v8816_v19, 95 }
 0x131   : > { %v1522_v24 = vrot.slane %v1514_v17, 4  ;;  %v1511_v25 = vmul.f32 %v1497_v9, %v1484_v23  ;;  %v1512_v26 = vmul.f32 %v1501_v10, %v1483_v22 }
 0x132   : > { %v1517_v28 = vpack.c.bf16 %v1513_v21, %v1513_v21  ;;  %v1429_v29 = vpop.permute.xlu1 %1428  ;;  %v1553_v21 = vrot.slane %v8337_v6, %v8668_v3 }
 0x133   : > { %1530 = vst [vmem:[#allocation2 + $0x140] sm:$0xf0] %v1522_v24  ;;  %v1515_v30 = vpack.c.bf16 %v1511_v25, %v1511_v25  ;;  %v1516_v31 = vpack.c.bf16 %v1512_v26, %v1512_v26  ;;  %v1427_v14 = vpop.permute.xlu0 %1426  ;;  %v1730_v32 = vld [vmem:[#allocation2 + $0x138] sm:$0xff] }
 0x134   : > { %v1525_v33 = vrot.slane %v1517_v28, 4  ;;  %v1437_v12 = vsel %vm14167_vm0, %v1427_v14, %v1429_v29  ;;  %v1728_v34 = vld [vmem:[#allocation2 + $0x128] sm:$0xff]  ;;  %1831 = vmatprep.subr.bf16.mxu1 %v1730_v32  ;;  %v1729_v35 = vld [vmem:[#allocation2 + $0x130] sm:$0xff]  ;;  %v1557_v32 = vrot.slane %v8337_v6, %v8674_v5 }
 0x135   : > { %v1523_v13 = vrot.slane %v1515_v30, 4  ;;  %v1524_v39 = vrot.slane %v1516_v31, 4  ;;  %v1462_v40 = vmul.f32 %v1445_v27, %v1437_v12  ;;  %1790 = vmatprep.subr.bf16.mxu0 %v1728_v34  ;;  %1832 = vmatpush1.bf16.msra.mxu1 %v1729_v35 }
 0x136   : > { %1533 = vst [vmem:[#allocation2 + $0x158] sm:$0xf0] %v1525_v33  ;;  %1791 = vmatpush1.bf16.msra.mxu0 %v1727_v11  ;;  %v1433_v42 = vpop.permute.xlu1 %1432 }
 0x137   : > { %1531 = vst [vmem:[#allocation2 + $0x148] sm:$0xf0] %v1523_v13  ;;  %1532 = vst [vmem:[#allocation2 + $0x150] sm:$0xf0] %v1524_v39  ;;  %v1466_v44 = vpack.c.bf16 %v1462_v40, %v1462_v40  ;;  %v1438_v45 = vsel %vm14167_vm0, %v1433_v42, %v1427_v14  ;;  %v1431_v46 = vpop.permute.xlu0 %1430  ;;  %v1565_v14 = vrot.slane %v8337_v6, %v8671_v4 }
 0x138   : > { %v1465_v47 = vmul.f32 %v1457_v36, %v1438_v45  ;;  %v1435_v48 = vsel %vm14167_vm0, %v1431_v46, %v1433_v42  ;;  %v1436_v49 = vsel %vm14167_vm0, %v1429_v29, %v1431_v46  ;;  %vm14169_vm0 = vcmp.lt.s32.totalorder %v8816_v19, 96  ;;  %v8339_v13 = vld [vmem:[%s14128_s1 + $0x60] ss:$8 sm:$0xf] }
 0x139   : > { %1470 = vst [vmem:[#allocation2 + $0x140] sm:$0xf] %v1466_v44  ;;  %v1463_v50 = vmul.f32 %v1449_v38, %v1436_v49  ;;  %v1464_v51 = vmul.f32 %v1453_v41, %v1435_v48  ;;  %v1561_v36 = vrot.slane %v8337_v6, %v8665_v2  ;;  %v1661_v46 = vrot.slane %v8339_v13, %v8668_v3 }
 0x13a   : > { %v1469_v54 = vpack.c.bf16 %v1465_v47, %v1465_v47  ;;  %v1585_v55 = vpop.permute.xlu1 %1584 }
 0x13b   : > { %v1467_v56 = vpack.c.bf16 %v1463_v50, %v1463_v50  ;;  %v1468_v57 = vpack.c.bf16 %v1464_v51, %v1464_v51  ;;  %v1583_v58 = vpop.permute.xlu0 %1582 }
 0x13c   : > { %1473 = vst [vmem:[#allocation2 + $0x158] sm:$0xf] %v1469_v54  ;;  %v1593_v59 = vsel %vm14168_vm15, %v1583_v58, %v1585_v55  ;;  %v1673_v54 = vrot.slane %v8339_v13, %v8671_v4 }
 0x13d   : > { %1471 = vst [vmem:[#allocation2 + $0x148] sm:$0xf] %v1467_v56  ;;  %1472 = vst [vmem:[#allocation2 + $0x150] sm:$0xf] %v1468_v57  ;;  %v1618_v61 = vmul.f32 %v1601_v52, %v1593_v59  ;;  %v1665_v56 = vrot.slane %v8339_v13, %v8674_v5  ;;  %v1669_v57 = vrot.slane %v8339_v13, %v8665_v2 }
 0x13e   : > { %v1589_v0 = vpop.permute.xlu1 %1588 }
 0x13f   : > { %v1622_v7 = vpack.c.bf16 %v1618_v61, %v1618_v61  ;;  %v1594_v8 = vsel %vm14168_vm15, %v1589_v0, %v1583_v58  ;;  %v1587_v9 = vpop.permute.xlu0 %1586 }
 0x140   : > { %v1621_v10 = vmul.f32 %v1613_v60, %v1594_v8  ;;  %v1591_v15 = vsel %vm14168_vm15, %v1587_v9, %v1589_v0  ;;  %v1592_v16 = vsel %vm14168_vm15, %v1585_v55, %v1587_v9  ;;  %v1731_v35 = vld [vmem:[#allocation2 + $0x140] sm:$0xff]  ;;  %vm1650_vm15 = vcmp.lt.s32.totalorder %v8816_v19, 94 }
 0x141   : > { %v1630_v17 = vrot.slane %v1622_v7, 4  ;;  %v1619_v18 = vmul.f32 %v1605_v62, %v1592_v16  ;;  %v1620_v20 = vmul.f32 %v1609_v63, %v1591_v15 }
 0x142   : > { %v1625_v22 = vpack.c.bf16 %v1621_v10, %v1621_v10  ;;  %v1537_v23 = vpop.permute.xlu1 %1536 }
 0x143   : > { %1638 = vst [vmem:[#allocation2 + $0x160] sm:$0xf0] %v1630_v17  ;;  %v1623_v24 = vpack.c.bf16 %v1619_v18, %v1619_v18  ;;  %v1624_v25 = vpack.c.bf16 %v1620_v20, %v1620_v20  ;;  %v1535_v26 = vpop.permute.xlu0 %1534  ;;  %v1734_v27 = vld [vmem:[#allocation2 + $0x158] sm:$0xff] }
 0x144   : > { %v1633_v28 = vrot.slane %v1625_v22, 4  ;;  %v1545_v29 = vsel %vm14169_vm0, %v1535_v26, %v1537_v23  ;;  %v1732_v30 = vld [vmem:[#allocation2 + $0x148] sm:$0xff]  ;;  %1833 = vmatprep.subr.bf16.mxu1 %v1734_v27  ;;  %v1733_v31 = vld [vmem:[#allocation2 + $0x150] sm:$0xff] }
 0x145   : > { %v1631_v33 = vrot.slane %v1623_v24, 4  ;;  %v1632_v12 = vrot.slane %v1624_v25, 4  ;;  %v1570_v34 = vmul.f32 %v1553_v21, %v1545_v29  ;;  %1792 = vmatprep.subr.bf16.mxu0 %v1732_v30  ;;  %1834 = vmatpush1.bf16.msra.mxu1 %v1733_v31 }
 0x146   : > { %1641 = vst [vmem:[#allocation2 + $0x178] sm:$0xf0] %v1633_v28  ;;  %1793 = vmatpush1.bf16.msra.mxu0 %v1731_v35  ;;  %v1541_v38 = vpop.permute.xlu1 %1540 }
 0x147   : > { %1639 = vst [vmem:[#allocation2 + $0x168] sm:$0xf0] %v1631_v33  ;;  %1640 = vst [vmem:[#allocation2 + $0x170] sm:$0xf0] %v1632_v12  ;;  %v1574_v39 = vpack.c.bf16 %v1570_v34, %v1570_v34  ;;  %v1546_v40 = vsel %vm14169_vm0, %v1541_v38, %v1535_v26  ;;  %v1539_v11 = vpop.permute.xlu0 %1538  ;;  %v8340_v26 = vcombine.low %v9054_v37, %v9054_v37 }
 0x148   : > { %v1573_v41 = vmul.f32 %v1565_v14, %v1546_v40  ;;  %v1543_v42 = vsel %vm14169_vm0, %v1539_v11, %v1541_v38  ;;  %v1544_v43 = vsel %vm14169_vm0, %v1537_v23, %v1539_v11  ;;  %vm1759_vm0 = vcmask 1043456  }
 0x149   : > { %1578 = vst [vmem:[#allocation2 + $0x160] sm:$0xf] %v1574_v39  ;;  %v1571_v44 = vmul.f32 %v1557_v32, %v1544_v43  ;;  %v1572_v45 = vmul.f32 %v1561_v36, %v1543_v42 }
 0x14a   : > { %v1577_v47 = vpack.c.bf16 %v1573_v41, %v1573_v41  ;;  %v1645_v48 = vpop.permute.xlu1 %1644 }
 0x14b   : > { %v1575_v49 = vpack.c.bf16 %v1571_v44, %v1571_v44  ;;  %v1576_v50 = vpack.c.bf16 %v1572_v45, %v1572_v45  ;;  %v1643_v51 = vpop.permute.xlu0 %1642 }
 0x14c   : > { %1581 = vst [vmem:[#allocation2 + $0x178] sm:$0xf] %v1577_v47  ;;  %v1653_v52 = vsel %vm1650_vm15, %v1643_v51, %v1645_v48 }
 0x14d   : > { %1579 = vst [vmem:[#allocation2 + $0x168] sm:$0xf] %v1575_v49  ;;  %1580 = vst [vmem:[#allocation2 + $0x170] sm:$0xf] %v1576_v50  ;;  %v1678_v55 = vmul.f32 %v1661_v46, %v1653_v52 }
 0x14e   : > { %v1649_v58 = vpop.permute.xlu1 %1648  ;;  %v1870_v50 = vld [vmem:[%s14128_s1] ss:$8 sm:$0xf] }
 0x14f   : > { %v1682_v59 = vpack.c.bf16 %v1678_v55, %v1678_v55  ;;  %v1654_v60 = vsel %vm1650_vm15, %v1649_v58, %v1643_v51  ;;  %v1647_v61 = vpop.permute.xlu0 %1646  ;;  %v1883_v55 = vrot.slane %v1870_v50, %v8665_v2 }
 0x150   : > { %v1681_v62 = vmul.f32 %v1673_v54, %v1654_v60  ;;  %v1651_v63 = vsel %vm1650_vm15, %v1647_v61, %v1649_v58  ;;  %v1652_v0 = vsel %vm1650_vm15, %v1645_v48, %v1647_v61  ;;  %v1735_v18 = vld [vmem:[#allocation2 + $0x160] sm:$0xff]  ;;  %v1879_v54 = vrot.slane %v1870_v50, %v8674_v5 }
 0x151   : > { %1686 = vst [vmem:[#allocation2 + $0x180] sm:$0xf] %v1682_v59  ;;  %v1679_v6 = vmul.f32 %v1665_v56, %v1652_v0  ;;  %v1680_v7 = vmul.f32 %v1669_v57, %v1651_v63  ;;  %v1875_v60 = vrot.slane %v1870_v50, %v8668_v3  ;;  %v1887_v63 = vrot.slane %v1870_v50, %v8671_v4  ;;  %v8346_v0 = vld [vmem:[%s14128_s1 + $0x1] ss:$8 sm:$0xf] }
 0x152   : > { %v1685_v8 = vpack.c.bf16 %v1681_v62, %v1681_v62 }
 0x153   : > { %v1683_v9 = vpack.c.bf16 %v1679_v6, %v1679_v6  ;;  %v1684_v10 = vpack.c.bf16 %v1680_v7, %v1680_v7  ;;  %v1738_v15 = vld [vmem:[#allocation2 + $0x178] sm:$0xff] }
 0x154   : > { %1689 = vst [vmem:[#allocation2 + $0x198] sm:$0xf] %v1685_v8  ;;  %v1736_v16 = vld [vmem:[#allocation2 + $0x168] sm:$0xff]  ;;  %1835 = vmatprep.subr.bf16.mxu1 %v1738_v15  ;;  %v1737_v17 = vld [vmem:[#allocation2 + $0x170] sm:$0xff] }
 0x155   : > { %1687 = vst [vmem:[#allocation2 + $0x188] sm:$0xf] %v1683_v9  ;;  %1688 = vst [vmem:[#allocation2 + $0x190] sm:$0xf] %v1684_v10  ;;  %1794 = vmatprep.subr.bf16.mxu0 %v1736_v16  ;;  %1836 = vmatpush1.bf16.msra.mxu1 %v1737_v17  ;;  %v1925_v16 = vrot.slane %v8346_v0, %v8674_v5 }
 0x156   : > { %1795 = vmatpush1.bf16.msra.mxu0 %v1735_v18 }
 0x158   : > { %v1739_v20 = vld [vmem:[#allocation2 + $0x180] sm:$0xf] }
 0x159   : > { %v1761_v24 = vsel %vm1759_vm0, %v1739_v20, 0  ;;  %v1929_v20 = vrot.slane %v8346_v0, %v8665_v2 }
 0x15b   : > { %v1742_v21 = vld [vmem:[#allocation2 + $0x198] sm:$0xf] }
 0x15c   : > { %v1740_v22 = vld [vmem:[#allocation2 + $0x188] sm:$0xf]  ;;  %8344 = vmatprep.subr.msk.bf16.mxu1 %vm1759_vm0, %v1742_v21  ;;  %v1741_v23 = vld [vmem:[#allocation2 + $0x190] sm:$0xf] }
 0x15d   : > { %8342 = vmatprep.subr.msk.bf16.mxu0 %vm1759_vm0, %v1740_v22  ;;  %v1767_v25 = vsel %vm1759_vm0, %v1741_v23, 0 }
 0x15e   : > { %1797 = vmatpush1.bf16.msra.mxu0 %v1761_v24  ;;  %1838 = vmatpush1.bf16.msra.mxu1 %v1767_v25 }
 0x15f   : > { %v9440_v45 = vpop.permute.xlu1 %3177 }
 0x160   : > { %v1747_v27 = vpop.permute.xlu0 %1746 }
 0x161   : > { %1805 = vmatmul.mubr.bf16.vlgmr.msra.gmra.mrb[0].mxu0 %v8340_v26  ;;  %1846 = vmatmul.mubr.bf16.vlgmr.msra.gmra.mrb[0].mxu1 %v8340_v26 }
 0x163   : > { %v9448_v47 = vpop.permute.xlu1 %4913 }
 0x164   : > { %v9438_v44 = vpop.permute.xlu0 %3172  ;;  %14481 = vst [vmem:[#allocation11_spill] sm:$0xff] %v9448_v47 }
 0x167   : > { %v9460_v49 = vpop.permute.xlu1 %4923 }
 0x168   : > { %v9446_v46 = vpop.permute.xlu0 %4908  ;;  %14484 = vst [vmem:[#allocation13_spill] sm:$0xff] %v9460_v49 }
 0x169   : > { %14480 = vst [vmem:[#allocation10_spill] sm:$0xff] %v9446_v46 }
 0x16c   : > { %v9458_v48 = vpop.permute.xlu0 %4918 }
 0x16d   : > { %14483 = vst [vmem:[#allocation12_spill] sm:$0xff] %v9458_v48 }
 0x234   : > { %v1847_v28 = vpop.f32.mrb[0].mxu1  ;;  %v1806_v29 = vpop.f32.mrb[0].mxu0 }
 0x235   : > { %v1848_v30 = vadd.f32 %v1847_v28, %v1747_v27  ;;  %v1807_v31 = vadd.f32 %v1806_v29, %v1747_v27  ;;  %v1808_v14 = vpop.f32.mrb[1].mxu0  ;;  %v1849_v32 = vpop.f32.mrb[1].mxu1 }
 0x236   : > { %v1809_v33 = vadd.f32 %v1808_v14, %v1747_v27  ;;  %v1850_v12 = vadd.f32 %v1849_v32, %v1747_v27  ;;  %v1810_v34 = vpop.f32.mrb[2].mxu0  ;;  %v1851_v35 = vpop.f32.mrb[2].mxu1  ;;  %v1921_v27 = vrot.slane %v8346_v0, %v8668_v3 }
 0x237   : > { %v9322_v36 = vmax.f32 %v1848_v30, 0.0  ;;  %v9324_v38 = vmax.f32 %v1807_v31, 0.0  ;;  %v1811_v37 = vpop.f32.mrb[3].mxu0  ;;  %v1852_v13 = vpop.f32.mrb[3].mxu1  ;;  %v1933_v30 = vrot.slane %v8346_v0, %v8671_v4 }
 0x238   : > { %v9326_v39 = vmax.f32 %v1809_v33, 0.0  ;;  %v9328_v40 = vmax.f32 %v1850_v12, 0.0  ;;  %v8347_v31 = vld [vmem:[%s14128_s1 + $0x2] ss:$8 sm:$0xf] }
 0x239   : > { %1862 = vrot.lane.b32.xlu0 %v9322_v36, %s14196_s20  ;;  %1858 = vrot.lane.b32.xlu1 %v9324_v38, %s14196_s20  ;;  %v2482_v11 = vpack.c.bf16 %v9324_v38, %v9324_v38  ;;  %v2484_v41 = vpack.c.bf16 %v9322_v36, %v9322_v36  ;;  %v1983_v37 = vrot.slane %v8347_v31, %v8674_v5 }
 0x23a   : > { %v2483_v42 = vpack.c.bf16 %v9326_v39, %v9326_v39  ;;  %v2485_v43 = vpack.c.bf16 %v9328_v40, %v9328_v40  ;;  %v1987_v13 = vrot.slane %v8347_v31, %v8665_v2 }
 0x23b   : > { %2486 = vst [vmem:[#allocation2 + $0xc0] sm:$0xf] %v2482_v11  ;;  %2488 = vst [vmem:[#allocation2 + $0xd0] sm:$0xf] %v2484_v41 }
 0x23c   : > { %2487 = vst [vmem:[#allocation2 + $0xc8] sm:$0xf] %v2483_v42  ;;  %2489 = vst [vmem:[#allocation2 + $0xd8] sm:$0xf] %v2485_v43 }
 0x23d   : > { %1904 = vrot.lane.b32.xlu0 %v9324_v38, %s14194_s19  ;;  %1860 = vrot.lane.b32.xlu1 %v9326_v39, %s14196_s20 }
 0x241   : > { %1908 = vrot.lane.b32.xlu0 %v9322_v36, %s14194_s19  ;;  %1864 = vrot.lane.b32.xlu1 %v9328_v40, %s14196_s20 }
 0x245   : > { %1962 = vrot.lane.b32.xlu0 %v9324_v38, %s14192_s22  ;;  %1906 = vrot.lane.b32.xlu1 %v9326_v39, %s14194_s19 }
 0x249   : > { %1966 = vrot.lane.b32.xlu0 %v9322_v36, %s14192_s22  ;;  %1910 = vrot.lane.b32.xlu1 %v9328_v40, %s14194_s19 }
 0x24d   : > { %2008 = vrot.lane.b32.xlu0 %v9324_v38, %s14190_s21  ;;  %1964 = vrot.lane.b32.xlu1 %v9326_v39, %s14192_s22 }
 0x251   : > { %2012 = vrot.lane.b32.xlu0 %v9322_v36, %s14190_s21  ;;  %1968 = vrot.lane.b32.xlu1 %v9328_v40, %s14192_s22 }
 0x255   : > { %2066 = vrot.lane.b32.xlu0 %v9324_v38, %s14188_s24  ;;  %2010 = vrot.lane.b32.xlu1 %v9326_v39, %s14190_s21 }
 0x259   : > { %2070 = vrot.lane.b32.xlu0 %v9322_v36, %s14188_s24  ;;  %2014 = vrot.lane.b32.xlu1 %v9328_v40, %s14190_s21 }
 0x25d   : > { %2112 = vrot.lane.b32.xlu0 %v9324_v38, %s14184_s23  ;;  %2068 = vrot.lane.b32.xlu1 %v9326_v39, %s14188_s24 }
 0x261   : > { %2116 = vrot.lane.b32.xlu0 %v9322_v36, %s14184_s23  ;;  %2072 = vrot.lane.b32.xlu1 %v9328_v40, %s14188_s24 }
 0x265   : > { %2170 = vrot.lane.b32.xlu0 %v9324_v38, %s14182_s26  ;;  %2114 = vrot.lane.b32.xlu1 %v9326_v39, %s14184_s23 }
 0x269   : > { %2174 = vrot.lane.b32.xlu0 %v9322_v36, %s14182_s26  ;;  %2118 = vrot.lane.b32.xlu1 %v9328_v40, %s14184_s23  ;;  %s14529_s23 = smov 18  }
 0x26d   : > { %2216 = vrot.lane.b32.xlu0 %v9324_v38, %s14180_s25  ;;  %2172 = vrot.lane.b32.xlu1 %v9326_v39, %s14182_s26 }
 0x271   : > { %2220 = vrot.lane.b32.xlu0 %v9322_v36, %s14180_s25  ;;  %2176 = vrot.lane.b32.xlu1 %v9328_v40, %s14182_s26  ;;  %s14493_s26 = smov 94  }
 0x275   : > { %2274 = vrot.lane.b32.xlu0 %v9324_v38, %s14178_s28  ;;  %2218 = vrot.lane.b32.xlu1 %v9326_v39, %s14180_s25 }
 0x279   : > { %2278 = vrot.lane.b32.xlu0 %v9322_v36, %s14178_s28  ;;  %2222 = vrot.lane.b32.xlu1 %v9328_v40, %s14180_s25  ;;  %s14492_s25 = smov 95  }
 0x27d   : > { %2320 = vrot.lane.b32.xlu0 %v9324_v38, %s14176_s27  ;;  %2276 = vrot.lane.b32.xlu1 %v9326_v39, %s14178_s28 }
 0x281   : > { %2324 = vrot.lane.b32.xlu0 %v9322_v36, %s14176_s27  ;;  %2280 = vrot.lane.b32.xlu1 %v9328_v40, %s14178_s28  ;;  %s14491_s28 = smov 96  }
 0x285   : > { %2378 = vrot.lane.b32.xlu0 %v9324_v38, %s14174_s30  ;;  %2322 = vrot.lane.b32.xlu1 %v9326_v39, %s14176_s27 }
 0x289   : > { %2382 = vrot.lane.b32.xlu0 %v9322_v36, %s14174_s30  ;;  %2326 = vrot.lane.b32.xlu1 %v9328_v40, %s14176_s27  ;;  %s14490_s27 = smov 97  }
 0x28d   : > { %2424 = vrot.lane.b32.xlu0 %v9324_v38, %s14172_s29  ;;  %2380 = vrot.lane.b32.xlu1 %v9326_v39, %s14174_s30 }
 0x291   : > { %2428 = vrot.lane.b32.xlu0 %v9322_v36, %s14172_s29  ;;  %2384 = vrot.lane.b32.xlu1 %v9328_v40, %s14174_s30  ;;  %s14489_s30 = smov 98  }
 0x295   : > { %2490 = vrot.lane.b32.xlu0 %v9324_v38, %s14170_s11  ;;  %2426 = vrot.lane.b32.xlu1 %v9326_v39, %s14172_s29 }
 0x299   : > { %2494 = vrot.lane.b32.xlu0 %v9322_v36, %s14170_s11  ;;  %2430 = vrot.lane.b32.xlu1 %v9328_v40, %s14172_s29  ;;  %s14488_s29 = smov 110  }
 0x29d   : > { %2548 = vrot.lane.b32.xlu0 %v9324_v38, %s14479_s12  ;;  %2492 = vrot.lane.b32.xlu1 %v9326_v39, %s14170_s11 }
 0x2a1   : > { %2552 = vrot.lane.b32.xlu0 %v9322_v36, %s14479_s12  ;;  %2496 = vrot.lane.b32.xlu1 %v9328_v40, %s14170_s11  ;;  %s14486_s11 = smov 112  }
 0x2a5   : > { %2594 = vrot.lane.b32.xlu0 %v9324_v38, %s14482_s15  ;;  %2550 = vrot.lane.b32.xlu1 %v9326_v39, %s14479_s12 }
 0x2a9   : > { %2598 = vrot.lane.b32.xlu0 %v9322_v36, %s14482_s15  ;;  %2554 = vrot.lane.b32.xlu1 %v9328_v40, %s14479_s12 }
 0x2ab   : > { %v1863_v51 = vpop.permute.xlu0 %1862  ;;  %v1859_v52 = vpop.permute.xlu1 %1858 }
 0x2ad   : > { %2652 = vrot.lane.b32.xlu0 %v9324_v38, %s14485_s17  ;;  %2596 = vrot.lane.b32.xlu1 %v9326_v39, %s14482_s15 }
 0x2af   : > { %v1905_v56 = vpop.permute.xlu0 %1904  ;;  %v1861_v57 = vpop.permute.xlu1 %1860 }
 0x2b0   : > { %v1867_v58 = vsel %vm395_vm2, %v1861_v57, %v1863_v51  ;;  %v1868_v59 = vsel %vm395_vm2, %v1859_v52, %v1861_v57  ;;  %v1979_v57 = vrot.slane %v8347_v31, %v8668_v3 }
 0x2b1   : > { %v1893_v61 = vmul.f32 %v1879_v54, %v1868_v59  ;;  %v1894_v62 = vmul.f32 %v1883_v55, %v1867_v58  ;;  %2656 = vrot.lane.b32.xlu0 %v9322_v36, %s14485_s17  ;;  %2600 = vrot.lane.b32.xlu1 %v9328_v40, %s14482_s15  ;;  %v1991_v58 = vrot.slane %v8347_v31, %v8671_v4  ;;  %v8349_v31 = vld [vmem:[%s14128_s1 + $0x4] ss:$8 sm:$0xf] }
 0x2b3   : > { %v1897_v6 = vpack.c.bf16 %v1893_v61, %v1893_v61  ;;  %v1898_v7 = vpack.c.bf16 %v1894_v62, %v1894_v62  ;;  %v1909_v8 = vpop.permute.xlu0 %1908  ;;  %v1865_v9 = vpop.permute.xlu1 %1864 }
 0x2b4   : > { %v1866_v10 = vsel %vm395_vm2, %v1863_v51, %v1865_v9  ;;  %v1869_v15 = vsel %vm395_vm2, %v1865_v9, %v1859_v52 }
 0x2b5   : > { %1901 = vst [vmem:[#allocation2 + $0x8] sm:$0xf] %v1897_v6  ;;  %1902 = vst [vmem:[#allocation2 + $0x10] sm:$0xf] %v1898_v7  ;;  %v1892_v17 = vmul.f32 %v1875_v60, %v1869_v15  ;;  %v1895_v18 = vmul.f32 %v1887_v63, %v1866_v10  ;;  %2698 = vrot.lane.b32.xlu0 %v9324_v38, %s14486_s11  ;;  %2654 = vrot.lane.b32.xlu1 %v9326_v39, %s14485_s17 }
 0x2b6   : > { %v8348_v63 = vld [vmem:[%s14128_s1 + $0x3] ss:$8 sm:$0xf] }
 0x2b7   : > { %v1896_v21 = vpack.c.bf16 %v1892_v17, %v1892_v17  ;;  %v1899_v22 = vpack.c.bf16 %v1895_v18, %v1895_v18  ;;  %v1963_v23 = vpop.permute.xlu0 %1962  ;;  %v1907_v24 = vpop.permute.xlu1 %1906  ;;  %v2029_v15 = vrot.slane %v8348_v63, %v8674_v5  ;;  %v2033_v18 = vrot.slane %v8348_v63, %v8665_v2 }
 0x2b8   : > { %v1913_v25 = vsel %vm442_vm1, %v1907_v24, %v1909_v8  ;;  %v1914_v26 = vsel %vm442_vm1, %v1905_v56, %v1907_v24 }
 0x2b9   : > { %1900 = vst [vmem:[#allocation2] sm:$0xf] %v1896_v21  ;;  %1903 = vst [vmem:[#allocation2 + $0x18] sm:$0xf] %v1899_v22  ;;  %v1939_v28 = vmul.f32 %v1925_v16, %v1914_v26  ;;  %v1940_v29 = vmul.f32 %v1929_v20, %v1913_v25  ;;  %2702 = vrot.lane.b32.xlu0 %v9322_v36, %s14486_s11  ;;  %2658 = vrot.lane.b32.xlu1 %v9328_v40, %s14485_s17 }
 0x2bb   : > { %v1943_v14 = vpack.c.bf16 %v1939_v28, %v1939_v28  ;;  %v1944_v32 = vpack.c.bf16 %v1940_v29, %v1940_v29  ;;  %v1967_v33 = vpop.permute.xlu0 %1966  ;;  %v1911_v12 = vpop.permute.xlu1 %1910 }
 0x2bc   : > { %v1912_v34 = vsel %vm442_vm1, %v1909_v8, %v1911_v12  ;;  %v1915_v35 = vsel %vm442_vm1, %v1911_v12, %v1905_v56 }
 0x2bd   : > { %v1951_v11 = vrot.slane %v1943_v14, 4  ;;  %v1952_v41 = vrot.slane %v1944_v32, 4  ;;  %v1938_v42 = vmul.f32 %v1921_v27, %v1915_v35  ;;  %v1941_v43 = vmul.f32 %v1933_v30, %v1912_v34  ;;  %2756 = vrot.lane.b32.xlu0 %v9324_v38, %s14487_s18  ;;  %2700 = vrot.lane.b32.xlu1 %v9326_v39, %s14486_s11 }
 0x2be   : > { %v2025_v27 = vrot.slane %v8348_v63, %v8668_v3  ;;  %v2037_v30 = vrot.slane %v8348_v63, %v8671_v4 }
 0x2bf   : > { %1959 = vst [vmem:[#allocation2 + $0x8] sm:$0xf0] %v1951_v11  ;;  %1960 = vst [vmem:[#allocation2 + $0x10] sm:$0xf0] %v1952_v41  ;;  %v1942_v50 = vpack.c.bf16 %v1938_v42, %v1938_v42  ;;  %v1945_v51 = vpack.c.bf16 %v1941_v43, %v1941_v43  ;;  %v2009_v52 = vpop.permute.xlu0 %2008  ;;  %v1965_v54 = vpop.permute.xlu1 %1964  ;;  %v2087_v41 = vrot.slane %v8349_v31, %v8674_v5 }
 0x2c0   : > { %v1971_v55 = vsel %vm502_vm4, %v1965_v54, %v1967_v33  ;;  %v1972_v56 = vsel %vm502_vm4, %v1963_v23, %v1965_v54  ;;  %v2091_v42 = vrot.slane %v8349_v31, %v8665_v2 }
 0x2c1   : > { %v1950_v59 = vrot.slane %v1942_v50, 4  ;;  %v1953_v60 = vrot.slane %v1945_v51, 4  ;;  %v1997_v61 = vmul.f32 %v1983_v37, %v1972_v56  ;;  %v1998_v62 = vmul.f32 %v1987_v13, %v1971_v55  ;;  %2760 = vrot.lane.b32.xlu0 %v9322_v36, %s14487_s18  ;;  %2704 = vrot.lane.b32.xlu1 %v9328_v40, %s14486_s11 }
 0x2c3   : > { %1958 = vst [vmem:[#allocation2] sm:$0xf0] %v1950_v59  ;;  %1961 = vst [vmem:[#allocation2 + $0x18] sm:$0xf0] %v1953_v60  ;;  %v2001_v0 = vpack.c.bf16 %v1997_v61, %v1997_v61  ;;  %v2002_v6 = vpack.c.bf16 %v1998_v62, %v1998_v62  ;;  %v2013_v7 = vpop.permute.xlu0 %2012  ;;  %v1969_v8 = vpop.permute.xlu1 %1968  ;;  %v2083_v60 = vrot.slane %v8349_v31, %v8668_v3 }
 0x2c4   : > { %v1970_v9 = vsel %vm502_vm4, %v1967_v33, %v1969_v8  ;;  %v1973_v10 = vsel %vm502_vm4, %v1969_v8, %v1963_v23  ;;  %v2095_v61 = vrot.slane %v8349_v31, %v8671_v4 }
 0x2c5   : > { %2005 = vst [vmem:[#allocation2 + $0x28] sm:$0xf] %v2001_v0  ;;  %2006 = vst [vmem:[#allocation2 + $0x30] sm:$0xf] %v2002_v6  ;;  %v1996_v16 = vmul.f32 %v1979_v57, %v1973_v10  ;;  %v1999_v17 = vmul.f32 %v1991_v58, %v1970_v9  ;;  %2802 = vrot.lane.b32.xlu0 %v9324_v38, %s14488_s29  ;;  %2758 = vrot.lane.b32.xlu1 %v9326_v39, %s14487_s18 }
 0x2c6   : > { %v3117_v20 = vld [vmem:[#allocation2 + $0x8] sm:$0xff]  ;;  %v3118_v37 = vld [vmem:[#allocation2 + $0x10] sm:$0xff] }
 0x2c7   : > { %v2000_v21 = vpack.c.bf16 %v1996_v16, %v1996_v16  ;;  %v2003_v22 = vpack.c.bf16 %v1999_v17, %v1999_v17  ;;  %v2067_v24 = vpop.permute.xlu0 %2066  ;;  %3204 = vmatprep.subr.bf16.mxu0 %v3117_v20  ;;  %v2011_v23 = vpop.permute.xlu1 %2010 }
 0x2c8   : > { %v2017_v25 = vsel %vm550_vm3, %v2011_v23, %v2013_v7  ;;  %v2018_v26 = vsel %vm550_vm3, %v2009_v52, %v2011_v23 }
 0x2c9   : > { %2004 = vst [vmem:[#allocation2 + $0x20] sm:$0xf] %v2000_v21  ;;  %2007 = vst [vmem:[#allocation2 + $0x38] sm:$0xf] %v2003_v22  ;;  %v2043_v28 = vmul.f32 %v2029_v15, %v2018_v26  ;;  %v2044_v29 = vmul.f32 %v2033_v18, %v2017_v25  ;;  %2806 = vrot.lane.b32.xlu0 %v9322_v36, %s14488_s29  ;;  %2762 = vrot.lane.b32.xlu1 %v9328_v40, %s14487_s18 }
 0x2ca   : > { %v3116_v14 = vld [vmem:[#allocation2] sm:$0xff]  ;;  %v3119_v32 = vld [vmem:[#allocation2 + $0x18] sm:$0xff] }
 0x2cb   : > { %v2047_v33 = vpack.c.bf16 %v2043_v28, %v2043_v28  ;;  %v2048_v12 = vpack.c.bf16 %v2044_v29, %v2044_v29  ;;  %v2071_v34 = vpop.permute.xlu0 %2070  ;;  %3205 = vmatpush1.bf16.msra.mxu0 %v3116_v14  ;;  %3247 = vmatprep.subr.bf16.mxu1 %v3119_v32  ;;  %v2015_v35 = vpop.permute.xlu1 %2014 }
 0x2cc   : > { %v2016_v13 = vsel %vm550_vm3, %v2013_v7, %v2015_v35  ;;  %v2019_v11 = vsel %vm550_vm3, %v2015_v35, %v2009_v52  ;;  %3248 = vmatpush1.bf16.msra.mxu1 %v3118_v37  ;;  %v8350_v7 = vld [vmem:[%s14128_s1 + $0x5] ss:$8 sm:$0xf] }
 0x2cd   : > { %v2055_v43 = vrot.slane %v2047_v33, 4  ;;  %v2056_v50 = vrot.slane %v2048_v12, 4  ;;  %v2042_v51 = vmul.f32 %v2025_v27, %v2019_v11  ;;  %v2045_v54 = vmul.f32 %v2037_v30, %v2016_v13  ;;  %2860 = vrot.lane.b32.xlu0 %v9324_v38, %s14489_s30  ;;  %2804 = vrot.lane.b32.xlu1 %v9326_v39, %s14488_s29  ;;  %v8351_v33 = vld [vmem:[%s14128_s1 + $0x6] ss:$8 sm:$0xf] }
 0x2ce   : > { %v2133_v18 = vrot.slane %v8350_v7, %v8674_v5  ;;  %v2137_v22 = vrot.slane %v8350_v7, %v8665_v2  ;;  %v2129_v30 = vrot.slane %v8350_v7, %v8668_v3  ;;  %v2141_v32 = vrot.slane %v8350_v7, %v8671_v4 }
 0x2cf   : > { %2063 = vst [vmem:[#allocation2 + $0x28] sm:$0xf0] %v2055_v43  ;;  %2064 = vst [vmem:[#allocation2 + $0x30] sm:$0xf0] %v2056_v50  ;;  %v2046_v55 = vpack.c.bf16 %v2042_v51, %v2042_v51  ;;  %v2049_v56 = vpack.c.bf16 %v2045_v54, %v2045_v54  ;;  %v2113_v52 = vpop.permute.xlu0 %2112  ;;  %v2069_v57 = vpop.permute.xlu1 %2068  ;;  %v2191_v50 = vrot.slane %v8351_v33, %v8674_v5 }
 0x2d0   : > { %v2075_v58 = vsel %vm610_vm6, %v2069_v57, %v2071_v34  ;;  %v2076_v59 = vsel %vm610_vm6, %v2067_v24, %v2069_v57  ;;  %v2195_v51 = vrot.slane %v8351_v33, %v8665_v2 }
 0x2d1   : > { %v2054_v62 = vrot.slane %v2046_v55, 4  ;;  %v2057_v63 = vrot.slane %v2049_v56, 4  ;;  %v2101_v0 = vmul.f32 %v2087_v41, %v2076_v59  ;;  %v2102_v6 = vmul.f32 %v2091_v42, %v2075_v58  ;;  %2864 = vrot.lane.b32.xlu0 %v9322_v36, %s14489_s30  ;;  %2808 = vrot.lane.b32.xlu1 %v9328_v40, %s14488_s29 }
 0x2d3   : > { %2062 = vst [vmem:[#allocation2 + $0x20] sm:$0xf0] %v2054_v62  ;;  %2065 = vst [vmem:[#allocation2 + $0x38] sm:$0xf0] %v2057_v63  ;;  %v2105_v8 = vpack.c.bf16 %v2101_v0, %v2101_v0  ;;  %v2106_v9 = vpack.c.bf16 %v2102_v6, %v2102_v6  ;;  %v2117_v10 = vpop.permute.xlu0 %2116  ;;  %v2073_v15 = vpop.permute.xlu1 %2072  ;;  %v2187_v63 = vrot.slane %v8351_v33, %v8668_v3 }
 0x2d4   : > { %v2074_v16 = vsel %vm610_vm6, %v2071_v34, %v2073_v15  ;;  %v2077_v17 = vsel %vm610_vm6, %v2073_v15, %v2067_v24  ;;  %v2199_v0 = vrot.slane %v8351_v33, %v8671_v4 }
 0x2d5   : > { %2109 = vst [vmem:[#allocation2 + $0x48] sm:$0xf] %v2105_v8  ;;  %2110 = vst [vmem:[#allocation2 + $0x50] sm:$0xf] %v2106_v9  ;;  %v2100_v20 = vmul.f32 %v2083_v60, %v2077_v17  ;;  %v2103_v21 = vmul.f32 %v2095_v61, %v2074_v16  ;;  %2906 = vrot.lane.b32.xlu0 %v9324_v38, %s14490_s27  ;;  %2862 = vrot.lane.b32.xlu1 %v9326_v39, %s14489_s30 }
 0x2d6   : > { %v3121_v23 = vld [vmem:[#allocation2 + $0x28] sm:$0xff]  ;;  %v3122_v41 = vld [vmem:[#allocation2 + $0x30] sm:$0xff] }
 0x2d7   : > { %v2104_v25 = vpack.c.bf16 %v2100_v20, %v2100_v20  ;;  %v2107_v26 = vpack.c.bf16 %v2103_v21, %v2103_v21  ;;  %v2171_v27 = vpop.permute.xlu0 %2170  ;;  %3206 = vmatprep.subr.bf16.mxu0 %v3121_v23  ;;  %v2115_v24 = vpop.permute.xlu1 %2114 }
 0x2d8   : > { %v2121_v28 = vsel %vm658_vm5, %v2115_v24, %v2117_v10  ;;  %v2122_v29 = vsel %vm658_vm5, %v2113_v52, %v2115_v24 }
 0x2d9   : > { %2108 = vst [vmem:[#allocation2 + $0x40] sm:$0xf] %v2104_v25  ;;  %2111 = vst [vmem:[#allocation2 + $0x58] sm:$0xf] %v2107_v26  ;;  %v2147_v31 = vmul.f32 %v2133_v18, %v2122_v29  ;;  %v2148_v14 = vmul.f32 %v2137_v22, %v2121_v28  ;;  %2910 = vrot.lane.b32.xlu0 %v9322_v36, %s14490_s27  ;;  %2866 = vrot.lane.b32.xlu1 %v9328_v40, %s14489_s30 }
 0x2da   : > { %v3120_v12 = vld [vmem:[#allocation2 + $0x20] sm:$0xff]  ;;  %v3123_v34 = vld [vmem:[#allocation2 + $0x38] sm:$0xff] }
 0x2db   : > { %v2151_v35 = vpack.c.bf16 %v2147_v31, %v2147_v31  ;;  %v2152_v37 = vpack.c.bf16 %v2148_v14, %v2148_v14  ;;  %v2175_v13 = vpop.permute.xlu0 %2174  ;;  %3207 = vmatpush1.bf16.msra.mxu0 %v3120_v12  ;;  %3249 = vmatprep.subr.bf16.mxu1 %v3123_v34  ;;  %v2119_v11 = vpop.permute.xlu1 %2118 }
 0x2dc   : > { %v2120_v42 = vsel %vm658_vm5, %v2117_v10, %v2119_v11  ;;  %v2123_v43 = vsel %vm658_vm5, %v2119_v11, %v2113_v52  ;;  %3250 = vmatpush1.bf16.msra.mxu1 %v3122_v41  ;;  %v8352_v10 = vld [vmem:[%s14128_s1 + $0x7] ss:$8 sm:$0xf] }
 0x2dd   : > { %v2159_v54 = vrot.slane %v2151_v35, 4  ;;  %v2160_v55 = vrot.slane %v2152_v37, 4  ;;  %v2146_v56 = vmul.f32 %v2129_v30, %v2123_v43  ;;  %v2149_v57 = vmul.f32 %v2141_v32, %v2120_v42  ;;  %2964 = vrot.lane.b32.xlu0 %v9324_v38, %s14491_s28  ;;  %2908 = vrot.lane.b32.xlu1 %v9326_v39, %s14490_s27  ;;  %v8353_v35 = vld [vmem:[%s14128_s1 + $0x20] ss:$8 sm:$0xf] }
 0x2de   : > { %v2237_v22 = vrot.slane %v8352_v10, %v8674_v5  ;;  %v2241_v26 = vrot.slane %v8352_v10, %v8665_v2  ;;  %v2233_v32 = vrot.slane %v8352_v10, %v8668_v3  ;;  %v2245_v34 = vrot.slane %v8352_v10, %v8671_v4 }
 0x2df   : > { %2167 = vst [vmem:[#allocation2 + $0x48] sm:$0xf0] %v2159_v54  ;;  %2168 = vst [vmem:[#allocation2 + $0x50] sm:$0xf0] %v2160_v55  ;;  %v2150_v58 = vpack.c.bf16 %v2146_v56, %v2146_v56  ;;  %v2153_v59 = vpack.c.bf16 %v2149_v57, %v2149_v57  ;;  %v2217_v52 = vpop.permute.xlu0 %2216  ;;  %v2173_v60 = vpop.permute.xlu1 %2172  ;;  %v2295_v55 = vrot.slane %v8353_v35, %v8674_v5 }
 0x2e0   : > { %v2179_v61 = vsel %vm718_vm8, %v2173_v60, %v2175_v13  ;;  %v2180_v62 = vsel %vm718_vm8, %v2171_v27, %v2173_v60  ;;  %v2299_v56 = vrot.slane %v8353_v35, %v8665_v2 }
 0x2e1   : > { %v2158_v6 = vrot.slane %v2150_v58, 4  ;;  %v2161_v7 = vrot.slane %v2153_v59, 4  ;;  %v2205_v8 = vmul.f32 %v2191_v50, %v2180_v62  ;;  %v2206_v9 = vmul.f32 %v2195_v51, %v2179_v61  ;;  %2968 = vrot.lane.b32.xlu0 %v9322_v36, %s14491_s28  ;;  %2912 = vrot.lane.b32.xlu1 %v9328_v40, %s14490_s27 }
 0x2e3   : > { %2166 = vst [vmem:[#allocation2 + $0x40] sm:$0xf0] %v2158_v6  ;;  %2169 = vst [vmem:[#allocation2 + $0x58] sm:$0xf0] %v2161_v7  ;;  %v2209_v15 = vpack.c.bf16 %v2205_v8, %v2205_v8  ;;  %v2210_v16 = vpack.c.bf16 %v2206_v9, %v2206_v9  ;;  %v2221_v17 = vpop.permute.xlu0 %2220  ;;  %v2177_v18 = vpop.permute.xlu1 %2176  ;;  %v2291_v7 = vrot.slane %v8353_v35, %v8668_v3 }
 0x2e4   : > { %v2178_v20 = vsel %vm718_vm8, %v2175_v13, %v2177_v18  ;;  %v2181_v21 = vsel %vm718_vm8, %v2177_v18, %v2171_v27  ;;  %v2303_v8 = vrot.slane %v8353_v35, %v8671_v4 }
 0x2e5   : > { %2213 = vst [vmem:[#allocation2 + $0x68] sm:$0xf] %v2209_v15  ;;  %2214 = vst [vmem:[#allocation2 + $0x70] sm:$0xf] %v2210_v16  ;;  %v2204_v23 = vmul.f32 %v2187_v63, %v2181_v21  ;;  %v2207_v25 = vmul.f32 %v2199_v0, %v2178_v20  ;;  %3010 = vrot.lane.b32.xlu0 %v9324_v38, %s14492_s25  ;;  %2966 = vrot.lane.b32.xlu1 %v9326_v39, %s14491_s28 }
 0x2e6   : > { %v3125_v24 = vld [vmem:[#allocation2 + $0x48] sm:$0xff]  ;;  %v3126_v50 = vld [vmem:[#allocation2 + $0x50] sm:$0xff] }
 0x2e7   : > { %v2208_v28 = vpack.c.bf16 %v2204_v23, %v2204_v23  ;;  %v2211_v29 = vpack.c.bf16 %v2207_v25, %v2207_v25  ;;  %v2275_v30 = vpop.permute.xlu0 %2274  ;;  %3208 = vmatprep.subr.bf16.mxu0 %v3125_v24  ;;  %v2219_v27 = vpop.permute.xlu1 %2218  ;;  %v8354_v16 = vld [vmem:[%s14128_s1 + $0x21] ss:$8 sm:$0xf] }
 0x2e8   : > { %v2225_v31 = vsel %vm766_vm7, %v2219_v27, %v2221_v17  ;;  %v2226_v14 = vsel %vm766_vm7, %v2217_v52, %v2219_v27  ;;  %v2345_v24 = vrot.slane %v8354_v16, %v8665_v2  ;;  %v2349_v35 = vrot.slane %v8354_v16, %v8671_v4 }
 0x2e9   : > { %2212 = vst [vmem:[#allocation2 + $0x60] sm:$0xf] %v2208_v28  ;;  %2215 = vst [vmem:[#allocation2 + $0x78] sm:$0xf] %v2211_v29  ;;  %v2251_v33 = vmul.f32 %v2237_v22, %v2226_v14  ;;  %v2252_v12 = vmul.f32 %v2241_v26, %v2225_v31  ;;  %3014 = vrot.lane.b32.xlu0 %v9322_v36, %s14492_s25  ;;  %2970 = vrot.lane.b32.xlu1 %v9328_v40, %s14491_s28  ;;  %v8536_v29 = vld [vmem:[%s14494_s4 + $0x4] ss:$8 sps:$4 sm:$0xff]  }
 0x2ea   : > { %v3124_v37 = vld [vmem:[#allocation2 + $0x40] sm:$0xff]  ;;  %v3127_v13 = vld [vmem:[#allocation2 + $0x58] sm:$0xff]  ;;  %v2341_v26 = vrot.slane %v8354_v16, %v8674_v5  ;;  %8372 = vmatprep.mubr.msk.bf16.mxu0 %vm1755_vm11, %v8536_v29  ;;  %8374 = vmatprep.mubr.msk.bf16.mxu1 %vm1755_vm11, %v8536_v29  ;;  %vm14495_vm11 = vcmp.lt.s32.totalorder %v8816_v19, 126 }
 0x2eb   : > { %v2255_v11 = vpack.c.bf16 %v2251_v33, %v2251_v33  ;;  %v2256_v41 = vpack.c.bf16 %v2252_v12, %v2252_v12  ;;  %v2279_v42 = vpop.permute.xlu0 %2278  ;;  %3209 = vmatpush1.bf16.msra.mxu0 %v3124_v37  ;;  %3251 = vmatprep.subr.bf16.mxu1 %v3127_v13  ;;  %v2223_v43 = vpop.permute.xlu1 %2222  ;;  %v8355_v37 = vld [vmem:[%s14128_s1 + $0x22] ss:$8 sm:$0xf] }
 0x2ec   : > { %v2224_v51 = vsel %vm766_vm7, %v2221_v17, %v2223_v43  ;;  %v2227_v54 = vsel %vm766_vm7, %v2223_v43, %v2217_v52  ;;  %3252 = vmatpush1.bf16.msra.mxu1 %v3126_v50 }
 0x2ed   : > { %v2263_v57 = vrot.slane %v2255_v11, 4  ;;  %v2264_v58 = vrot.slane %v2256_v41, 4  ;;  %v2250_v59 = vmul.f32 %v2233_v32, %v2227_v54  ;;  %v2253_v60 = vmul.f32 %v2245_v34, %v2224_v51  ;;  %3068 = vrot.lane.b32.xlu0 %v9324_v38, %s14493_s26  ;;  %3012 = vrot.lane.b32.xlu1 %v9326_v39, %s14492_s25 }
 0x2ee   : > { %v2337_v34 = vrot.slane %v8354_v16, %v8668_v3  ;;  %v8356_v16 = vld [vmem:[%s14128_s1 + $0x23] ss:$8 sm:$0xf] }
 0x2ef   : > { %2271 = vst [vmem:[#allocation2 + $0x68] sm:$0xf0] %v2263_v57  ;;  %2272 = vst [vmem:[#allocation2 + $0x70] sm:$0xf0] %v2264_v58  ;;  %v2254_v61 = vpack.c.bf16 %v2250_v59, %v2250_v59  ;;  %v2257_v62 = vpack.c.bf16 %v2253_v60, %v2253_v60  ;;  %v2321_v52 = vpop.permute.xlu0 %2320  ;;  %v2277_v63 = vpop.permute.xlu1 %2276 }
 0x2f0   : > { %v2283_v0 = vsel %vm826_vm10, %v2277_v63, %v2279_v42  ;;  %v2284_v6 = vsel %vm826_vm10, %v2275_v30, %v2277_v63 }
 0x2f1   : > { %v2262_v38 = vrot.slane %v2254_v61, 4  ;;  %v2265_v9 = vrot.slane %v2257_v62, 4  ;;  %v2309_v10 = vmul.f32 %v2295_v55, %v2284_v6  ;;  %v2310_v15 = vmul.f32 %v2299_v56, %v2283_v0  ;;  %3072 = vrot.lane.b32.xlu0 %v9322_v36, %s14493_s26  ;;  %3016 = vrot.lane.b32.xlu1 %v9328_v40, %s14492_s25 }
 0x2f2   : > { %v2399_v55 = vrot.slane %v8355_v37, %v8674_v5  ;;  %v2403_v56 = vrot.slane %v8355_v37, %v8665_v2 }
 0x2f3   : > { %2270 = vst [vmem:[#allocation2 + $0x60] sm:$0xf0] %v2262_v38  ;;  %2273 = vst [vmem:[#allocation2 + $0x78] sm:$0xf0] %v2265_v9  ;;  %v2313_v17 = vpack.c.bf16 %v2309_v10, %v2309_v10  ;;  %v2314_v18 = vpack.c.bf16 %v2310_v15, %v2310_v15  ;;  %v2325_v20 = vpop.permute.xlu0 %2324  ;;  %v2281_v21 = vpop.permute.xlu1 %2280 }
 0x2f4   : > { %v2282_v22 = vsel %vm826_vm10, %v2279_v42, %v2281_v21  ;;  %v2285_v23 = vsel %vm826_vm10, %v2281_v21, %v2275_v30 }
 0x2f5   : > { %2317 = vst [vmem:[#allocation2 + $0x88] sm:$0xf] %v2313_v17  ;;  %2318 = vst [vmem:[#allocation2 + $0x90] sm:$0xf] %v2314_v18  ;;  %v2308_v36 = vmul.f32 %v2291_v7, %v2285_v23  ;;  %v2311_v25 = vmul.f32 %v2303_v8, %v2282_v22  ;;  %3070 = vrot.lane.b32.xlu1 %v9326_v39, %s14493_s26  ;;  %v2395_v7 = vrot.slane %v8355_v37, %v8668_v3 }
 0x2f6   : > { %v3129_v28 = vld [vmem:[#allocation2 + $0x68] sm:$0xff]  ;;  %v3130_v51 = vld [vmem:[#allocation2 + $0x70] sm:$0xff]  ;;  %v2407_v8 = vrot.slane %v8355_v37, %v8671_v4 }
 0x2f7   : > { %v2312_v27 = vpack.c.bf16 %v2308_v36, %v2308_v36  ;;  %v2315_v31 = vpack.c.bf16 %v2311_v25, %v2311_v25  ;;  %v2379_v14 = vpop.permute.xlu0 %2378  ;;  %3210 = vmatprep.subr.bf16.mxu0 %v3129_v28  ;;  %v2323_v30 = vpop.permute.xlu1 %2322 }
 0x2f8   : > { %v2329_v32 = vsel %vm874_vm9, %v2323_v30, %v2325_v20  ;;  %v2330_v39 = vsel %vm874_vm9, %v2321_v52, %v2323_v30 }
 0x2f9   : > { %2316 = vst [vmem:[#allocation2 + $0x80] sm:$0xf] %v2312_v27  ;;  %2319 = vst [vmem:[#allocation2 + $0x98] sm:$0xf] %v2315_v31  ;;  %v2355_v33 = vmul.f32 %v2341_v26, %v2330_v39  ;;  %v2356_v12 = vmul.f32 %v2345_v24, %v2329_v32  ;;  %3074 = vrot.lane.b32.xlu1 %v9328_v40, %s14493_s26  ;;  %v2445_v26 = vrot.slane %v8356_v16, %v8674_v5 }
 0x2fa   : > { %v3128_v13 = vld [vmem:[#allocation2 + $0x60] sm:$0xff]  ;;  %v3131_v11 = vld [vmem:[#allocation2 + $0x78] sm:$0xff]  ;;  %v2449_v24 = vrot.slane %v8356_v16, %v8665_v2 }
 0x2fb   : > { %v2359_v41 = vpack.c.bf16 %v2355_v33, %v2355_v33  ;;  %v2360_v42 = vpack.c.bf16 %v2356_v12, %v2356_v12  ;;  %v2383_v43 = vpop.permute.xlu0 %2382  ;;  %3211 = vmatpush1.bf16.msra.mxu0 %v3128_v13  ;;  %3253 = vmatprep.subr.bf16.mxu1 %v3131_v11  ;;  %v2327_v50 = vpop.permute.xlu1 %2326  ;;  %v2441_v12 = vrot.slane %v8356_v16, %v8668_v3 }
 0x2fc   : > { %v2328_v40 = vsel %vm874_vm9, %v2325_v20, %v2327_v50  ;;  %v2331_v54 = vsel %vm874_vm9, %v2327_v50, %v2321_v52  ;;  %3254 = vmatpush1.bf16.msra.mxu1 %v3130_v51 }
 0x2fd   : > { %v2367_v57 = vrot.slane %v2359_v41, 4  ;;  %v2368_v58 = vrot.slane %v2360_v42, 4  ;;  %v2354_v59 = vmul.f32 %v2337_v34, %v2331_v54  ;;  %v2357_v60 = vmul.f32 %v2349_v35, %v2328_v40  ;;  %v8357_v35 = vld [vmem:[%s14128_s1 + $0x25] ss:$8 sm:$0xf] }
 0x2fe   : > { %v2453_v34 = vrot.slane %v8356_v16, %v8671_v4  ;;  %v2507_v54 = vrot.slane %v8357_v35, %v8668_v3 }
 0x2ff   : > { %2375 = vst [vmem:[#allocation2 + $0x88] sm:$0xf0] %v2367_v57  ;;  %2376 = vst [vmem:[#allocation2 + $0x90] sm:$0xf0] %v2368_v58  ;;  %v2358_v61 = vpack.c.bf16 %v2354_v59, %v2354_v59  ;;  %v2361_v62 = vpack.c.bf16 %v2357_v60, %v2357_v60  ;;  %v2425_v63 = vpop.permute.xlu0 %2424  ;;  %v2381_v0 = vpop.permute.xlu1 %2380 }
 0x300   : > { %v2387_v6 = vsel %vm14271_vm13, %v2381_v0, %v2383_v43  ;;  %v2388_v52 = vsel %vm14271_vm13, %v2379_v14, %v2381_v0 }
 0x301   : > { %v2366_v38 = vrot.slane %v2358_v61, 4  ;;  %v2369_v9 = vrot.slane %v2361_v62, 4  ;;  %v2413_v10 = vmul.f32 %v2399_v55, %v2388_v52  ;;  %v2414_v15 = vmul.f32 %v2403_v56, %v2387_v6 }
 0x302   : > { %v2511_v55 = vrot.slane %v8357_v35, %v8674_v5  ;;  %v2515_v52 = vrot.slane %v8357_v35, %v8665_v2 }
 0x303   : > { %2374 = vst [vmem:[#allocation2 + $0x80] sm:$0xf0] %v2366_v38  ;;  %2377 = vst [vmem:[#allocation2 + $0x98] sm:$0xf0] %v2369_v9  ;;  %v2417_v17 = vpack.c.bf16 %v2413_v10, %v2413_v10  ;;  %v2418_v18 = vpack.c.bf16 %v2414_v15, %v2414_v15  ;;  %v2429_v20 = vpop.permute.xlu0 %2428  ;;  %v2385_v21 = vpop.permute.xlu1 %2384 }
 0x304   : > { %v2386_v22 = vsel %vm14271_vm13, %v2383_v43, %v2385_v21  ;;  %v2389_v23 = vsel %vm14271_vm13, %v2385_v21, %v2379_v14  ;;  %v8358_v15 = vld [vmem:[%s14128_s1 + $0x26] ss:$8 sm:$0xf] }
 0x305   : > { %2421 = vst [vmem:[#allocation2 + $0xa8] sm:$0xf] %v2417_v17  ;;  %2422 = vst [vmem:[#allocation2 + $0xb0] sm:$0xf] %v2418_v18  ;;  %v2412_v36 = vmul.f32 %v2395_v7, %v2389_v23  ;;  %v2415_v25 = vmul.f32 %v2407_v8, %v2386_v22  ;;  %v2519_v7 = vrot.slane %v8357_v35, %v8671_v4 }
 0x306   : > { %v3133_v28 = vld [vmem:[#allocation2 + $0x88] sm:$0xff]  ;;  %v3134_v50 = vld [vmem:[#allocation2 + $0x90] sm:$0xff]  ;;  %v2565_v23 = vrot.slane %v8358_v15, %v8668_v3 }
 0x307   : > { %v2416_v29 = vpack.c.bf16 %v2412_v36, %v2412_v36  ;;  %v2419_v27 = vpack.c.bf16 %v2415_v25, %v2415_v25  ;;  %v2491_v31 = vpop.permute.xlu0 %2490  ;;  %3212 = vmatprep.subr.bf16.mxu0 %v3133_v28  ;;  %v2427_v30 = vpop.permute.xlu1 %2426  ;;  %v2569_v36 = vrot.slane %v8358_v15, %v8674_v5 }
 0x308   : > { %v2433_v32 = vsel %vm14187_vm12, %v2427_v30, %v2429_v20  ;;  %v2434_v14 = vsel %vm14187_vm12, %v2425_v63, %v2427_v30 }
 0x309   : > { %2420 = vst [vmem:[#allocation2 + $0xa0] sm:$0xf] %v2416_v29  ;;  %2423 = vst [vmem:[#allocation2 + $0xb8] sm:$0xf] %v2419_v27  ;;  %v2459_v39 = vmul.f32 %v2445_v26, %v2434_v14  ;;  %v2460_v33 = vmul.f32 %v2449_v24, %v2433_v32 }
 0x30a   : > { %v3132_v37 = vld [vmem:[#allocation2 + $0x80] sm:$0xff]  ;;  %v3135_v13 = vld [vmem:[#allocation2 + $0x98] sm:$0xff] }
 0x30b   : > { %v2463_v11 = vpack.c.bf16 %v2459_v39, %v2459_v39  ;;  %v2464_v41 = vpack.c.bf16 %v2460_v33, %v2460_v33  ;;  %v2495_v42 = vpop.permute.xlu0 %2494  ;;  %3213 = vmatpush1.bf16.msra.mxu0 %v3132_v37  ;;  %3255 = vmatprep.subr.bf16.mxu1 %v3135_v13  ;;  %v2431_v43 = vpop.permute.xlu1 %2430  ;;  %v2573_v33 = vrot.slane %v8358_v15, %v8665_v2 }
 0x30c   : > { %v2432_v51 = vsel %vm14187_vm12, %v2429_v20, %v2431_v43  ;;  %v2435_v40 = vsel %vm14187_vm12, %v2431_v43, %v2425_v63  ;;  %3256 = vmatpush1.bf16.msra.mxu1 %v3134_v50  ;;  %vm14522_vm12 = vcmp.lt.s32.totalorder %v8816_v19, 95 }
 0x30d   : > { %v2471_v56 = vrot.slane %v2463_v11, 4  ;;  %v2472_v57 = vrot.slane %v2464_v41, 4  ;;  %v2458_v58 = vmul.f32 %v2441_v12, %v2435_v40  ;;  %v2461_v59 = vmul.f32 %v2453_v34, %v2432_v51 }
 0x30e   : > { %v2577_v12 = vrot.slane %v8358_v15, %v8671_v4 }
 0x30f   : > { %2479 = vst [vmem:[#allocation2 + $0xa8] sm:$0xf0] %v2471_v56  ;;  %2480 = vst [vmem:[#allocation2 + $0xb0] sm:$0xf0] %v2472_v57  ;;  %v2462_v60 = vpack.c.bf16 %v2458_v58, %v2458_v58  ;;  %v2465_v61 = vpack.c.bf16 %v2461_v59, %v2461_v59  ;;  %v2549_v62 = vpop.permute.xlu0 %2548  ;;  %v2493_v0 = vpop.permute.xlu1 %2492 }
 0x310   : > { %v2499_v6 = vsel %vm14186_vm14, %v2493_v0, %v2495_v42  ;;  %v2500_v63 = vsel %vm14186_vm14, %v2491_v31, %v2493_v0 }
 0x311   : > { %v2470_v8 = vrot.slane %v2462_v60, 4  ;;  %v2473_v38 = vrot.slane %v2465_v61, 4  ;;  %v2524_v9 = vmul.f32 %v2507_v54, %v2500_v63  ;;  %v2525_v10 = vmul.f32 %v2511_v55, %v2499_v6 }
 0x313   : > { %2478 = vst [vmem:[#allocation2 + $0xa0] sm:$0xf0] %v2470_v8  ;;  %2481 = vst [vmem:[#allocation2 + $0xb8] sm:$0xf0] %v2473_v38  ;;  %v2528_v16 = vpack.c.bf16 %v2524_v9, %v2524_v9  ;;  %v2529_v17 = vpack.c.bf16 %v2525_v10, %v2525_v10  ;;  %v2553_v18 = vpop.permute.xlu0 %2552  ;;  %v2497_v20 = vpop.permute.xlu1 %2496 }
 0x314   : > { %v2498_v21 = vsel %vm14186_vm14, %v2495_v42, %v2497_v20  ;;  %v2501_v22 = vsel %vm14186_vm14, %v2497_v20, %v2491_v31  ;;  %vm14496_vm14 = vmmov %vm14495_vm11  ;;  %v8359_v42 = vld [vmem:[%s14128_s1 + $0x27] ss:$8 sm:$0xf] }
 0x315   : > { %v2536_v25 = vrot.slane %v2528_v16, 4  ;;  %v2537_v26 = vrot.slane %v2529_v17, 4  ;;  %v2526_v24 = vmul.f32 %v2515_v52, %v2498_v21  ;;  %v2527_v28 = vmul.f32 %v2519_v7, %v2501_v22  ;;  %v8360_v16 = vld [vmem:[%s14128_s1 + $0x40] ss:$8 sm:$0xf] }
 0x316   : > { %v3137_v29 = vld [vmem:[#allocation2 + $0xa8] sm:$0xff]  ;;  %v3138_v54 = vld [vmem:[#allocation2 + $0xb0] sm:$0xff]  ;;  %v2611_v59 = vrot.slane %v8359_v42, %v8668_v3  ;;  %v2615_v60 = vrot.slane %v8359_v42, %v8674_v5  ;;  %v2619_v10 = vrot.slane %v8359_v42, %v8665_v2  ;;  %v2623_v15 = vrot.slane %v8359_v42, %v8671_v4 }
 0x317   : > { %2544 = vst [vmem:[#allocation2 + $0xc0] sm:$0xf0] %v2536_v25  ;;  %2545 = vst [vmem:[#allocation2 + $0xc8] sm:$0xf0] %v2537_v26  ;;  %v2530_v27 = vpack.c.bf16 %v2526_v24, %v2526_v24  ;;  %v2531_v30 = vpack.c.bf16 %v2527_v28, %v2527_v28  ;;  %v2595_v32 = vpop.permute.xlu0 %2594  ;;  %3214 = vmatprep.subr.bf16.mxu0 %v3137_v29  ;;  %v2551_v14 = vpop.permute.xlu1 %2550  ;;  %v2669_v26 = vrot.slane %v8360_v16, %v8668_v3 }
 0x318   : > { %v2557_v39 = vsel %vm14495_vm11, %v2551_v14, %v2553_v18  ;;  %v2558_v31 = vsel %vm14496_vm14, %v2549_v62, %v2551_v14  ;;  %vm14497_vm14 = vmmov %vm14495_vm11  ;;  %v2673_v24 = vrot.slane %v8360_v16, %v8674_v5  ;;  %v8361_v42 = vld [vmem:[%s14128_s1 + $0x41] ss:$8 sm:$0xf] }
 0x319   : > { %v2538_v34 = vrot.slane %v2530_v27, 4  ;;  %v2539_v35 = vrot.slane %v2531_v30, 4  ;;  %v2582_v37 = vmul.f32 %v2565_v23, %v2558_v31  ;;  %v2583_v13 = vmul.f32 %v2569_v36, %v2557_v39 }
 0x31a   : > { %v3136_v11 = vld [vmem:[#allocation2 + $0xa0] sm:$0xff]  ;;  %v3139_v41 = vld [vmem:[#allocation2 + $0xb8] sm:$0xff] }
 0x31b   : > { %2546 = vst [vmem:[#allocation2 + $0xd0] sm:$0xf0] %v2538_v34  ;;  %2547 = vst [vmem:[#allocation2 + $0xd8] sm:$0xf0] %v2539_v35  ;;  %v2586_v43 = vpack.c.bf16 %v2582_v37, %v2582_v37  ;;  %v2587_v50 = vpack.c.bf16 %v2583_v13, %v2583_v13  ;;  %v2599_v51 = vpop.permute.xlu0 %2598  ;;  %3215 = vmatpush1.bf16.msra.mxu0 %v3136_v11  ;;  %3257 = vmatprep.subr.bf16.mxu1 %v3139_v41  ;;  %v2555_v40 = vpop.permute.xlu1 %2554 }
 0x31c   : > { %v2556_v55 = vsel %vm14497_vm14, %v2553_v18, %v2555_v40  ;;  %v2559_v56 = vsel %vm14495_vm11, %v2555_v40, %v2549_v62  ;;  %3258 = vmatpush1.bf16.msra.mxu1 %v3138_v54  ;;  %vm14498_vm14 = vcmp.lt.s32.totalorder %v8816_v19, 114  ;;  %v2677_v34 = vrot.slane %v8360_v16, %v8665_v2 }
 0x31d   : > { %2590 = vst [vmem:[#allocation2 + $0xe0] sm:$0xf] %v2586_v43  ;;  %2591 = vst [vmem:[#allocation2 + $0xe8] sm:$0xf] %v2587_v50  ;;  %v2584_v57 = vmul.f32 %v2573_v33, %v2556_v55  ;;  %v2585_v58 = vmul.f32 %v2577_v12, %v2559_v56  ;;  %v2681_v35 = vrot.slane %v8360_v16, %v8671_v4 }
 0x31e   : > { %v3141_v61 = vld [vmem:[#allocation2 + $0xc8] sm:$0xff]  ;;  %v3140_v0 = vld [vmem:[#allocation2 + $0xc0] sm:$0xff]  ;;  %vm14499_vm11 = vmmov %vm14498_vm14 }
 0x31f   : > { %v2588_v6 = vpack.c.bf16 %v2584_v57, %v2584_v57  ;;  %v2589_v63 = vpack.c.bf16 %v2585_v58, %v2585_v58  ;;  %v2653_v52 = vpop.permute.xlu0 %2652  ;;  %3216 = vmatprep.subr.bf16.mxu0 %v3141_v61  ;;  %v2597_v7 = vpop.permute.xlu1 %2596  ;;  %v2715_v58 = vrot.slane %v8361_v42, %v8668_v3 }
 0x320   : > { %v2603_v8 = vsel %vm14498_vm14, %v2597_v7, %v2599_v51  ;;  %v2604_v62 = vsel %vm14499_vm11, %v2595_v32, %v2597_v7  ;;  %3217 = vmatpush1.bf16.msra.mxu0 %v3140_v0  ;;  %vm14500_vm14 = vmmov %vm14499_vm11 }
 0x321   : > { %2592 = vst [vmem:[#allocation2 + $0xf0] sm:$0xf] %v2588_v6  ;;  %2593 = vst [vmem:[#allocation2 + $0xf8] sm:$0xf] %v2589_v63  ;;  %v2628_v38 = vmul.f32 %v2611_v59, %v2604_v62  ;;  %v2629_v9 = vmul.f32 %v2615_v60, %v2603_v8  ;;  %v2719_v59 = vrot.slane %v8361_v42, %v8674_v5 }
 0x322   : > { %v3143_v17 = vld [vmem:[#allocation2 + $0xd8] sm:$0xff]  ;;  %v3142_v18 = vld [vmem:[#allocation2 + $0xd0] sm:$0xff] }
 0x323   : > { %v2632_v20 = vpack.c.bf16 %v2628_v38, %v2628_v38  ;;  %v2633_v21 = vpack.c.bf16 %v2629_v9, %v2629_v9  ;;  %v2657_v22 = vpop.permute.xlu0 %2656  ;;  %3259 = vmatprep.subr.bf16.mxu1 %v3143_v17  ;;  %v2601_v23 = vpop.permute.xlu1 %2600  ;;  %v2723_v9 = vrot.slane %v8361_v42, %v8665_v2 }
 0x324   : > { %v2602_v36 = vsel %vm14500_vm14, %v2599_v51, %v2601_v23  ;;  %v2605_v25 = vsel %vm14499_vm11, %v2601_v23, %v2595_v32  ;;  %3260 = vmatpush1.bf16.msra.mxu1 %v3142_v18  ;;  %vm14501_vm14 = vcmp.lt.s32.totalorder %v8816_v19, 113 }
 0x325   : > { %v2640_v28 = vrot.slane %v2632_v20, 4  ;;  %v2641_v29 = vrot.slane %v2633_v21, 4  ;;  %v2630_v27 = vmul.f32 %v2619_v10, %v2602_v36  ;;  %v2631_v30 = vmul.f32 %v2623_v15, %v2605_v25  ;;  %vm14502_vm11 = vmmov %vm14501_vm14  ;;  %v8362_v15 = vld [vmem:[%s14128_s1 + $0x42] ss:$8 sm:$0xf] }
 0x326   : > { %v2727_v10 = vrot.slane %v8361_v42, %v8671_v4  ;;  %v2773_v25 = vrot.slane %v8362_v15, %v8668_v3 }
 0x327   : > { %2648 = vst [vmem:[#allocation2 + $0xe0] sm:$0xf0] %v2640_v28  ;;  %2649 = vst [vmem:[#allocation2 + $0xe8] sm:$0xf0] %v2641_v29  ;;  %v2634_v14 = vpack.c.bf16 %v2630_v27, %v2630_v27  ;;  %v2635_v39 = vpack.c.bf16 %v2631_v30, %v2631_v30  ;;  %v2699_v31 = vpop.permute.xlu0 %2698  ;;  %v2655_v33 = vpop.permute.xlu1 %2654 }
 0x328   : > { %v2661_v12 = vsel %vm14501_vm14, %v2655_v33, %v2657_v22  ;;  %v2662_v32 = vsel %vm14502_vm11, %v2653_v52, %v2655_v33  ;;  %vm14503_vm14 = vmmov %vm14502_vm11 }
 0x329   : > { %v2642_v37 = vrot.slane %v2634_v14, 4  ;;  %v2643_v13 = vrot.slane %v2635_v39, 4  ;;  %v2686_v11 = vmul.f32 %v2669_v26, %v2662_v32  ;;  %v2687_v41 = vmul.f32 %v2673_v24, %v2661_v12 }
 0x32a   : > { %v2777_v26 = vrot.slane %v8362_v15, %v8674_v5  ;;  %v2781_v32 = vrot.slane %v8362_v15, %v8665_v2 }
 0x32b   : > { %2650 = vst [vmem:[#allocation2 + $0xf0] sm:$0xf0] %v2642_v37  ;;  %2651 = vst [vmem:[#allocation2 + $0xf8] sm:$0xf0] %v2643_v13  ;;  %v2690_v43 = vpack.c.bf16 %v2686_v11, %v2686_v11  ;;  %v2691_v50 = vpack.c.bf16 %v2687_v41, %v2687_v41  ;;  %v2703_v51 = vpop.permute.xlu0 %2702  ;;  %v2659_v40 = vpop.permute.xlu1 %2658 }
 0x32c   : > { %v2660_v54 = vsel %vm14503_vm14, %v2657_v22, %v2659_v40  ;;  %v2663_v55 = vsel %vm14502_vm11, %v2659_v40, %v2653_v52  ;;  %vm14504_vm14 = vcmp.lt.s32.totalorder %v8816_v19, 112  ;;  %v8363_v41 = vld [vmem:[%s14128_s1 + $0x43] ss:$8 sm:$0xf] }
 0x32d   : > { %2694 = vst [vmem:[#allocation2 + $0x100] sm:$0xf] %v2690_v43  ;;  %2695 = vst [vmem:[#allocation2 + $0x108] sm:$0xf] %v2691_v50  ;;  %v2688_v56 = vmul.f32 %v2677_v34, %v2660_v54  ;;  %v2689_v57 = vmul.f32 %v2681_v35, %v2663_v55  ;;  %v2785_v34 = vrot.slane %v8362_v15, %v8671_v4 }
 0x32e   : > { %v3145_v60 = vld [vmem:[#allocation2 + $0xe8] sm:$0xff]  ;;  %v3144_v61 = vld [vmem:[#allocation2 + $0xe0] sm:$0xff]  ;;  %vm14505_vm11 = vmmov %vm14504_vm14 }
 0x32f   : > { %v2692_v0 = vpack.c.bf16 %v2688_v56, %v2688_v56  ;;  %v2693_v6 = vpack.c.bf16 %v2689_v57, %v2689_v57  ;;  %v2757_v63 = vpop.permute.xlu0 %2756  ;;  %v2701_v7 = vpop.permute.xlu1 %2700  ;;  %3218 = vmatprep.subr.bf16.mxu0 %v3145_v60  ;;  %v2819_v57 = vrot.slane %v8363_v41, %v8668_v3 }
 0x330   : > { %v2707_v8 = vsel %vm14504_vm14, %v2701_v7, %v2703_v51  ;;  %v2708_v52 = vsel %vm14505_vm11, %v2699_v31, %v2701_v7  ;;  %3219 = vmatpush1.bf16.msra.mxu0 %v3144_v61  ;;  %vm14506_vm14 = vmmov %vm14505_vm11 }
 0x331   : > { %2696 = vst [vmem:[#allocation2 + $0x110] sm:$0xf] %v2692_v0  ;;  %2697 = vst [vmem:[#allocation2 + $0x118] sm:$0xf] %v2693_v6  ;;  %v2732_v62 = vmul.f32 %v2715_v58, %v2708_v52  ;;  %v2733_v38 = vmul.f32 %v2719_v59, %v2707_v8  ;;  %v2823_v58 = vrot.slane %v8363_v41, %v8674_v5 }
 0x332   : > { %v3147_v16 = vld [vmem:[#allocation2 + $0xf8] sm:$0xff]  ;;  %v3146_v17 = vld [vmem:[#allocation2 + $0xf0] sm:$0xff] }
 0x333   : > { %v2736_v18 = vpack.c.bf16 %v2732_v62, %v2732_v62  ;;  %v2737_v20 = vpack.c.bf16 %v2733_v38, %v2733_v38  ;;  %v2761_v21 = vpop.permute.xlu0 %2760  ;;  %3261 = vmatprep.subr.bf16.mxu1 %v3147_v16  ;;  %v2705_v22 = vpop.permute.xlu1 %2704  ;;  %v2827_v38 = vrot.slane %v8363_v41, %v8665_v2 }
 0x334   : > { %v2706_v23 = vsel %vm14506_vm14, %v2703_v51, %v2705_v22  ;;  %v2709_v36 = vsel %vm14505_vm11, %v2705_v22, %v2699_v31  ;;  %3262 = vmatpush1.bf16.msra.mxu1 %v3146_v17  ;;  %vm14507_vm14 = vcmp.lt.s32.totalorder %v8816_v19, 111 }
 0x335   : > { %v2744_v24 = vrot.slane %v2736_v18, 4  ;;  %v2745_v28 = vrot.slane %v2737_v20, 4  ;;  %v2734_v29 = vmul.f32 %v2723_v9, %v2706_v23  ;;  %v2735_v27 = vmul.f32 %v2727_v10, %v2709_v36  ;;  %vm14508_vm11 = vmmov %vm14507_vm14  ;;  %v8364_v10 = vld [vmem:[%s14128_s1 + $0x44] ss:$8 sm:$0xf] }
 0x336   : > { %v2831_v9 = vrot.slane %v8363_v41, %v8671_v4  ;;  %v2877_v36 = vrot.slane %v8364_v10, %v8668_v3 }
 0x337   : > { %2752 = vst [vmem:[#allocation2 + $0x100] sm:$0xf0] %v2744_v24  ;;  %2753 = vst [vmem:[#allocation2 + $0x108] sm:$0xf0] %v2745_v28  ;;  %v2738_v30 = vpack.c.bf16 %v2734_v29, %v2734_v29  ;;  %v2739_v14 = vpack.c.bf16 %v2735_v27, %v2735_v27  ;;  %v2803_v39 = vpop.permute.xlu0 %2802  ;;  %v2759_v33 = vpop.permute.xlu1 %2758 }
 0x338   : > { %v2765_v12 = vsel %vm14507_vm14, %v2759_v33, %v2761_v21  ;;  %v2766_v31 = vsel %vm14508_vm11, %v2757_v63, %v2759_v33  ;;  %vm14509_vm14 = vmmov %vm14508_vm11 }
 0x339   : > { %v2746_v35 = vrot.slane %v2738_v30, 4  ;;  %v2747_v37 = vrot.slane %v2739_v14, 4  ;;  %v2790_v13 = vmul.f32 %v2773_v25, %v2766_v31  ;;  %v2791_v11 = vmul.f32 %v2777_v26, %v2765_v12 }
 0x33a   : > { %v2881_v25 = vrot.slane %v8364_v10, %v8674_v5  ;;  %v2885_v31 = vrot.slane %v8364_v10, %v8665_v2 }
 0x33b   : > { %2754 = vst [vmem:[#allocation2 + $0x110] sm:$0xf0] %v2746_v35  ;;  %2755 = vst [vmem:[#allocation2 + $0x118] sm:$0xf0] %v2747_v37  ;;  %v2794_v42 = vpack.c.bf16 %v2790_v13, %v2790_v13  ;;  %v2795_v43 = vpack.c.bf16 %v2791_v11, %v2791_v11  ;;  %v2807_v50 = vpop.permute.xlu0 %2806  ;;  %v2763_v51 = vpop.permute.xlu1 %2762 }
 0x33c   : > { %v2764_v40 = vsel %vm14509_vm14, %v2761_v21, %v2763_v51  ;;  %v2767_v54 = vsel %vm14508_vm11, %v2763_v51, %v2757_v63  ;;  %vm14510_vm14 = vcmp.lt.s32.totalorder %v8816_v19, 110  ;;  %v8365_v11 = vld [vmem:[%s14128_s1 + $0x45] ss:$8 sm:$0xf] }
 0x33d   : > { %2798 = vst [vmem:[#allocation2 + $0x120] sm:$0xf] %v2794_v42  ;;  %2799 = vst [vmem:[#allocation2 + $0x128] sm:$0xf] %v2795_v43  ;;  %v2792_v55 = vmul.f32 %v2781_v32, %v2764_v40  ;;  %v2793_v56 = vmul.f32 %v2785_v34, %v2767_v54  ;;  %v2889_v32 = vrot.slane %v8364_v10, %v8671_v4 }
 0x33e   : > { %v3149_v59 = vld [vmem:[#allocation2 + $0x108] sm:$0xff]  ;;  %v3148_v60 = vld [vmem:[#allocation2 + $0x100] sm:$0xff]  ;;  %vm14511_vm11 = vmmov %vm14510_vm14 }
 0x33f   : > { %v2796_v61 = vpack.c.bf16 %v2792_v55, %v2792_v55  ;;  %v2797_v0 = vpack.c.bf16 %v2793_v56, %v2793_v56  ;;  %v2861_v6 = vpop.permute.xlu0 %2860  ;;  %v2805_v7 = vpop.permute.xlu1 %2804  ;;  %3220 = vmatprep.subr.bf16.mxu0 %v3149_v59  ;;  %v2923_v56 = vrot.slane %v8365_v11, %v8668_v3 }
 0x340   : > { %v2811_v8 = vsel %vm14510_vm14, %v2805_v7, %v2807_v50  ;;  %v2812_v63 = vsel %vm14511_vm11, %v2803_v39, %v2805_v7  ;;  %3221 = vmatpush1.bf16.msra.mxu0 %v3148_v60  ;;  %vm14512_vm14 = vmmov %vm14511_vm11 }
 0x341   : > { %2800 = vst [vmem:[#allocation2 + $0x130] sm:$0xf] %v2796_v61  ;;  %2801 = vst [vmem:[#allocation2 + $0x138] sm:$0xf] %v2797_v0  ;;  %v2836_v52 = vmul.f32 %v2819_v57, %v2812_v63  ;;  %v2837_v62 = vmul.f32 %v2823_v58, %v2811_v8  ;;  %v2927_v57 = vrot.slane %v8365_v11, %v8674_v5 }
 0x342   : > { %v3151_v15 = vld [vmem:[#allocation2 + $0x118] sm:$0xff]  ;;  %v3150_v16 = vld [vmem:[#allocation2 + $0x110] sm:$0xff] }
 0x343   : > { %v2840_v17 = vpack.c.bf16 %v2836_v52, %v2836_v52  ;;  %v2841_v18 = vpack.c.bf16 %v2837_v62, %v2837_v62  ;;  %v2865_v20 = vpop.permute.xlu0 %2864  ;;  %3263 = vmatprep.subr.bf16.mxu1 %v3151_v15  ;;  %v2809_v21 = vpop.permute.xlu1 %2808  ;;  %v2931_v62 = vrot.slane %v8365_v11, %v8665_v2 }
 0x344   : > { %v2810_v22 = vsel %vm14512_vm14, %v2807_v50, %v2809_v21  ;;  %v2813_v23 = vsel %vm14511_vm11, %v2809_v21, %v2803_v39  ;;  %3264 = vmatpush1.bf16.msra.mxu1 %v3150_v16  ;;  %vm14513_vm14 = vcmp.lt.s32.totalorder %v8816_v19, 98 }
 0x345   : > { %v2848_v26 = vrot.slane %v2840_v17, 4  ;;  %v2849_v24 = vrot.slane %v2841_v18, 4  ;;  %v2838_v28 = vmul.f32 %v2827_v38, %v2810_v22  ;;  %v2839_v29 = vmul.f32 %v2831_v9, %v2813_v23  ;;  %vm14514_vm11 = vmmov %vm14513_vm14  ;;  %v8366_v9 = vld [vmem:[%s14128_s1 + $0x46] ss:$8 sm:$0xf] }
 0x346   : > { %v2935_v38 = vrot.slane %v8365_v11, %v8671_v4  ;;  %v2981_v23 = vrot.slane %v8366_v9, %v8668_v3 }
 0x347   : > { %2856 = vst [vmem:[#allocation2 + $0x120] sm:$0xf0] %v2848_v26  ;;  %2857 = vst [vmem:[#allocation2 + $0x128] sm:$0xf0] %v2849_v24  ;;  %v2842_v27 = vpack.c.bf16 %v2838_v28, %v2838_v28  ;;  %v2843_v30 = vpack.c.bf16 %v2839_v29, %v2839_v29  ;;  %v2907_v14 = vpop.permute.xlu0 %2906  ;;  %v2863_v33 = vpop.permute.xlu1 %2862 }
 0x348   : > { %v2869_v12 = vsel %vm14513_vm14, %v2863_v33, %v2865_v20  ;;  %v2870_v39 = vsel %vm14514_vm11, %v2861_v6, %v2863_v33  ;;  %vm14515_vm14 = vmmov %vm14514_vm11 }
 0x349   : > { %v2850_v34 = vrot.slane %v2842_v27, 4  ;;  %v2851_v35 = vrot.slane %v2843_v30, 4  ;;  %v2894_v37 = vmul.f32 %v2877_v36, %v2870_v39  ;;  %v2895_v13 = vmul.f32 %v2881_v25, %v2869_v12 }
 0x34a   : > { %v2985_v36 = vrot.slane %v8366_v9, %v8674_v5  ;;  %v2989_v39 = vrot.slane %v8366_v9, %v8665_v2 }
 0x34b   : > { %2858 = vst [vmem:[#allocation2 + $0x130] sm:$0xf0] %v2850_v34  ;;  %2859 = vst [vmem:[#allocation2 + $0x138] sm:$0xf0] %v2851_v35  ;;  %v2898_v41 = vpack.c.bf16 %v2894_v37, %v2894_v37  ;;  %v2899_v42 = vpack.c.bf16 %v2895_v13, %v2895_v13  ;;  %v2911_v43 = vpop.permute.xlu0 %2910  ;;  %v2867_v50 = vpop.permute.xlu1 %2866 }
 0x34c   : > { %v2868_v51 = vsel %vm14515_vm14, %v2865_v20, %v2867_v50  ;;  %v2871_v40 = vsel %vm14514_vm11, %v2867_v50, %v2861_v6  ;;  %vm14516_vm14 = vcmp.lt.s32.totalorder %v8816_v19, 97  ;;  %v8367_v13 = vld [vmem:[%s14128_s1 + $0x47] ss:$8 sm:$0xf] }
 0x34d   : > { %2902 = vst [vmem:[#allocation2 + $0x140] sm:$0xf] %v2898_v41  ;;  %2903 = vst [vmem:[#allocation2 + $0x148] sm:$0xf] %v2899_v42  ;;  %v2896_v54 = vmul.f32 %v2885_v31, %v2868_v51  ;;  %v2897_v55 = vmul.f32 %v2889_v32, %v2871_v40  ;;  %v2993_v31 = vrot.slane %v8366_v9, %v8671_v4 }
 0x34e   : > { %v3153_v58 = vld [vmem:[#allocation2 + $0x128] sm:$0xff]  ;;  %v3152_v59 = vld [vmem:[#allocation2 + $0x120] sm:$0xff]  ;;  %vm14517_vm11 = vmmov %vm14516_vm14 }
 0x34f   : > { %v2900_v60 = vpack.c.bf16 %v2896_v54, %v2896_v54  ;;  %v2901_v61 = vpack.c.bf16 %v2897_v55, %v2897_v55  ;;  %v2965_v0 = vpop.permute.xlu0 %2964  ;;  %v2909_v7 = vpop.permute.xlu1 %2908  ;;  %3222 = vmatprep.subr.bf16.mxu0 %v3153_v58  ;;  %v3027_v55 = vrot.slane %v8367_v13, %v8668_v3 }
 0x350   : > { %v2915_v8 = vsel %vm14516_vm14, %v2909_v7, %v2911_v43  ;;  %v2916_v6 = vsel %vm14517_vm11, %v2907_v14, %v2909_v7  ;;  %3223 = vmatpush1.bf16.msra.mxu0 %v3152_v59  ;;  %vm14518_vm14 = vmmov %vm14517_vm11 }
 0x351   : > { %2904 = vst [vmem:[#allocation2 + $0x150] sm:$0xf] %v2900_v60  ;;  %2905 = vst [vmem:[#allocation2 + $0x158] sm:$0xf] %v2901_v61  ;;  %v2940_v63 = vmul.f32 %v2923_v56, %v2916_v6  ;;  %v2941_v52 = vmul.f32 %v2927_v57, %v2915_v8  ;;  %v3031_v56 = vrot.slane %v8367_v13, %v8674_v5 }
 0x352   : > { %v3155_v10 = vld [vmem:[#allocation2 + $0x138] sm:$0xff]  ;;  %v3154_v15 = vld [vmem:[#allocation2 + $0x130] sm:$0xff] }
 0x353   : > { %v2944_v16 = vpack.c.bf16 %v2940_v63, %v2940_v63  ;;  %v2945_v17 = vpack.c.bf16 %v2941_v52, %v2941_v52  ;;  %v2969_v18 = vpop.permute.xlu0 %2968  ;;  %3265 = vmatprep.subr.bf16.mxu1 %v3155_v10  ;;  %v2913_v20 = vpop.permute.xlu1 %2912  ;;  %v3035_v52 = vrot.slane %v8367_v13, %v8665_v2 }
 0x354   : > { %v2914_v21 = vsel %vm14518_vm14, %v2911_v43, %v2913_v20  ;;  %v2917_v22 = vsel %vm14517_vm11, %v2913_v20, %v2907_v14  ;;  %3266 = vmatpush1.bf16.msra.mxu1 %v3154_v15  ;;  %vm14519_vm14 = vcmp.lt.s32.totalorder %v8816_v19, 96 }
 0x355   : > { %v2952_v25 = vrot.slane %v2944_v16, 4  ;;  %v2953_v26 = vrot.slane %v2945_v17, 4  ;;  %v2942_v24 = vmul.f32 %v2931_v62, %v2914_v21  ;;  %v2943_v28 = vmul.f32 %v2935_v38, %v2917_v22  ;;  %vm14520_vm11 = vmmov %vm14519_vm14  ;;  %v8368_v38 = vld [vmem:[%s14128_s1 + $0x60] ss:$8 sm:$0xf] }
 0x356   : > { %v3039_v62 = vrot.slane %v8367_v13, %v8671_v4  ;;  %v3085_v21 = vrot.slane %v8368_v38, %v8668_v3  ;;  %v3089_v22 = vrot.slane %v8368_v38, %v8674_v5 }
 0x357   : > { %2960 = vst [vmem:[#allocation2 + $0x140] sm:$0xf0] %v2952_v25  ;;  %2961 = vst [vmem:[#allocation2 + $0x148] sm:$0xf0] %v2953_v26  ;;  %v2946_v29 = vpack.c.bf16 %v2942_v24, %v2942_v24  ;;  %v2947_v27 = vpack.c.bf16 %v2943_v28, %v2943_v28  ;;  %v3011_v30 = vpop.permute.xlu0 %3010  ;;  %v2967_v33 = vpop.permute.xlu1 %2966 }
 0x358   : > { %v2973_v12 = vsel %vm14519_vm14, %v2967_v33, %v2969_v18  ;;  %v2974_v14 = vsel %vm14520_vm11, %v2965_v0, %v2967_v33  ;;  %vm14521_vm14 = vmmov %vm14520_vm11 }
 0x359   : > { %v2954_v32 = vrot.slane %v2946_v29, 4  ;;  %v2955_v34 = vrot.slane %v2947_v27, 4  ;;  %v2998_v35 = vmul.f32 %v2981_v23, %v2974_v14  ;;  %v2999_v37 = vmul.f32 %v2985_v36, %v2973_v12 }
 0x35a   : > { %v3093_v12 = vrot.slane %v8368_v38, %v8665_v2  ;;  %v3097_v14 = vrot.slane %v8368_v38, %v8671_v4 }
 0x35b   : > { %2962 = vst [vmem:[#allocation2 + $0x150] sm:$0xf0] %v2954_v32  ;;  %2963 = vst [vmem:[#allocation2 + $0x158] sm:$0xf0] %v2955_v34  ;;  %v3002_v11 = vpack.c.bf16 %v2998_v35, %v2998_v35  ;;  %v3003_v41 = vpack.c.bf16 %v2999_v37, %v2999_v37  ;;  %v3015_v42 = vpop.permute.xlu0 %3014  ;;  %v2971_v43 = vpop.permute.xlu1 %2970 }
 0x35c   : > { %v2972_v50 = vsel %vm14521_vm14, %v2969_v18, %v2971_v43  ;;  %v2975_v51 = vsel %vm14520_vm11, %v2971_v43, %v2965_v0  ;;  %vm14523_vm14 = vmmov %vm14522_vm12 }
 0x35d   : > { %3006 = vst [vmem:[#allocation2 + $0x160] sm:$0xf] %v3002_v11  ;;  %3007 = vst [vmem:[#allocation2 + $0x168] sm:$0xf] %v3003_v41  ;;  %v3000_v40 = vmul.f32 %v2989_v39, %v2972_v50  ;;  %v3001_v54 = vmul.f32 %v2993_v31, %v2975_v51 }
 0x35e   : > { %v3157_v57 = vld [vmem:[#allocation2 + $0x148] sm:$0xff]  ;;  %v3156_v58 = vld [vmem:[#allocation2 + $0x140] sm:$0xff]  ;;  %vm14524_vm11 = vmmov %vm14522_vm12 }
 0x35f   : > { %v3004_v59 = vpack.c.bf16 %v3000_v40, %v3000_v40  ;;  %v3005_v60 = vpack.c.bf16 %v3001_v54, %v3001_v54  ;;  %v3013_v61 = vpop.permute.xlu1 %3012  ;;  %3224 = vmatprep.subr.bf16.mxu0 %v3157_v57  ;;  %v3069_v8 = vpop.permute.xlu0 %3068 }
 0x360   : > { %v3019_v7 = vsel %vm14522_vm12, %v3013_v61, %v3015_v42  ;;  %v3020_v0 = vsel %vm14523_vm14, %v3011_v30, %v3013_v61  ;;  %3225 = vmatpush1.bf16.msra.mxu0 %v3156_v58 }
 0x361   : > { %3008 = vst [vmem:[#allocation2 + $0x170] sm:$0xf] %v3004_v59  ;;  %3009 = vst [vmem:[#allocation2 + $0x178] sm:$0xf] %v3005_v60  ;;  %v3044_v6 = vmul.f32 %v3027_v55, %v3020_v0  ;;  %v3045_v63 = vmul.f32 %v3031_v56, %v3019_v7  ;;  %v8538_v60 = vld [vmem:[%s14494_s4] ss:$8 sps:$4 sm:$0xff]  }
 0x362   : > { %v3159_v9 = vld [vmem:[#allocation2 + $0x158] sm:$0xff]  ;;  %v3158_v10 = vld [vmem:[#allocation2 + $0x150] sm:$0xff]  ;;  %s14551_s4 = smov 32  }
 0x363   : > { %v3048_v15 = vpack.c.bf16 %v3044_v6, %v3044_v6  ;;  %v3049_v16 = vpack.c.bf16 %v3045_v63, %v3045_v63  ;;  %3267 = vmatprep.subr.bf16.mxu1 %v3159_v9  ;;  %v3017_v17 = vpop.permute.xlu1 %3016  ;;  %v3073_v24 = vpop.permute.xlu0 %3072 }
 0x364   : > { %v3018_v18 = vsel %vm14522_vm12, %v3015_v42, %v3017_v17  ;;  %v3021_v20 = vsel %vm14524_vm11, %v3017_v17, %v3011_v30  ;;  %3268 = vmatpush1.bf16.msra.mxu1 %v3158_v10 }
 0x365   : > { %v3056_v23 = vrot.slane %v3048_v15, 4  ;;  %v3057_v36 = vrot.slane %v3049_v16, 4  ;;  %v3046_v25 = vmul.f32 %v3035_v52, %v3018_v18  ;;  %v3047_v26 = vmul.f32 %v3039_v62, %v3021_v20 }
 0x367   : > { %3064 = vst [vmem:[#allocation2 + $0x160] sm:$0xf0] %v3056_v23  ;;  %3065 = vst [vmem:[#allocation2 + $0x168] sm:$0xf0] %v3057_v36  ;;  %v3050_v28 = vpack.c.bf16 %v3046_v25, %v3046_v25  ;;  %v3051_v29 = vpack.c.bf16 %v3047_v26, %v3047_v26  ;;  %v3071_v27 = vpop.permute.xlu1 %3070 }
 0x368   : > { %v3077_v33 = vsel %vm1650_vm15, %v3071_v27, %v3073_v24  ;;  %v3078_v30 = vsel %vm1650_vm15, %v3069_v8, %v3071_v27 }
 0x369   : > { %v3058_v39 = vrot.slane %v3050_v28, 4  ;;  %v3059_v31 = vrot.slane %v3051_v29, 4  ;;  %v3102_v32 = vmul.f32 %v3085_v21, %v3078_v30  ;;  %v3103_v34 = vmul.f32 %v3089_v22, %v3077_v33 }
 0x36b   : > { %3066 = vst [vmem:[#allocation2 + $0x170] sm:$0xf0] %v3058_v39  ;;  %3067 = vst [vmem:[#allocation2 + $0x178] sm:$0xf0] %v3059_v31  ;;  %v3106_v35 = vpack.c.bf16 %v3102_v32, %v3102_v32  ;;  %v3107_v37 = vpack.c.bf16 %v3103_v34, %v3103_v34  ;;  %v3075_v13 = vpop.permute.xlu1 %3074 }
 0x36c   : > { %v3076_v11 = vsel %vm1650_vm15, %v3073_v24, %v3075_v13  ;;  %v3079_v41 = vsel %vm1650_vm15, %v3075_v13, %v3069_v8 }
 0x36d   : > { %3110 = vst [vmem:[#allocation2 + $0x180] sm:$0xf] %v3106_v35  ;;  %3111 = vst [vmem:[#allocation2 + $0x188] sm:$0xf] %v3107_v37  ;;  %v3104_v42 = vmul.f32 %v3093_v12, %v3076_v11  ;;  %v3105_v43 = vmul.f32 %v3097_v14, %v3079_v41 }
 0x36e   : > { %v3161_v50 = vld [vmem:[#allocation2 + $0x168] sm:$0xff]  ;;  %v3160_v51 = vld [vmem:[#allocation2 + $0x160] sm:$0xff] }
 0x36f   : > { %v3108_v40 = vpack.c.bf16 %v3104_v42, %v3104_v42  ;;  %v3109_v54 = vpack.c.bf16 %v3105_v43, %v3105_v43  ;;  %3226 = vmatprep.subr.bf16.mxu0 %v3161_v50 }
 0x370   : > { %3227 = vmatpush1.bf16.msra.mxu0 %v3160_v51 }
 0x371   : > { %3112 = vst [vmem:[#allocation2 + $0x190] sm:$0xf] %v3108_v40  ;;  %3113 = vst [vmem:[#allocation2 + $0x198] sm:$0xf] %v3109_v54 }
 0x372   : > { %v3163_v55 = vld [vmem:[#allocation2 + $0x178] sm:$0xff]  ;;  %v3162_v56 = vld [vmem:[#allocation2 + $0x170] sm:$0xff] }
 0x373   : > { %3269 = vmatprep.subr.bf16.mxu1 %v3163_v55 }
 0x374   : > { %3270 = vmatpush1.bf16.msra.mxu1 %v3162_v56  ;;  %v3165_v57 = vld [vmem:[#allocation2 + $0x188] sm:$0xf]  ;;  %v3164_v58 = vld [vmem:[#allocation2 + $0x180] sm:$0xf] }
 0x375   : > { %8371 = vmatprep.subr.msk.bf16.mxu0 %vm1759_vm0, %v3165_v57  ;;  %v3193_v59 = vsel %vm1759_vm0, %v3164_v58, 0 }
 0x376   : > { %3229 = vmatpush1.bf16.msra.mxu0 %v3193_v59 }
 0x378   : > { %v3167_v61 = vld [vmem:[#allocation2 + $0x198] sm:$0xf]  ;;  %v3166_v7 = vld [vmem:[#allocation2 + $0x190] sm:$0xf] }
 0x379   : > { %3237 = vmatmul.mubr.bf16.vlgmr.msra.gmra.mrb[4].mxu0 %v8538_v60  ;;  %8373 = vmatprep.subr.msk.bf16.mxu1 %vm1759_vm0, %v3167_v61  ;;  %v3199_v0 = vsel %vm1759_vm0, %v3166_v7, 0  ;;  %vm14611_vm0 = vcmp.lt.s32.totalorder %v8816_v19, 1 }
 0x37a   : > { %3272 = vmatpush1.bf16.msra.mxu1 %v3199_v0  ;;  %vm14613_vm14 = vmmov %vm14611_vm0 }
 0x37b   : > { %vm14615_vm12 = vmmov %vm14611_vm0 }
 0x37c   : > { %vm14617_vm11 = vmmov %vm14611_vm0 }
 0x37d   : > { %3280 = vmatmul.mubr.bf16.vlgmr.msra.gmra.mrb[4].mxu1 %v8538_v60 }
 0x44c   : > { %v3238_v8 = vpop.f32.mrb[4].mxu0 }
 0x44d   : > { %v3239_v6 = vadd.f32 %v3238_v8, %v9438_v44  ;;  %v9915_v63 = vpop.f32.mrb[5].mxu0 }
 0x44e   : > { %v3242_v52 = vpop.f32.mrb[6].mxu0 }
 0x44f   : > { %v9917_v62 = vmax.f32 %v3239_v6, 0.0  ;;  %v3243_v38 = vadd.f32 %v3242_v52, %v9440_v45  ;;  %v9920_v9 = vpop.f32.mrb[7].mxu0  ;;  %v3241_v6 = vadd.f32 %v9915_v63, %v9438_v44 }
 0x450   : > { %v3281_v10 = vpop.f32.mrb[4].mxu1 }
 0x451   : > { %14525 = vst [vmem:[#allocation14_spill] sm:$0xff] %v9917_v62  ;;  %v9922_v15 = vmax.f32 %v3243_v38, 0.0  ;;  %v3282_v16 = vadd.f32 %v3281_v10, %v9438_v44  ;;  %v9925_v17 = vpop.f32.mrb[5].mxu1  ;;  %3298 = vrot.lane.b32.xlu0 %v9917_v62, %s14196_s20  ;;  %v3245_v38 = vadd.f32 %v9920_v9, %v9440_v45 }
 0x452   : > { %v3285_v18 = vpop.f32.mrb[6].mxu1 }
 0x453   : > { %14526 = vst [vmem:[#allocation15_spill] sm:$0xff] %v9922_v15  ;;  %v9929_v20 = vmax.f32 %v3282_v16, 0.0  ;;  %v3286_v21 = vadd.f32 %v3285_v18, %v9440_v45  ;;  %v9932_v22 = vpop.f32.mrb[7].mxu1  ;;  %3300 = vrot.lane.b32.xlu1 %v9922_v15, %s14196_s20  ;;  %v10204_v16 = vmax.f32 %v3241_v6, 0.0  ;;  %v3284_v18 = vadd.f32 %v9925_v17, %v9438_v44 }
 0x454   : > { %v3288_v9 = vadd.f32 %v9932_v22, %v9440_v45 }
 0x455   : > { %14527 = vst [vmem:[#allocation16_spill] sm:$0xff] %v9929_v20  ;;  %v9936_v23 = vmax.f32 %v3286_v21, 0.0  ;;  %3306 = vrot.lane.b32.xlu0 %v9929_v20, %s14196_s20  ;;  %v10212_v21 = vmax.f32 %v3245_v38, 0.0  ;;  %v10220_v6 = vmax.f32 %v3284_v18, 0.0 }
 0x456   : > { %v10226_v17 = vmax.f32 %v3288_v9, 0.0 }
 0x457   : > { %14528 = vst [vmem:[#allocation17_spill] sm:$0xff] %v9936_v23  ;;  %3308 = vrot.lane.b32.xlu1 %v9936_v23, %s14196_s20  ;;  %s14535_s20 = smov 1  }
 0x459   : > { %3360 = vrot.lane.b32.xlu0 %v9917_v62, %s14194_s19 }
 0x45b   : > { %3362 = vrot.lane.b32.xlu1 %v9922_v15, %s14194_s19 }
 0x45d   : > { %3368 = vrot.lane.b32.xlu0 %v9929_v20, %s14194_s19 }
 0x45f   : > { %3370 = vrot.lane.b32.xlu1 %v9936_v23, %s14194_s19  ;;  %s14534_s19 = smov 2  }
 0x461   : > { %3422 = vrot.lane.b32.xlu0 %v9917_v62, %s14192_s22 }
 0x463   : > { %3424 = vrot.lane.b32.xlu1 %v9922_v15, %s14192_s22 }
 0x465   : > { %3430 = vrot.lane.b32.xlu0 %v9929_v20, %s14192_s22 }
 0x467   : > { %3432 = vrot.lane.b32.xlu1 %v9936_v23, %s14192_s22  ;;  %s14533_s22 = smov 14  }
 0x469   : > { %3484 = vrot.lane.b32.xlu0 %v9917_v62, %s14190_s21 }
 0x46b   : > { %3486 = vrot.lane.b32.xlu1 %v9922_v15, %s14190_s21 }
 0x46d   : > { %3492 = vrot.lane.b32.xlu0 %v9929_v20, %s14190_s21 }
 0x46f   : > { %3494 = vrot.lane.b32.xlu1 %v9936_v23, %s14190_s21  ;;  %s14532_s21 = smov 15  }
 0x471   : > { %3546 = vrot.lane.b32.xlu0 %v9917_v62, %s14188_s24 }
 0x473   : > { %3548 = vrot.lane.b32.xlu1 %v9922_v15, %s14188_s24 }
 0x475   : > { %3554 = vrot.lane.b32.xlu0 %v9929_v20, %s14188_s24 }
 0x477   : > { %3556 = vrot.lane.b32.xlu1 %v9936_v23, %s14188_s24  ;;  %s14531_s24 = smov 16  }
 0x479   : > { %3608 = vrot.lane.b32.xlu0 %v9917_v62, %s14529_s23 }
 0x47b   : > { %3610 = vrot.lane.b32.xlu1 %v9922_v15, %s14529_s23 }
 0x47d   : > { %3616 = vrot.lane.b32.xlu0 %v9929_v20, %s14529_s23 }
 0x47f   : > { %3618 = vrot.lane.b32.xlu1 %v9936_v23, %s14529_s23 }
 0x481   : > { %3670 = vrot.lane.b32.xlu0 %v9917_v62, %s14530_s16 }
 0x483   : > { %3672 = vrot.lane.b32.xlu1 %v9922_v15, %s14530_s16 }
 0x485   : > { %3678 = vrot.lane.b32.xlu0 %v9929_v20, %s14530_s16 }
 0x487   : > { %3680 = vrot.lane.b32.xlu1 %v9936_v23, %s14530_s16 }
 0x489   : > { %3732 = vrot.lane.b32.xlu0 %v9917_v62, %s14531_s24 }
 0x48b   : > { %3734 = vrot.lane.b32.xlu1 %v9922_v15, %s14531_s24 }
 0x48d   : > { %3740 = vrot.lane.b32.xlu0 %v9929_v20, %s14531_s24 }
 0x48f   : > { %3742 = vrot.lane.b32.xlu1 %v9936_v23, %s14531_s24 }
 0x491   : > { %3794 = vrot.lane.b32.xlu0 %v9917_v62, %s14532_s21 }
 0x493   : > { %3796 = vrot.lane.b32.xlu1 %v9922_v15, %s14532_s21 }
 0x495   : > { %3802 = vrot.lane.b32.xlu0 %v9929_v20, %s14532_s21 }
 0x497   : > { %3804 = vrot.lane.b32.xlu1 %v9936_v23, %s14532_s21 }
 0x499   : > { %3856 = vrot.lane.b32.xlu0 %v9917_v62, %s14533_s22 }
 0x49b   : > { %3858 = vrot.lane.b32.xlu1 %v9922_v15, %s14533_s22 }
 0x49d   : > { %3864 = vrot.lane.b32.xlu0 %v9929_v20, %s14533_s22 }
 0x49f   : > { %3866 = vrot.lane.b32.xlu1 %v9936_v23, %s14533_s22 }
 0x4a1   : > { %3918 = vrot.lane.b32.xlu0 %v9917_v62, %s14534_s19 }
 0x4a3   : > { %3920 = vrot.lane.b32.xlu1 %v9922_v15, %s14534_s19 }
 0x4a5   : > { %3926 = vrot.lane.b32.xlu0 %v9929_v20, %s14534_s19 }
 0x4a7   : > { %3928 = vrot.lane.b32.xlu1 %v9936_v23, %s14534_s19 }
 0x4a9   : > { %3980 = vrot.lane.b32.xlu0 %v9917_v62, %s14535_s20 }
 0x4ab   : > { %3982 = vrot.lane.b32.xlu1 %v9922_v15, %s14535_s20 }
 0x4ad   : > { %3988 = vrot.lane.b32.xlu0 %v9929_v20, %s14535_s20 }
 0x4af   : > { %3990 = vrot.lane.b32.xlu1 %v9936_v23, %s14535_s20 }
 0x4b1   : > { %4050 = vrot.lane.b32.xlu0 %v9917_v62, %s14536_s0 }
 0x4b3   : > { %4052 = vrot.lane.b32.xlu1 %v9922_v15, %s14536_s0 }
 0x4b5   : > { %4058 = vrot.lane.b32.xlu0 %v9929_v20, %s14536_s0 }
 0x4b7   : > { %4060 = vrot.lane.b32.xlu1 %v9936_v23, %s14536_s0 }
 0x4b9   : > { %4112 = vrot.lane.b32.xlu0 %v9917_v62, %s14479_s12 }
 0x4bb   : > { %4114 = vrot.lane.b32.xlu1 %v9922_v15, %s14479_s12 }
 0x4bd   : > { %4120 = vrot.lane.b32.xlu0 %v9929_v20, %s14479_s12 }
 0x4bf   : > { %4122 = vrot.lane.b32.xlu1 %v9936_v23, %s14479_s12 }
 0x4c1   : > { %4174 = vrot.lane.b32.xlu0 %v9917_v62, %s14482_s15 }
 0x4c3   : > { %4176 = vrot.lane.b32.xlu1 %v9922_v15, %s14482_s15  ;;  %v10050_v36 = vpop.permute.xlu0 %3298 }
 0x4c5   : > { %v10052_v25 = vpop.permute.xlu1 %3300  ;;  %4182 = vrot.lane.b32.xlu0 %v9929_v20, %s14482_s15 }
 0x4c7   : > { %4184 = vrot.lane.b32.xlu1 %v9936_v23, %s14482_s15  ;;  %v10058_v26 = vpop.permute.xlu0 %3306 }
 0x4c9   : > { %v10060_v24 = vpop.permute.xlu1 %3308  ;;  %4236 = vrot.lane.b32.xlu0 %v9917_v62, %s14485_s17 }
 0x4cb   : > { %4238 = vrot.lane.b32.xlu1 %v9922_v15, %s14485_s17  ;;  %v10066_v28 = vpop.permute.xlu0 %3360 }
 0x4cd   : > { %v10068_v29 = vpop.permute.xlu1 %3362  ;;  %4244 = vrot.lane.b32.xlu0 %v9929_v20, %s14485_s17 }
 0x4cf   : > { %4246 = vrot.lane.b32.xlu1 %v9936_v23, %s14485_s17  ;;  %v10074_v27 = vpop.permute.xlu0 %3368 }
 0x4d1   : > { %v10076_v33 = vpop.permute.xlu1 %3370  ;;  %4298 = vrot.lane.b32.xlu0 %v9917_v62, %s14486_s11 }
 0x4d3   : > { %4300 = vrot.lane.b32.xlu1 %v9922_v15, %s14486_s11  ;;  %v10082_v30 = vpop.permute.xlu0 %3422 }
 0x4d5   : > { %v10084_v12 = vpop.permute.xlu1 %3424  ;;  %4306 = vrot.lane.b32.xlu0 %v9929_v20, %s14486_s11 }
 0x4d7   : > { %4308 = vrot.lane.b32.xlu1 %v9936_v23, %s14486_s11  ;;  %v10090_v14 = vpop.permute.xlu0 %3430 }
 0x4d9   : > { %v10092_v39 = vpop.permute.xlu1 %3432  ;;  %4360 = vrot.lane.b32.xlu0 %v9917_v62, %s14487_s18 }
 0x4db   : > { %4362 = vrot.lane.b32.xlu1 %v9922_v15, %s14487_s18  ;;  %v10098_v31 = vpop.permute.xlu0 %3484 }
 0x4dd   : > { %v10100_v32 = vpop.permute.xlu1 %3486  ;;  %4368 = vrot.lane.b32.xlu0 %v9929_v20, %s14487_s18 }
 0x4df   : > { %4370 = vrot.lane.b32.xlu1 %v9936_v23, %s14487_s18  ;;  %v10106_v34 = vpop.permute.xlu0 %3492 }
 0x4e1   : > { %v10108_v35 = vpop.permute.xlu1 %3494  ;;  %4422 = vrot.lane.b32.xlu0 %v9917_v62, %s14488_s29 }
 0x4e3   : > { %4424 = vrot.lane.b32.xlu1 %v9922_v15, %s14488_s29  ;;  %v10114_v37 = vpop.permute.xlu0 %3546 }
 0x4e5   : > { %v10116_v13 = vpop.permute.xlu1 %3548  ;;  %4430 = vrot.lane.b32.xlu0 %v9929_v20, %s14488_s29 }
 0x4e7   : > { %4432 = vrot.lane.b32.xlu1 %v9936_v23, %s14488_s29  ;;  %v10122_v11 = vpop.permute.xlu0 %3554 }
 0x4e9   : > { %v10124_v41 = vpop.permute.xlu1 %3556  ;;  %4484 = vrot.lane.b32.xlu0 %v9917_v62, %s14489_s30 }
 0x4eb   : > { %4486 = vrot.lane.b32.xlu1 %v9922_v15, %s14489_s30  ;;  %v10130_v42 = vpop.permute.xlu0 %3608 }
 0x4ed   : > { %v10132_v43 = vpop.permute.xlu1 %3610  ;;  %4492 = vrot.lane.b32.xlu0 %v9929_v20, %s14489_s30 }
 0x4ef   : > { %4494 = vrot.lane.b32.xlu1 %v9936_v23, %s14489_s30  ;;  %v10138_v50 = vpop.permute.xlu0 %3616 }
 0x4f1   : > { %v10140_v51 = vpop.permute.xlu1 %3618  ;;  %4546 = vrot.lane.b32.xlu0 %v9917_v62, %s14490_s27 }
 0x4f3   : > { %4548 = vrot.lane.b32.xlu1 %v9922_v15, %s14490_s27  ;;  %v10146_v40 = vpop.permute.xlu0 %3670 }
 0x4f5   : > { %v10148_v54 = vpop.permute.xlu1 %3672  ;;  %4554 = vrot.lane.b32.xlu0 %v9929_v20, %s14490_s27 }
 0x4f7   : > { %4556 = vrot.lane.b32.xlu1 %v9936_v23, %s14490_s27  ;;  %v10154_v55 = vpop.permute.xlu0 %3678 }
 0x4f9   : > { %v10156_v56 = vpop.permute.xlu1 %3680  ;;  %4608 = vrot.lane.b32.xlu0 %v9917_v62, %s14491_s28 }
 0x4fb   : > { %4610 = vrot.lane.b32.xlu1 %v9922_v15, %s14491_s28  ;;  %v10162_v57 = vpop.permute.xlu0 %3732 }
 0x4fd   : > { %v10164_v58 = vpop.permute.xlu1 %3734  ;;  %4616 = vrot.lane.b32.xlu0 %v9929_v20, %s14491_s28 }
 0x4ff   : > { %4618 = vrot.lane.b32.xlu1 %v9936_v23, %s14491_s28  ;;  %v10170_v59 = vpop.permute.xlu0 %3740 }
 0x501   : > { %v10172_v60 = vpop.permute.xlu1 %3742  ;;  %4670 = vrot.lane.b32.xlu0 %v9917_v62, %s14492_s25 }
 0x503   : > { %4672 = vrot.lane.b32.xlu1 %v9922_v15, %s14492_s25  ;;  %v10178_v61 = vpop.permute.xlu0 %3794 }
 0x505   : > { %v10180_v7 = vpop.permute.xlu1 %3796  ;;  %4678 = vrot.lane.b32.xlu0 %v9929_v20, %s14492_s25 }
 0x507   : > { %4680 = vrot.lane.b32.xlu1 %v9936_v23, %s14492_s25  ;;  %v10186_v0 = vpop.permute.xlu0 %3802 }
 0x509   : > { %v10188_v8 = vpop.permute.xlu1 %3804  ;;  %4732 = vrot.lane.b32.xlu0 %v9917_v62, %s14493_s26 }
 0x50b   : > { %4734 = vrot.lane.b32.xlu1 %v9922_v15, %s14493_s26  ;;  %v10196_v52 = vpop.permute.xlu0 %3856 }
 0x50c   : > { %14537 = vst [vmem:[#allocation18_spill] sm:$0xff] %v10196_v52 }
 0x50d   : > { %v10200_v10 = vpop.permute.xlu1 %3858  ;;  %4740 = vrot.lane.b32.xlu0 %v9929_v20, %s14493_s26 }
 0x50e   : > { %14538 = vst [vmem:[#allocation19_spill] sm:$0xff] %v10200_v10 }
 0x50f   : > { %4742 = vrot.lane.b32.xlu1 %v9936_v23, %s14493_s26  ;;  %v10210_v63 = vpop.permute.xlu0 %3864 }
 0x510   : > { %14539 = vst [vmem:[#allocation20_spill] sm:$0xff] %v10210_v63 }
 0x511   : > { %v10216_v53 = vpop.permute.xlu1 %3866  ;;  %3302 = vrot.lane.b32.xlu0 %v10204_v16, %s14541_s2 }
 0x512   : > { %14540 = vst [vmem:[#allocation21_spill] sm:$0xff] %v10216_v53 }
 0x513   : > { %3304 = vrot.lane.b32.xlu1 %v10212_v21, %s14541_s2  ;;  %v10224_v44 = vpop.permute.xlu0 %3918 }
 0x514   : > { %14542 = vst [vmem:[#allocation22_spill] sm:$0xff] %v10224_v44 }
 0x515   : > { %v10228_v1 = vpop.permute.xlu1 %3920  ;;  %3310 = vrot.lane.b32.xlu0 %v10220_v6, %s14541_s2 }
 0x516   : > { %14543 = vst [vmem:[#allocation23_spill] sm:$0xff] %v10228_v1 }
 0x517   : > { %3312 = vrot.lane.b32.xlu1 %v10226_v17, %s14541_s2  ;;  %v10234_v45 = vpop.permute.xlu0 %3926 }
 0x518   : > { %14544 = vst [vmem:[#allocation24_spill] sm:$0xff] %v10234_v45 }
 0x519   : > { %v10236_v22 = vpop.permute.xlu1 %3928  ;;  %3364 = vrot.lane.b32.xlu0 %v10204_v16, %s14546_s3 }
 0x51a   : > { %14545 = vst [vmem:[#allocation25_spill] sm:$0xff] %v10236_v22 }
 0x51b   : > { %3366 = vrot.lane.b32.xlu1 %v10212_v21, %s14546_s3  ;;  %v10242_v38 = vpop.permute.xlu0 %3980 }
 0x51c   : > { %14547 = vst [vmem:[#allocation26_spill] sm:$0xff] %v10242_v38 }
 0x51d   : > { %v10244_v18 = vpop.permute.xlu1 %3982  ;;  %3372 = vrot.lane.b32.xlu0 %v10220_v6, %s14546_s3 }
 0x51e   : > { %14548 = vst [vmem:[#allocation27_spill] sm:$0xff] %v10244_v18 }
 0x51f   : > { %3374 = vrot.lane.b32.xlu1 %v10226_v17, %s14546_s3  ;;  %v10250_v9 = vpop.permute.xlu0 %3988 }
 0x520   : > { %14549 = vst [vmem:[#allocation28_spill] sm:$0xff] %v10250_v9 }
 0x521   : > { %v10252_v49 = vpop.permute.xlu1 %3990  ;;  %3426 = vrot.lane.b32.xlu0 %v10204_v16, %s14551_s4 }
 0x522   : > { %14550 = vst [vmem:[#allocation29_spill] sm:$0xff] %v10252_v49  ;;  %v8375_v49 = vld [vmem:[%s14128_s1 + $0x1] ss:$8 sm:$0xf] }
 0x523   : > { %3428 = vrot.lane.b32.xlu1 %v10212_v21, %s14551_s4  ;;  %v10258_v48 = vpop.permute.xlu0 %4050 }
 0x524   : > { %14552 = vst [vmem:[#allocation30_spill] sm:$0xff] %v10258_v48 }
 0x525   : > { %v10260_v47 = vpop.permute.xlu1 %4052  ;;  %3434 = vrot.lane.b32.xlu0 %v10220_v6, %s14551_s4 }
 0x526   : > { %14553 = vst [vmem:[#allocation31_spill] sm:$0xff] %v10260_v47 }
 0x527   : > { %3436 = vrot.lane.b32.xlu1 %v10226_v17, %s14551_s4  ;;  %v10266_v46 = vpop.permute.xlu0 %4058 }
 0x528   : > { %14554 = vst [vmem:[#allocation32_spill] sm:$0xff] %v10266_v46 }
 0x529   : > { %v10268_v23 = vpop.permute.xlu1 %4060  ;;  %3488 = vrot.lane.b32.xlu0 %v10204_v16, %s14556_s5 }
 0x52a   : > { %14555 = vst [vmem:[#allocation33_spill] sm:$0xff] %v10268_v23  ;;  %v8541_v23 = vld [vmem:[%s14133_s6 + $0x4] ss:$16 sps:$4 sm:$0xff]  }
 0x52b   : > { %3490 = vrot.lane.b32.xlu1 %v10212_v21, %s14556_s5  ;;  %v10274_v20 = vpop.permute.xlu0 %4112  ;;  %5003 = vmatprep.mubr.bf16.mxu0 %v8541_v23 }
 0x52c   : > { %14557 = vst [vmem:[#allocation34_spill] sm:$0xff] %v10274_v20  ;;  %5109 = vmatprep.mubr.bf16.mxu1 %v8541_v23  ;;  %v3393_v23 = vrot.slane %v8375_v49, %v8674_v5 }
 0x52d   : > { %v10276_v15 = vpop.permute.xlu1 %4114  ;;  %3496 = vrot.lane.b32.xlu0 %v10220_v6, %s14556_s5 }
 0x52e   : > { %14558 = vst [vmem:[#allocation35_spill] sm:$0xff] %v10276_v15 }
 0x52f   : > { %3498 = vrot.lane.b32.xlu1 %v10226_v17, %s14556_s5  ;;  %v10282_v62 = vpop.permute.xlu0 %4120 }
 0x530   : > { %14559 = vst [vmem:[#allocation36_spill] sm:$0xff] %v10282_v62 }
 0x531   : > { %v10284_v48 = vpop.permute.xlu1 %4122  ;;  %3550 = vrot.lane.b32.xlu0 %v10204_v16, %s14561_s7 }
 0x532   : > { %14560 = vst [vmem:[#allocation37_spill] sm:$0xff] %v10284_v48 }
 0x533   : > { %3552 = vrot.lane.b32.xlu1 %v10212_v21, %s14561_s7  ;;  %v10290_v47 = vpop.permute.xlu0 %4174 }
 0x534   : > { %14562 = vst [vmem:[#allocation38_spill] sm:$0xff] %v10290_v47 }
 0x535   : > { %v10292_v20 = vpop.permute.xlu1 %4176  ;;  %3558 = vrot.lane.b32.xlu0 %v10220_v6, %s14561_s7 }
 0x536   : > { %14563 = vst [vmem:[#allocation39_spill] sm:$0xff] %v10292_v20 }
 0x537   : > { %3560 = vrot.lane.b32.xlu1 %v10226_v17, %s14561_s7  ;;  %v10298_v15 = vpop.permute.xlu0 %4182 }
 0x538   : > { %14564 = vst [vmem:[#allocation40_spill] sm:$0xff] %v10298_v15 }
 0x539   : > { %v10300_v62 = vpop.permute.xlu1 %4184  ;;  %3612 = vrot.lane.b32.xlu0 %v10204_v16, %s14529_s23 }
 0x53a   : > { %14565 = vst [vmem:[#allocation41_spill] sm:$0xff] %v10300_v62 }
 0x53b   : > { %3614 = vrot.lane.b32.xlu1 %v10212_v21, %s14529_s23  ;;  %v10306_v48 = vpop.permute.xlu0 %4236 }
 0x53c   : > { %14566 = vst [vmem:[#allocation42_spill] sm:$0xff] %v10306_v48 }
 0x53d   : > { %v10308_v47 = vpop.permute.xlu1 %4238  ;;  %3620 = vrot.lane.b32.xlu0 %v10220_v6, %s14529_s23 }
 0x53e   : > { %14567 = vst [vmem:[#allocation43_spill] sm:$0xff] %v10308_v47 }
 0x53f   : > { %3622 = vrot.lane.b32.xlu1 %v10226_v17, %s14529_s23  ;;  %v10314_v20 = vpop.permute.xlu0 %4244 }
 0x540   : > { %14568 = vst [vmem:[#allocation44_spill] sm:$0xff] %v10314_v20 }
 0x541   : > { %v10316_v15 = vpop.permute.xlu1 %4246  ;;  %3674 = vrot.lane.b32.xlu0 %v10204_v16, %s14530_s16 }
 0x542   : > { %14569 = vst [vmem:[#allocation45_spill] sm:$0xff] %v10316_v15 }
 0x543   : > { %3676 = vrot.lane.b32.xlu1 %v10212_v21, %s14530_s16  ;;  %v10322_v62 = vpop.permute.xlu0 %4298 }
 0x544   : > { %14570 = vst [vmem:[#allocation46_spill] sm:$0xff] %v10322_v62 }
 0x545   : > { %v10324_v48 = vpop.permute.xlu1 %4300  ;;  %3682 = vrot.lane.b32.xlu0 %v10220_v6, %s14530_s16 }
 0x546   : > { %14571 = vst [vmem:[#allocation47_spill] sm:$0xff] %v10324_v48 }
 0x547   : > { %3684 = vrot.lane.b32.xlu1 %v10226_v17, %s14530_s16  ;;  %v10330_v47 = vpop.permute.xlu0 %4306 }
 0x548   : > { %14572 = vst [vmem:[#allocation48_spill] sm:$0xff] %v10330_v47 }
 0x549   : > { %v10332_v20 = vpop.permute.xlu1 %4308  ;;  %3736 = vrot.lane.b32.xlu0 %v10204_v16, %s14531_s24 }
 0x54a   : > { %14573 = vst [vmem:[#allocation49_spill] sm:$0xff] %v10332_v20 }
 0x54b   : > { %3738 = vrot.lane.b32.xlu1 %v10212_v21, %s14531_s24  ;;  %v10338_v15 = vpop.permute.xlu0 %4360 }
 0x54c   : > { %14574 = vst [vmem:[#allocation50_spill] sm:$0xff] %v10338_v15 }
 0x54d   : > { %v10340_v62 = vpop.permute.xlu1 %4362  ;;  %3744 = vrot.lane.b32.xlu0 %v10220_v6, %s14531_s24 }
 0x54e   : > { %14575 = vst [vmem:[#allocation51_spill] sm:$0xff] %v10340_v62 }
 0x54f   : > { %3746 = vrot.lane.b32.xlu1 %v10226_v17, %s14531_s24  ;;  %v10346_v48 = vpop.permute.xlu0 %4368 }
 0x550   : > { %14576 = vst [vmem:[#allocation52_spill] sm:$0xff] %v10346_v48 }
 0x551   : > { %v10348_v47 = vpop.permute.xlu1 %4370  ;;  %3798 = vrot.lane.b32.xlu0 %v10204_v16, %s14532_s21 }
 0x552   : > { %14577 = vst [vmem:[#allocation53_spill] sm:$0xff] %v10348_v47 }
 0x553   : > { %3800 = vrot.lane.b32.xlu1 %v10212_v21, %s14532_s21  ;;  %v10354_v20 = vpop.permute.xlu0 %4422 }
 0x554   : > { %14578 = vst [vmem:[#allocation54_spill] sm:$0xff] %v10354_v20 }
 0x555   : > { %v10356_v15 = vpop.permute.xlu1 %4424  ;;  %3806 = vrot.lane.b32.xlu0 %v10220_v6, %s14532_s21 }
 0x556   : > { %14579 = vst [vmem:[#allocation55_spill] sm:$0xff] %v10356_v15 }
 0x557   : > { %3808 = vrot.lane.b32.xlu1 %v10226_v17, %s14532_s21  ;;  %v10362_v62 = vpop.permute.xlu0 %4430 }
 0x558   : > { %14580 = vst [vmem:[#allocation56_spill] sm:$0xff] %v10362_v62 }
 0x559   : > { %v10364_v48 = vpop.permute.xlu1 %4432  ;;  %3860 = vrot.lane.b32.xlu0 %v10204_v16, %s14533_s22 }
 0x55a   : > { %14581 = vst [vmem:[#allocation57_spill] sm:$0xff] %v10364_v48 }
 0x55b   : > { %3862 = vrot.lane.b32.xlu1 %v10212_v21, %s14533_s22  ;;  %v10370_v47 = vpop.permute.xlu0 %4484 }
 0x55c   : > { %14582 = vst [vmem:[#allocation58_spill] sm:$0xff] %v10370_v47 }
 0x55d   : > { %v10372_v20 = vpop.permute.xlu1 %4486  ;;  %3868 = vrot.lane.b32.xlu0 %v10220_v6, %s14533_s22 }
 0x55e   : > { %14583 = vst [vmem:[#allocation59_spill] sm:$0xff] %v10372_v20 }
 0x55f   : > { %3870 = vrot.lane.b32.xlu1 %v10226_v17, %s14533_s22  ;;  %v10378_v15 = vpop.permute.xlu0 %4492 }
 0x560   : > { %14584 = vst [vmem:[#allocation60_spill] sm:$0xff] %v10378_v15 }
 0x561   : > { %v10380_v62 = vpop.permute.xlu1 %4494  ;;  %3922 = vrot.lane.b32.xlu0 %v10204_v16, %s14534_s19 }
 0x562   : > { %14585 = vst [vmem:[#allocation61_spill] sm:$0xff] %v10380_v62 }
 0x563   : > { %3924 = vrot.lane.b32.xlu1 %v10212_v21, %s14534_s19  ;;  %v10386_v48 = vpop.permute.xlu0 %4546 }
 0x564   : > { %14586 = vst [vmem:[#allocation62_spill] sm:$0xff] %v10386_v48 }
 0x565   : > { %v10388_v47 = vpop.permute.xlu1 %4548  ;;  %3930 = vrot.lane.b32.xlu0 %v10220_v6, %s14534_s19 }
 0x566   : > { %14587 = vst [vmem:[#allocation63_spill] sm:$0xff] %v10388_v47 }
 0x567   : > { %3932 = vrot.lane.b32.xlu1 %v10226_v17, %s14534_s19  ;;  %v10394_v20 = vpop.permute.xlu0 %4554 }
 0x568   : > { %14588 = vst [vmem:[#allocation64_spill] sm:$0xff] %v10394_v20 }
 0x569   : > { %v10396_v15 = vpop.permute.xlu1 %4556  ;;  %3984 = vrot.lane.b32.xlu0 %v10204_v16, %s14535_s20 }
 0x56a   : > { %14589 = vst [vmem:[#allocation65_spill] sm:$0xff] %v10396_v15 }
 0x56b   : > { %3986 = vrot.lane.b32.xlu1 %v10212_v21, %s14535_s20  ;;  %v10402_v62 = vpop.permute.xlu0 %4608 }
 0x56c   : > { %14590 = vst [vmem:[#allocation66_spill] sm:$0xff] %v10402_v62 }
 0x56d   : > { %v10404_v48 = vpop.permute.xlu1 %4610  ;;  %3992 = vrot.lane.b32.xlu0 %v10220_v6, %s14535_s20 }
 0x56e   : > { %14591 = vst [vmem:[#allocation67_spill] sm:$0xff] %v10404_v48 }
 0x56f   : > { %3994 = vrot.lane.b32.xlu1 %v10226_v17, %s14535_s20  ;;  %v10410_v47 = vpop.permute.xlu0 %4616 }
 0x570   : > { %14592 = vst [vmem:[#allocation68_spill] sm:$0xff] %v10410_v47 }
 0x571   : > { %v10412_v20 = vpop.permute.xlu1 %4618  ;;  %4054 = vrot.lane.b32.xlu0 %v10204_v16, %s14536_s0 }
 0x572   : > { %14593 = vst [vmem:[#allocation69_spill] sm:$0xff] %v10412_v20 }
 0x573   : > { %4056 = vrot.lane.b32.xlu1 %v10212_v21, %s14536_s0  ;;  %v10418_v15 = vpop.permute.xlu0 %4670 }
 0x574   : > { %14594 = vst [vmem:[#allocation70_spill] sm:$0xff] %v10418_v15 }
 0x575   : > { %v10420_v62 = vpop.permute.xlu1 %4672  ;;  %4062 = vrot.lane.b32.xlu0 %v10220_v6, %s14536_s0 }
 0x576   : > { %14595 = vst [vmem:[#allocation71_spill] sm:$0xff] %v10420_v62 }
 0x577   : > { %4064 = vrot.lane.b32.xlu1 %v10226_v17, %s14536_s0  ;;  %v10426_v48 = vpop.permute.xlu0 %4678 }
 0x578   : > { %14596 = vst [vmem:[#allocation72_spill] sm:$0xff] %v10426_v48 }
 0x579   : > { %v10428_v47 = vpop.permute.xlu1 %4680  ;;  %4116 = vrot.lane.b32.xlu0 %v10204_v16, %s14479_s12 }
 0x57a   : > { %14597 = vst [vmem:[#allocation73_spill] sm:$0xff] %v10428_v47  ;;  %v3322_v47 = vld [vmem:[%s14128_s1] ss:$8 sm:$0xf] }
 0x57b   : > { %4118 = vrot.lane.b32.xlu1 %v10212_v21, %s14479_s12  ;;  %v10434_v20 = vpop.permute.xlu0 %4732  ;;  %v3327_v9 = vrot.slane %v3322_v47, %v8668_v3  ;;  %v3339_v45 = vrot.slane %v3322_v47, %v8671_v4  ;;  %v3335_v63 = vrot.slane %v3322_v47, %v8665_v2 }
 0x57c   : > { %14598 = vst [vmem:[#allocation74_spill] sm:$0xff] %v10434_v20 }
 0x57d   : > { %v10436_v15 = vpop.permute.xlu1 %4734  ;;  %4124 = vrot.lane.b32.xlu0 %v10220_v6, %s14479_s12 }
 0x57e   : > { %14599 = vst [vmem:[#allocation75_spill] sm:$0xff] %v10436_v15  ;;  %v3331_v15 = vrot.slane %v3322_v47, %v8674_v5 }
 0x57f   : > { %4126 = vrot.lane.b32.xlu1 %v10226_v17, %s14479_s12  ;;  %v10442_v62 = vpop.permute.xlu0 %4740 }
 0x580   : > { %14600 = vst [vmem:[#allocation76_spill] sm:$0xff] %v10442_v62 }
 0x581   : > { %v10447_v48 = vpop.permute.xlu1 %4742  ;;  %4178 = vrot.lane.b32.xlu0 %v10204_v16, %s14482_s15 }
 0x582   : > { %14601 = vst [vmem:[#allocation77_spill] sm:$0xff] %v10447_v48 }
 0x583   : > { %4180 = vrot.lane.b32.xlu1 %v10212_v21, %s14482_s15  ;;  %v3303_v20 = vpop.permute.xlu0 %3302 }
 0x584   : > { %v3318_v62 = vsel %vm395_vm2, %v10050_v36, %v3303_v20  ;;  %v3316_v53 = vsel %vm395_vm2, %v3303_v20, %v10058_v26 }
 0x585   : > { %v3305_v46 = vpop.permute.xlu1 %3304  ;;  %4186 = vrot.lane.b32.xlu0 %v10220_v6, %s14482_s15  ;;  %v3345_v18 = vmul.f32 %v3331_v15, %v3318_v62 }
 0x586   : > { %v3319_v48 = vsel %vm395_vm2, %v10052_v25, %v3305_v46 }
 0x587   : > { %v3349_v38 = vmul.f32 %v3331_v15, %v3319_v48  ;;  %4188 = vrot.lane.b32.xlu1 %v10226_v17, %s14482_s15  ;;  %v3311_v22 = vpop.permute.xlu0 %3310  ;;  %v3317_v48 = vsel %vm395_vm2, %v3305_v46, %v10060_v24 }
 0x588   : > { %v3314_v1 = vsel %vm395_vm2, %v10058_v26, %v3311_v22  ;;  %v3320_v44 = vsel %vm395_vm2, %v3311_v22, %v10050_v36  ;;  %v3350_v52 = vmul.f32 %v3335_v63, %v3317_v48 }
 0x589   : > { %v3353_v62 = vpack.c.bf16 %v3349_v38, %v3345_v18  ;;  %v3313_v15 = vpop.permute.xlu1 %3312  ;;  %4240 = vrot.lane.b32.xlu0 %v10204_v16, %s14485_s17  ;;  %v3344_v10 = vmul.f32 %v3327_v9, %v3320_v44  ;;  %v3347_v36 = vmul.f32 %v3339_v45, %v3314_v1 }
 0x58a   : > { %v3315_v47 = vsel %vm395_vm2, %v10060_v24, %v3313_v15  ;;  %v3321_v46 = vsel %vm395_vm2, %v3313_v15, %v10052_v25  ;;  %v3346_v25 = vmul.f32 %v3335_v63, %v3316_v53 }
 0x58b   : > { %v3348_v22 = vmul.f32 %v3327_v9, %v3321_v46  ;;  %v3351_v38 = vmul.f32 %v3339_v45, %v3315_v47  ;;  %4242 = vrot.lane.b32.xlu1 %v10212_v21, %s14485_s17  ;;  %v3365_v18 = vpop.permute.xlu0 %3364  ;;  %4971 = vmatprep.subr.bf16.mxu0 %v3353_v62  ;;  %v3389_v45 = vrot.slane %v8375_v49, %v8668_v3  ;;  %v8376_v9 = vld [vmem:[%s14128_s1 + $0x2] ss:$8 sm:$0xf] }
 0x58c   : > { %v3380_v20 = vsel %vm442_vm1, %v10066_v28, %v3365_v18  ;;  %v3354_v53 = vpack.c.bf16 %v3350_v52, %v3346_v25  ;;  %v3397_v46 = vrot.slane %v8375_v49, %v8665_v2  ;;  %v3455_v52 = vrot.slane %v8376_v9, %v8674_v5 }
 0x58d   : > { %v3352_v26 = vpack.c.bf16 %v3348_v22, %v3344_v10  ;;  %v3355_v44 = vpack.c.bf16 %v3351_v38, %v3347_v36  ;;  %v3367_v24 = vpop.permute.xlu1 %3366  ;;  %4248 = vrot.lane.b32.xlu0 %v10220_v6, %s14485_s17  ;;  %v3407_v48 = vmul.f32 %v3393_v23, %v3380_v20  ;;  %v3401_v10 = vrot.slane %v8375_v49, %v8671_v4 }
 0x58e   : > { %v3381_v1 = vsel %vm442_vm1, %v10068_v29, %v3367_v24  ;;  %v3378_v38 = vsel %vm442_vm1, %v3365_v18, %v10074_v27 }
 0x58f   : > { %v3411_v62 = vmul.f32 %v3393_v23, %v3381_v1  ;;  %4250 = vrot.lane.b32.xlu1 %v10226_v17, %s14485_s17  ;;  %v3373_v15 = vpop.permute.xlu0 %3372  ;;  %4972 = vmatpush1.bf16.msra.mxu0 %v3352_v26  ;;  %v3379_v23 = vsel %vm442_vm1, %v3367_v24, %v10076_v33 }
 0x590   : > { %v3376_v63 = vsel %vm442_vm1, %v10074_v27, %v3373_v15  ;;  %v3382_v47 = vsel %vm442_vm1, %v3373_v15, %v10066_v28  ;;  %5077 = vmatprep.subr.bf16.mxu1 %v3355_v44  ;;  %v3412_v1 = vmul.f32 %v3397_v46, %v3379_v23 }
 0x591   : > { %v3415_v36 = vpack.c.bf16 %v3411_v62, %v3407_v48  ;;  %v3375_v22 = vpop.permute.xlu1 %3374  ;;  %4302 = vrot.lane.b32.xlu0 %v10204_v16, %s14486_s11  ;;  %v3406_v20 = vmul.f32 %v3389_v45, %v3382_v47  ;;  %5078 = vmatpush1.bf16.msra.mxu1 %v3354_v53  ;;  %v3409_v26 = vmul.f32 %v3401_v10, %v3376_v63 }
 0x592   : > { %v3377_v49 = vsel %vm442_vm1, %v10076_v33, %v3375_v22  ;;  %v3383_v28 = vsel %vm442_vm1, %v3375_v22, %v10068_v29  ;;  %v3408_v29 = vmul.f32 %v3397_v46, %v3378_v38  ;;  %v3451_v62 = vrot.slane %v8376_v9, %v8668_v3 }
 0x593   : > { %v3410_v44 = vmul.f32 %v3389_v45, %v3383_v28  ;;  %v3413_v24 = vmul.f32 %v3401_v10, %v3377_v49  ;;  %4304 = vrot.lane.b32.xlu1 %v10212_v21, %s14486_s11  ;;  %v3427_v25 = vpop.permute.xlu0 %3426  ;;  %4973 = vmatprep.subr.bf16.mxu0 %v3415_v36  ;;  %v8377_v10 = vld [vmem:[%s14128_s1 + $0x3] ss:$8 sm:$0xf]  ;;  %v3463_v63 = vrot.slane %v8376_v9, %v8671_v4 }
 0x594   : > { %v3442_v27 = vsel %vm502_vm4, %v10082_v30, %v3427_v25  ;;  %v3416_v46 = vpack.c.bf16 %v3412_v1, %v3408_v29  ;;  %v3459_v22 = vrot.slane %v8376_v9, %v8665_v2  ;;  %v3517_v49 = vrot.slane %v8377_v10, %v8674_v5 }
 0x595   : > { %v3414_v18 = vpack.c.bf16 %v3410_v44, %v3406_v20  ;;  %v3417_v33 = vpack.c.bf16 %v3413_v24, %v3409_v26  ;;  %v3429_v48 = vpop.permute.xlu1 %3428  ;;  %4310 = vrot.lane.b32.xlu0 %v10220_v6, %s14486_s11  ;;  %v3469_v15 = vmul.f32 %v3455_v52, %v3442_v27  ;;  %v3440_v28 = vsel %vm502_vm4, %v3427_v25, %v10090_v14 }
 0x596   : > { %v3443_v45 = vsel %vm502_vm4, %v10084_v12, %v3429_v48  ;;  %v3513_v29 = vrot.slane %v8377_v10, %v8668_v3 }
 0x597   : > { %v3473_v53 = vmul.f32 %v3455_v52, %v3443_v45  ;;  %4312 = vrot.lane.b32.xlu1 %v10226_v17, %s14486_s11  ;;  %v3435_v47 = vpop.permute.xlu0 %3434  ;;  %4974 = vmatpush1.bf16.msra.mxu0 %v3414_v18  ;;  %v3441_v52 = vsel %vm502_vm4, %v3429_v48, %v10092_v39  ;;  %v8378_v45 = vld [vmem:[%s14128_s1 + $0x4] ss:$8 sm:$0xf] }
 0x598   : > { %v3438_v23 = vsel %vm502_vm4, %v10090_v14, %v3435_v47  ;;  %v3444_v36 = vsel %vm502_vm4, %v3435_v47, %v10082_v30  ;;  %5079 = vmatprep.subr.bf16.mxu1 %v3417_v33  ;;  %v3474_v18 = vmul.f32 %v3459_v22, %v3441_v52 }
 0x599   : > { %v3477_v38 = vpack.c.bf16 %v3473_v53, %v3469_v15  ;;  %v3437_v20 = vpop.permute.xlu1 %3436  ;;  %4364 = vrot.lane.b32.xlu0 %v10204_v16, %s14487_s18  ;;  %v3468_v26 = vmul.f32 %v3451_v62, %v3444_v36  ;;  %5080 = vmatpush1.bf16.msra.mxu1 %v3416_v46  ;;  %v3471_v44 = vmul.f32 %v3463_v63, %v3438_v23 }
 0x59a   : > { %v3439_v30 = vsel %vm502_vm4, %v10092_v39, %v3437_v20  ;;  %v3445_v9 = vsel %vm502_vm4, %v3437_v20, %v10084_v12  ;;  %v3470_v12 = vmul.f32 %v3459_v22, %v3440_v28  ;;  %v3525_v53 = vrot.slane %v8377_v10, %v8671_v4 }
 0x59b   : > { %v3472_v24 = vmul.f32 %v3451_v62, %v3445_v9  ;;  %v3475_v1 = vmul.f32 %v3463_v63, %v3439_v30  ;;  %4366 = vrot.lane.b32.xlu1 %v10212_v21, %s14487_s18  ;;  %v3489_v27 = vpop.permute.xlu0 %3488  ;;  %4975 = vmatprep.subr.bf16.mxu0 %v3477_v38  ;;  %v3521_v36 = vrot.slane %v8377_v10, %v8665_v2 }
 0x59c   : > { %v3504_v14 = vsel %vm550_vm3, %v10098_v31, %v3489_v27  ;;  %v3478_v47 = vpack.c.bf16 %v3474_v18, %v3470_v12  ;;  %v3579_v20 = vrot.slane %v8378_v45, %v8674_v5  ;;  %v3587_v12 = vrot.slane %v8378_v45, %v8671_v4 }
 0x59d   : > { %v3476_v25 = vpack.c.bf16 %v3472_v24, %v3468_v26  ;;  %v3479_v39 = vpack.c.bf16 %v3475_v1, %v3471_v44  ;;  %v3491_v33 = vpop.permute.xlu1 %3490  ;;  %4372 = vrot.lane.b32.xlu0 %v10220_v6, %s14487_s18  ;;  %v3531_v62 = vmul.f32 %v3517_v49, %v3504_v14  ;;  %v3575_v14 = vrot.slane %v8378_v45, %v8668_v3 }
 0x59e   : > { %v3505_v48 = vsel %vm550_vm3, %v10100_v32, %v3491_v33  ;;  %v3503_v22 = vsel %vm550_vm3, %v3491_v33, %v10108_v35 }
 0x59f   : > { %v3535_v15 = vmul.f32 %v3517_v49, %v3505_v48  ;;  %4374 = vrot.lane.b32.xlu1 %v10226_v17, %s14487_s18  ;;  %v3497_v63 = vpop.permute.xlu0 %3496  ;;  %4976 = vmatpush1.bf16.msra.mxu0 %v3476_v25  ;;  %v3502_v49 = vsel %vm550_vm3, %v3489_v27, %v10106_v34  ;;  %v3536_v24 = vmul.f32 %v3521_v36, %v3503_v22  ;;  %v8379_v25 = vld [vmem:[%s14128_s1 + $0x5] ss:$8 sm:$0xf] }
 0x5a0   : > { %v3500_v46 = vsel %vm550_vm3, %v10106_v34, %v3497_v63  ;;  %v3506_v23 = vsel %vm550_vm3, %v3497_v63, %v10098_v31  ;;  %5081 = vmatprep.subr.bf16.mxu1 %v3479_v39 }
 0x5a1   : > { %v3539_v52 = vpack.c.bf16 %v3535_v15, %v3531_v62  ;;  %v3499_v38 = vpop.permute.xlu1 %3498  ;;  %4426 = vrot.lane.b32.xlu0 %v10204_v16, %s14488_s29  ;;  %v3530_v28 = vmul.f32 %v3513_v29, %v3506_v23  ;;  %5082 = vmatpush1.bf16.msra.mxu1 %v3478_v47  ;;  %v3533_v26 = vmul.f32 %v3525_v53, %v3500_v46 }
 0x5a2   : > { %v3501_v31 = vsel %vm550_vm3, %v10108_v35, %v3499_v38  ;;  %v3507_v10 = vsel %vm550_vm3, %v3499_v38, %v10100_v32  ;;  %v3532_v32 = vmul.f32 %v3521_v36, %v3502_v49  ;;  %v3641_v23 = vrot.slane %v8379_v25, %v8674_v5 }
 0x5a3   : > { %v3534_v30 = vmul.f32 %v3513_v29, %v3507_v10  ;;  %v3537_v9 = vmul.f32 %v3525_v53, %v3501_v31  ;;  %4428 = vrot.lane.b32.xlu1 %v10212_v21, %s14488_s29  ;;  %v3551_v44 = vpop.permute.xlu0 %3550  ;;  %4977 = vmatprep.subr.bf16.mxu0 %v3539_v52  ;;  %v3583_v53 = vrot.slane %v8378_v45, %v8665_v2 }
 0x5a4   : > { %v3566_v34 = vsel %vm610_vm6, %v10114_v37, %v3551_v44  ;;  %v3540_v29 = vpack.c.bf16 %v3536_v24, %v3532_v32  ;;  %v3564_v36 = vsel %vm610_vm6, %v3551_v44, %v10122_v11 }
 0x5a5   : > { %v3538_v1 = vpack.c.bf16 %v3534_v30, %v3530_v28  ;;  %v3541_v35 = vpack.c.bf16 %v3537_v9, %v3533_v26  ;;  %v3553_v27 = vpop.permute.xlu1 %3552  ;;  %4434 = vrot.lane.b32.xlu0 %v10220_v6, %s14488_s29  ;;  %v3593_v39 = vmul.f32 %v3579_v20, %v3566_v34  ;;  %v3637_v30 = vrot.slane %v8379_v25, %v8668_v3  ;;  %v8380_v9 = vld [vmem:[%s14128_s1 + $0x6] ss:$8 sm:$0xf] }
 0x5a6   : > { %v3567_v18 = vsel %vm610_vm6, %v10116_v13, %v3553_v27  ;;  %v3565_v63 = vsel %vm610_vm6, %v3553_v27, %v10124_v41  ;;  %v3649_v34 = vrot.slane %v8379_v25, %v8671_v4 }
 0x5a7   : > { %v3597_v33 = vmul.f32 %v3579_v20, %v3567_v18  ;;  %4436 = vrot.lane.b32.xlu1 %v10226_v17, %s14488_s29  ;;  %v3559_v48 = vpop.permute.xlu0 %3558  ;;  %4978 = vmatpush1.bf16.msra.mxu0 %v3538_v1  ;;  %v3598_v28 = vmul.f32 %v3583_v53, %v3565_v63  ;;  %v3645_v18 = vrot.slane %v8379_v25, %v8665_v2 }
 0x5a8   : > { %v3562_v62 = vsel %vm610_vm6, %v10122_v11, %v3559_v48  ;;  %v3568_v15 = vsel %vm610_vm6, %v3559_v48, %v10114_v37  ;;  %5083 = vmatprep.subr.bf16.mxu1 %v3541_v35 }
 0x5a9   : > { %v3601_v47 = vpack.c.bf16 %v3597_v33, %v3593_v39  ;;  %v3561_v46 = vpop.permute.xlu1 %3560  ;;  %4488 = vrot.lane.b32.xlu0 %v10204_v16, %s14489_s30  ;;  %v3592_v22 = vmul.f32 %v3575_v14, %v3568_v15  ;;  %5084 = vmatpush1.bf16.msra.mxu1 %v3540_v29  ;;  %v3595_v52 = vmul.f32 %v3587_v12, %v3562_v62 }
 0x5aa   : > { %v3563_v37 = vsel %vm610_vm6, %v10124_v41, %v3561_v46  ;;  %v3569_v45 = vsel %vm610_vm6, %v3561_v46, %v10116_v13  ;;  %v3594_v13 = vmul.f32 %v3583_v53, %v3564_v36 }
 0x5ab   : > { %v3596_v38 = vmul.f32 %v3575_v14, %v3569_v45  ;;  %v3599_v20 = vmul.f32 %v3587_v12, %v3563_v37  ;;  %4490 = vrot.lane.b32.xlu1 %v10212_v21, %s14489_s30  ;;  %v3613_v49 = vpop.permute.xlu0 %3612  ;;  %4979 = vmatprep.subr.bf16.mxu0 %v3601_v47  ;;  %v3703_v12 = vrot.slane %v8380_v9, %v8674_v5  ;;  %v8381_v37 = vld [vmem:[%s14128_s1 + $0x7] ss:$8 sm:$0xf] }
 0x5ac   : > { %v3628_v11 = vsel %vm658_vm5, %v10130_v42, %v3613_v49  ;;  %v3602_v35 = vpack.c.bf16 %v3598_v28, %v3594_v13  ;;  %v3626_v48 = vsel %vm658_vm5, %v3613_v49, %v10138_v50 }
 0x5ad   : > { %v3600_v31 = vpack.c.bf16 %v3596_v38, %v3592_v22  ;;  %v3603_v41 = vpack.c.bf16 %v3599_v20, %v3595_v52  ;;  %v3615_v10 = vpop.permute.xlu1 %3614  ;;  %4496 = vrot.lane.b32.xlu0 %v10220_v6, %s14489_s30  ;;  %v3655_v44 = vmul.f32 %v3641_v23, %v3628_v11  ;;  %v3699_v22 = vrot.slane %v8380_v9, %v8668_v3 }
 0x5ae   : > { %v3629_v26 = vsel %vm658_vm5, %v10132_v43, %v3615_v10  ;;  %v3627_v14 = vsel %vm658_vm5, %v3615_v10, %v10140_v51  ;;  %v3711_v38 = vrot.slane %v8380_v9, %v8671_v4 }
 0x5af   : > { %v3659_v24 = vmul.f32 %v3641_v23, %v3629_v26  ;;  %4498 = vrot.lane.b32.xlu1 %v10226_v17, %s14489_s30  ;;  %v3621_v1 = vpop.permute.xlu0 %3620  ;;  %4980 = vmatpush1.bf16.msra.mxu0 %v3600_v31  ;;  %v3660_v47 = vmul.f32 %v3645_v18, %v3627_v14  ;;  %v3707_v31 = vrot.slane %v8380_v9, %v8665_v2 }
 0x5b0   : > { %v3624_v27 = vsel %vm658_vm5, %v10138_v50, %v3621_v1  ;;  %v3630_v32 = vsel %vm658_vm5, %v3621_v1, %v10130_v42  ;;  %5085 = vmatprep.subr.bf16.mxu1 %v3603_v41  ;;  %v3765_v26 = vrot.slane %v8381_v37, %v8674_v5 }
 0x5b1   : > { %v3663_v39 = vpack.c.bf16 %v3659_v24, %v3655_v44  ;;  %v3623_v33 = vpop.permute.xlu1 %3622  ;;  %4550 = vrot.lane.b32.xlu0 %v10204_v16, %s14490_s27  ;;  %v3654_v29 = vmul.f32 %v3637_v30, %v3630_v32  ;;  %5086 = vmatpush1.bf16.msra.mxu1 %v3602_v35  ;;  %v3657_v62 = vmul.f32 %v3649_v34, %v3624_v27 }
 0x5b2   : > { %v3625_v42 = vsel %vm658_vm5, %v10140_v51, %v3623_v33  ;;  %v3631_v25 = vsel %vm658_vm5, %v3623_v33, %v10132_v43  ;;  %v3656_v43 = vmul.f32 %v3645_v18, %v3626_v48  ;;  %v8382_v33 = vld [vmem:[%s14128_s1 + $0x20] ss:$8 sm:$0xf] }
 0x5b3   : > { %v3658_v15 = vmul.f32 %v3637_v30, %v3631_v25  ;;  %v3661_v53 = vmul.f32 %v3649_v34, %v3625_v42  ;;  %4552 = vrot.lane.b32.xlu1 %v10212_v21, %s14490_s27  ;;  %v3675_v63 = vpop.permute.xlu0 %3674  ;;  %4981 = vmatprep.subr.bf16.mxu0 %v3663_v39  ;;  %v3761_v39 = vrot.slane %v8381_v37, %v8668_v3 }
 0x5b4   : > { %v3690_v50 = vsel %vm718_vm8, %v10146_v40, %v3675_v63  ;;  %v3664_v49 = vpack.c.bf16 %v3660_v47, %v3656_v43  ;;  %v3688_v30 = vsel %vm718_vm8, %v3675_v63, %v10154_v55 }
 0x5b5   : > { %v3662_v46 = vpack.c.bf16 %v3658_v15, %v3654_v29  ;;  %v3665_v51 = vpack.c.bf16 %v3661_v53, %v3657_v62  ;;  %v3677_v23 = vpop.permute.xlu1 %3676  ;;  %4558 = vrot.lane.b32.xlu0 %v10220_v6, %s14490_s27  ;;  %v3717_v45 = vmul.f32 %v3703_v12, %v3690_v50  ;;  %v3773_v29 = vrot.slane %v8381_v37, %v8671_v4 }
 0x5b6   : > { %v3691_v36 = vsel %vm718_vm8, %v10148_v54, %v3677_v23  ;;  %v3689_v41 = vsel %vm718_vm8, %v3677_v23, %v10156_v56  ;;  %v3769_v53 = vrot.slane %v8381_v37, %v8665_v2 }
 0x5b7   : > { %v3721_v52 = vmul.f32 %v3703_v12, %v3691_v36  ;;  %4560 = vrot.lane.b32.xlu1 %v10226_v17, %s14490_s27  ;;  %v3683_v20 = vpop.permute.xlu0 %3682  ;;  %4982 = vmatpush1.bf16.msra.mxu0 %v3662_v46  ;;  %v3722_v27 = vmul.f32 %v3707_v31, %v3689_v41  ;;  %v3827_v46 = vrot.slane %v8382_v33, %v8674_v5 }
 0x5b8   : > { %v3686_v28 = vsel %vm718_vm8, %v10154_v55, %v3683_v20  ;;  %v3692_v11 = vsel %vm718_vm8, %v3683_v20, %v10146_v40  ;;  %5087 = vmatprep.subr.bf16.mxu1 %v3665_v51 }
 0x5b9   : > { %v3725_v10 = vpack.c.bf16 %v3721_v52, %v3717_v45  ;;  %v3685_v13 = vpop.permute.xlu1 %3684  ;;  %4612 = vrot.lane.b32.xlu0 %v10204_v16, %s14491_s28  ;;  %v3716_v44 = vmul.f32 %v3699_v22, %v3692_v11  ;;  %5088 = vmatpush1.bf16.msra.mxu1 %v3664_v49  ;;  %v3719_v24 = vmul.f32 %v3711_v38, %v3686_v28 }
 0x5ba   : > { %v3687_v40 = vsel %vm718_vm8, %v10156_v56, %v3685_v13  ;;  %v3693_v9 = vsel %vm718_vm8, %v3685_v13, %v10148_v54  ;;  %v3718_v54 = vmul.f32 %v3707_v31, %v3688_v30  ;;  %v3823_v28 = vrot.slane %v8382_v33, %v8668_v3  ;;  %v8383_v31 = vld [vmem:[%s14128_s1 + $0x21] ss:$8 sm:$0xf] }
 0x5bb   : > { %v3720_v34 = vmul.f32 %v3699_v22, %v3693_v9  ;;  %v3723_v1 = vmul.f32 %v3711_v38, %v3687_v40  ;;  %4614 = vrot.lane.b32.xlu1 %v10212_v21, %s14491_s28  ;;  %v3737_v35 = vpop.permute.xlu0 %3736  ;;  %4983 = vmatprep.subr.bf16.mxu0 %v3725_v10  ;;  %v3835_v11 = vrot.slane %v8382_v33, %v8671_v4 }
 0x5bc   : > { %v3752_v55 = vsel %vm766_vm7, %v10162_v57, %v3737_v35  ;;  %v3726_v25 = vpack.c.bf16 %v3722_v27, %v3718_v54  ;;  %v3750_v51 = vsel %vm766_vm7, %v3737_v35, %v10170_v59  ;;  %v3889_v35 = vrot.slane %v8383_v31, %v8674_v5 }
 0x5bd   : > { %v3724_v32 = vpack.c.bf16 %v3720_v34, %v3716_v44  ;;  %v3727_v56 = vpack.c.bf16 %v3723_v1, %v3719_v24  ;;  %v3739_v18 = vpop.permute.xlu1 %3738  ;;  %4620 = vrot.lane.b32.xlu0 %v10220_v6, %s14491_s28  ;;  %v3779_v12 = vmul.f32 %v3765_v26, %v3752_v55  ;;  %v3831_v44 = vrot.slane %v8382_v33, %v8665_v2 }
 0x5be   : > { %v3753_v14 = vsel %vm766_vm7, %v10164_v58, %v3739_v18  ;;  %v3751_v63 = vsel %vm766_vm7, %v3739_v18, %v10172_v60 }
 0x5bf   : > { %v3783_v48 = vmul.f32 %v3765_v26, %v3753_v14  ;;  %4622 = vrot.lane.b32.xlu1 %v10226_v17, %s14491_s28  ;;  %v3745_v42 = vpop.permute.xlu0 %3744  ;;  %4984 = vmatpush1.bf16.msra.mxu0 %v3724_v32  ;;  %v3784_v52 = vmul.f32 %v3769_v53, %v3751_v63 }
 0x5c0   : > { %v3748_v62 = vsel %vm766_vm7, %v10170_v59, %v3745_v42  ;;  %v3754_v15 = vsel %vm766_vm7, %v3745_v42, %v10162_v57  ;;  %5089 = vmatprep.subr.bf16.mxu1 %v3727_v56 }
 0x5c1   : > { %v3787_v47 = vpack.c.bf16 %v3783_v48, %v3779_v12  ;;  %v3747_v50 = vpop.permute.xlu1 %3746  ;;  %4674 = vrot.lane.b32.xlu0 %v10204_v16, %s14492_s25  ;;  %v3778_v23 = vmul.f32 %v3761_v39, %v3754_v15  ;;  %5090 = vmatpush1.bf16.msra.mxu1 %v3726_v25  ;;  %v3781_v36 = vmul.f32 %v3773_v29, %v3748_v62 }
 0x5c2   : > { %v3749_v57 = vsel %vm766_vm7, %v10172_v60, %v3747_v50  ;;  %v3755_v43 = vsel %vm766_vm7, %v3747_v50, %v10164_v58  ;;  %v3780_v58 = vmul.f32 %v3769_v53, %v3750_v51  ;;  %v3885_v25 = vrot.slane %v8383_v31, %v8668_v3  ;;  %v14604_v53 = vld [vmem:[#allocation21_spill] sm:$0xff] }
 0x5c3   : > { %v3782_v22 = vmul.f32 %v3761_v39, %v3755_v43  ;;  %v3785_v37 = vmul.f32 %v3773_v29, %v3749_v57  ;;  %4676 = vrot.lane.b32.xlu1 %v10212_v21, %s14492_s25  ;;  %v3799_v45 = vpop.permute.xlu0 %3798  ;;  %4985 = vmatprep.subr.bf16.mxu0 %v3787_v47  ;;  %v14602_v39 = vld [vmem:[#allocation18_spill] sm:$0xff]  ;;  %v14603_v29 = vld [vmem:[#allocation19_spill] sm:$0xff]  ;;  %v3897_v62 = vrot.slane %v8383_v31, %v8671_v4 }
 0x5c4   : > { %v3814_v59 = vsel %vm826_vm10, %v10178_v61, %v3799_v45  ;;  %v3788_v30 = vpack.c.bf16 %v3784_v52, %v3780_v58  ;;  %v3812_v24 = vsel %vm826_vm10, %v3799_v45, %v10186_v0  ;;  %v3893_v51 = vrot.slane %v8383_v31, %v8665_v2  ;;  %v14606_v31 = vld [vmem:[#allocation22_spill] sm:$0xff] }
 0x5c5   : > { %v3786_v38 = vpack.c.bf16 %v3782_v22, %v3778_v23  ;;  %v3789_v60 = vpack.c.bf16 %v3785_v37, %v3781_v36  ;;  %v3801_v20 = vpop.permute.xlu1 %3800  ;;  %4682 = vrot.lane.b32.xlu0 %v10220_v6, %s14492_s25  ;;  %v3841_v41 = vmul.f32 %v3827_v46, %v3814_v59  ;;  %v3842_v14 = vmul.f32 %v3831_v44, %v3812_v24  ;;  %v14605_v23 = vld [vmem:[#allocation20_spill] sm:$0xff] }
 0x5c6   : > { %v3815_v49 = vsel %vm826_vm10, %v10180_v7, %v3801_v20  ;;  %v3813_v10 = vsel %vm826_vm10, %v3801_v20, %v10188_v8 }
 0x5c7   : > { %v3845_v13 = vmul.f32 %v3827_v46, %v3815_v49  ;;  %4684 = vrot.lane.b32.xlu1 %v10226_v17, %s14492_s25  ;;  %v3807_v26 = vpop.permute.xlu0 %3806  ;;  %4986 = vmatpush1.bf16.msra.mxu0 %v3786_v38  ;;  %v3846_v27 = vmul.f32 %v3831_v44, %v3813_v10  ;;  %v8384_v46 = vld [vmem:[%s14128_s1 + $0x22] ss:$8 sm:$0xf] }
 0x5c8   : > { %v3810_v40 = vsel %vm826_vm10, %v10186_v0, %v3807_v26  ;;  %v3816_v9 = vsel %vm826_vm10, %v3807_v26, %v10178_v61  ;;  %5091 = vmatprep.subr.bf16.mxu1 %v3789_v60  ;;  %v3951_v38 = vrot.slane %v8384_v46, %v8674_v5  ;;  %v14607_v44 = vld [vmem:[#allocation23_spill] sm:$0xff]  ;;  %v3959_v24 = vrot.slane %v8384_v46, %v8671_v4 }
 0x5c9   : > { %v3849_v34 = vpack.c.bf16 %v3845_v13, %v3841_v41  ;;  %v3809_v1 = vpop.permute.xlu1 %3808  ;;  %4736 = vrot.lane.b32.xlu0 %v10204_v16, %s14493_s26  ;;  %v3840_v55 = vmul.f32 %v3823_v28, %v3816_v9  ;;  %5092 = vmatpush1.bf16.msra.mxu1 %v3788_v30  ;;  %v3843_v56 = vmul.f32 %v3835_v11, %v3810_v40 }
 0x5ca   : > { %v3811_v32 = vsel %vm826_vm10, %v10188_v8, %v3809_v1  ;;  %v3817_v61 = vsel %vm826_vm10, %v3809_v1, %v10180_v7  ;;  %v3850_v7 = vpack.c.bf16 %v3846_v27, %v3842_v14  ;;  %v3947_v9 = vrot.slane %v8384_v46, %v8668_v3  ;;  %v14608_v1 = vld [vmem:[#allocation25_spill] sm:$0xff] }
 0x5cb   : > { %v3844_v0 = vmul.f32 %v3823_v28, %v3817_v61  ;;  %v3847_v18 = vmul.f32 %v3835_v11, %v3811_v32  ;;  %4738 = vrot.lane.b32.xlu1 %v10212_v21, %s14493_s26  ;;  %v3861_v54 = vpop.permute.xlu0 %3860  ;;  %4987 = vmatprep.subr.bf16.mxu0 %v3849_v34  ;;  %v8385_v32 = vld [vmem:[%s14128_s1 + $0x23] ss:$8 sm:$0xf]  ;;  %v3955_v61 = vrot.slane %v8384_v46, %v8665_v2 }
 0x5cc   : > { %v3876_v33 = vsel %vm874_vm9, %v14602_v39, %v3861_v54  ;;  %v3874_v36 = vsel %vm874_vm9, %v3861_v54, %v14605_v23 }
 0x5cd   : > { %v3848_v12 = vpack.c.bf16 %v3844_v0, %v3840_v55  ;;  %v3851_v8 = vpack.c.bf16 %v3847_v18, %v3843_v56  ;;  %v3863_v48 = vpop.permute.xlu1 %3862  ;;  %4744 = vrot.lane.b32.xlu0 %v10220_v6, %s14493_s26  ;;  %v3903_v15 = vmul.f32 %v3889_v35, %v3876_v33  ;;  %v3904_v11 = vmul.f32 %v3893_v51, %v3874_v36  ;;  %v14609_v56 = vld [vmem:[#allocation24_spill] sm:$0xff] }
 0x5ce   : > { %v3877_v42 = vsel %vm874_vm9, %v14603_v29, %v3863_v48  ;;  %v3875_v63 = vsel %vm874_vm9, %v3863_v48, %v14604_v53  ;;  %v4013_v48 = vrot.slane %v8385_v32, %v8674_v5  ;;  %v4021_v36 = vrot.slane %v8385_v32, %v8671_v4 }
 0x5cf   : > { %v3907_v47 = vmul.f32 %v3889_v35, %v3877_v42  ;;  %4746 = vrot.lane.b32.xlu1 %v10226_v17, %s14493_s26  ;;  %v3869_v50 = vpop.permute.xlu0 %3868  ;;  %4988 = vmatpush1.bf16.msra.mxu0 %v3848_v12  ;;  %v3908_v45 = vmul.f32 %v3893_v51, %v3875_v63 }
 0x5d0   : > { %v3872_v57 = vsel %vm874_vm9, %v14605_v23, %v3869_v50  ;;  %v3878_v43 = vsel %vm874_vm9, %v3869_v50, %v14602_v39  ;;  %5093 = vmatprep.subr.bf16.mxu1 %v3851_v8  ;;  %v14612_v23 = vld [vmem:[#allocation27_spill] sm:$0xff] }
 0x5d1   : > { %v3911_v22 = vpack.c.bf16 %v3907_v47, %v3903_v15  ;;  %v3871_v37 = vpop.permute.xlu1 %3870  ;;  %5094 = vmatpush1.bf16.msra.mxu1 %v3850_v7  ;;  %v3902_v60 = vmul.f32 %v3885_v25, %v3878_v43  ;;  %v3905_v20 = vmul.f32 %v3897_v62, %v3872_v57  ;;  %v3912_v30 = vpack.c.bf16 %v3908_v45, %v3904_v11 }
 0x5d2   : > { %v3873_v52 = vsel %vm874_vm9, %v14604_v53, %v3871_v37  ;;  %v3879_v59 = vsel %vm874_vm9, %v3871_v37, %v14603_v29  ;;  %v14610_v53 = vld [vmem:[#allocation26_spill] sm:$0xff]  ;;  %v4009_v43 = vrot.slane %v8385_v32, %v8668_v3  ;;  %v14614_v37 = vld [vmem:[#allocation29_spill] sm:$0xff] }
 0x5d3   : > { %v3906_v58 = vmul.f32 %v3885_v25, %v3879_v59  ;;  %v3909_v49 = vmul.f32 %v3897_v62, %v3873_v52  ;;  %v3923_v28 = vpop.permute.xlu0 %3922  ;;  %4989 = vmatprep.subr.bf16.mxu0 %v3911_v22 }
 0x5d4   : > { %v3938_v41 = vsel %vm14271_vm13, %v14606_v31, %v3923_v28  ;;  %v3936_v54 = vsel %vm14271_vm13, %v3923_v28, %v14609_v56 }
 0x5d5   : > { %v3910_v10 = vpack.c.bf16 %v3906_v58, %v3902_v60  ;;  %v3913_v13 = vpack.c.bf16 %v3909_v49, %v3905_v20  ;;  %v3925_v26 = vpop.permute.xlu1 %3924  ;;  %v3965_v34 = vmul.f32 %v3951_v38, %v3938_v41  ;;  %v3966_v15 = vmul.f32 %v3955_v61, %v3936_v54  ;;  %v14616_v20 = vld [vmem:[#allocation28_spill] sm:$0xff] }
 0x5d6   : > { %v3939_v40 = vsel %vm14271_vm13, %v14607_v44, %v3925_v26  ;;  %v3937_v35 = vsel %vm14271_vm13, %v3925_v26, %v14608_v1  ;;  %v4017_v60 = vrot.slane %v8385_v32, %v8665_v2 }
 0x5d7   : > { %v3969_v27 = vmul.f32 %v3951_v38, %v3939_v40  ;;  %v3931_v55 = vpop.permute.xlu0 %3930  ;;  %4990 = vmatpush1.bf16.msra.mxu0 %v3910_v10  ;;  %5095 = vmatprep.subr.bf16.mxu1 %v3913_v13  ;;  %v3970_v33 = vmul.f32 %v3955_v61, %v3937_v35  ;;  %v8386_v38 = vld [vmem:[%s14128_s1 + $0x25] ss:$8 sm:$0xf] }
 0x5d8   : > { %v3934_v0 = vsel %vm14271_vm13, %v14609_v56, %v3931_v55  ;;  %v3940_v18 = vsel %vm14271_vm13, %v3931_v55, %v14606_v31  ;;  %5096 = vmatpush1.bf16.msra.mxu1 %v3912_v30  ;;  %v4083_v26 = vrot.slane %v8386_v38, %v8674_v5  ;;  %v4045_v55 = vpack.c.bf16 %v10226_v17, %v10220_v6  ;;  %v14627_v6 = vld [vmem:[#allocation30_spill] sm:$0xff] }
 0x5d9   : > { %v3973_v14 = vpack.c.bf16 %v3969_v27, %v3965_v34  ;;  %v3933_v39 = vpop.permute.xlu1 %3932  ;;  %v3964_v7 = vmul.f32 %v3947_v9, %v3940_v18  ;;  %v3967_v29 = vmul.f32 %v3959_v24, %v3934_v0  ;;  %v3974_v51 = vpack.c.bf16 %v3970_v33, %v3966_v15  ;;  %v14625_v33 = vld [vmem:[#allocation31_spill] sm:$0xff] }
 0x5da   : > { %v3935_v12 = vsel %vm14271_vm13, %v14608_v1, %v3933_v39  ;;  %v3941_v8 = vsel %vm14271_vm13, %v3933_v39, %v14607_v44  ;;  %vm14620_vm13 = vmmov %vm14611_vm0  ;;  %v14621_v1 = vld [vmem:[#allocation32_spill] sm:$0xff]  ;;  %v4043_v27 = vpack.c.bf16 %v10212_v21, %v10204_v16  ;;  %v4079_v56 = vrot.slane %v8386_v38, %v8668_v3 }
 0x5db   : > { %v3968_v42 = vmul.f32 %v3947_v9, %v3941_v8  ;;  %v3971_v25 = vmul.f32 %v3959_v24, %v3935_v12  ;;  %v3985_v62 = vpop.permute.xlu0 %3984  ;;  %4991 = vmatprep.subr.bf16.mxu0 %v3973_v14  ;;  %v4087_v18 = vrot.slane %v8386_v38, %v8665_v2  ;;  %v14623_v14 = vld [vmem:[#allocation33_spill] sm:$0xff]  ;;  %v4091_v16 = vrot.slane %v8386_v38, %v8671_v4 }
 0x5dc   : > { %v4000_v63 = vsel %vm14611_vm0, %v14610_v53, %v3985_v62  ;;  %v8387_v21 = vld [vmem:[%s14128_s1 + $0x26] ss:$8 sm:$0xf] }
 0x5dd   : > { %v3972_v47 = vpack.c.bf16 %v3968_v42, %v3964_v7  ;;  %v3975_v50 = vpack.c.bf16 %v3971_v25, %v3967_v29  ;;  %v3987_v46 = vpop.permute.xlu1 %3986  ;;  %v4027_v22 = vmul.f32 %v4013_v48, %v4000_v63  ;;  %v14631_v25 = vld [vmem:[#allocation14_spill] sm:$0xff] }
 0x5de   : > { %v4001_v57 = vsel %vm14613_vm14, %v14612_v23, %v3987_v46  ;;  %v3999_v45 = vsel %vm14615_vm12, %v3987_v46, %v14614_v37  ;;  %vm14618_vm14 = vmmov %vm14611_vm0  ;;  %v14633_v46 = vld [vmem:[#allocation16_spill] sm:$0xff] }
 0x5df   : > { %v4031_v52 = vmul.f32 %v4013_v48, %v4001_v57  ;;  %v3993_v59 = vpop.permute.xlu0 %3992  ;;  %4992 = vmatpush1.bf16.msra.mxu0 %v3972_v47  ;;  %5097 = vmatprep.subr.bf16.mxu1 %v3975_v50  ;;  %v3998_v28 = vsel %vm14618_vm14, %v3985_v62, %v14616_v20  ;;  %v4032_v41 = vmul.f32 %v4017_v60, %v3999_v45  ;;  %vm14619_vm12 = vmmov %vm14611_vm0  ;;  %v14632_v62 = vld [vmem:[#allocation15_spill] sm:$0xff] }
 0x5e0   : > { %v3996_v58 = vsel %vm14617_vm11, %v14616_v20, %v3993_v59  ;;  %v4002_v49 = vsel %vm14611_vm0, %v3993_v59, %v14610_v53  ;;  %5098 = vmatpush1.bf16.msra.mxu1 %v3974_v51  ;;  %v4028_v34 = vmul.f32 %v4017_v60, %v3998_v28  ;;  %vm14622_vm11 = vcmp.lt.s32.totalorder %v8816_v19, 127  ;;  %v14634_v51 = vld [vmem:[#allocation17_spill] sm:$0xff]  ;;  %v14636_v60 = vld [vmem:[#allocation36_spill] sm:$0xff] }
 0x5e1   : > { %v4035_v11 = vpack.c.bf16 %v4031_v52, %v4027_v22  ;;  %v3995_v31 = vpop.permute.xlu1 %3994  ;;  %v4026_v30 = vmul.f32 %v4009_v43, %v4002_v49  ;;  %v4029_v44 = vmul.f32 %v4021_v36, %v3996_v58  ;;  %vm14626_vm0 = vmmov %vm14622_vm11  ;;  %v4042_v15 = vpack.c.bf16 %v14632_v62, %v14631_v25  ;;  %v14638_v58 = vld [vmem:[#allocation34_spill] sm:$0xff]  ;;  %v14652_v62 = vld [vmem:[#allocation41_spill] sm:$0xff] }
 0x5e2   : > { %v3997_v10 = vsel %vm14619_vm12, %v14614_v37, %v3995_v31  ;;  %v4003_v13 = vsel %vm14620_vm13, %v3995_v31, %v14612_v23  ;;  %v4036_v54 = vpack.c.bf16 %v4032_v41, %v4028_v34  ;;  %vm14624_vm13 = vmmov %vm14622_vm11  ;;  %v4141_v50 = vrot.slane %v8387_v21, %v8668_v3 }
 0x5e3   : > { %v4030_v40 = vmul.f32 %v4009_v43, %v4003_v13  ;;  %v4033_v9 = vmul.f32 %v4021_v36, %v3997_v10  ;;  %v4055_v24 = vpop.permute.xlu0 %4054  ;;  %4993 = vmatprep.subr.bf16.mxu0 %v4035_v11  ;;  %vm14628_vm14 = vmmov %vm14626_vm0  ;;  %v4044_v23 = vpack.c.bf16 %v14634_v51, %v14633_v46  ;;  %v4145_v22 = vrot.slane %v8387_v21, %v8674_v5 }
 0x5e4   : > { %v4068_v35 = vsel %vm14622_vm11, %v4055_v24, %v14621_v1  ;;  %v4070_v17 = vsel %vm14628_vm14, %v14627_v6, %v4055_v24  ;;  %vm14629_vm12 = vmmov %vm14626_vm0  ;;  %vm14637_vm14 = vcmp.lt.s32.totalorder %v8816_v19, 126  ;;  %v4149_v10 = vrot.slane %v8387_v21, %v8665_v2 }
 0x5e5   : > { %v4034_v32 = vpack.c.bf16 %v4030_v40, %v4026_v30  ;;  %v4037_v61 = vpack.c.bf16 %v4033_v9, %v4029_v44  ;;  %v4057_v0 = vpop.permute.xlu1 %4056  ;;  %v4097_v8 = vmul.f32 %v4083_v26, %v4068_v35  ;;  %vm14630_vm11 = vmmov %vm14626_vm0  ;;  %v4096_v57 = vmul.f32 %v4079_v56, %v4070_v17  ;;  %v14642_v44 = vld [vmem:[#allocation35_spill] sm:$0xff]  ;;  %v14648_v17 = vld [vmem:[#allocation40_spill] sm:$0xff] }
 0x5e6   : > { %v4069_v39 = vsel %vm14624_vm13, %v4057_v0, %v14623_v14  ;;  %v4071_v12 = vsel %vm14626_vm0, %v14625_v33, %v4057_v0  ;;  %vm14635_vm13 = vmmov %vm14626_vm0  ;;  %v4153_v9 = vrot.slane %v8387_v21, %v8671_v4 }
 0x5e7   : > { %v4101_v48 = vmul.f32 %v4083_v26, %v4069_v39  ;;  %v4063_v7 = vpop.permute.xlu0 %4062  ;;  %4994 = vmatpush1.bf16.msra.mxu0 %v4034_v32  ;;  %5099 = vmatprep.subr.bf16.mxu1 %v4037_v61  ;;  %v4100_v53 = vmul.f32 %v4079_v56, %v4071_v12  ;;  %v14640_v26 = vld [vmem:[#allocation37_spill] sm:$0xff] }
 0x5e8   : > { %v4066_v29 = vsel %vm14629_vm12, %v14621_v1, %v4063_v7  ;;  %v4072_v42 = vsel %vm14630_vm11, %v4063_v7, %v14627_v6  ;;  %4995 = vmatprep.subr.bf16.mxu0 %v4043_v27  ;;  %5100 = vmatpush1.bf16.msra.mxu1 %v4036_v54  ;;  %vm14639_vm12 = vmmov %vm14637_vm14  ;;  %v8388_v27 = vld [vmem:[%s14128_s1 + $0x27] ss:$8 sm:$0xf] }
 0x5e9   : > { %v4105_v63 = vpack.c.bf16 %v4101_v48, %v4097_v8  ;;  %v4065_v47 = vpop.permute.xlu1 %4064  ;;  %5101 = vmatprep.subr.bf16.mxu1 %v4045_v55  ;;  %v4098_v37 = vmul.f32 %v4087_v18, %v4066_v29  ;;  %v4099_v45 = vmul.f32 %v4091_v16, %v4072_v42  ;;  %v4104_v28 = vpack.c.bf16 %v4100_v53, %v4096_v57  ;;  %vm14641_vm11 = vmmov %vm14639_vm12  ;;  %v14650_v48 = vld [vmem:[#allocation38_spill] sm:$0xff]  ;;  %v14654_v53 = vld [vmem:[#allocation39_spill] sm:$0xff] }
 0x5ea   : > { %v4067_v43 = vsel %vm14635_vm13, %v14623_v14, %v4065_v47  ;;  %v4073_v36 = vsel %vm14626_vm0, %v4065_v47, %v14625_v33  ;;  %vm14643_vm13 = vmmov %vm14641_vm11  ;;  %v4203_v14 = vrot.slane %v8388_v27, %v8668_v3  ;;  %v4207_v39 = vrot.slane %v8388_v27, %v8674_v5 }
 0x5eb   : > { %v4102_v52 = vmul.f32 %v4087_v18, %v4067_v43  ;;  %v4103_v59 = vmul.f32 %v4091_v16, %v4073_v36  ;;  %v4117_v38 = vpop.permute.xlu0 %4116  ;;  %4996 = vmatpush1.bf16.msra.mxu0 %v4042_v15  ;;  %vm14644_vm0 = vmmov %vm14641_vm11  ;;  %v4211_v47 = vrot.slane %v8388_v27, %v8665_v2  ;;  %v8389_v36 = vld [vmem:[%s14128_s1 + $0x40] ss:$8 sm:$0xf] }
 0x5ec   : > { %v4130_v20 = vsel %vm14637_vm14, %v4117_v38, %v14636_v60  ;;  %v4132_v49 = vsel %vm14639_vm12, %v14638_v58, %v4117_v38  ;;  %4997 = vmatprep.subr.bf16.mxu0 %v4105_v63  ;;  %5102 = vmatpush1.bf16.msra.mxu1 %v4044_v23  ;;  %vm14645_vm14 = vmmov %vm14644_vm0 }
 0x5ed   : > { %v4106_v11 = vpack.c.bf16 %v4102_v52, %v4098_v37  ;;  %v4107_v31 = vpack.c.bf16 %v4103_v59, %v4099_v45  ;;  %v4119_v41 = vpop.permute.xlu1 %4118  ;;  %v4158_v13 = vmul.f32 %v4141_v50, %v4132_v49  ;;  %v4159_v24 = vmul.f32 %v4145_v22, %v4130_v20  ;;  %vm14646_vm12 = vmmov %vm14644_vm0 }
 0x5ee   : > { %v4131_v30 = vsel %vm14641_vm11, %v4119_v41, %v14640_v26  ;;  %v4133_v40 = vsel %vm14643_vm13, %v14642_v44, %v4119_v41  ;;  %vm14647_vm11 = vmmov %vm14644_vm0  ;;  %vm14649_vm13 = vcmp.lt.s32.totalorder %v8816_v19, 114  ;;  %v4265_v20 = vrot.slane %v8389_v36, %v8668_v3 }
 0x5ef   : > { %v4162_v34 = vmul.f32 %v4141_v50, %v4133_v40  ;;  %v4163_v1 = vmul.f32 %v4145_v22, %v4131_v30  ;;  %v4125_v35 = vpop.permute.xlu0 %4124  ;;  %5103 = vmatprep.subr.bf16.mxu1 %v4107_v31  ;;  %4998 = vmatpush1.bf16.msra.mxu0 %v4104_v28  ;;  %v4215_v50 = vrot.slane %v8388_v27, %v8671_v4  ;;  %v14661_v30 = vld [vmem:[#allocation42_spill] sm:$0xff]  ;;  %v8542_v40 = vld [vmem:[%s14133_s6 + $0x24] ss:$16 sps:$4 sm:$0xff]  }
 0x5f0   : > { %v4128_v55 = vsel %vm14644_vm0, %v14636_v60, %v4125_v35  ;;  %v4134_v32 = vsel %vm14645_vm14, %v4125_v35, %v14638_v58  ;;  %5104 = vmatpush1.bf16.msra.mxu1 %v4106_v11  ;;  %vm14651_vm0 = vmmov %vm14649_vm13  ;;  %v4269_v58 = vrot.slane %v8389_v36, %v8674_v5  ;;  %v14663_v27 = vld [vmem:[#allocation45_spill] sm:$0xff] }
 0x5f1   : > { %v4166_v61 = vpack.c.bf16 %v4162_v34, %v4158_v13  ;;  %v4167_v56 = vpack.c.bf16 %v4163_v1, %v4159_v24  ;;  %v4127_v0 = vpop.permute.xlu1 %4126  ;;  %v4160_v33 = vmul.f32 %v4149_v10, %v4128_v55  ;;  %v4161_v12 = vmul.f32 %v4153_v9, %v4134_v32  ;;  %vm14653_vm14 = vmmov %vm14651_vm0  ;;  %v14659_v13 = vld [vmem:[#allocation44_spill] sm:$0xff]  ;;  %v14665_v32 = vld [vmem:[#allocation43_spill] sm:$0xff] }
 0x5f2   : > { %v4129_v18 = vsel %vm14646_vm12, %v14640_v26, %v4127_v0  ;;  %v4135_v54 = vsel %vm14647_vm11, %v4127_v0, %v14642_v44  ;;  %vm14655_vm12 = vmmov %vm14651_vm0  ;;  %v4273_v1 = vrot.slane %v8389_v36, %v8665_v2  ;;  %v8390_v0 = vld [vmem:[%s14128_s1 + $0x41] ss:$8 sm:$0xf] }
 0x5f3   : > { %v4164_v16 = vmul.f32 %v4149_v10, %v4129_v18  ;;  %v4165_v21 = vmul.f32 %v4153_v9, %v4135_v54  ;;  %v4179_v6 = vpop.permute.xlu0 %4178  ;;  %4999 = vmatprep.subr.bf16.mxu0 %v4167_v56  ;;  %vm14656_vm11 = vmmov %vm14651_vm0  ;;  %v8539_v10 = vld [vmem:[%s14133_s6] ss:$16 sps:$4 sm:$0xff]   ;;  %v4277_v56 = vrot.slane %v8389_v36, %v8671_v4  ;;  %v4335_v36 = vrot.slane %v8390_v0, %v8665_v2 }
 0x5f4   : > { %v4192_v8 = vsel %vm14649_vm13, %v4179_v6, %v14648_v17  ;;  %v4194_v7 = vsel %vm14651_vm0, %v14650_v48, %v4179_v6  ;;  %5000 = vmatpush1.bf16.msra.mxu0 %v4166_v61  ;;  %vm14657_vm13 = vmmov %vm14651_vm0 }
 0x5f5   : > { %v4168_v29 = vpack.c.bf16 %v4164_v16, %v4160_v33  ;;  %v4169_v42 = vpack.c.bf16 %v4165_v21, %v4161_v12  ;;  %v4181_v25 = vpop.permute.xlu1 %4180  ;;  %v4220_v46 = vmul.f32 %v4203_v14, %v4194_v7  ;;  %v4221_v51 = vmul.f32 %v4207_v39, %v4192_v8 }
 0x5f6   : > { %v4193_v15 = vsel %vm14653_vm14, %v4181_v25, %v14652_v62  ;;  %v4195_v63 = vsel %vm14655_vm12, %v14654_v53, %v4181_v25  ;;  %vm14658_vm14 = vmmov %vm14651_vm0  ;;  %vm14660_vm12 = vcmp.lt.s32.totalorder %v8816_v19, 113 }
 0x5f7   : > { %v4224_v23 = vmul.f32 %v4203_v14, %v4195_v63  ;;  %v4225_v57 = vmul.f32 %v4207_v39, %v4193_v15  ;;  %v4187_v43 = vpop.permute.xlu0 %4186  ;;  %5105 = vmatprep.subr.bf16.mxu1 %v4169_v42  ;;  %v14671_v63 = vld [vmem:[#allocation48_spill] sm:$0xff] }
 0x5f8   : > { %v4190_v22 = vsel %vm14656_vm11, %v14648_v17, %v4187_v43  ;;  %v4196_v37 = vsel %vm14657_vm13, %v4187_v43, %v14650_v48  ;;  %5106 = vmatpush1.bf16.msra.mxu1 %v4168_v29  ;;  %vm14662_vm11 = vmmov %vm14660_vm12  ;;  %v4327_v17 = vrot.slane %v8390_v0, %v8668_v3  ;;  %v4331_v29 = vrot.slane %v8390_v0, %v8674_v5 }
 0x5f9   : > { %v4228_v45 = vpack.c.bf16 %v4224_v23, %v4220_v46  ;;  %v4229_v52 = vpack.c.bf16 %v4225_v57, %v4221_v51  ;;  %v4189_v59 = vpop.permute.xlu1 %4188  ;;  %v4222_v49 = vmul.f32 %v4211_v47, %v4190_v22  ;;  %v4223_v28 = vmul.f32 %v4215_v50, %v4196_v37  ;;  %vm14664_vm13 = vmmov %vm14662_vm11  ;;  %v8547_v51 = vld [vmem:[%s14133_s6 + $0xc] ss:$16 sps:$4 sm:$0xff]   ;;  %v14675_v37 = vld [vmem:[#allocation49_spill] sm:$0xff] }
 0x5fa   : > { %v4191_v38 = vsel %vm14651_vm0, %v14652_v62, %v4189_v59  ;;  %v4197_v60 = vsel %vm14658_vm14, %v4189_v59, %v14654_v53  ;;  %vm14666_vm0 = vmmov %vm14662_vm11  ;;  %v8544_v53 = vld [vmem:[%s14133_s6 + $0x20] ss:$16 sps:$4 sm:$0xff]  }
 0x5fb   : > { %v4226_v11 = vmul.f32 %v4211_v47, %v4191_v38  ;;  %v4227_v31 = vmul.f32 %v4215_v50, %v4197_v60  ;;  %v4241_v41 = vpop.permute.xlu0 %4240  ;;  %5001 = vmatprep.subr.bf16.mxu0 %v4229_v52  ;;  %vm14667_vm14 = vmmov %vm14666_vm0  ;;  %v14673_v50 = vld [vmem:[#allocation46_spill] sm:$0xff]  ;;  %v14677_v52 = vld [vmem:[#allocation47_spill] sm:$0xff]  ;;  %v4339_v38 = vrot.slane %v8390_v0, %v8671_v4 }
 0x5fc   : > { %v4254_v26 = vsel %vm14660_vm12, %v4241_v41, %v14659_v13  ;;  %v4256_v44 = vsel %vm14662_vm11, %v14661_v30, %v4241_v41  ;;  %5002 = vmatpush1.bf16.msra.mxu0 %v4228_v45  ;;  %vm14668_vm12 = vmmov %vm14666_vm0  ;;  %v8391_v60 = vld [vmem:[%s14128_s1 + $0x42] ss:$8 sm:$0xf] }
 0x5fd   : > { %v4230_v9 = vpack.c.bf16 %v4226_v11, %v4222_v49  ;;  %v4231_v24 = vpack.c.bf16 %v4227_v31, %v4223_v28  ;;  %v4243_v34 = vpop.permute.xlu1 %4242  ;;  %v4282_v35 = vmul.f32 %v4265_v20, %v4256_v44  ;;  %v4283_v18 = vmul.f32 %v4269_v58, %v4254_v26  ;;  %vm14669_vm11 = vmmov %vm14666_vm0 }
 0x5fe   : > { %v4255_v55 = vsel %vm14664_vm13, %v4243_v34, %v14663_v27  ;;  %v4257_v61 = vsel %vm14666_vm0, %v14665_v32, %v4243_v34  ;;  %vm14670_vm13 = vmmov %vm14666_vm0  ;;  %vm14672_vm0 = vcmp.lt.s32.totalorder %v8816_v19, 112  ;;  %v4389_v26 = vrot.slane %v8391_v60, %v8668_v3 }
 0x5ff   : > { %v4286_v54 = vmul.f32 %v4265_v20, %v4257_v61  ;;  %v4287_v14 = vmul.f32 %v4269_v58, %v4255_v55  ;;  %v4249_v39 = vpop.permute.xlu0 %4248  ;;  %5107 = vmatprep.subr.bf16.mxu1 %v4231_v24  ;;  %5004 = vmatmul.mubr.bf16.vlgmr.msra.gmra.mrb[8].mxu0 %v8539_v10 }
 0x600   : > { %v4252_v33 = vsel %vm14667_vm14, %v14659_v13, %v4249_v39  ;;  %v4258_v12 = vsel %vm14668_vm12, %v4249_v39, %v14661_v30  ;;  %5108 = vmatpush1.bf16.msra.mxu1 %v4230_v9  ;;  %5013 = vmatprep.mubr.bf16.mxu0 %v8542_v40  ;;  %vm14674_vm14 = vmmov %vm14672_vm0  ;;  %vm4964_vm12 = vcmask 130048   ;;  %v4393_v9 = vrot.slane %v8391_v60, %v8674_v5  ;;  %v14688_v39 = vld [vmem:[#allocation51_spill] sm:$0xff] }
 0x601   : > { %v4290_v16 = vpack.c.bf16 %v4286_v54, %v4282_v35  ;;  %v4291_v21 = vpack.c.bf16 %v4287_v14, %v4283_v18  ;;  %v4251_v6 = vpop.permute.xlu1 %4250  ;;  %v4284_v8 = vmul.f32 %v4273_v1, %v4252_v33  ;;  %v4285_v42 = vmul.f32 %v4277_v56, %v4258_v12  ;;  %v14686_v54 = vld [vmem:[#allocation53_spill] sm:$0xff] }
 0x602   : > { %v4253_v48 = vsel %vm14669_vm11, %v14663_v27, %v4251_v6  ;;  %v4259_v7 = vsel %vm14670_vm13, %v4251_v6, %v14665_v32  ;;  %vm14676_vm11 = vmmov %vm14672_vm0  ;;  %v14682_v27 = vld [vmem:[#allocation52_spill] sm:$0xff]  ;;  %v14684_v32 = vld [vmem:[#allocation50_spill] sm:$0xff]  ;;  %v4397_v12 = vrot.slane %v8391_v60, %v8665_v2 }
 0x603   : > { %v4288_v25 = vmul.f32 %v4273_v1, %v4253_v48  ;;  %v4289_v62 = vmul.f32 %v4277_v56, %v4259_v7  ;;  %v4303_v15 = vpop.permute.xlu0 %4302  ;;  %5024 = vmatprep.subr.bf16.mxu0 %v4291_v21  ;;  %5110 = vmatmul.mubr.bf16.vlgmr.msra.gmra.mrb[8].mxu1 %v8539_v10  ;;  %vm14678_vm13 = vmmov %vm14672_vm0  ;;  %v8392_v7 = vld [vmem:[%s14128_s1 + $0x43] ss:$8 sm:$0xf] }
 0x604   : > { %v4316_v47 = vsel %vm14672_vm0, %v4303_v15, %v14671_v63  ;;  %v4318_v46 = vsel %vm14674_vm14, %v14673_v50, %v4303_v15  ;;  %5025 = vmatpush1.bf16.msra.mxu0 %v4290_v16  ;;  %5119 = vmatprep.mubr.bf16.mxu1 %v8542_v40  ;;  %vm14679_vm14 = vmmov %vm14672_vm0  ;;  %v4401_v16 = vrot.slane %v8391_v60, %v8671_v4  ;;  %v14697_v60 = vld [vmem:[#allocation57_spill] sm:$0xff] }
 0x605   : > { %v4292_v23 = vpack.c.bf16 %v4288_v25, %v4284_v8  ;;  %v4293_v57 = vpack.c.bf16 %v4289_v62, %v4285_v42  ;;  %v4305_v43 = vpop.permute.xlu1 %4304  ;;  %v4344_v22 = vmul.f32 %v4327_v17, %v4318_v46  ;;  %v4345_v20 = vmul.f32 %v4331_v29, %v4316_v47 }
 0x606   : > { %v4317_v45 = vsel %vm14676_vm11, %v4305_v43, %v14675_v37  ;;  %v4319_v59 = vsel %vm14678_vm13, %v14677_v52, %v4305_v43  ;;  %vm14680_vm11 = vmmov %vm14672_vm0  ;;  %v4451_v47 = vrot.slane %v8392_v7, %v8668_v3 }
 0x607   : > { %v4348_v58 = vmul.f32 %v4327_v17, %v4319_v59  ;;  %v4349_v49 = vmul.f32 %v4331_v29, %v4317_v45  ;;  %v4311_v28 = vpop.permute.xlu0 %4310  ;;  %5130 = vmatprep.subr.bf16.mxu1 %v4293_v57  ;;  %5014 = vmatmul.mubr.bf16.gmra.mrb[12].mxu0 %v8544_v53  ;;  %vm14681_vm13 = vmmov %vm14672_vm0 }
 0x608   : > { %v4314_v11 = vsel %vm14672_vm0, %v14671_v63, %v4311_v28  ;;  %v4320_v31 = vsel %vm14679_vm14, %v4311_v28, %v14673_v50  ;;  %5131 = vmatpush1.bf16.msra.mxu1 %v4292_v23  ;;  %8406 = vmatprep.mubr.msk.bf16.mxu0 %vm4964_vm12, %v8547_v51  ;;  %vm14683_vm0 = vcmp.lt.s32.totalorder %v8816_v19, 111  ;;  %v4455_v50 = vrot.slane %v8392_v7, %v8674_v5 }
 0x609   : > { %v4352_v41 = vpack.c.bf16 %v4348_v58, %v4344_v22  ;;  %v4353_v10 = vpack.c.bf16 %v4349_v49, %v4345_v20  ;;  %v4313_v13 = vpop.permute.xlu1 %4312  ;;  %v4346_v30 = vmul.f32 %v4335_v36, %v4314_v11  ;;  %v4347_v24 = vmul.f32 %v4339_v38, %v4320_v31  ;;  %vm14685_vm14 = vmmov %vm14683_vm0  ;;  %v14699_v58 = vld [vmem:[#allocation55_spill] sm:$0xff] }
 0x60a   : > { %v4315_v44 = vsel %vm14680_vm11, %v14675_v37, %v4313_v13  ;;  %v4321_v40 = vsel %vm14681_vm13, %v4313_v13, %v14677_v52  ;;  %vm14687_vm11 = vmmov %vm14683_vm0  ;;  %v14695_v37 = vld [vmem:[#allocation54_spill] sm:$0xff]  ;;  %v4459_v28 = vrot.slane %v8392_v7, %v8665_v2  ;;  %v4463_v11 = vrot.slane %v8392_v7, %v8671_v4 }
 0x60b   : > { %v4350_v34 = vmul.f32 %v4335_v36, %v4315_v44  ;;  %v4351_v1 = vmul.f32 %v4339_v38, %v4321_v40  ;;  %v4365_v35 = vpop.permute.xlu0 %4364  ;;  %5026 = vmatprep.subr.bf16.mxu0 %v4353_v10  ;;  %5120 = vmatmul.mubr.bf16.gmra.mrb[12].mxu1 %v8544_v53  ;;  %vm14689_vm13 = vmmov %vm14683_vm0  ;;  %v14693_v36 = vld [vmem:[#allocation56_spill] sm:$0xff] }
 0x60c   : > { %v4378_v55 = vsel %vm14683_vm0, %v4365_v35, %v14682_v27  ;;  %v4380_v61 = vsel %vm14685_vm14, %v14684_v32, %v4365_v35  ;;  %5027 = vmatpush1.bf16.msra.mxu0 %v4352_v41  ;;  %8408 = vmatprep.mubr.msk.bf16.mxu1 %vm4964_vm12, %v8547_v51  ;;  %vm14690_vm14 = vmmov %vm14683_vm0 }
 0x60d   : > { %v4354_v56 = vpack.c.bf16 %v4350_v34, %v4346_v30  ;;  %v4355_v0 = vpack.c.bf16 %v4351_v1, %v4347_v24  ;;  %v4367_v18 = vpop.permute.xlu1 %4366  ;;  %v4406_v21 = vmul.f32 %v4389_v26, %v4380_v61  ;;  %v4407_v6 = vmul.f32 %v4393_v9, %v4378_v55  ;;  %v8393_v30 = vld [vmem:[%s14128_s1 + $0x44] ss:$8 sm:$0xf] }
 0x60e   : > { %v4379_v14 = vsel %vm14687_vm11, %v4367_v18, %v14686_v54  ;;  %v4381_v33 = vsel %vm14689_vm13, %v14688_v39, %v4367_v18  ;;  %vm14691_vm11 = vmmov %vm14683_vm0  ;;  %v4517_v55 = vrot.slane %v8393_v30, %v8674_v5  ;;  %v4521_v7 = vrot.slane %v8393_v30, %v8665_v2 }
 0x60f   : > { %v4410_v17 = vmul.f32 %v4389_v26, %v4381_v33  ;;  %v4411_v8 = vmul.f32 %v4393_v9, %v4379_v14  ;;  %v4373_v48 = vpop.permute.xlu0 %4372  ;;  %5132 = vmatprep.subr.bf16.mxu1 %v4355_v0  ;;  %vm14692_vm13 = vmmov %vm14683_vm0 }
 0x610   : > { %v4376_v29 = vsel %vm14683_vm0, %v14682_v27, %v4373_v48  ;;  %v4382_v42 = vsel %vm14690_vm14, %v4373_v48, %v14684_v32  ;;  %5133 = vmatpush1.bf16.msra.mxu1 %v4354_v56  ;;  %vm14694_vm0 = vcmp.lt.s32.totalorder %v8816_v19, 110  ;;  %v4513_v27 = vrot.slane %v8393_v30, %v8668_v3 }
 0x611   : > { %v4414_v25 = vpack.c.bf16 %v4410_v17, %v4406_v21  ;;  %v4415_v62 = vpack.c.bf16 %v4411_v8, %v4407_v6  ;;  %v4375_v15 = vpop.permute.xlu1 %4374  ;;  %v4408_v46 = vmul.f32 %v4397_v12, %v4376_v29  ;;  %v4409_v51 = vmul.f32 %v4401_v16, %v4382_v42  ;;  %vm14696_vm14 = vmmov %vm14694_vm0  ;;  %v14708_v6 = vld [vmem:[#allocation61_spill] sm:$0xff]  ;;  %v14710_v8 = vld [vmem:[#allocation59_spill] sm:$0xff] }
 0x612   : > { %v4377_v53 = vsel %vm14691_vm11, %v14686_v54, %v4375_v15  ;;  %v4383_v63 = vsel %vm14692_vm13, %v4375_v15, %v14688_v39  ;;  %vm14698_vm11 = vmmov %vm14694_vm0  ;;  %v14704_v54 = vld [vmem:[#allocation60_spill] sm:$0xff]  ;;  %v14706_v39 = vld [vmem:[#allocation58_spill] sm:$0xff]  ;;  %v4525_v29 = vrot.slane %v8393_v30, %v8671_v4 }
 0x613   : > { %v4412_v23 = vmul.f32 %v4397_v12, %v4377_v53  ;;  %v4413_v57 = vmul.f32 %v4401_v16, %v4383_v63  ;;  %v4427_v43 = vpop.permute.xlu0 %4426  ;;  %5028 = vmatprep.subr.bf16.mxu0 %v4415_v62  ;;  %vm14700_vm13 = vmmov %vm14694_vm0  ;;  %v8394_v63 = vld [vmem:[%s14128_s1 + $0x45] ss:$8 sm:$0xf] }
 0x614   : > { %v4440_v22 = vsel %vm14694_vm0, %v4427_v43, %v14693_v36  ;;  %v4442_v45 = vsel %vm14696_vm14, %v14695_v37, %v4427_v43  ;;  %5029 = vmatpush1.bf16.msra.mxu0 %v4414_v25  ;;  %vm14701_vm14 = vmmov %vm14694_vm0  ;;  %v4583_v30 = vrot.slane %v8394_v63, %v8665_v2 }
 0x615   : > { %v4416_v52 = vpack.c.bf16 %v4412_v23, %v4408_v46  ;;  %v4417_v59 = vpack.c.bf16 %v4413_v57, %v4409_v51  ;;  %v4429_v38 = vpop.permute.xlu1 %4428  ;;  %v4468_v31 = vmul.f32 %v4451_v47, %v4442_v45  ;;  %v4469_v41 = vmul.f32 %v4455_v50, %v4440_v22 }
 0x616   : > { %v4441_v20 = vsel %vm14698_vm11, %v4429_v38, %v14697_v60  ;;  %v4443_v49 = vsel %vm14700_vm13, %v14699_v58, %v4429_v38  ;;  %vm14702_vm11 = vmmov %vm14694_vm0  ;;  %v4579_v22 = vrot.slane %v8394_v63, %v8674_v5 }
 0x617   : > { %v4472_v10 = vmul.f32 %v4451_v47, %v4443_v49  ;;  %v4473_v13 = vmul.f32 %v4455_v50, %v4441_v20  ;;  %v4435_v26 = vpop.permute.xlu0 %4434  ;;  %5134 = vmatprep.subr.bf16.mxu1 %v4417_v59  ;;  %vm14703_vm13 = vmmov %vm14694_vm0 }
 0x618   : > { %v4438_v44 = vsel %vm14694_vm0, %v14693_v36, %v4435_v26  ;;  %v4444_v40 = vsel %vm14701_vm14, %v4435_v26, %v14695_v37  ;;  %5135 = vmatpush1.bf16.msra.mxu1 %v4416_v52  ;;  %vm14705_vm0 = vcmp.lt.s32.totalorder %v8816_v19, 98  ;;  %v4575_v36 = vrot.slane %v8394_v63, %v8668_v3 }
 0x619   : > { %v4476_v9 = vpack.c.bf16 %v4472_v10, %v4468_v31  ;;  %v4477_v24 = vpack.c.bf16 %v4473_v13, %v4469_v41  ;;  %v4437_v34 = vpop.permute.xlu1 %4436  ;;  %v4470_v32 = vmul.f32 %v4459_v28, %v4438_v44  ;;  %v4471_v61 = vmul.f32 %v4463_v11, %v4444_v40  ;;  %vm14707_vm14 = vmmov %vm14705_vm0  ;;  %v14719_v41 = vld [vmem:[#allocation65_spill] sm:$0xff]  ;;  %v14721_v13 = vld [vmem:[#allocation63_spill] sm:$0xff] }
 0x61a   : > { %v4439_v1 = vsel %vm14702_vm11, %v14697_v60, %v4437_v34  ;;  %v4445_v35 = vsel %vm14703_vm13, %v4437_v34, %v14699_v58  ;;  %vm14709_vm11 = vmmov %vm14705_vm0  ;;  %v14715_v60 = vld [vmem:[#allocation64_spill] sm:$0xff]  ;;  %v14717_v58 = vld [vmem:[#allocation62_spill] sm:$0xff]  ;;  %v4587_v44 = vrot.slane %v8394_v63, %v8671_v4 }
 0x61b   : > { %v4474_v56 = vmul.f32 %v4459_v28, %v4439_v1  ;;  %v4475_v0 = vmul.f32 %v4463_v11, %v4445_v35  ;;  %v4489_v18 = vpop.permute.xlu0 %4488  ;;  %5030 = vmatprep.subr.bf16.mxu0 %v4477_v24  ;;  %vm14711_vm13 = vmmov %vm14705_vm0  ;;  %v8395_v35 = vld [vmem:[%s14128_s1 + $0x46] ss:$8 sm:$0xf] }
 0x61c   : > { %v4502_v14 = vsel %vm14705_vm0, %v4489_v18, %v14704_v54  ;;  %v4504_v33 = vsel %vm14707_vm14, %v14706_v39, %v4489_v18  ;;  %5031 = vmatpush1.bf16.msra.mxu0 %v4476_v9  ;;  %vm14712_vm14 = vmmov %vm14705_vm0  ;;  %v4645_v63 = vrot.slane %v8395_v35, %v8665_v2 }
 0x61d   : > { %v4478_v12 = vpack.c.bf16 %v4474_v56, %v4470_v32  ;;  %v4479_v16 = vpack.c.bf16 %v4475_v0, %v4471_v61  ;;  %v4491_v21 = vpop.permute.xlu1 %4490  ;;  %v4530_v42 = vmul.f32 %v4513_v27, %v4504_v33  ;;  %v4531_v25 = vmul.f32 %v4517_v55, %v4502_v14 }
 0x61e   : > { %v4503_v17 = vsel %vm14709_vm11, %v4491_v21, %v14708_v6  ;;  %v4505_v48 = vsel %vm14711_vm13, %v14710_v8, %v4491_v21  ;;  %vm14713_vm11 = vmmov %vm14705_vm0  ;;  %v4641_v14 = vrot.slane %v8395_v35, %v8674_v5 }
 0x61f   : > { %v4534_v62 = vmul.f32 %v4513_v27, %v4505_v48  ;;  %v4535_v15 = vmul.f32 %v4517_v55, %v4503_v17  ;;  %v4497_v53 = vpop.permute.xlu0 %4496  ;;  %5136 = vmatprep.subr.bf16.mxu1 %v4479_v16  ;;  %vm14714_vm13 = vmmov %vm14705_vm0 }
 0x620   : > { %v4500_v47 = vsel %vm14705_vm0, %v14704_v54, %v4497_v53  ;;  %v4506_v50 = vsel %vm14712_vm14, %v4497_v53, %v14706_v39  ;;  %5137 = vmatpush1.bf16.msra.mxu1 %v4478_v12  ;;  %vm14716_vm0 = vcmp.lt.s32.totalorder %v8816_v19, 97  ;;  %v4637_v54 = vrot.slane %v8395_v35, %v8668_v3 }
 0x621   : > { %v4538_v46 = vpack.c.bf16 %v4534_v62, %v4530_v42  ;;  %v4539_v51 = vpack.c.bf16 %v4535_v15, %v4531_v25  ;;  %v4499_v23 = vpop.permute.xlu1 %4498  ;;  %v4532_v37 = vmul.f32 %v4521_v7, %v4500_v47  ;;  %v4533_v45 = vmul.f32 %v4525_v29, %v4506_v50  ;;  %vm14718_vm14 = vmmov %vm14716_vm0  ;;  %v14730_v25 = vld [vmem:[#allocation69_spill] sm:$0xff]  ;;  %v14732_v15 = vld [vmem:[#allocation67_spill] sm:$0xff] }
 0x622   : > { %v4501_v57 = vsel %vm14713_vm11, %v14708_v6, %v4499_v23  ;;  %v4507_v43 = vsel %vm14714_vm13, %v4499_v23, %v14710_v8  ;;  %vm14720_vm11 = vmmov %vm14716_vm0  ;;  %v14726_v6 = vld [vmem:[#allocation68_spill] sm:$0xff]  ;;  %v14728_v8 = vld [vmem:[#allocation66_spill] sm:$0xff]  ;;  %v4649_v47 = vrot.slane %v8395_v35, %v8671_v4 }
 0x623   : > { %v4536_v52 = vmul.f32 %v4521_v7, %v4501_v57  ;;  %v4537_v59 = vmul.f32 %v4525_v29, %v4507_v43  ;;  %v4551_v38 = vpop.permute.xlu0 %4550  ;;  %5032 = vmatprep.subr.bf16.mxu0 %v4539_v51  ;;  %vm14722_vm13 = vmmov %vm14716_vm0  ;;  %v8396_v43 = vld [vmem:[%s14128_s1 + $0x47] ss:$8 sm:$0xf] }
 0x624   : > { %v4564_v20 = vsel %vm14716_vm0, %v4551_v38, %v14715_v60  ;;  %v4566_v49 = vsel %vm14718_vm14, %v14717_v58, %v4551_v38  ;;  %5033 = vmatpush1.bf16.msra.mxu0 %v4538_v46  ;;  %vm14723_vm14 = vmmov %vm14716_vm0  ;;  %v4707_v35 = vrot.slane %v8396_v43, %v8665_v2 }
 0x625   : > { %v4540_v28 = vpack.c.bf16 %v4536_v52, %v4532_v37  ;;  %v4541_v11 = vpack.c.bf16 %v4537_v59, %v4533_v45  ;;  %v4553_v31 = vpop.permute.xlu1 %4552  ;;  %v4592_v40 = vmul.f32 %v4575_v36, %v4566_v49  ;;  %v4593_v9 = vmul.f32 %v4579_v22, %v4564_v20 }
 0x626   : > { %v4565_v10 = vsel %vm14720_vm11, %v4553_v31, %v14719_v41  ;;  %v4567_v26 = vsel %vm14722_vm13, %v14721_v13, %v4553_v31  ;;  %vm14724_vm11 = vmmov %vm14716_vm0  ;;  %v4703_v20 = vrot.slane %v8396_v43, %v8674_v5 }
 0x627   : > { %v4596_v24 = vmul.f32 %v4575_v36, %v4567_v26  ;;  %v4597_v34 = vmul.f32 %v4579_v22, %v4565_v10  ;;  %v4559_v1 = vpop.permute.xlu0 %4558  ;;  %5138 = vmatprep.subr.bf16.mxu1 %v4541_v11  ;;  %vm14725_vm13 = vmmov %vm14716_vm0 }
 0x628   : > { %v4562_v27 = vsel %vm14716_vm0, %v14715_v60, %v4559_v1  ;;  %v4568_v55 = vsel %vm14723_vm14, %v4559_v1, %v14717_v58  ;;  %5139 = vmatpush1.bf16.msra.mxu1 %v4540_v28  ;;  %vm14727_vm0 = vcmp.lt.s32.totalorder %v8816_v19, 96  ;;  %v4699_v60 = vrot.slane %v8396_v43, %v8668_v3 }
 0x629   : > { %v4600_v32 = vpack.c.bf16 %v4596_v24, %v4592_v40  ;;  %v4601_v61 = vpack.c.bf16 %v4597_v34, %v4593_v9  ;;  %v4561_v56 = vpop.permute.xlu1 %4560  ;;  %v4594_v39 = vmul.f32 %v4583_v30, %v4562_v27  ;;  %v4595_v33 = vmul.f32 %v4587_v44, %v4568_v55  ;;  %vm14729_vm14 = vmmov %vm14727_vm0  ;;  %v14741_v9 = vld [vmem:[#allocation73_spill] sm:$0xff]  ;;  %v14743_v34 = vld [vmem:[#allocation71_spill] sm:$0xff] }
 0x62a   : > { %v4563_v0 = vsel %vm14724_vm11, %v14719_v41, %v4561_v56  ;;  %v4569_v18 = vsel %vm14725_vm13, %v4561_v56, %v14721_v13  ;;  %vm14731_vm11 = vmmov %vm14727_vm0  ;;  %v14737_v41 = vld [vmem:[#allocation72_spill] sm:$0xff]  ;;  %v14739_v13 = vld [vmem:[#allocation70_spill] sm:$0xff]  ;;  %v4711_v27 = vrot.slane %v8396_v43, %v8671_v4 }
 0x62b   : > { %v4598_v12 = vmul.f32 %v4583_v30, %v4563_v0  ;;  %v4599_v16 = vmul.f32 %v4587_v44, %v4569_v18  ;;  %v4613_v21 = vpop.permute.xlu0 %4612  ;;  %5034 = vmatprep.subr.bf16.mxu0 %v4601_v61  ;;  %vm14733_vm13 = vmmov %vm14727_vm0  ;;  %v8397_v18 = vld [vmem:[%s14128_s1 + $0x60] ss:$8 sm:$0xf] }
 0x62c   : > { %v4626_v17 = vsel %vm14727_vm0, %v4613_v21, %v14726_v6  ;;  %v4628_v48 = vsel %vm14729_vm14, %v14728_v8, %v4613_v21  ;;  %5035 = vmatpush1.bf16.msra.mxu0 %v4600_v32  ;;  %vm14734_vm14 = vmmov %vm14727_vm0  ;;  %v4769_v43 = vrot.slane %v8397_v18, %v8665_v2 }
 0x62d   : > { %v4602_v7 = vpack.c.bf16 %v4598_v12, %v4594_v39  ;;  %v4603_v29 = vpack.c.bf16 %v4599_v16, %v4595_v33  ;;  %v4615_v42 = vpop.permute.xlu1 %4614  ;;  %v4654_v50 = vmul.f32 %v4637_v54, %v4628_v48  ;;  %v4655_v46 = vmul.f32 %v4641_v14, %v4626_v17 }
 0x62e   : > { %v4627_v62 = vsel %vm14731_vm11, %v4615_v42, %v14730_v25  ;;  %v4629_v53 = vsel %vm14733_vm13, %v14732_v15, %v4615_v42  ;;  %vm14735_vm11 = vmmov %vm14727_vm0  ;;  %v4765_v17 = vrot.slane %v8397_v18, %v8674_v5 }
 0x62f   : > { %v4658_v51 = vmul.f32 %v4637_v54, %v4629_v53  ;;  %v4659_v23 = vmul.f32 %v4641_v14, %v4627_v62  ;;  %v4621_v57 = vpop.permute.xlu0 %4620  ;;  %5140 = vmatprep.subr.bf16.mxu1 %v4603_v29  ;;  %vm14736_vm13 = vmmov %vm14727_vm0 }
 0x630   : > { %v4624_v36 = vsel %vm14727_vm0, %v14726_v6, %v4621_v57  ;;  %v4630_v22 = vsel %vm14734_vm14, %v4621_v57, %v14728_v8  ;;  %5141 = vmatpush1.bf16.msra.mxu1 %v4602_v7  ;;  %vm14738_vm0 = vcmp.lt.s32.totalorder %v8816_v19, 95  ;;  %v4761_v6 = vrot.slane %v8397_v18, %v8668_v3 }
 0x631   : > { %v4662_v37 = vpack.c.bf16 %v4658_v51, %v4654_v50  ;;  %v4663_v45 = vpack.c.bf16 %v4659_v23, %v4655_v46  ;;  %v4623_v52 = vpop.permute.xlu1 %4622  ;;  %v4656_v58 = vmul.f32 %v4645_v63, %v4624_v36  ;;  %v4657_v49 = vmul.f32 %v4649_v47, %v4630_v22  ;;  %vm14740_vm14 = vmmov %vm14738_vm0  ;;  %v14750_v46 = vld [vmem:[#allocation77_spill] sm:$0xff]  ;;  %v14751_v23 = vld [vmem:[#allocation75_spill] sm:$0xff] }
 0x632   : > { %v4625_v59 = vsel %vm14735_vm11, %v14730_v25, %v4623_v52  ;;  %v4631_v38 = vsel %vm14736_vm13, %v4623_v52, %v14732_v15  ;;  %vm14742_vm11 = vmmov %vm14738_vm0  ;;  %v14748_v25 = vld [vmem:[#allocation76_spill] sm:$0xff]  ;;  %v14749_v15 = vld [vmem:[#allocation74_spill] sm:$0xff]  ;;  %v4773_v36 = vrot.slane %v8397_v18, %v8671_v4 }
 0x633   : > { %v4660_v28 = vmul.f32 %v4645_v63, %v4625_v59  ;;  %v4661_v11 = vmul.f32 %v4649_v47, %v4631_v38  ;;  %v4675_v31 = vpop.permute.xlu0 %4674  ;;  %5036 = vmatprep.subr.bf16.mxu0 %v4663_v45  ;;  %vm14744_vm13 = vmmov %vm14738_vm0 }
 0x634   : > { %v4688_v10 = vsel %vm14738_vm0, %v4675_v31, %v14737_v41  ;;  %v4690_v26 = vsel %vm14740_vm14, %v14739_v13, %v4675_v31  ;;  %5037 = vmatpush1.bf16.msra.mxu0 %v4662_v37  ;;  %vm14745_vm14 = vmmov %vm14738_vm0 }
 0x635   : > { %v4664_v30 = vpack.c.bf16 %v4660_v28, %v4656_v58  ;;  %v4665_v44 = vpack.c.bf16 %v4661_v11, %v4657_v49  ;;  %v4677_v40 = vpop.permute.xlu1 %4676  ;;  %v4716_v55 = vmul.f32 %v4699_v60, %v4690_v26  ;;  %v4717_v32 = vmul.f32 %v4703_v20, %v4688_v10  ;;  %v8545_v26 = vld [vmem:[%s14133_s6 + $0x8] ss:$16 sps:$4 sm:$0xff]  }
 0x636   : > { %v4689_v24 = vsel %vm14742_vm11, %v4677_v40, %v14741_v9  ;;  %v4691_v1 = vsel %vm14744_vm13, %v14743_v34, %v4677_v40  ;;  %vm14746_vm11 = vmmov %vm14738_vm0 }
 0x637   : > { %v4720_v61 = vmul.f32 %v4699_v60, %v4691_v1  ;;  %v4721_v56 = vmul.f32 %v4703_v20, %v4689_v24  ;;  %v4683_v0 = vpop.permute.xlu0 %4682  ;;  %5142 = vmatprep.subr.bf16.mxu1 %v4665_v44  ;;  %vm14747_vm13 = vmmov %vm14738_vm0 }
 0x638   : > { %v4686_v54 = vsel %vm14738_vm0, %v14737_v41, %v4683_v0  ;;  %v4692_v14 = vsel %vm14745_vm14, %v4683_v0, %v14739_v13  ;;  %5143 = vmatpush1.bf16.msra.mxu1 %v4664_v30  ;;  %v8548_v30 = vld [vmem:[%s14133_s6 + $0x2c] ss:$16 sps:$4 sm:$0xff]  }
 0x639   : > { %v4724_v39 = vpack.c.bf16 %v4720_v61, %v4716_v55  ;;  %v4725_v33 = vpack.c.bf16 %v4721_v56, %v4717_v32  ;;  %v4685_v12 = vpop.permute.xlu1 %4684  ;;  %v4718_v8 = vmul.f32 %v4707_v35, %v4686_v54  ;;  %v4719_v48 = vmul.f32 %v4711_v27, %v4692_v14  ;;  %v14754_v61 = vld [vmem:[#allocation11_spill] sm:$0xff] }
 0x63a   : > { %v4687_v16 = vsel %vm14746_vm11, %v14741_v9, %v4685_v12  ;;  %v4693_v21 = vsel %vm14747_vm13, %v4685_v12, %v14743_v34  ;;  %v8550_v9 = vld [vmem:[%s14133_s6 + $0x28] ss:$16 sps:$4 sm:$0xff]  }
 0x63b   : > { %v4722_v7 = vmul.f32 %v4707_v35, %v4687_v16  ;;  %v4723_v29 = vmul.f32 %v4711_v27, %v4693_v21  ;;  %v4737_v42 = vpop.permute.xlu0 %4736  ;;  %5038 = vmatprep.subr.bf16.mxu0 %v4725_v33  ;;  %v14752_v34 = vld [vmem:[#allocation10_spill] sm:$0xff] }
 0x63c   : > { %v4750_v62 = vsel %vm1650_vm15, %v4737_v42, %v14748_v25  ;;  %v4752_v53 = vsel %vm1650_vm15, %v14749_v15, %v4737_v42  ;;  %5039 = vmatpush1.bf16.msra.mxu0 %v4724_v39 }
 0x63d   : > { %v4726_v63 = vpack.c.bf16 %v4722_v7, %v4718_v8  ;;  %v4727_v47 = vpack.c.bf16 %v4723_v29, %v4719_v48  ;;  %v4739_v50 = vpop.permute.xlu1 %4738  ;;  %v4778_v22 = vmul.f32 %v4761_v6, %v4752_v53  ;;  %v4779_v37 = vmul.f32 %v4765_v17, %v4750_v62 }
 0x63e   : > { %v4751_v51 = vsel %vm1650_vm15, %v4739_v50, %v14750_v46  ;;  %v4753_v57 = vsel %vm1650_vm15, %v14751_v23, %v4739_v50 }
 0x63f   : > { %v4782_v45 = vmul.f32 %v4761_v6, %v4753_v57  ;;  %v4783_v52 = vmul.f32 %v4765_v17, %v4751_v51  ;;  %v4745_v59 = vpop.permute.xlu0 %4744  ;;  %5144 = vmatprep.subr.bf16.mxu1 %v4727_v47 }
 0x640   : > { %v4748_v38 = vsel %vm1650_vm15, %v14748_v25, %v4745_v59  ;;  %v4754_v60 = vsel %vm1650_vm15, %v4745_v59, %v14749_v15  ;;  %5145 = vmatpush1.bf16.msra.mxu1 %v4726_v63  ;;  %v14760_v15 = vld [vmem:[#allocation12_spill] sm:$0xff] }
 0x641   : > { %v4786_v20 = vpack.c.bf16 %v4782_v45, %v4778_v22  ;;  %v4787_v58 = vpack.c.bf16 %v4783_v52, %v4779_v37  ;;  %v4747_v49 = vpop.permute.xlu1 %4746  ;;  %v4780_v31 = vmul.f32 %v4769_v43, %v4748_v38  ;;  %v4781_v41 = vmul.f32 %v4773_v36, %v4754_v60 }
 0x642   : > { %v4749_v28 = vsel %vm1650_vm15, %v14750_v46, %v4747_v49  ;;  %v4755_v11 = vsel %vm1650_vm15, %v4747_v49, %v14751_v23  ;;  %v14762_v23 = vld [vmem:[#allocation13_spill] sm:$0xff] }
 0x643   : > { %v4784_v10 = vmul.f32 %v4769_v43, %v4749_v28  ;;  %v4785_v13 = vmul.f32 %v4773_v36, %v4755_v11  ;;  %5040 = vmatprep.subr.bf16.mxu0 %v4787_v58 }
 0x644   : > { %5041 = vmatpush1.bf16.msra.mxu0 %v4786_v20 }
 0x645   : > { %v4788_v44 = vpack.c.bf16 %v4784_v10, %v4780_v31  ;;  %v4789_v40 = vpack.c.bf16 %v4785_v13, %v4781_v41 }
 0x647   : > { %5057 = vmatmul.mubr.bf16.vlgmr.msra.gmra.mrb[8].mxu0 %v8545_v26  ;;  %5146 = vmatprep.subr.bf16.mxu1 %v4789_v40 }
 0x648   : > { %5147 = vmatpush1.bf16.msra.mxu1 %v4788_v44  ;;  %8407 = vmatprep.mubr.msk.bf16.mxu0 %vm4964_vm12, %v8548_v30 }
 0x64b   : > { %5163 = vmatmul.mubr.bf16.vlgmr.msra.gmra.mrb[8].mxu1 %v8545_v26 }
 0x64c   : > { %8409 = vmatprep.mubr.msk.bf16.mxu1 %vm4964_vm12, %v8548_v30  ;;  %vm14822_vm12 = vcmp.lt.s32.totalorder %v8816_v19, 2 }
 0x64d   : > { %vm14824_vm0 = vmmov %vm14822_vm12 }
 0x64e   : > { %vm14826_vm14 = vmmov %vm14824_vm0 }
 0x64f   : > { %5067 = vmatmul.mubr.bf16.gmra.mrb[12].mxu0 %v8550_v9  ;;  %vm14828_vm11 = vmmov %vm14824_vm0 }
 0x650   : > { %vm14831_vm13 = vmmov %vm14824_vm0 }
 0x653   : > { %5173 = vmatmul.mubr.bf16.gmra.mrb[12].mxu1 %v8550_v9 }
 0x71a   : > { %v5058_v24 = vpop.f32.mrb[8].mxu0 }
 0x71b   : > { %v8438_v1 = vadd.f32 %v5058_v24, %v14752_v34  ;;  %v5060_v35 = vpop.f32.mrb[9].mxu0 }
 0x71c   : > { %v8439_v27 = vadd.f32 %v5060_v35, %v14752_v34  ;;  %v5062_v55 = vpop.f32.mrb[10].mxu0 }
 0x71d   : > { %v11308_v32 = vmax.f32 %v8438_v1, 0.0  ;;  %v8440_v56 = vadd.f32 %v5062_v55, %v14754_v61  ;;  %v5064_v0 = vpop.f32.mrb[11].mxu0 }
 0x71e   : > { %v8441_v18 = vadd.f32 %v5064_v0, %v14754_v61  ;;  %v5164_v54 = vpop.f32.mrb[8].mxu1  ;;  %v11317_v12 = vmax.f32 %v8439_v27, 0.0 }
 0x71f   : > { %14753 = vst [vmem:[#allocation18_spill] sm:$0xff] %v11308_v32  ;;  %v11312_v14 = vmax.f32 %v8440_v56, 0.0  ;;  %v8446_v39 = vadd.f32 %v5164_v54, %v14752_v34  ;;  %v5166_v33 = vpop.f32.mrb[9].mxu1  ;;  %5199 = vrot.lane.b32.xlu0 %v11308_v32, %s14541_s2 }
 0x720   : > { %14756 = vst [vmem:[#allocation21_spill] sm:$0xff] %v11317_v12  ;;  %v11319_v16 = vmax.f32 %v8441_v18, 0.0  ;;  %v8447_v21 = vadd.f32 %v5166_v33, %v14752_v34  ;;  %v5168_v6 = vpop.f32.mrb[10].mxu1 }
 0x721   : > { %14755 = vst [vmem:[#allocation19_spill] sm:$0xff] %v11312_v14  ;;  %v11322_v17 = vmax.f32 %v8446_v39, 0.0  ;;  %v8448_v8 = vadd.f32 %v5168_v6, %v14754_v61  ;;  %v5170_v48 = vpop.f32.mrb[11].mxu1  ;;  %5201 = vrot.lane.b32.xlu1 %v11312_v14, %s14541_s2  ;;  %v6423_v7 = vpack.c.bf16 %v11312_v14, %v11308_v32 }
 0x722   : > { %14757 = vst [vmem:[#allocation20_spill] sm:$0xff] %v11319_v16  ;;  %v8449_v29 = vadd.f32 %v5170_v48, %v14754_v61  ;;  %v5068_v42 = vpop.f32.mrb[12].mxu0  ;;  %v6424_v25 = vpack.c.bf16 %v11319_v16, %v11317_v12  ;;  %v11337_v47 = vmax.f32 %v8447_v21, 0.0 }
 0x723   : > { %14758 = vst [vmem:[#allocation22_spill] sm:$0xff] %v11322_v17  ;;  %v11332_v62 = vmax.f32 %v8448_v8, 0.0  ;;  %v8442_v53 = vadd.f32 %v5068_v42, %v14760_v15  ;;  %v5070_v63 = vpop.f32.mrb[13].mxu0  ;;  %5215 = vrot.lane.b32.xlu0 %v11322_v17, %s14541_s2  ;;  %6431 = vst [vmem:[#allocation2 + $0x300] sm:$0xff] %v6423_v7 }
 0x724   : > { %14761 = vst [vmem:[#allocation25_spill] sm:$0xff] %v11337_v47  ;;  %v11339_v50 = vmax.f32 %v8449_v29, 0.0  ;;  %v8443_v46 = vadd.f32 %v5070_v63, %v14760_v15  ;;  %v5072_v51 = vpop.f32.mrb[14].mxu0  ;;  %6432 = vst [vmem:[#allocation2 + $0x308] sm:$0xff] %v6424_v25 }
 0x725   : > { %14759 = vst [vmem:[#allocation23_spill] sm:$0xff] %v11332_v62  ;;  %v8444_v57 = vadd.f32 %v5072_v51, %v14762_v23  ;;  %v5074_v43 = vpop.f32.mrb[15].mxu0  ;;  %5217 = vrot.lane.b32.xlu1 %v11332_v62, %s14541_s2  ;;  %v6425_v36 = vpack.c.bf16 %v11332_v62, %v11322_v17  ;;  %v11350_v52 = vmax.f32 %v8442_v53, 0.0 }
 0x726   : > { %v8445_v22 = vadd.f32 %v5074_v43, %v14762_v23  ;;  %v5174_v37 = vpop.f32.mrb[12].mxu1  ;;  %v6426_v45 = vpack.c.bf16 %v11339_v50, %v11337_v47  ;;  %v11357_v20 = vmax.f32 %v8443_v46, 0.0 }
 0x727   : > { %v11352_v59 = vmax.f32 %v8444_v57, 0.0  ;;  %v8450_v38 = vadd.f32 %v5174_v37, %v14760_v15  ;;  %v5176_v60 = vpop.f32.mrb[13].mxu1  ;;  %5301 = vrot.lane.b32.xlu0 %v11308_v32, %s14546_s3  ;;  %6433 = vst [vmem:[#allocation2 + $0x310] sm:$0xff] %v6425_v36 }
 0x728   : > { %14763 = vst [vmem:[#allocation24_spill] sm:$0xff] %v11357_v20  ;;  %v11359_v58 = vmax.f32 %v8445_v22, 0.0  ;;  %v8451_v49 = vadd.f32 %v5176_v60, %v14760_v15  ;;  %v5178_v28 = vpop.f32.mrb[14].mxu1  ;;  %6434 = vst [vmem:[#allocation2 + $0x318] sm:$0xff] %v6426_v45 }
 0x729   : > { %v8452_v11 = vadd.f32 %v5178_v28, %v14762_v23  ;;  %v5180_v31 = vpop.f32.mrb[15].mxu1  ;;  %5303 = vrot.lane.b32.xlu1 %v11312_v14, %s14546_s3  ;;  %v6427_v41 = vpack.c.bf16 %v11352_v59, %v11350_v52  ;;  %v11370_v26 = vmax.f32 %v8450_v38, 0.0 }
 0x72a   : > { %14764 = vst [vmem:[#allocation26_spill] sm:$0xff] %v11359_v58  ;;  %v8453_v10 = vadd.f32 %v5180_v31, %v14762_v23  ;;  %v6428_v13 = vpack.c.bf16 %v11359_v58, %v11357_v20  ;;  %v11376_v44 = vmax.f32 %v8451_v49, 0.0 }
 0x72b   : > { %v11372_v30 = vmax.f32 %v8452_v11, 0.0  ;;  %5317 = vrot.lane.b32.xlu0 %v11322_v17, %s14546_s3  ;;  %6435 = vst [vmem:[#allocation2 + $0x320] sm:$0xff] %v6427_v41 }
 0x72c   : > { %14765 = vst [vmem:[#allocation27_spill] sm:$0xff] %v11376_v44  ;;  %v11378_v40 = vmax.f32 %v8453_v10, 0.0  ;;  %6436 = vst [vmem:[#allocation2 + $0x328] sm:$0xff] %v6428_v13 }
 0x72d   : > { %5319 = vrot.lane.b32.xlu1 %v11332_v62, %s14546_s3  ;;  %v6429_v9 = vpack.c.bf16 %v11372_v30, %v11370_v26 }
 0x72e   : > { %14766 = vst [vmem:[#allocation29_spill] sm:$0xff] %v11378_v40  ;;  %v6430_v24 = vpack.c.bf16 %v11378_v40, %v11376_v44 }
 0x72f   : > { %5403 = vrot.lane.b32.xlu0 %v11308_v32, %s14551_s4  ;;  %6437 = vst [vmem:[#allocation2 + $0x330] sm:$0xff] %v6429_v9 }
 0x730   : > { %6438 = vst [vmem:[#allocation2 + $0x338] sm:$0xff] %v6430_v24 }
 0x731   : > { %5405 = vrot.lane.b32.xlu1 %v11312_v14, %s14551_s4 }
 0x733   : > { %5419 = vrot.lane.b32.xlu0 %v11322_v17, %s14551_s4 }
 0x735   : > { %5421 = vrot.lane.b32.xlu1 %v11332_v62, %s14551_s4 }
 0x737   : > { %5505 = vrot.lane.b32.xlu0 %v11308_v32, %s14556_s5 }
 0x739   : > { %5507 = vrot.lane.b32.xlu1 %v11312_v14, %s14556_s5 }
 0x73b   : > { %5521 = vrot.lane.b32.xlu0 %v11322_v17, %s14556_s5 }
 0x73d   : > { %5523 = vrot.lane.b32.xlu1 %v11332_v62, %s14556_s5 }
 0x73f   : > { %5607 = vrot.lane.b32.xlu0 %v11308_v32, %s14561_s7 }
 0x741   : > { %5609 = vrot.lane.b32.xlu1 %v11312_v14, %s14561_s7 }
 0x743   : > { %5623 = vrot.lane.b32.xlu0 %v11322_v17, %s14561_s7 }
 0x745   : > { %5625 = vrot.lane.b32.xlu1 %v11332_v62, %s14561_s7 }
 0x747   : > { %5709 = vrot.lane.b32.xlu0 %v11308_v32, %s14529_s23 }
 0x749   : > { %5711 = vrot.lane.b32.xlu1 %v11312_v14, %s14529_s23 }
 0x74b   : > { %5725 = vrot.lane.b32.xlu0 %v11322_v17, %s14529_s23 }
 0x74d   : > { %5727 = vrot.lane.b32.xlu1 %v11332_v62, %s14529_s23 }
 0x74f   : > { %5811 = vrot.lane.b32.xlu0 %v11308_v32, %s14530_s16 }
 0x751   : > { %5813 = vrot.lane.b32.xlu1 %v11312_v14, %s14530_s16 }
 0x753   : > { %5827 = vrot.lane.b32.xlu0 %v11322_v17, %s14530_s16 }
 0x755   : > { %5829 = vrot.lane.b32.xlu1 %v11332_v62, %s14530_s16 }
 0x757   : > { %5913 = vrot.lane.b32.xlu0 %v11308_v32, %s14531_s24 }
 0x759   : > { %5915 = vrot.lane.b32.xlu1 %v11312_v14, %s14531_s24 }
 0x75b   : > { %5929 = vrot.lane.b32.xlu0 %v11322_v17, %s14531_s24 }
 0x75d   : > { %5931 = vrot.lane.b32.xlu1 %v11332_v62, %s14531_s24 }
 0x75f   : > { %6015 = vrot.lane.b32.xlu0 %v11308_v32, %s14532_s21 }
 0x761   : > { %6017 = vrot.lane.b32.xlu1 %v11312_v14, %s14532_s21 }
 0x763   : > { %6031 = vrot.lane.b32.xlu0 %v11322_v17, %s14532_s21 }
 0x765   : > { %6033 = vrot.lane.b32.xlu1 %v11332_v62, %s14532_s21 }
 0x767   : > { %6117 = vrot.lane.b32.xlu0 %v11308_v32, %s14533_s22 }
 0x769   : > { %6119 = vrot.lane.b32.xlu1 %v11312_v14, %s14533_s22 }
 0x76b   : > { %6133 = vrot.lane.b32.xlu0 %v11322_v17, %s14533_s22 }
 0x76d   : > { %6135 = vrot.lane.b32.xlu1 %v11332_v62, %s14533_s22 }
 0x76f   : > { %6219 = vrot.lane.b32.xlu0 %v11308_v32, %s14534_s19 }
 0x771   : > { %6221 = vrot.lane.b32.xlu1 %v11312_v14, %s14534_s19 }
 0x773   : > { %6235 = vrot.lane.b32.xlu0 %v11322_v17, %s14534_s19 }
 0x775   : > { %6237 = vrot.lane.b32.xlu1 %v11332_v62, %s14534_s19 }
 0x777   : > { %6321 = vrot.lane.b32.xlu0 %v11308_v32, %s14535_s20 }
 0x779   : > { %6323 = vrot.lane.b32.xlu1 %v11312_v14, %s14535_s20 }
 0x77b   : > { %6337 = vrot.lane.b32.xlu0 %v11322_v17, %s14535_s20 }
 0x77d   : > { %6339 = vrot.lane.b32.xlu1 %v11332_v62, %s14535_s20 }
 0x77f   : > { %6439 = vrot.lane.b32.xlu0 %v11308_v32, %s14536_s0 }
 0x781   : > { %6441 = vrot.lane.b32.xlu1 %v11312_v14, %s14536_s0 }
 0x783   : > { %6455 = vrot.lane.b32.xlu0 %v11322_v17, %s14536_s0 }
 0x785   : > { %6457 = vrot.lane.b32.xlu1 %v11332_v62, %s14536_s0 }
 0x787   : > { %6541 = vrot.lane.b32.xlu0 %v11308_v32, %s14479_s12 }
 0x789   : > { %6543 = vrot.lane.b32.xlu1 %v11312_v14, %s14479_s12 }
 0x78b   : > { %6557 = vrot.lane.b32.xlu0 %v11322_v17, %s14479_s12 }
 0x78d   : > { %6559 = vrot.lane.b32.xlu1 %v11332_v62, %s14479_s12 }
 0x78f   : > { %6643 = vrot.lane.b32.xlu0 %v11308_v32, %s14482_s15 }
 0x791   : > { %6645 = vrot.lane.b32.xlu1 %v11312_v14, %s14482_s15  ;;  %v11486_v34 = vpop.permute.xlu0 %5199 }
 0x793   : > { %v11488_v1 = vpop.permute.xlu1 %5201  ;;  %6659 = vrot.lane.b32.xlu0 %v11322_v17, %s14482_s15 }
 0x795   : > { %6661 = vrot.lane.b32.xlu1 %v11332_v62, %s14482_s15  ;;  %v11494_v35 = vpop.permute.xlu0 %5215 }
 0x797   : > { %v11496_v27 = vpop.permute.xlu1 %5217  ;;  %5207 = vrot.lane.b32.xlu0 %v11317_v12, %s14541_s2 }
 0x799   : > { %5209 = vrot.lane.b32.xlu1 %v11319_v16, %s14541_s2  ;;  %v11502_v55 = vpop.permute.xlu0 %5301 }
 0x79b   : > { %v11504_v61 = vpop.permute.xlu1 %5303  ;;  %5223 = vrot.lane.b32.xlu0 %v11337_v47, %s14541_s2 }
 0x79d   : > { %5225 = vrot.lane.b32.xlu1 %v11339_v50, %s14541_s2  ;;  %v11510_v56 = vpop.permute.xlu0 %5317 }
 0x79f   : > { %v11512_v0 = vpop.permute.xlu1 %5319  ;;  %5309 = vrot.lane.b32.xlu0 %v11317_v12, %s14546_s3 }
 0x7a1   : > { %5311 = vrot.lane.b32.xlu1 %v11319_v16, %s14546_s3  ;;  %v11518_v18 = vpop.permute.xlu0 %5403 }
 0x7a3   : > { %v11520_v54 = vpop.permute.xlu1 %5405  ;;  %5325 = vrot.lane.b32.xlu0 %v11337_v47, %s14546_s3 }
 0x7a5   : > { %5327 = vrot.lane.b32.xlu1 %v11339_v50, %s14546_s3  ;;  %v11526_v39 = vpop.permute.xlu0 %5419 }
 0x7a7   : > { %v11528_v33 = vpop.permute.xlu1 %5421  ;;  %5411 = vrot.lane.b32.xlu0 %v11317_v12, %s14551_s4 }
 0x7a9   : > { %5413 = vrot.lane.b32.xlu1 %v11319_v16, %s14551_s4  ;;  %v11534_v21 = vpop.permute.xlu0 %5505 }
 0x7ab   : > { %v11536_v6 = vpop.permute.xlu1 %5507  ;;  %5427 = vrot.lane.b32.xlu0 %v11337_v47, %s14551_s4 }
 0x7ad   : > { %5429 = vrot.lane.b32.xlu1 %v11339_v50, %s14551_s4  ;;  %v11542_v8 = vpop.permute.xlu0 %5521 }
 0x7af   : > { %v11544_v48 = vpop.permute.xlu1 %5523  ;;  %5513 = vrot.lane.b32.xlu0 %v11317_v12, %s14556_s5 }
 0x7b1   : > { %5515 = vrot.lane.b32.xlu1 %v11319_v16, %s14556_s5  ;;  %v11550_v7 = vpop.permute.xlu0 %5607 }
 0x7b3   : > { %v11552_v29 = vpop.permute.xlu1 %5609  ;;  %5529 = vrot.lane.b32.xlu0 %v11337_v47, %s14556_s5 }
 0x7b5   : > { %5531 = vrot.lane.b32.xlu1 %v11339_v50, %s14556_s5  ;;  %v11558_v42 = vpop.permute.xlu0 %5623 }
 0x7b7   : > { %v11560_v25 = vpop.permute.xlu1 %5625  ;;  %5615 = vrot.lane.b32.xlu0 %v11317_v12, %s14561_s7 }
 0x7b9   : > { %5617 = vrot.lane.b32.xlu1 %v11319_v16, %s14561_s7  ;;  %v11566_v15 = vpop.permute.xlu0 %5709 }
 0x7bb   : > { %v11568_v53 = vpop.permute.xlu1 %5711  ;;  %5631 = vrot.lane.b32.xlu0 %v11337_v47, %s14561_s7 }
 0x7bd   : > { %5633 = vrot.lane.b32.xlu1 %v11339_v50, %s14561_s7  ;;  %v11574_v63 = vpop.permute.xlu0 %5725 }
 0x7bf   : > { %v11576_v46 = vpop.permute.xlu1 %5727  ;;  %5717 = vrot.lane.b32.xlu0 %v11317_v12, %s14529_s23 }
 0x7c1   : > { %5719 = vrot.lane.b32.xlu1 %v11319_v16, %s14529_s23  ;;  %v11582_v51 = vpop.permute.xlu0 %5811 }
 0x7c3   : > { %v11584_v23 = vpop.permute.xlu1 %5813  ;;  %5733 = vrot.lane.b32.xlu0 %v11337_v47, %s14529_s23 }
 0x7c5   : > { %5735 = vrot.lane.b32.xlu1 %v11339_v50, %s14529_s23  ;;  %v11590_v57 = vpop.permute.xlu0 %5827 }
 0x7c7   : > { %v11592_v43 = vpop.permute.xlu1 %5829  ;;  %5819 = vrot.lane.b32.xlu0 %v11317_v12, %s14530_s16 }
 0x7c9   : > { %5821 = vrot.lane.b32.xlu1 %v11319_v16, %s14530_s16  ;;  %v11598_v36 = vpop.permute.xlu0 %5913 }
 0x7cb   : > { %v11600_v22 = vpop.permute.xlu1 %5915  ;;  %5835 = vrot.lane.b32.xlu0 %v11337_v47, %s14530_s16 }
 0x7cd   : > { %5837 = vrot.lane.b32.xlu1 %v11339_v50, %s14530_s16  ;;  %v11606_v37 = vpop.permute.xlu0 %5929 }
 0x7cf   : > { %v11608_v45 = vpop.permute.xlu1 %5931  ;;  %5921 = vrot.lane.b32.xlu0 %v11317_v12, %s14531_s24 }
 0x7d1   : > { %5923 = vrot.lane.b32.xlu1 %v11319_v16, %s14531_s24  ;;  %v11614_v38 = vpop.permute.xlu0 %6015 }
 0x7d3   : > { %v11616_v60 = vpop.permute.xlu1 %6017  ;;  %5937 = vrot.lane.b32.xlu0 %v11337_v47, %s14531_s24 }
 0x7d4   : > { %14767 = vst [vmem:[#allocation28_spill] sm:$0xff] %v11616_v60 }
 0x7d5   : > { %5939 = vrot.lane.b32.xlu1 %v11339_v50, %s14531_s24  ;;  %v11622_v49 = vpop.permute.xlu0 %6031 }
 0x7d7   : > { %v11624_v28 = vpop.permute.xlu1 %6033  ;;  %6023 = vrot.lane.b32.xlu0 %v11317_v12, %s14532_s21 }
 0x7d9   : > { %6025 = vrot.lane.b32.xlu1 %v11319_v16, %s14532_s21  ;;  %v11630_v11 = vpop.permute.xlu0 %6117 }
 0x7da   : > { %14768 = vst [vmem:[#allocation32_spill] sm:$0xff] %v11630_v11 }
 0x7db   : > { %v11632_v31 = vpop.permute.xlu1 %6119  ;;  %6039 = vrot.lane.b32.xlu0 %v11337_v47, %s14532_s21 }
 0x7dc   : > { %14769 = vst [vmem:[#allocation33_spill] sm:$0xff] %v11632_v31 }
 0x7dd   : > { %6041 = vrot.lane.b32.xlu1 %v11339_v50, %s14532_s21  ;;  %v11638_v41 = vpop.permute.xlu0 %6133 }
 0x7de   : > { %14770 = vst [vmem:[#allocation31_spill] sm:$0xff] %v11638_v41 }
 0x7df   : > { %v11640_v10 = vpop.permute.xlu1 %6135  ;;  %6125 = vrot.lane.b32.xlu0 %v11317_v12, %s14533_s22 }
 0x7e0   : > { %14771 = vst [vmem:[#allocation30_spill] sm:$0xff] %v11640_v10 }
 0x7e1   : > { %6127 = vrot.lane.b32.xlu1 %v11319_v16, %s14533_s22  ;;  %v11646_v13 = vpop.permute.xlu0 %6219 }
 0x7e2   : > { %14772 = vst [vmem:[#allocation14_spill] sm:$0xff] %v11646_v13 }
 0x7e3   : > { %v11648_v9 = vpop.permute.xlu1 %6221  ;;  %6141 = vrot.lane.b32.xlu0 %v11337_v47, %s14533_s22 }
 0x7e4   : > { %14773 = vst [vmem:[#allocation15_spill] sm:$0xff] %v11648_v9 }
 0x7e5   : > { %6143 = vrot.lane.b32.xlu1 %v11339_v50, %s14533_s22  ;;  %v11654_v24 = vpop.permute.xlu0 %6235 }
 0x7e6   : > { %14774 = vst [vmem:[#allocation16_spill] sm:$0xff] %v11654_v24 }
 0x7e7   : > { %v11656_v62 = vpop.permute.xlu1 %6237  ;;  %6227 = vrot.lane.b32.xlu0 %v11317_v12, %s14534_s19 }
 0x7e8   : > { %14775 = vst [vmem:[#allocation17_spill] sm:$0xff] %v11656_v62 }
 0x7e9   : > { %6229 = vrot.lane.b32.xlu1 %v11319_v16, %s14534_s19  ;;  %v11662_v17 = vpop.permute.xlu0 %6321 }
 0x7ea   : > { %14776 = vst [vmem:[#allocation36_spill] sm:$0xff] %v11662_v17 }
 0x7eb   : > { %v11664_v32 = vpop.permute.xlu1 %6323  ;;  %6243 = vrot.lane.b32.xlu0 %v11337_v47, %s14534_s19 }
 0x7ec   : > { %14777 = vst [vmem:[#allocation34_spill] sm:$0xff] %v11664_v32 }
 0x7ed   : > { %6245 = vrot.lane.b32.xlu1 %v11339_v50, %s14534_s19  ;;  %v11670_v40 = vpop.permute.xlu0 %6337 }
 0x7ee   : > { %14778 = vst [vmem:[#allocation37_spill] sm:$0xff] %v11670_v40 }
 0x7ef   : > { %v11672_v58 = vpop.permute.xlu1 %6339  ;;  %6329 = vrot.lane.b32.xlu0 %v11317_v12, %s14535_s20 }
 0x7f0   : > { %14779 = vst [vmem:[#allocation35_spill] sm:$0xff] %v11672_v58 }
 0x7f1   : > { %6331 = vrot.lane.b32.xlu1 %v11319_v16, %s14535_s20  ;;  %v11678_v44 = vpop.permute.xlu0 %6439 }
 0x7f2   : > { %14780 = vst [vmem:[#allocation40_spill] sm:$0xff] %v11678_v44 }
 0x7f3   : > { %v11680_v20 = vpop.permute.xlu1 %6441  ;;  %6345 = vrot.lane.b32.xlu0 %v11337_v47, %s14535_s20 }
 0x7f4   : > { %14781 = vst [vmem:[#allocation38_spill] sm:$0xff] %v11680_v20 }
 0x7f5   : > { %6347 = vrot.lane.b32.xlu1 %v11339_v50, %s14535_s20  ;;  %v11686_v32 = vpop.permute.xlu0 %6455 }
 0x7f6   : > { %14782 = vst [vmem:[#allocation41_spill] sm:$0xff] %v11686_v32 }
 0x7f7   : > { %v11688_v17 = vpop.permute.xlu1 %6457  ;;  %6447 = vrot.lane.b32.xlu0 %v11317_v12, %s14536_s0 }
 0x7f8   : > { %14783 = vst [vmem:[#allocation39_spill] sm:$0xff] %v11688_v17 }
 0x7f9   : > { %6449 = vrot.lane.b32.xlu1 %v11319_v16, %s14536_s0  ;;  %v11694_v58 = vpop.permute.xlu0 %6541 }
 0x7fa   : > { %14784 = vst [vmem:[#allocation44_spill] sm:$0xff] %v11694_v58 }
 0x7fb   : > { %v11696_v44 = vpop.permute.xlu1 %6543  ;;  %6463 = vrot.lane.b32.xlu0 %v11337_v47, %s14536_s0 }
 0x7fc   : > { %14785 = vst [vmem:[#allocation42_spill] sm:$0xff] %v11696_v44 }
 0x7fd   : > { %6465 = vrot.lane.b32.xlu1 %v11339_v50, %s14536_s0  ;;  %v11702_v20 = vpop.permute.xlu0 %6557 }
 0x7fe   : > { %14786 = vst [vmem:[#allocation45_spill] sm:$0xff] %v11702_v20 }
 0x7ff   : > { %v11704_v32 = vpop.permute.xlu1 %6559  ;;  %6549 = vrot.lane.b32.xlu0 %v11317_v12, %s14479_s12 }
 0x800   : > { %14787 = vst [vmem:[#allocation43_spill] sm:$0xff] %v11704_v32  ;;  %v5247_v32 = vld [vmem:[%s14128_s1] ss:$8 sm:$0xf] }
 0x801   : > { %6551 = vrot.lane.b32.xlu1 %v11319_v16, %s14479_s12  ;;  %v11710_v17 = vpop.permute.xlu0 %6643  ;;  %v11750_v62 = vrot.slane %v5247_v32, %v8668_v3  ;;  %v11753_v13 = vrot.slane %v5247_v32, %v8671_v4 }
 0x802   : > { %14788 = vst [vmem:[#allocation48_spill] sm:$0xff] %v11710_v17  ;;  %v11733_v17 = vrot.slane %v5247_v32, %v8665_v2 }
 0x803   : > { %v11712_v58 = vpop.permute.xlu1 %6645  ;;  %6565 = vrot.lane.b32.xlu0 %v11337_v47, %s14479_s12 }
 0x804   : > { %14789 = vst [vmem:[#allocation46_spill] sm:$0xff] %v11712_v58  ;;  %v11730_v58 = vrot.slane %v5247_v32, %v8674_v5 }
 0x805   : > { %6567 = vrot.lane.b32.xlu1 %v11339_v50, %s14479_s12  ;;  %v11718_v44 = vpop.permute.xlu0 %6659 }
 0x806   : > { %14790 = vst [vmem:[#allocation49_spill] sm:$0xff] %v11718_v44 }
 0x807   : > { %v11723_v20 = vpop.permute.xlu1 %6661  ;;  %6651 = vrot.lane.b32.xlu0 %v11317_v12, %s14482_s15 }
 0x808   : > { %14791 = vst [vmem:[#allocation47_spill] sm:$0xff] %v11723_v20 }
 0x809   : > { %6653 = vrot.lane.b32.xlu1 %v11319_v16, %s14482_s15  ;;  %v5208_v40 = vpop.permute.xlu0 %5207 }
 0x80a   : > { %v5235_v44 = vsel %vm395_vm2, %v5208_v40, %v11494_v35  ;;  %v5239_v20 = vsel %vm395_vm2, %v11486_v34, %v5208_v40  ;;  %v8410_v40 = vld [vmem:[%s14128_s1 + $0x1] ss:$8 sm:$0xf] }
 0x80b   : > { %v5210_v9 = vpop.permute.xlu1 %5209  ;;  %6667 = vrot.lane.b32.xlu0 %v11337_v47, %s14482_s15  ;;  %v5270_v47 = vmul.f32 %v11730_v58, %v5239_v20  ;;  %v5271_v24 = vmul.f32 %v11733_v17, %v5235_v44 }
 0x80c   : > { %v5236_v16 = vsel %vm395_vm2, %v5210_v9, %v11496_v27  ;;  %v5240_v12 = vsel %vm395_vm2, %v11488_v1, %v5210_v9 }
 0x80d   : > { %v5274_v31 = vmul.f32 %v11730_v58, %v5240_v12  ;;  %v5275_v10 = vmul.f32 %v11733_v17, %v5236_v16  ;;  %6669 = vrot.lane.b32.xlu1 %v11339_v50, %s14482_s15  ;;  %v5224_v9 = vpop.permute.xlu0 %5223  ;;  %v11773_v12 = vrot.slane %v8410_v40, %v8674_v5 }
 0x80e   : > { %v5231_v32 = vsel %vm395_vm2, %v11494_v35, %v5224_v9  ;;  %v5243_v11 = vsel %vm395_vm2, %v5224_v9, %v11486_v34 }
 0x80f   : > { %v5286_v41 = vpack.c.bf16 %v5274_v31, %v5270_v47  ;;  %v5287_v20 = vpack.c.bf16 %v5275_v10, %v5271_v24  ;;  %v5226_v60 = vpop.permute.xlu1 %5225  ;;  %5203 = vrot.lane.b32.xlu0 %v11350_v52, %s14541_s2  ;;  %v5269_v16 = vmul.f32 %v11750_v62, %v5243_v11  ;;  %v11783_v47 = vrot.slane %v8410_v40, %v8665_v2 }
 0x810   : > { %v5232_v44 = vsel %vm395_vm2, %v11496_v27, %v5226_v60  ;;  %v5244_v35 = vsel %vm395_vm2, %v5226_v60, %v11488_v1  ;;  %v5272_v34 = vmul.f32 %v11753_v13, %v5231_v32  ;;  %v11799_v32 = vrot.slane %v8410_v40, %v8668_v3 }
 0x811   : > { %5294 = vst [vmem:[#allocation2 + $0x8] sm:$0xff] %v5286_v41  ;;  %5295 = vst [vmem:[#allocation2 + $0x10] sm:$0xff] %v5287_v20  ;;  %v5273_v31 = vmul.f32 %v11750_v62, %v5244_v35  ;;  %v5276_v10 = vmul.f32 %v11753_v13, %v5232_v44  ;;  %6747 = vrot.lane.b32.xlu1 %v11312_v14, %s14485_s17  ;;  %v5310_v11 = vpop.permute.xlu0 %5309  ;;  %7916 = vmatprep.subr.bf16.mxu0 %v5286_v41 }
 0x812   : > { %v5337_v1 = vsel %vm442_vm1, %v5310_v11, %v11510_v56  ;;  %v5341_v27 = vsel %vm442_vm1, %v11502_v55, %v5310_v11 }
 0x813   : > { %v5285_v60 = vpack.c.bf16 %v5273_v31, %v5269_v16  ;;  %v5288_v24 = vpack.c.bf16 %v5276_v10, %v5272_v34  ;;  %v5312_v9 = vpop.permute.xlu1 %5311  ;;  %5219 = vrot.lane.b32.xlu0 %v11370_v26, %s14541_s2  ;;  %v5372_v44 = vmul.f32 %v11773_v12, %v5341_v27  ;;  %v11809_v16 = vrot.slane %v8410_v40, %v8671_v4  ;;  %v8411_v27 = vld [vmem:[%s14128_s1 + $0x2] ss:$8 sm:$0xf] }
 0x814   : > { %v5338_v41 = vsel %vm442_vm1, %v5312_v9, %v11512_v0  ;;  %v5342_v35 = vsel %vm442_vm1, %v11504_v61, %v5312_v9  ;;  %v5373_v34 = vmul.f32 %v11783_v47, %v5337_v1 }
 0x815   : > { %5293 = vst [vmem:[#allocation2] sm:$0xff] %v5285_v60  ;;  %5296 = vst [vmem:[#allocation2 + $0x18] sm:$0xff] %v5288_v24  ;;  %v5376_v31 = vmul.f32 %v11773_v12, %v5342_v35  ;;  %v5377_v10 = vmul.f32 %v11783_v47, %v5338_v41  ;;  %5205 = vrot.lane.b32.xlu1 %v11352_v59, %s14541_s2  ;;  %v5326_v11 = vpop.permute.xlu0 %5325  ;;  %7917 = vmatpush1.bf16.msra.mxu0 %v5285_v60 }
 0x816   : > { %v5333_v40 = vsel %vm442_vm1, %v11510_v56, %v5326_v11  ;;  %v5345_v1 = vsel %vm442_vm1, %v5326_v11, %v11502_v55  ;;  %8080 = vmatprep.subr.bf16.mxu1 %v5288_v24  ;;  %v11834_v56 = vrot.slane %v8411_v27, %v8674_v5  ;;  %v11837_v55 = vrot.slane %v8411_v27, %v8665_v2 }
 0x817   : > { %v5388_v9 = vpack.c.bf16 %v5376_v31, %v5372_v44  ;;  %v5389_v41 = vpack.c.bf16 %v5377_v10, %v5373_v34  ;;  %v5328_v35 = vpop.permute.xlu1 %5327  ;;  %5305 = vrot.lane.b32.xlu0 %v11350_v52, %s14546_s3  ;;  %8081 = vmatpush1.bf16.msra.mxu1 %v5287_v20  ;;  %v5371_v24 = vmul.f32 %v11799_v32, %v5345_v1 }
 0x818   : > { %v5334_v14 = vsel %vm442_vm1, %v11512_v0, %v5328_v35  ;;  %v5346_v60 = vsel %vm442_vm1, %v5328_v35, %v11504_v61  ;;  %v5374_v44 = vmul.f32 %v11809_v16, %v5333_v40 }
 0x819   : > { %5396 = vst [vmem:[#allocation2 + $0x48] sm:$0xff] %v5388_v9  ;;  %5397 = vst [vmem:[#allocation2 + $0x50] sm:$0xff] %v5389_v41  ;;  %v5375_v34 = vmul.f32 %v11799_v32, %v5346_v60  ;;  %v5378_v0 = vmul.f32 %v11809_v16, %v5334_v14  ;;  %5221 = vrot.lane.b32.xlu1 %v11372_v30, %s14541_s2  ;;  %v5412_v61 = vpop.permute.xlu0 %5411  ;;  %v11860_v9 = vrot.slane %v8411_v27, %v8668_v3 }
 0x81a   : > { %v5439_v31 = vsel %vm502_vm4, %v5412_v61, %v11526_v39  ;;  %v5443_v20 = vsel %vm502_vm4, %v11518_v18, %v5412_v61  ;;  %v11863_v41 = vrot.slane %v8411_v27, %v8671_v4 }
 0x81b   : > { %v5387_v10 = vpack.c.bf16 %v5375_v34, %v5371_v24  ;;  %v5390_v11 = vpack.c.bf16 %v5378_v0, %v5374_v44  ;;  %v5414_v1 = vpop.permute.xlu1 %5413  ;;  %5321 = vrot.lane.b32.xlu0 %v11370_v26, %s14546_s3  ;;  %v5474_v35 = vmul.f32 %v11834_v56, %v5443_v20  ;;  %v5475_v60 = vmul.f32 %v11837_v55, %v5439_v31  ;;  %v8412_v0 = vld [vmem:[%s14128_s1 + $0x3] ss:$8 sm:$0xf] }
 0x81c   : > { %v5440_v14 = vsel %vm502_vm4, %v5414_v1, %v11528_v33  ;;  %v5444_v40 = vsel %vm502_vm4, %v11520_v54, %v5414_v1 }
 0x81d   : > { %5395 = vst [vmem:[#allocation2 + $0x40] sm:$0xff] %v5387_v10  ;;  %5398 = vst [vmem:[#allocation2 + $0x58] sm:$0xff] %v5390_v11  ;;  %v5478_v24 = vmul.f32 %v11834_v56, %v5444_v40  ;;  %v5479_v44 = vmul.f32 %v11837_v55, %v5440_v14  ;;  %5307 = vrot.lane.b32.xlu1 %v11352_v59, %s14546_s3  ;;  %v5428_v34 = vpop.permute.xlu0 %5427  ;;  %v11892_v14 = vrot.slane %v8412_v0, %v8665_v2 }
 0x81e   : > { %v5435_v27 = vsel %vm502_vm4, %v11526_v39, %v5428_v34  ;;  %v5447_v61 = vsel %vm502_vm4, %v5428_v34, %v11518_v18  ;;  %v11889_v39 = vrot.slane %v8412_v0, %v8674_v5 }
 0x81f   : > { %v5490_v31 = vpack.c.bf16 %v5478_v24, %v5474_v35  ;;  %v5491_v20 = vpack.c.bf16 %v5479_v44, %v5475_v60  ;;  %v5430_v10 = vpop.permute.xlu1 %5429  ;;  %5407 = vrot.lane.b32.xlu0 %v11350_v52, %s14551_s4  ;;  %v5473_v18 = vmul.f32 %v11860_v9, %v5447_v61  ;;  %v5476_v40 = vmul.f32 %v11863_v41, %v5435_v27 }
 0x820   : > { %v5436_v11 = vsel %vm502_vm4, %v11528_v33, %v5430_v10  ;;  %v5448_v1 = vsel %vm502_vm4, %v5430_v10, %v11520_v54  ;;  %v11918_v10 = vrot.slane %v8412_v0, %v8671_v4 }
 0x821   : > { %5498 = vst [vmem:[#allocation2 + $0x88] sm:$0xff] %v5490_v31  ;;  %5499 = vst [vmem:[#allocation2 + $0x90] sm:$0xff] %v5491_v20  ;;  %v5477_v35 = vmul.f32 %v11860_v9, %v5448_v1  ;;  %v5480_v33 = vmul.f32 %v11863_v41, %v5436_v11  ;;  %5323 = vrot.lane.b32.xlu1 %v11372_v30, %s14546_s3  ;;  %v5514_v54 = vpop.permute.xlu0 %5513  ;;  %v11915_v20 = vrot.slane %v8412_v0, %v8668_v3 }
 0x822   : > { %v5541_v60 = vsel %vm550_vm3, %v5514_v54, %v11542_v8  ;;  %v5545_v24 = vsel %vm550_vm3, %v11534_v21, %v5514_v54 }
 0x823   : > { %v5489_v44 = vpack.c.bf16 %v5477_v35, %v5473_v18  ;;  %v5492_v34 = vpack.c.bf16 %v5480_v33, %v5476_v40  ;;  %v5516_v61 = vpop.permute.xlu1 %5515  ;;  %5423 = vrot.lane.b32.xlu0 %v11370_v26, %s14551_s4  ;;  %v5576_v11 = vmul.f32 %v11889_v39, %v5545_v24  ;;  %v5577_v1 = vmul.f32 %v11892_v14, %v5541_v60  ;;  %v8413_v33 = vld [vmem:[%s14128_s1 + $0x4] ss:$8 sm:$0xf] }
 0x824   : > { %v5542_v27 = vsel %vm550_vm3, %v5516_v61, %v11544_v48  ;;  %v5546_v31 = vsel %vm550_vm3, %v11536_v6, %v5516_v61 }
 0x825   : > { %5497 = vst [vmem:[#allocation2 + $0x80] sm:$0xff] %v5489_v44  ;;  %5500 = vst [vmem:[#allocation2 + $0x98] sm:$0xff] %v5492_v34  ;;  %v5580_v18 = vmul.f32 %v11889_v39, %v5546_v31  ;;  %v5581_v40 = vmul.f32 %v11892_v14, %v5542_v27  ;;  %5409 = vrot.lane.b32.xlu1 %v11352_v59, %s14551_s4  ;;  %v5530_v35 = vpop.permute.xlu0 %5529  ;;  %v11947_v27 = vrot.slane %v8413_v33, %v8665_v2 }
 0x826   : > { %v5537_v0 = vsel %vm550_vm3, %v11542_v8, %v5530_v35  ;;  %v5549_v54 = vsel %vm550_vm3, %v5530_v35, %v11534_v21  ;;  %v11944_v8 = vrot.slane %v8413_v33, %v8674_v5 }
 0x827   : > { %v5592_v60 = vpack.c.bf16 %v5580_v18, %v5576_v11  ;;  %v5593_v24 = vpack.c.bf16 %v5581_v40, %v5577_v1  ;;  %v5532_v44 = vpop.permute.xlu1 %5531  ;;  %5509 = vrot.lane.b32.xlu0 %v11350_v52, %s14556_s5  ;;  %v5575_v21 = vmul.f32 %v11915_v20, %v5549_v54  ;;  %v5578_v31 = vmul.f32 %v11918_v10, %v5537_v0 }
 0x828   : > { %v5538_v34 = vsel %vm550_vm3, %v11544_v48, %v5532_v44  ;;  %v5550_v61 = vsel %vm550_vm3, %v5532_v44, %v11536_v6  ;;  %v11973_v44 = vrot.slane %v8413_v33, %v8671_v4 }
 0x829   : > { %5600 = vst [vmem:[#allocation2 + $0xc8] sm:$0xff] %v5592_v60  ;;  %5601 = vst [vmem:[#allocation2 + $0xd0] sm:$0xff] %v5593_v24  ;;  %v5579_v11 = vmul.f32 %v11915_v20, %v5550_v61  ;;  %v5582_v48 = vmul.f32 %v11918_v10, %v5538_v34  ;;  %5425 = vrot.lane.b32.xlu1 %v11372_v30, %s14551_s4  ;;  %v5616_v6 = vpop.permute.xlu0 %5615  ;;  %v11970_v24 = vrot.slane %v8413_v33, %v8668_v3 }
 0x82a   : > { %v5643_v1 = vsel %vm610_vm6, %v5616_v6, %v11558_v42  ;;  %v5647_v18 = vsel %vm610_vm6, %v11550_v7, %v5616_v6  ;;  %14793 = vst [vmem:[#allocation50_spill] sm:$0xff] %v11973_v44 }
 0x82b   : > { %v5591_v40 = vpack.c.bf16 %v5579_v11, %v5575_v21  ;;  %v5594_v35 = vpack.c.bf16 %v5582_v48, %v5578_v31  ;;  %v5618_v54 = vpop.permute.xlu1 %5617  ;;  %5525 = vrot.lane.b32.xlu0 %v11370_v26, %s14556_s5  ;;  %14792 = vst [vmem:[#allocation52_spill] sm:$0xff] %v11970_v24  ;;  %v5678_v34 = vmul.f32 %v11944_v8, %v5647_v18  ;;  %v8414_v48 = vld [vmem:[%s14128_s1 + $0x5] ss:$8 sm:$0xf] }
 0x82c   : > { %v5644_v0 = vsel %vm610_vm6, %v5618_v54, %v11560_v25  ;;  %v5648_v60 = vsel %vm610_vm6, %v11552_v29, %v5618_v54  ;;  %v5679_v61 = vmul.f32 %v11947_v27, %v5643_v1 }
 0x82d   : > { %5599 = vst [vmem:[#allocation2 + $0xc0] sm:$0xff] %v5591_v40  ;;  %5602 = vst [vmem:[#allocation2 + $0xd8] sm:$0xff] %v5594_v35  ;;  %v5682_v21 = vmul.f32 %v11944_v8, %v5648_v60  ;;  %v5683_v31 = vmul.f32 %v11947_v27, %v5644_v0  ;;  %5511 = vrot.lane.b32.xlu1 %v11352_v59, %s14556_s5  ;;  %v5632_v11 = vpop.permute.xlu0 %5631  ;;  %v12002_v0 = vrot.slane %v8414_v48, %v8665_v2 }
 0x82e   : > { %v5639_v33 = vsel %vm610_vm6, %v11558_v42, %v5632_v11  ;;  %v5651_v6 = vsel %vm610_vm6, %v5632_v11, %v11550_v7  ;;  %v11999_v42 = vrot.slane %v8414_v48, %v8674_v5 }
 0x82f   : > { %v5694_v1 = vpack.c.bf16 %v5682_v21, %v5678_v34  ;;  %v5695_v18 = vpack.c.bf16 %v5683_v31, %v5679_v61  ;;  %v5634_v40 = vpop.permute.xlu1 %5633  ;;  %5611 = vrot.lane.b32.xlu0 %v11350_v52, %s14561_s7  ;;  %14795 = vst [vmem:[#allocation51_spill] sm:$0xff] %v12002_v0  ;;  %v5677_v7 = vmul.f32 %v11970_v24, %v5651_v6 }
 0x830   : > { %v5640_v35 = vsel %vm610_vm6, %v11560_v25, %v5634_v40  ;;  %v5652_v54 = vsel %vm610_vm6, %v5634_v40, %v11552_v29  ;;  %14794 = vst [vmem:[#allocation53_spill] sm:$0xff] %v11999_v42  ;;  %v5680_v60 = vmul.f32 %v11973_v44, %v5639_v33  ;;  %v12028_v40 = vrot.slane %v8414_v48, %v8671_v4 }
 0x831   : > { %5702 = vst [vmem:[#allocation2 + $0x108] sm:$0xff] %v5694_v1  ;;  %5703 = vst [vmem:[#allocation2 + $0x110] sm:$0xff] %v5695_v18  ;;  %v5681_v34 = vmul.f32 %v11970_v24, %v5652_v54  ;;  %v5684_v25 = vmul.f32 %v11973_v44, %v5640_v35  ;;  %5527 = vrot.lane.b32.xlu1 %v11372_v30, %s14556_s5  ;;  %v5718_v29 = vpop.permute.xlu0 %5717  ;;  %v12025_v18 = vrot.slane %v8414_v48, %v8668_v3 }
 0x832   : > { %v5745_v61 = vsel %vm658_vm5, %v5718_v29, %v11574_v63  ;;  %v5749_v21 = vsel %vm658_vm5, %v11566_v15, %v5718_v29  ;;  %14797 = vst [vmem:[#allocation54_spill] sm:$0xff] %v12028_v40 }
 0x833   : > { %v5693_v31 = vpack.c.bf16 %v5681_v34, %v5677_v7  ;;  %v5696_v11 = vpack.c.bf16 %v5684_v25, %v5680_v60  ;;  %v5720_v6 = vpop.permute.xlu1 %5719  ;;  %5627 = vrot.lane.b32.xlu0 %v11370_v26, %s14561_s7  ;;  %14796 = vst [vmem:[#allocation56_spill] sm:$0xff] %v12025_v18  ;;  %v5780_v35 = vmul.f32 %v11999_v42, %v5749_v21  ;;  %v8415_v25 = vld [vmem:[%s14128_s1 + $0x6] ss:$8 sm:$0xf] }
 0x834   : > { %v5746_v33 = vsel %vm658_vm5, %v5720_v6, %v11576_v46  ;;  %v5750_v1 = vsel %vm658_vm5, %v11568_v53, %v5720_v6  ;;  %v5781_v54 = vmul.f32 %v12002_v0, %v5745_v61 }
 0x835   : > { %5701 = vst [vmem:[#allocation2 + $0x100] sm:$0xff] %v5693_v31  ;;  %5704 = vst [vmem:[#allocation2 + $0x118] sm:$0xff] %v5696_v11  ;;  %v5784_v7 = vmul.f32 %v11999_v42, %v5750_v1  ;;  %v5785_v60 = vmul.f32 %v12002_v0, %v5746_v33  ;;  %5613 = vrot.lane.b32.xlu1 %v11352_v59, %s14561_s7  ;;  %v5734_v34 = vpop.permute.xlu0 %5733  ;;  %v12057_v33 = vrot.slane %v8415_v25, %v8665_v2 }
 0x836   : > { %v5741_v48 = vsel %vm658_vm5, %v11574_v63, %v5734_v34  ;;  %v5753_v29 = vsel %vm658_vm5, %v5734_v34, %v11566_v15  ;;  %v12054_v63 = vrot.slane %v8415_v25, %v8674_v5 }
 0x837   : > { %v5796_v61 = vpack.c.bf16 %v5784_v7, %v5780_v35  ;;  %v5797_v21 = vpack.c.bf16 %v5785_v60, %v5781_v54  ;;  %v5736_v31 = vpop.permute.xlu1 %5735  ;;  %5713 = vrot.lane.b32.xlu0 %v11350_v52, %s14529_s23  ;;  %14799 = vst [vmem:[#allocation55_spill] sm:$0xff] %v12057_v33  ;;  %v5779_v15 = vmul.f32 %v12025_v18, %v5753_v29 }
 0x838   : > { %v5742_v11 = vsel %vm658_vm5, %v11576_v46, %v5736_v31  ;;  %v5754_v6 = vsel %vm658_vm5, %v5736_v31, %v11568_v53  ;;  %14798 = vst [vmem:[#allocation57_spill] sm:$0xff] %v12054_v63  ;;  %v5782_v1 = vmul.f32 %v12028_v40, %v5741_v48  ;;  %v12083_v31 = vrot.slane %v8415_v25, %v8671_v4 }
 0x839   : > { %5804 = vst [vmem:[#allocation2 + $0x148] sm:$0xff] %v5796_v61  ;;  %5805 = vst [vmem:[#allocation2 + $0x150] sm:$0xff] %v5797_v21  ;;  %v5783_v35 = vmul.f32 %v12025_v18, %v5754_v6  ;;  %v5786_v46 = vmul.f32 %v12028_v40, %v5742_v11  ;;  %5629 = vrot.lane.b32.xlu1 %v11372_v30, %s14561_s7  ;;  %v5820_v53 = vpop.permute.xlu0 %5819  ;;  %v12080_v21 = vrot.slane %v8415_v25, %v8668_v3  ;;  %v14912_v18 = vld [vmem:[#allocation5_spill] sm:$0xff] }
 0x83a   : > { %v5847_v54 = vsel %vm718_vm8, %v5820_v53, %v11590_v57  ;;  %v5851_v7 = vsel %vm718_vm8, %v11582_v51, %v5820_v53  ;;  %14801 = vst [vmem:[#allocation58_spill] sm:$0xff] %v12083_v31 }
 0x83b   : > { %v5795_v60 = vpack.c.bf16 %v5783_v35, %v5779_v15  ;;  %v5798_v34 = vpack.c.bf16 %v5786_v46, %v5782_v1  ;;  %v5822_v29 = vpop.permute.xlu1 %5821  ;;  %5729 = vrot.lane.b32.xlu0 %v11370_v26, %s14529_s23  ;;  %14800 = vst [vmem:[#allocation60_spill] sm:$0xff] %v12080_v21  ;;  %v5882_v11 = vmul.f32 %v12054_v63, %v5851_v7  ;;  %v8416_v46 = vld [vmem:[%s14128_s1 + $0x7] ss:$8 sm:$0xf] }
 0x83c   : > { %v5848_v48 = vsel %vm718_vm8, %v5822_v29, %v11592_v43  ;;  %v5852_v61 = vsel %vm718_vm8, %v11584_v23, %v5822_v29  ;;  %v5883_v6 = vmul.f32 %v12057_v33, %v5847_v54 }
 0x83d   : > { %5803 = vst [vmem:[#allocation2 + $0x140] sm:$0xff] %v5795_v60  ;;  %5806 = vst [vmem:[#allocation2 + $0x158] sm:$0xff] %v5798_v34  ;;  %v5886_v15 = vmul.f32 %v12054_v63, %v5852_v61  ;;  %v5887_v1 = vmul.f32 %v12057_v33, %v5848_v48  ;;  %5715 = vrot.lane.b32.xlu1 %v11352_v59, %s14529_s23  ;;  %v5836_v35 = vpop.permute.xlu0 %5835  ;;  %v12112_v48 = vrot.slane %v8416_v46, %v8665_v2  ;;  %v8594_v63 = vmov 1983009808  }
 0x83e   : > { %v5843_v25 = vsel %vm718_vm8, %v11590_v57, %v5836_v35  ;;  %v5855_v53 = vsel %vm718_vm8, %v5836_v35, %v11582_v51  ;;  %v12109_v57 = vrot.slane %v8416_v46, %v8674_v5  ;;  %v7875_v40 = vunpack.c.l.s4 %v8594_v63  ;;  %v12687_v63 = vld [vmem:[%s14135_s8] sm:$0xff] }
 0x83f   : > { %v5898_v54 = vpack.c.bf16 %v5886_v15, %v5882_v11  ;;  %v5899_v7 = vpack.c.bf16 %v5887_v1, %v5883_v6  ;;  %v5838_v60 = vpop.permute.xlu1 %5837  ;;  %5815 = vrot.lane.b32.xlu0 %v11350_v52, %s14530_s16  ;;  %14803 = vst [vmem:[#allocation59_spill] sm:$0xff] %v12112_v48  ;;  %v5881_v51 = vmul.f32 %v12080_v21, %v5855_v53 }
 0x840   : > { %v5844_v34 = vsel %vm718_vm8, %v11592_v43, %v5838_v60  ;;  %v5856_v29 = vsel %vm718_vm8, %v5838_v60, %v11584_v23  ;;  %14802 = vst [vmem:[#allocation61_spill] sm:$0xff] %v12109_v57  ;;  %v5884_v61 = vmul.f32 %v12083_v31, %v5843_v25  ;;  %v12138_v60 = vrot.slane %v8416_v46, %v8671_v4 }
 0x841   : > { %5906 = vst [vmem:[#allocation2 + $0x188] sm:$0xff] %v5898_v54  ;;  %5907 = vst [vmem:[#allocation2 + $0x190] sm:$0xff] %v5899_v7  ;;  %v5885_v11 = vmul.f32 %v12080_v21, %v5856_v29  ;;  %v5888_v43 = vmul.f32 %v12083_v31, %v5844_v34  ;;  %5731 = vrot.lane.b32.xlu1 %v11372_v30, %s14529_s23  ;;  %v5922_v23 = vpop.permute.xlu0 %5921  ;;  %v12135_v7 = vrot.slane %v8416_v46, %v8668_v3 }
 0x842   : > { %v5949_v6 = vsel %vm766_vm7, %v5922_v23, %v11606_v37  ;;  %v5953_v15 = vsel %vm766_vm7, %v11598_v36, %v5922_v23  ;;  %14805 = vst [vmem:[#allocation62_spill] sm:$0xff] %v12138_v60 }
 0x843   : > { %v5897_v1 = vpack.c.bf16 %v5885_v11, %v5881_v51  ;;  %v5900_v35 = vpack.c.bf16 %v5888_v43, %v5884_v61  ;;  %v5924_v53 = vpop.permute.xlu1 %5923  ;;  %5831 = vrot.lane.b32.xlu0 %v11370_v26, %s14530_s16  ;;  %14804 = vst [vmem:[#allocation64_spill] sm:$0xff] %v12135_v7  ;;  %v5984_v34 = vmul.f32 %v12109_v57, %v5953_v15  ;;  %v8417_v43 = vld [vmem:[%s14128_s1 + $0x20] ss:$8 sm:$0xf] }
 0x844   : > { %v5950_v25 = vsel %vm766_vm7, %v5924_v53, %v11608_v45  ;;  %v5954_v54 = vsel %vm766_vm7, %v11600_v22, %v5924_v53  ;;  %v5985_v29 = vmul.f32 %v12112_v48, %v5949_v6 }
 0x845   : > { %5905 = vst [vmem:[#allocation2 + $0x180] sm:$0xff] %v5897_v1  ;;  %5908 = vst [vmem:[#allocation2 + $0x198] sm:$0xff] %v5900_v35  ;;  %v5988_v51 = vmul.f32 %v12109_v57, %v5954_v54  ;;  %v5989_v61 = vmul.f32 %v12112_v48, %v5950_v25  ;;  %5817 = vrot.lane.b32.xlu1 %v11352_v59, %s14530_s16  ;;  %v5938_v11 = vpop.permute.xlu0 %5937  ;;  %v12167_v25 = vrot.slane %v8417_v43, %v8665_v2 }
 0x846   : > { %v5945_v46 = vsel %vm766_vm7, %v11606_v37, %v5938_v11  ;;  %v5957_v23 = vsel %vm766_vm7, %v5938_v11, %v11598_v36  ;;  %v12164_v37 = vrot.slane %v8417_v43, %v8674_v5 }
 0x847   : > { %v6000_v6 = vpack.c.bf16 %v5988_v51, %v5984_v34  ;;  %v6001_v15 = vpack.c.bf16 %v5989_v61, %v5985_v29  ;;  %v5940_v1 = vpop.permute.xlu1 %5939  ;;  %5917 = vrot.lane.b32.xlu0 %v11350_v52, %s14531_s24  ;;  %14807 = vst [vmem:[#allocation63_spill] sm:$0xff] %v12167_v25  ;;  %v5983_v36 = vmul.f32 %v12135_v7, %v5957_v23 }
 0x848   : > { %v5946_v35 = vsel %vm766_vm7, %v11608_v45, %v5940_v1  ;;  %v5958_v53 = vsel %vm766_vm7, %v5940_v1, %v11600_v22  ;;  %14806 = vst [vmem:[#allocation65_spill] sm:$0xff] %v12164_v37  ;;  %v5986_v54 = vmul.f32 %v12138_v60, %v5945_v46  ;;  %v12190_v1 = vrot.slane %v8417_v43, %v8668_v3 }
 0x849   : > { %6008 = vst [vmem:[#allocation2 + $0x1c8] sm:$0xff] %v6000_v6  ;;  %6009 = vst [vmem:[#allocation2 + $0x1d0] sm:$0xff] %v6001_v15  ;;  %v5987_v34 = vmul.f32 %v12135_v7, %v5958_v53  ;;  %v5990_v45 = vmul.f32 %v12138_v60, %v5946_v35  ;;  %5833 = vrot.lane.b32.xlu1 %v11372_v30, %s14530_s16  ;;  %v6024_v22 = vpop.permute.xlu0 %6023  ;;  %v14808_v6 = vld [vmem:[#allocation28_spill] sm:$0xff]  ;;  %v12193_v35 = vrot.slane %v8417_v43, %v8671_v4 }
 0x84a   : > { %v6051_v29 = vsel %vm826_vm10, %v6024_v22, %v11622_v49  ;;  %v6055_v51 = vsel %vm826_vm10, %v11614_v38, %v6024_v22  ;;  %14809 = vst [vmem:[#allocation68_spill] sm:$0xff] %v12190_v1  ;;  %v8418_v22 = vld [vmem:[%s14128_s1 + $0x21] ss:$8 sm:$0xf] }
 0x84b   : > { %v5999_v61 = vpack.c.bf16 %v5987_v34, %v5983_v36  ;;  %v6002_v11 = vpack.c.bf16 %v5990_v45, %v5986_v54  ;;  %v6026_v23 = vpop.permute.xlu1 %6025  ;;  %5933 = vrot.lane.b32.xlu0 %v11370_v26, %s14531_s24  ;;  %14810 = vst [vmem:[#allocation66_spill] sm:$0xff] %v12193_v35  ;;  %v6086_v53 = vmul.f32 %v12164_v37, %v6055_v51 }
 0x84c   : > { %v6052_v46 = vsel %vm826_vm10, %v6026_v23, %v11624_v28  ;;  %v6056_v15 = vsel %vm826_vm10, %v14808_v6, %v6026_v23  ;;  %v6087_v36 = vmul.f32 %v12167_v25, %v6051_v29 }
 0x84d   : > { %6007 = vst [vmem:[#allocation2 + $0x1c0] sm:$0xff] %v5999_v61  ;;  %6010 = vst [vmem:[#allocation2 + $0x1d8] sm:$0xff] %v6002_v11  ;;  %v6090_v54 = vmul.f32 %v12164_v37, %v6056_v15  ;;  %v6091_v34 = vmul.f32 %v12167_v25, %v6052_v46  ;;  %5919 = vrot.lane.b32.xlu1 %v11352_v59, %s14531_s24  ;;  %v6040_v45 = vpop.permute.xlu0 %6039  ;;  %v12222_v15 = vrot.slane %v8418_v22, %v8665_v2 }
 0x84e   : > { %v6047_v43 = vsel %vm826_vm10, %v11622_v49, %v6040_v45  ;;  %v6059_v29 = vsel %vm826_vm10, %v6040_v45, %v11614_v38  ;;  %v12219_v49 = vrot.slane %v8418_v22, %v8674_v5  ;;  %v14814_v45 = vld [vmem:[#allocation32_spill] sm:$0xff]  ;;  %v12248_v25 = vrot.slane %v8418_v22, %v8671_v4 }
 0x84f   : > { %v6102_v51 = vpack.c.bf16 %v6090_v54, %v6086_v53  ;;  %v6103_v61 = vpack.c.bf16 %v6091_v34, %v6087_v36  ;;  %v6042_v11 = vpop.permute.xlu1 %6041  ;;  %6019 = vrot.lane.b32.xlu0 %v11350_v52, %s14532_s21  ;;  %14812 = vst [vmem:[#allocation67_spill] sm:$0xff] %v12222_v15  ;;  %v6085_v38 = vmul.f32 %v12190_v1, %v6059_v29  ;;  %v14813_v54 = vld [vmem:[#allocation31_spill] sm:$0xff] }
 0x850   : > { %v6048_v23 = vsel %vm826_vm10, %v11624_v28, %v6042_v11  ;;  %v6060_v46 = vsel %vm826_vm10, %v6042_v11, %v14808_v6  ;;  %14811 = vst [vmem:[#allocation69_spill] sm:$0xff] %v12219_v49  ;;  %v6088_v53 = vmul.f32 %v12193_v35, %v6047_v43  ;;  %v14815_v43 = vld [vmem:[#allocation30_spill] sm:$0xff]  ;;  %14818 = vst [vmem:[#allocation70_spill] sm:$0xff] %v12248_v25 }
 0x851   : > { %6110 = vst [vmem:[#allocation2 + $0x208] sm:$0xff] %v6102_v51  ;;  %6111 = vst [vmem:[#allocation2 + $0x210] sm:$0xff] %v6103_v61  ;;  %v6089_v36 = vmul.f32 %v12190_v1, %v6060_v46  ;;  %v6092_v28 = vmul.f32 %v12193_v35, %v6048_v23  ;;  %5935 = vrot.lane.b32.xlu1 %v11372_v30, %s14531_s24  ;;  %v6126_v6 = vpop.permute.xlu0 %6125  ;;  %v14816_v46 = vld [vmem:[#allocation33_spill] sm:$0xff]  ;;  %v12245_v1 = vrot.slane %v8418_v22, %v8668_v3 }
 0x852   : > { %v6153_v34 = vsel %vm874_vm9, %v6126_v6, %v14813_v54  ;;  %v6157_v51 = vsel %vm874_vm9, %v14814_v45, %v6126_v6 }
 0x853   : > { %v6101_v61 = vpack.c.bf16 %v6089_v36, %v6085_v38  ;;  %v6104_v29 = vpack.c.bf16 %v6092_v28, %v6088_v53  ;;  %v6128_v11 = vpop.permute.xlu1 %6127  ;;  %6035 = vrot.lane.b32.xlu0 %v11370_v26, %s14532_s21  ;;  %14817 = vst [vmem:[#allocation72_spill] sm:$0xff] %v12245_v1  ;;  %v6188_v38 = vmul.f32 %v12219_v49, %v6157_v51 }
 0x854   : > { %v6154_v23 = vsel %vm874_vm9, %v6128_v11, %v14815_v43  ;;  %v6158_v35 = vsel %vm874_vm9, %v14816_v46, %v6128_v11  ;;  %v6189_v53 = vmul.f32 %v12222_v15, %v6153_v34  ;;  %v8419_v11 = vld [vmem:[%s14128_s1 + $0x22] ss:$8 sm:$0xf] }
 0x855   : > { %6109 = vst [vmem:[#allocation2 + $0x200] sm:$0xff] %v6101_v61  ;;  %6112 = vst [vmem:[#allocation2 + $0x218] sm:$0xff] %v6104_v29  ;;  %v6192_v36 = vmul.f32 %v12219_v49, %v6158_v35  ;;  %v6193_v28 = vmul.f32 %v12222_v15, %v6154_v23  ;;  %6021 = vrot.lane.b32.xlu1 %v11352_v59, %s14532_s21  ;;  %v6142_v6 = vpop.permute.xlu0 %6141  ;;  %v12277_v15 = vrot.slane %v8419_v11, %v8665_v2 }
 0x856   : > { %v6149_v22 = vsel %vm874_vm9, %v14813_v54, %v6142_v6  ;;  %v6161_v34 = vsel %vm874_vm9, %v6142_v6, %v14814_v45  ;;  %v12274_v54 = vrot.slane %v8419_v11, %v8674_v5  ;;  %v14823_v6 = vld [vmem:[#allocation14_spill] sm:$0xff]  ;;  %v12303_v49 = vrot.slane %v8419_v11, %v8671_v4 }
 0x857   : > { %v6204_v51 = vpack.c.bf16 %v6192_v36, %v6188_v38  ;;  %v6205_v35 = vpack.c.bf16 %v6193_v28, %v6189_v53  ;;  %v6144_v61 = vpop.permute.xlu1 %6143  ;;  %6121 = vrot.lane.b32.xlu0 %v11350_v52, %s14533_s22  ;;  %14820 = vst [vmem:[#allocation71_spill] sm:$0xff] %v12277_v15  ;;  %v6187_v45 = vmul.f32 %v12245_v1, %v6161_v34  ;;  %v14821_v36 = vld [vmem:[#allocation16_spill] sm:$0xff] }
 0x858   : > { %v6150_v29 = vsel %vm874_vm9, %v14815_v43, %v6144_v61  ;;  %v6162_v23 = vsel %vm874_vm9, %v6144_v61, %v14816_v46  ;;  %14819 = vst [vmem:[#allocation73_spill] sm:$0xff] %v12274_v54  ;;  %v6190_v38 = vmul.f32 %v12248_v25, %v6149_v22  ;;  %v14825_v22 = vld [vmem:[#allocation17_spill] sm:$0xff]  ;;  %14830 = vst [vmem:[#allocation74_spill] sm:$0xff] %v12303_v49 }
 0x859   : > { %6212 = vst [vmem:[#allocation2 + $0x248] sm:$0xff] %v6204_v51  ;;  %6213 = vst [vmem:[#allocation2 + $0x250] sm:$0xff] %v6205_v35  ;;  %v6191_v53 = vmul.f32 %v12245_v1, %v6162_v23  ;;  %v6194_v43 = vmul.f32 %v12248_v25, %v6150_v29  ;;  %6037 = vrot.lane.b32.xlu1 %v11372_v30, %s14532_s21  ;;  %v6228_v46 = vpop.permute.xlu0 %6227  ;;  %v14827_v23 = vld [vmem:[#allocation15_spill] sm:$0xff]  ;;  %v12300_v1 = vrot.slane %v8419_v11, %v8668_v3 }
 0x85a   : > { %v6255_v28 = vsel %vm14822_vm12, %v6228_v46, %v14821_v36  ;;  %v6259_v51 = vsel %vm14824_vm0, %v14823_v6, %v6228_v46  ;;  %vm14832_vm12 = vmmov %vm14824_vm0 }
 0x85b   : > { %v6203_v35 = vpack.c.bf16 %v6191_v53, %v6187_v45  ;;  %v6206_v34 = vpack.c.bf16 %v6194_v43, %v6190_v38  ;;  %v6230_v61 = vpop.permute.xlu1 %6229  ;;  %6137 = vrot.lane.b32.xlu0 %v11370_v26, %s14533_s22  ;;  %14829 = vst [vmem:[#allocation76_spill] sm:$0xff] %v12300_v1  ;;  %v6290_v45 = vmul.f32 %v12274_v54, %v6259_v51 }
 0x85c   : > { %v6256_v29 = vsel %vm14826_vm14, %v6230_v61, %v14825_v22  ;;  %v6260_v25 = vsel %vm14828_vm11, %v14827_v23, %v6230_v61  ;;  %v6291_v38 = vmul.f32 %v12277_v15, %v6255_v28  ;;  %v8420_v61 = vld [vmem:[%s14128_s1 + $0x23] ss:$8 sm:$0xf]  ;;  %vm14833_vm14 = vmmov %vm14824_vm0  ;;  %vm14837_vm11 = vcmp.lt.s32.totalorder %v8816_v19, 1 }
 0x85d   : > { %6211 = vst [vmem:[#allocation2 + $0x240] sm:$0xff] %v6203_v35  ;;  %6214 = vst [vmem:[#allocation2 + $0x258] sm:$0xff] %v6206_v34  ;;  %v6294_v53 = vmul.f32 %v12274_v54, %v6260_v25  ;;  %v6295_v43 = vmul.f32 %v12277_v15, %v6256_v29  ;;  %6123 = vrot.lane.b32.xlu1 %v11352_v59, %s14533_s22  ;;  %v6244_v46 = vpop.permute.xlu0 %6243  ;;  %v12332_v15 = vrot.slane %v8420_v61, %v8665_v2 }
 0x85e   : > { %v6251_v11 = vsel %vm14831_vm13, %v14821_v36, %v6244_v46  ;;  %v6263_v28 = vsel %vm14832_vm12, %v6244_v46, %v14823_v6  ;;  %v12329_v36 = vrot.slane %v8420_v61, %v8674_v5  ;;  %v14838_v46 = vld [vmem:[#allocation36_spill] sm:$0xff]  ;;  %vm14839_vm13 = vmmov %vm14837_vm11  ;;  %v12358_v54 = vrot.slane %v8420_v61, %v8671_v4 }
 0x85f   : > { %v6306_v51 = vpack.c.bf16 %v6294_v53, %v6290_v45  ;;  %v6307_v25 = vpack.c.bf16 %v6295_v43, %v6291_v38  ;;  %v6246_v35 = vpop.permute.xlu1 %6245  ;;  %6223 = vrot.lane.b32.xlu0 %v11350_v52, %s14534_s19  ;;  %14835 = vst [vmem:[#allocation75_spill] sm:$0xff] %v12332_v15  ;;  %v6289_v6 = vmul.f32 %v12300_v1, %v6263_v28  ;;  %v14836_v53 = vld [vmem:[#allocation37_spill] sm:$0xff]  ;;  %vm14841_vm12 = vmmov %vm14837_vm11 }
 0x860   : > { %v6252_v34 = vsel %vm14824_vm0, %v14825_v22, %v6246_v35  ;;  %v6264_v29 = vsel %vm14833_vm14, %v6246_v35, %v14827_v23  ;;  %14834 = vst [vmem:[#allocation77_spill] sm:$0xff] %v12329_v36  ;;  %v6292_v45 = vmul.f32 %v12303_v49, %v6251_v11  ;;  %v14840_v11 = vld [vmem:[#allocation35_spill] sm:$0xff]  ;;  %vm14843_vm0 = vmmov %vm14837_vm11 }
 0x861   : > { %6314 = vst [vmem:[#allocation2 + $0x288] sm:$0xff] %v6306_v51  ;;  %6315 = vst [vmem:[#allocation2 + $0x290] sm:$0xff] %v6307_v25  ;;  %v6293_v38 = vmul.f32 %v12300_v1, %v6264_v29  ;;  %v6296_v22 = vmul.f32 %v12303_v49, %v6252_v34  ;;  %6139 = vrot.lane.b32.xlu1 %v11372_v30, %s14533_s22  ;;  %v6330_v23 = vpop.permute.xlu0 %6329  ;;  %v14842_v29 = vld [vmem:[#allocation34_spill] sm:$0xff]  ;;  %v12355_v1 = vrot.slane %v8420_v61, %v8668_v3 }
 0x862   : > { %v6357_v43 = vsel %vm14837_vm11, %v6330_v23, %v14836_v53  ;;  %v6361_v51 = vsel %vm14839_vm13, %v14838_v46, %v6330_v23  ;;  %14845 = vst [vmem:[#allocation11_spill] sm:$0xff] %v12358_v54  ;;  %vm14846_vm14 = vmmov %vm14843_vm0 }
 0x863   : > { %v6305_v25 = vpack.c.bf16 %v6293_v38, %v6289_v6  ;;  %v6308_v28 = vpack.c.bf16 %v6296_v22, %v6292_v45  ;;  %v6332_v35 = vpop.permute.xlu1 %6331  ;;  %6239 = vrot.lane.b32.xlu0 %v11370_v26, %s14534_s19  ;;  %14844 = vst [vmem:[#allocation10_spill] sm:$0xff] %v12355_v1  ;;  %v6392_v6 = vmul.f32 %v12329_v36, %v6361_v51  ;;  %vm14847_vm11 = vmmov %vm14843_vm0 }
 0x864   : > { %v6358_v34 = vsel %vm14841_vm12, %v6332_v35, %v14840_v11  ;;  %v6362_v49 = vsel %vm14843_vm0, %v14842_v29, %v6332_v35  ;;  %v6393_v45 = vmul.f32 %v12332_v15, %v6357_v43  ;;  %v8421_v35 = vld [vmem:[%s14128_s1 + $0x25] ss:$8 sm:$0xf]  ;;  %vm14848_vm13 = vmmov %vm14843_vm0 }
 0x865   : > { %6313 = vst [vmem:[#allocation2 + $0x280] sm:$0xff] %v6305_v25  ;;  %6316 = vst [vmem:[#allocation2 + $0x298] sm:$0xff] %v6308_v28  ;;  %v6396_v38 = vmul.f32 %v12329_v36, %v6362_v49  ;;  %v6397_v22 = vmul.f32 %v12332_v15, %v6358_v34  ;;  %6225 = vrot.lane.b32.xlu1 %v11352_v59, %s14534_s19  ;;  %v6346_v23 = vpop.permute.xlu0 %6345  ;;  %v12387_v15 = vrot.slane %v8421_v35, %v8674_v5 }
 0x866   : > { %v6353_v61 = vsel %vm14846_vm14, %v14836_v53, %v6346_v23  ;;  %v6365_v43 = vsel %vm14847_vm11, %v6346_v23, %v14838_v46  ;;  %vm14849_vm12 = vmmov %vm14843_vm0  ;;  %v12384_v53 = vrot.slane %v8421_v35, %v8668_v3  ;;  %vm14853_vm0 = vcmp.lt.s32.totalorder %v8816_v19, 127  ;;  %v14854_v23 = vld [vmem:[#allocation40_spill] sm:$0xff] }
 0x867   : > { %v6408_v51 = vpack.c.bf16 %v6396_v38, %v6392_v6  ;;  %v6409_v49 = vpack.c.bf16 %v6397_v22, %v6393_v45  ;;  %v6348_v25 = vpop.permute.xlu1 %6347  ;;  %6325 = vrot.lane.b32.xlu0 %v11350_v52, %s14535_s20  ;;  %14851 = vst [vmem:[#allocation13_spill] sm:$0xff] %v12387_v15  ;;  %v6391_v46 = vmul.f32 %v12355_v1, %v6365_v43  ;;  %v14852_v38 = vld [vmem:[#allocation41_spill] sm:$0xff]  ;;  %vm14855_vm14 = vmmov %vm14853_vm0 }
 0x868   : > { %v6354_v28 = vsel %vm14848_vm13, %v14840_v11, %v6348_v25  ;;  %v6366_v34 = vsel %vm14849_vm12, %v6348_v25, %v14842_v29  ;;  %14850 = vst [vmem:[#allocation12_spill] sm:$0xff] %v12384_v53  ;;  %v6394_v6 = vmul.f32 %v12358_v54, %v6353_v61  ;;  %v14856_v61 = vld [vmem:[#allocation39_spill] sm:$0xff]  ;;  %vm14857_vm11 = vmmov %vm14853_vm0  ;;  %v12413_v36 = vrot.slane %v8421_v35, %v8671_v4 }
 0x869   : > { %6416 = vst [vmem:[#allocation2 + $0x2c8] sm:$0xff] %v6408_v51  ;;  %6417 = vst [vmem:[#allocation2 + $0x2d0] sm:$0xff] %v6409_v49  ;;  %v6395_v45 = vmul.f32 %v12355_v1, %v6366_v34  ;;  %v6398_v11 = vmul.f32 %v12358_v54, %v6354_v28  ;;  %6241 = vrot.lane.b32.xlu1 %v11372_v30, %s14534_s19  ;;  %v6448_v29 = vpop.permute.xlu0 %6447  ;;  %v14858_v34 = vld [vmem:[#allocation38_spill] sm:$0xff]  ;;  %v12410_v1 = vrot.slane %v8421_v35, %v8665_v2 }
 0x86a   : > { %v6475_v22 = vsel %vm14853_vm0, %v6448_v29, %v14852_v38  ;;  %v6479_v51 = vsel %vm14855_vm14, %v14854_v23, %v6448_v29  ;;  %vm14859_vm13 = vmmov %vm14853_vm0  ;;  %14861 = vst [vmem:[#allocation31_spill] sm:$0xff] %v12413_v36 }
 0x86b   : > { %v6407_v49 = vpack.c.bf16 %v6395_v45, %v6391_v46  ;;  %v6410_v43 = vpack.c.bf16 %v6398_v11, %v6394_v6  ;;  %v6450_v25 = vpop.permute.xlu1 %6449  ;;  %6341 = vrot.lane.b32.xlu0 %v11370_v26, %s14535_s20  ;;  %14860 = vst [vmem:[#allocation28_spill] sm:$0xff] %v12410_v1  ;;  %v6509_v46 = vmul.f32 %v12384_v53, %v6479_v51  ;;  %vm14862_vm12 = vmmov %vm14853_vm0 }
 0x86c   : > { %v6476_v28 = vsel %vm14857_vm11, %v6450_v25, %v14856_v61  ;;  %v6480_v54 = vsel %vm14859_vm13, %v14858_v34, %v6450_v25  ;;  %v6510_v6 = vmul.f32 %v12387_v15, %v6475_v22  ;;  %v8422_v25 = vld [vmem:[%s14128_s1 + $0x26] ss:$8 sm:$0xf]  ;;  %vm14863_vm14 = vmmov %vm14853_vm0  ;;  %vm14868_vm13 = vcmp.lt.s32.totalorder %v8816_v19, 126 }
 0x86d   : > { %6415 = vst [vmem:[#allocation2 + $0x2c0] sm:$0xff] %v6407_v49  ;;  %6418 = vst [vmem:[#allocation2 + $0x2d8] sm:$0xff] %v6410_v43  ;;  %v6513_v45 = vmul.f32 %v12384_v53, %v6480_v54  ;;  %v6514_v11 = vmul.f32 %v12387_v15, %v6476_v28  ;;  %6327 = vrot.lane.b32.xlu1 %v11352_v59, %s14535_s20  ;;  %v6464_v29 = vpop.permute.xlu0 %6463  ;;  %v12442_v15 = vrot.slane %v8422_v25, %v8674_v5 }
 0x86e   : > { %v6471_v35 = vsel %vm14862_vm12, %v14852_v38, %v6464_v29  ;;  %v6483_v22 = vsel %vm14853_vm0, %v6464_v29, %v14854_v23  ;;  %vm14864_vm11 = vmmov %vm14853_vm0  ;;  %v12439_v38 = vrot.slane %v8422_v25, %v8668_v3  ;;  %v14869_v29 = vld [vmem:[#allocation44_spill] sm:$0xff]  ;;  %v12468_v53 = vrot.slane %v8422_v25, %v8671_v4 }
 0x86f   : > { %v6525_v51 = vpack.c.bf16 %v6513_v45, %v6509_v46  ;;  %v6526_v54 = vpack.c.bf16 %v6514_v11, %v6510_v6  ;;  %v6466_v49 = vpop.permute.xlu1 %6465  ;;  %6443 = vrot.lane.b32.xlu0 %v11350_v52, %s14536_s0  ;;  %14866 = vst [vmem:[#allocation30_spill] sm:$0xff] %v12442_v15  ;;  %v6511_v23 = vmul.f32 %v12410_v1, %v6471_v35  ;;  %v14867_v45 = vld [vmem:[#allocation45_spill] sm:$0xff]  ;;  %vm14870_vm12 = vmmov %vm14868_vm13 }
 0x870   : > { %v6472_v43 = vsel %vm14863_vm14, %v14856_v61, %v6466_v49  ;;  %v6484_v28 = vsel %vm14864_vm11, %v6466_v49, %v14858_v34  ;;  %14865 = vst [vmem:[#allocation32_spill] sm:$0xff] %v12439_v38  ;;  %v6512_v46 = vmul.f32 %v12413_v36, %v6483_v22  ;;  %v14871_v22 = vld [vmem:[#allocation43_spill] sm:$0xff]  ;;  %vm14872_vm0 = vmmov %vm14870_vm12 }
 0x871   : > { %6533 = vst [vmem:[#allocation2 + $0x340] sm:$0xff] %v6525_v51  ;;  %6534 = vst [vmem:[#allocation2 + $0x348] sm:$0xff] %v6526_v54  ;;  %v6515_v6 = vmul.f32 %v12410_v1, %v6472_v43  ;;  %v6516_v61 = vmul.f32 %v12413_v36, %v6484_v28  ;;  %6343 = vrot.lane.b32.xlu1 %v11372_v30, %s14535_s20  ;;  %v6550_v34 = vpop.permute.xlu0 %6549  ;;  %v14873_v28 = vld [vmem:[#allocation42_spill] sm:$0xff]  ;;  %v12465_v1 = vrot.slane %v8422_v25, %v8665_v2 }
 0x872   : > { %v6577_v11 = vsel %vm14868_vm13, %v6550_v34, %v14867_v45  ;;  %v6581_v51 = vsel %vm14870_vm12, %v14869_v29, %v6550_v34  ;;  %vm14874_vm14 = vmmov %vm14872_vm0  ;;  %14876 = vst [vmem:[#allocation16_spill] sm:$0xff] %v12468_v53 }
 0x873   : > { %v6527_v54 = vpack.c.bf16 %v6515_v6, %v6511_v23  ;;  %v6528_v35 = vpack.c.bf16 %v6516_v61, %v6512_v46  ;;  %v6552_v49 = vpop.permute.xlu1 %6551  ;;  %6459 = vrot.lane.b32.xlu0 %v11370_v26, %s14536_s0  ;;  %14875 = vst [vmem:[#allocation33_spill] sm:$0xff] %v12465_v1  ;;  %v6611_v23 = vmul.f32 %v12439_v38, %v6581_v51  ;;  %vm14877_vm11 = vmmov %vm14872_vm0 }
 0x874   : > { %v6578_v43 = vsel %vm14872_vm0, %v6552_v49, %v14871_v22  ;;  %v6582_v36 = vsel %vm14874_vm14, %v14873_v28, %v6552_v49  ;;  %v6612_v46 = vmul.f32 %v12442_v15, %v6577_v11  ;;  %v8423_v49 = vld [vmem:[%s14128_s1 + $0x27] ss:$8 sm:$0xf]  ;;  %vm14878_vm13 = vmmov %vm14872_vm0  ;;  %vm14883_vm14 = vcmp.lt.s32.totalorder %v8816_v19, 114 }
 0x875   : > { %6535 = vst [vmem:[#allocation2 + $0x350] sm:$0xff] %v6527_v54  ;;  %6536 = vst [vmem:[#allocation2 + $0x358] sm:$0xff] %v6528_v35  ;;  %v6615_v6 = vmul.f32 %v12439_v38, %v6582_v36  ;;  %v6616_v61 = vmul.f32 %v12442_v15, %v6578_v43  ;;  %6445 = vrot.lane.b32.xlu1 %v11352_v59, %s14536_s0  ;;  %v6566_v34 = vpop.permute.xlu0 %6565  ;;  %v12497_v15 = vrot.slane %v8423_v49, %v8674_v5 }
 0x876   : > { %v6573_v25 = vsel %vm14877_vm11, %v14867_v45, %v6566_v34  ;;  %v6585_v11 = vsel %vm14878_vm13, %v6566_v34, %v14869_v29  ;;  %vm14879_vm12 = vmmov %vm14872_vm0  ;;  %v12494_v45 = vrot.slane %v8423_v49, %v8668_v3  ;;  %v14884_v34 = vld [vmem:[#allocation48_spill] sm:$0xff]  ;;  %v12520_v3 = vrot.slane %v8423_v49, %v8665_v2 }
 0x877   : > { %v6627_v51 = vpack.c.bf16 %v6615_v6, %v6611_v23  ;;  %v6628_v36 = vpack.c.bf16 %v6616_v61, %v6612_v46  ;;  %v6568_v54 = vpop.permute.xlu1 %6567  ;;  %6545 = vrot.lane.b32.xlu0 %v11350_v52, %s14479_s12  ;;  %14881 = vst [vmem:[#allocation17_spill] sm:$0xff] %v12497_v15  ;;  %v6613_v29 = vmul.f32 %v12465_v1, %v6573_v25  ;;  %v14882_v6 = vld [vmem:[#allocation49_spill] sm:$0xff]  ;;  %vm14885_vm11 = vmmov %vm14883_vm14 }
 0x878   : > { %v6574_v35 = vsel %vm14879_vm12, %v14871_v22, %v6568_v54  ;;  %v6586_v43 = vsel %vm14872_vm0, %v6568_v54, %v14873_v28  ;;  %14880 = vst [vmem:[#allocation14_spill] sm:$0xff] %v12494_v45  ;;  %v6614_v23 = vmul.f32 %v12468_v53, %v6585_v11  ;;  %v14886_v11 = vld [vmem:[#allocation47_spill] sm:$0xff]  ;;  %vm14887_vm13 = vmmov %vm14885_vm11 }
 0x879   : > { %6635 = vst [vmem:[#allocation2 + $0x380] sm:$0xff] %v6627_v51  ;;  %6636 = vst [vmem:[#allocation2 + $0x388] sm:$0xff] %v6628_v36  ;;  %v6617_v46 = vmul.f32 %v12465_v1, %v6574_v35  ;;  %v6618_v22 = vmul.f32 %v12468_v53, %v6586_v43  ;;  %6461 = vrot.lane.b32.xlu1 %v11372_v30, %s14536_s0  ;;  %v6652_v28 = vpop.permute.xlu0 %6651  ;;  %v14888_v43 = vld [vmem:[#allocation46_spill] sm:$0xff]  ;;  %v12523_v53 = vrot.slane %v8423_v49, %v8671_v4 }
 0x87a   : > { %v6679_v61 = vsel %vm14883_vm14, %v6652_v28, %v14882_v6  ;;  %v6683_v51 = vsel %vm14885_vm11, %v14884_v34, %v6652_v28  ;;  %vm14889_vm12 = vmmov %vm14885_vm11  ;;  %14890 = vst [vmem:[#allocation15_spill] sm:$0xff] %v12520_v3 }
 0x87b   : > { %v6629_v36 = vpack.c.bf16 %v6617_v46, %v6613_v29  ;;  %v6630_v25 = vpack.c.bf16 %v6618_v22, %v6614_v23  ;;  %v6654_v54 = vpop.permute.xlu1 %6653  ;;  %6561 = vrot.lane.b32.xlu0 %v11370_v26, %s14479_s12  ;;  %14891 = vst [vmem:[#allocation37_spill] sm:$0xff] %v12523_v53  ;;  %v6713_v29 = vmul.f32 %v12494_v45, %v6683_v51  ;;  %vm14892_vm0 = vmmov %vm14885_vm11 }
 0x87c   : > { %v6680_v35 = vsel %vm14887_vm13, %v6654_v54, %v14886_v11  ;;  %v6684_v5 = vsel %vm14889_vm12, %v14888_v43, %v6654_v54  ;;  %v6714_v23 = vmul.f32 %v12497_v15, %v6679_v61  ;;  %vm14893_vm14 = vmmov %vm14892_vm0  ;;  %14915 = vst [vmem:[#allocation46_spill] sm:$0xff] %v12687_v63 }
 0x87d   : > { %6637 = vst [vmem:[#allocation2 + $0x390] sm:$0xff] %v6629_v36  ;;  %6638 = vst [vmem:[#allocation2 + $0x398] sm:$0xff] %v6630_v25  ;;  %v6717_v46 = vmul.f32 %v12494_v45, %v6684_v5  ;;  %v6718_v22 = vmul.f32 %v12497_v15, %v6680_v35  ;;  %6547 = vrot.lane.b32.xlu1 %v11352_v59, %s14479_s12  ;;  %v6668_v28 = vpop.permute.xlu0 %6667 }
 0x87e   : > { %v6675_v54 = vsel %vm14892_vm0, %v14882_v6, %v6668_v28  ;;  %v6687_v49 = vsel %vm14893_vm14, %v6668_v28, %v14884_v34  ;;  %vm14894_vm11 = vmmov %vm14892_vm0 }
 0x87f   : > { %v6729_v36 = vpack.c.bf16 %v6717_v46, %v6713_v29  ;;  %v6730_v51 = vpack.c.bf16 %v6718_v22, %v6714_v23  ;;  %v6670_v25 = vpop.permute.xlu1 %6669  ;;  %6647 = vrot.lane.b32.xlu0 %v11350_v52, %s14482_s15  ;;  %vm14895_vm13 = vmmov %vm14892_vm0  ;;  %v6715_v6 = vmul.f32 %v12520_v3, %v6675_v54  ;;  %v6716_v34 = vmul.f32 %v12523_v53, %v6687_v49  ;;  %v14897_v54 = vld [vmem:[#allocation24_spill] sm:$0xff] }
 0x880   : > { %v6676_v5 = vsel %vm14894_vm11, %v14886_v11, %v6670_v25  ;;  %v6688_v61 = vsel %vm14895_vm13, %v6670_v25, %v14888_v43  ;;  %v14899_v25 = vld [vmem:[#allocation26_spill] sm:$0xff]  ;;  %vm15027_vm13 = vcmp.lt.s32.totalorder %v8816_v19, 127 }
 0x881   : > { %6737 = vst [vmem:[#allocation2 + $0x3c0] sm:$0xff] %v6729_v36  ;;  %6738 = vst [vmem:[#allocation2 + $0x3c8] sm:$0xff] %v6730_v51  ;;  %v6719_v35 = vmul.f32 %v12520_v3, %v6676_v5  ;;  %v6720_v29 = vmul.f32 %v12523_v53, %v6688_v61  ;;  %6563 = vrot.lane.b32.xlu1 %v11372_v30, %s14479_s12  ;;  %v12551_v23 = vpop.permute.xlu0 %5203  ;;  %v14898_v51 = vld [vmem:[#allocation27_spill] sm:$0xff] }
 0x883   : > { %v6731_v11 = vpack.c.bf16 %v6719_v35, %v6715_v6  ;;  %v6732_v46 = vpack.c.bf16 %v6720_v29, %v6716_v34  ;;  %v12553_v22 = vpop.permute.xlu1 %6747  ;;  %6663 = vrot.lane.b32.xlu0 %v11370_v26, %s14482_s15  ;;  %v14900_v6 = vld [vmem:[#allocation29_spill] sm:$0xff] }
 0x884   : > { %14896 = vst [vmem:[#allocation36_spill] sm:$0xff] %v12553_v22 }
 0x885   : > { %6739 = vst [vmem:[#allocation2 + $0x3d0] sm:$0xff] %v6731_v11  ;;  %6740 = vst [vmem:[#allocation2 + $0x3d8] sm:$0xff] %v6732_v46  ;;  %6649 = vrot.lane.b32.xlu1 %v11352_v59, %s14482_s15  ;;  %v12559_v43 = vpop.permute.xlu0 %5219 }
 0x887   : > { %v12561_v28 = vpop.permute.xlu1 %5205  ;;  %5211 = vrot.lane.b32.xlu0 %v14897_v54, %s14541_s2 }
 0x889   : > { %6665 = vrot.lane.b32.xlu1 %v11372_v30, %s14482_s15  ;;  %v12567_v49 = vpop.permute.xlu0 %5305 }
 0x88b   : > { %v12569_v36 = vpop.permute.xlu1 %5221  ;;  %5227 = vrot.lane.b32.xlu0 %v14898_v51, %s14541_s2 }
 0x88d   : > { %5213 = vrot.lane.b32.xlu1 %v14899_v25, %s14541_s2  ;;  %v12575_v5 = vpop.permute.xlu0 %5321 }
 0x88f   : > { %v12577_v61 = vpop.permute.xlu1 %5307  ;;  %5313 = vrot.lane.b32.xlu0 %v14897_v54, %s14546_s3 }
 0x891   : > { %5229 = vrot.lane.b32.xlu1 %v14900_v6, %s14541_s2  ;;  %v12583_v34 = vpop.permute.xlu0 %5407  ;;  %s8437_s2 = sshll.u32 %s15213_s13, 4 }
 0x893   : > { %v12585_v35 = vpop.permute.xlu1 %5323  ;;  %5329 = vrot.lane.b32.xlu0 %v14898_v51, %s14546_s3 }
 0x895   : > { %5315 = vrot.lane.b32.xlu1 %v14899_v25, %s14546_s3  ;;  %v12591_v29 = vpop.permute.xlu0 %5423 }
 0x897   : > { %v12593_v11 = vpop.permute.xlu1 %5409  ;;  %5415 = vrot.lane.b32.xlu0 %v14897_v54, %s14551_s4 }
 0x899   : > { %5331 = vrot.lane.b32.xlu1 %v14900_v6, %s14546_s3  ;;  %v12599_v46 = vpop.permute.xlu0 %5509 }
 0x89b   : > { %v12601_v4 = vpop.permute.xlu1 %5425  ;;  %5431 = vrot.lane.b32.xlu0 %v14898_v51, %s14551_s4 }
 0x89d   : > { %5417 = vrot.lane.b32.xlu1 %v14899_v25, %s14551_s4  ;;  %v12607_v2 = vpop.permute.xlu0 %5525 }
 0x89f   : > { %v12609_v22 = vpop.permute.xlu1 %5511  ;;  %5517 = vrot.lane.b32.xlu0 %v14897_v54, %s14556_s5 }
 0x8a1   : > { %5433 = vrot.lane.b32.xlu1 %v14900_v6, %s14551_s4  ;;  %v12615_v53 = vpop.permute.xlu0 %5611  ;;  %s15214_s4 = sld [smem:[#allocation109_spill]] }
 0x8a3   : > { %v12617_v3 = vpop.permute.xlu1 %5527  ;;  %5533 = vrot.lane.b32.xlu0 %v14898_v51, %s14556_s5 }
 0x8a5   : > { %5519 = vrot.lane.b32.xlu1 %v14899_v25, %s14556_s5  ;;  %v12623_v15 = vpop.permute.xlu0 %5627 }
 0x8a7   : > { %v12625_v45 = vpop.permute.xlu1 %5613  ;;  %5619 = vrot.lane.b32.xlu0 %v14897_v54, %s14561_s7 }
 0x8a9   : > { %5535 = vrot.lane.b32.xlu1 %v14900_v6, %s14556_s5  ;;  %v12631_v1 = vpop.permute.xlu0 %5713  ;;  %s356_s5 = scalar_lea.vmem %s15214_s4, %s8437_s2 }
 0x8aa   : > { %14901 = vst [vmem:[#allocation35_spill] sm:$0xff] %v12631_v1 }
 0x8ab   : > { %v12633_v38 = vpop.permute.xlu1 %5629  ;;  %5635 = vrot.lane.b32.xlu0 %v14898_v51, %s14561_s7 }
 0x8ad   : > { %5621 = vrot.lane.b32.xlu1 %v14899_v25, %s14561_s7  ;;  %v12639_v37 = vpop.permute.xlu0 %5729 }
 0x8ae   : > { %14902 = vst [vmem:[#allocation34_spill] sm:$0xff] %v12639_v37 }
 0x8af   : > { %v12641_v60 = vpop.permute.xlu1 %5715  ;;  %5721 = vrot.lane.b32.xlu0 %v14897_v54, %s14529_s23 }
 0x8b0   : > { %14903 = vst [vmem:[#allocation41_spill] sm:$0xff] %v12641_v60 }
 0x8b1   : > { %5637 = vrot.lane.b32.xlu1 %v14900_v6, %s14561_s7  ;;  %v12647_v7 = vpop.permute.xlu0 %5815 }
 0x8b2   : > { %14904 = vst [vmem:[#allocation40_spill] sm:$0xff] %v12647_v7 }
 0x8b3   : > { %v12649_v48 = vpop.permute.xlu1 %5731  ;;  %5737 = vrot.lane.b32.xlu0 %v14898_v51, %s14529_s23 }
 0x8b4   : > { %14905 = vst [vmem:[#allocation39_spill] sm:$0xff] %v12649_v48 }
 0x8b5   : > { %5723 = vrot.lane.b32.xlu1 %v14899_v25, %s14529_s23  ;;  %v12655_v57 = vpop.permute.xlu0 %5831 }
 0x8b6   : > { %14906 = vst [vmem:[#allocation38_spill] sm:$0xff] %v12655_v57 }
 0x8b7   : > { %v12657_v31 = vpop.permute.xlu1 %5817  ;;  %5823 = vrot.lane.b32.xlu0 %v14897_v54, %s14530_s16 }
 0x8b8   : > { %14907 = vst [vmem:[#allocation45_spill] sm:$0xff] %v12657_v31  ;;  %v7876_v31 = vunpack.c.0.s8 %v7875_v40 }
 0x8b9   : > { %5739 = vrot.lane.b32.xlu1 %v14900_v6, %s14529_s23  ;;  %v12663_v21 = vpop.permute.xlu0 %5917  ;;  %s15167_s23 = sld [smem:[#allocation108_spill]] }
 0x8ba   : > { %14908 = vst [vmem:[#allocation44_spill] sm:$0xff] %v12663_v21  ;;  %v12678_v21 = vsub.s32 %v7876_v31, %v14912_v18 }
 0x8bb   : > { %v12665_v33 = vpop.permute.xlu1 %5833  ;;  %5839 = vrot.lane.b32.xlu0 %v14898_v51, %s14530_s16 }
 0x8bc   : > { %14909 = vst [vmem:[#allocation43_spill] sm:$0xff] %v12665_v33  ;;  %14913 = vst [vmem:[#allocation48_spill] sm:$0xff] %v12678_v21  ;;  %v12691_v40 = vrot.slane %v12687_v63, %v12678_v21 }
 0x8bd   : > { %5825 = vrot.lane.b32.xlu1 %v14899_v25, %s14530_s16  ;;  %v12671_v57 = vpop.permute.xlu0 %5933 }
 0x8be   : > { %14910 = vst [vmem:[#allocation42_spill] sm:$0xff] %v12671_v57  ;;  %14916 = vst [vmem:[#allocation24_spill] sm:$0xff] %v12691_v40  ;;  %v7888_v18 = vcombine.high %v12691_v40, %v12691_v40 }
 0x8bf   : > { %v12673_v7 = vpop.permute.xlu1 %5919  ;;  %5925 = vrot.lane.b32.xlu0 %v14897_v54, %s14531_s24 }
 0x8c0   : > { %14911 = vst [vmem:[#allocation49_spill] sm:$0xff] %v12673_v7  ;;  %7948 = vmatprep.mubr.bf16.mxu0 %v7888_v18  ;;  %8112 = vmatprep.mubr.bf16.mxu1 %v7888_v18 }
 0x8c1   : > { %5841 = vrot.lane.b32.xlu1 %v14900_v6, %s14530_s16  ;;  %v12682_v33 = vpop.permute.xlu0 %6019 }
 0x8c2   : > { %14914 = vst [vmem:[#allocation47_spill] sm:$0xff] %v12682_v33 }
 0x8c3   : > { %v12693_v7 = vpop.permute.xlu1 %5935  ;;  %5941 = vrot.lane.b32.xlu0 %v14898_v51, %s14531_s24 }
 0x8c4   : > { %14917 = vst [vmem:[#allocation27_spill] sm:$0xff] %v12693_v7  ;;  %v14945_v7 = vld [vmem:[#allocation18_spill] sm:$0xff] }
 0x8c5   : > { %5927 = vrot.lane.b32.xlu1 %v14899_v25, %s14531_s24  ;;  %v12701_v31 = vpop.permute.xlu0 %6035 }
 0x8c6   : > { %14918 = vst [vmem:[#allocation26_spill] sm:$0xff] %v12701_v31 }
 0x8c7   : > { %v12703_v33 = vpop.permute.xlu1 %6021  ;;  %6027 = vrot.lane.b32.xlu0 %v14897_v54, %s14532_s21 }
 0x8c8   : > { %14919 = vst [vmem:[#allocation29_spill] sm:$0xff] %v12703_v33 }
 0x8c9   : > { %5943 = vrot.lane.b32.xlu1 %v14900_v6, %s14531_s24  ;;  %v12709_v21 = vpop.permute.xlu0 %6121  ;;  %s15135_s24 = smov 95  }
 0x8ca   : > { %14920 = vst [vmem:[#allocation5_spill] sm:$0xff] %v12709_v21 }
 0x8cb   : > { %v12711_v63 = vpop.permute.xlu1 %6037  ;;  %6043 = vrot.lane.b32.xlu0 %v14898_v51, %s14532_s21 }
 0x8cc   : > { %14921 = vst [vmem:[#allocation78_spill] sm:$0xff] %v12711_v63 }
 0x8cd   : > { %6029 = vrot.lane.b32.xlu1 %v14899_v25, %s14532_s21  ;;  %v12717_v40 = vpop.permute.xlu0 %6137 }
 0x8ce   : > { %14922 = vst [vmem:[#allocation79_spill] sm:$0xff] %v12717_v40 }
 0x8cf   : > { %v12719_v18 = vpop.permute.xlu1 %6123  ;;  %6129 = vrot.lane.b32.xlu0 %v14897_v54, %s14533_s22 }
 0x8d0   : > { %14923 = vst [vmem:[#allocation80_spill] sm:$0xff] %v12719_v18 }
 0x8d1   : > { %6045 = vrot.lane.b32.xlu1 %v14900_v6, %s14532_s21  ;;  %v12725_v33 = vpop.permute.xlu0 %6223 }
 0x8d2   : > { %14924 = vst [vmem:[#allocation81_spill] sm:$0xff] %v12725_v33 }
 0x8d3   : > { %v12727_v21 = vpop.permute.xlu1 %6139  ;;  %6145 = vrot.lane.b32.xlu0 %v14898_v51, %s14533_s22 }
 0x8d4   : > { %14925 = vst [vmem:[#allocation82_spill] sm:$0xff] %v12727_v21 }
 0x8d5   : > { %6131 = vrot.lane.b32.xlu1 %v14899_v25, %s14533_s22  ;;  %v12733_v63 = vpop.permute.xlu0 %6239 }
 0x8d6   : > { %14926 = vst [vmem:[#allocation83_spill] sm:$0xff] %v12733_v63 }
 0x8d7   : > { %v12735_v40 = vpop.permute.xlu1 %6225  ;;  %6231 = vrot.lane.b32.xlu0 %v14897_v54, %s14534_s19 }
 0x8d8   : > { %14927 = vst [vmem:[#allocation84_spill] sm:$0xff] %v12735_v40 }
 0x8d9   : > { %6147 = vrot.lane.b32.xlu1 %v14900_v6, %s14533_s22  ;;  %v12741_v18 = vpop.permute.xlu0 %6325 }
 0x8da   : > { %14928 = vst [vmem:[#allocation85_spill] sm:$0xff] %v12741_v18 }
 0x8db   : > { %v12743_v33 = vpop.permute.xlu1 %6241  ;;  %6247 = vrot.lane.b32.xlu0 %v14898_v51, %s14534_s19 }
 0x8dc   : > { %14929 = vst [vmem:[#allocation86_spill] sm:$0xff] %v12743_v33 }
 0x8dd   : > { %6233 = vrot.lane.b32.xlu1 %v14899_v25, %s14534_s19  ;;  %v12749_v21 = vpop.permute.xlu0 %6341 }
 0x8de   : > { %14930 = vst [vmem:[#allocation87_spill] sm:$0xff] %v12749_v21 }
 0x8df   : > { %v12751_v63 = vpop.permute.xlu1 %6327  ;;  %6333 = vrot.lane.b32.xlu0 %v14897_v54, %s14535_s20 }
 0x8e0   : > { %14931 = vst [vmem:[#allocation88_spill] sm:$0xff] %v12751_v63 }
 0x8e1   : > { %6249 = vrot.lane.b32.xlu1 %v14900_v6, %s14534_s19  ;;  %v12757_v40 = vpop.permute.xlu0 %6443 }
 0x8e2   : > { %14932 = vst [vmem:[#allocation89_spill] sm:$0xff] %v12757_v40 }
 0x8e3   : > { %v12759_v18 = vpop.permute.xlu1 %6343  ;;  %6349 = vrot.lane.b32.xlu0 %v14898_v51, %s14535_s20 }
 0x8e4   : > { %14933 = vst [vmem:[#allocation90_spill] sm:$0xff] %v12759_v18 }
 0x8e5   : > { %6335 = vrot.lane.b32.xlu1 %v14899_v25, %s14535_s20  ;;  %v12765_v33 = vpop.permute.xlu0 %6459 }
 0x8e6   : > { %14934 = vst [vmem:[#allocation91_spill] sm:$0xff] %v12765_v33 }
 0x8e7   : > { %v12767_v21 = vpop.permute.xlu1 %6445  ;;  %6451 = vrot.lane.b32.xlu0 %v14897_v54, %s14536_s0 }
 0x8e8   : > { %14935 = vst [vmem:[#allocation92_spill] sm:$0xff] %v12767_v21 }
 0x8e9   : > { %6351 = vrot.lane.b32.xlu1 %v14900_v6, %s14535_s20  ;;  %v12773_v63 = vpop.permute.xlu0 %6545 }
 0x8ea   : > { %14936 = vst [vmem:[#allocation93_spill] sm:$0xff] %v12773_v63 }
 0x8eb   : > { %v12775_v40 = vpop.permute.xlu1 %6461  ;;  %6467 = vrot.lane.b32.xlu0 %v14898_v51, %s14536_s0 }
 0x8ec   : > { %14937 = vst [vmem:[#allocation94_spill] sm:$0xff] %v12775_v40 }
 0x8ed   : > { %6453 = vrot.lane.b32.xlu1 %v14899_v25, %s14536_s0  ;;  %v12781_v18 = vpop.permute.xlu0 %6561 }
 0x8ee   : > { %14938 = vst [vmem:[#allocation95_spill] sm:$0xff] %v12781_v18 }
 0x8ef   : > { %v12783_v33 = vpop.permute.xlu1 %6547  ;;  %6553 = vrot.lane.b32.xlu0 %v14897_v54, %s14479_s12 }
 0x8f0   : > { %14939 = vst [vmem:[#allocation96_spill] sm:$0xff] %v12783_v33 }
 0x8f1   : > { %6469 = vrot.lane.b32.xlu1 %v14900_v6, %s14536_s0  ;;  %v12789_v21 = vpop.permute.xlu0 %6647 }
 0x8f2   : > { %14940 = vst [vmem:[#allocation97_spill] sm:$0xff] %v12789_v21 }
 0x8f3   : > { %v12791_v63 = vpop.permute.xlu1 %6563  ;;  %6569 = vrot.lane.b32.xlu0 %v14898_v51, %s14479_s12 }
 0x8f4   : > { %14941 = vst [vmem:[#allocation98_spill] sm:$0xff] %v12791_v63 }
 0x8f5   : > { %6555 = vrot.lane.b32.xlu1 %v14899_v25, %s14479_s12  ;;  %v12797_v40 = vpop.permute.xlu0 %6663 }
 0x8f6   : > { %14942 = vst [vmem:[#allocation99_spill] sm:$0xff] %v12797_v40 }
 0x8f7   : > { %v12799_v18 = vpop.permute.xlu1 %6649  ;;  %6655 = vrot.lane.b32.xlu0 %v14897_v54, %s14482_s15 }
 0x8f8   : > { %14943 = vst [vmem:[#allocation100_spill] sm:$0xff] %v12799_v18 }
 0x8f9   : > { %6571 = vrot.lane.b32.xlu1 %v14900_v6, %s14479_s12  ;;  %v5212_v33 = vpop.permute.xlu0 %5211 }
 0x8fa   : > { %v5241_v63 = vsel %vm395_vm2, %v12551_v23, %v5212_v33  ;;  %v5237_v40 = vsel %vm395_vm2, %v5212_v33, %v12559_v43 }
 0x8fb   : > { %v12805_v21 = vpop.permute.xlu1 %6665  ;;  %6671 = vrot.lane.b32.xlu0 %v14898_v51, %s14482_s15  ;;  %v5279_v33 = vmul.f32 %v11733_v17, %v5237_v40 }
 0x8fc   : > { %14944 = vst [vmem:[#allocation101_spill] sm:$0xff] %v12805_v21  ;;  %v5278_v21 = vmul.f32 %v11730_v58, %v5241_v63 }
 0x8fd   : > { %6657 = vrot.lane.b32.xlu1 %v14899_v25, %s14482_s15  ;;  %v5228_v18 = vpop.permute.xlu0 %5227 }
 0x8fe   : > { %v5245_v57 = vsel %vm395_vm2, %v5228_v18, %v12551_v23  ;;  %v5233_v48 = vsel %vm395_vm2, %v12559_v43, %v5228_v18 }
 0x8ff   : > { %v5214_v31 = vpop.permute.xlu1 %5213  ;;  %6745 = vrot.lane.b32.xlu0 %v14945_v7, %s14485_s17  ;;  %v5277_v37 = vmul.f32 %v11750_v62, %v5245_v57  ;;  %v5280_v40 = vmul.f32 %v11753_v13, %v5233_v48  ;;  %v14947_v48 = vld [vmem:[#allocation20_spill] sm:$0xff] }
 0x900   : > { %v5238_v0 = vsel %vm395_vm2, %v5214_v31, %v12569_v36  ;;  %v5242_v60 = vsel %vm395_vm2, %v12561_v28, %v5214_v31  ;;  %v14946_v31 = vld [vmem:[#allocation21_spill] sm:$0xff] }
 0x901   : > { %v5282_v63 = vmul.f32 %v11730_v58, %v5242_v60  ;;  %v5283_v42 = vmul.f32 %v11733_v17, %v5238_v0  ;;  %6673 = vrot.lane.b32.xlu1 %v14900_v6, %s14482_s15  ;;  %v5314_v23 = vpop.permute.xlu0 %5313  ;;  %s15152_s15 = smov 94  }
 0x902   : > { %v5339_v58 = vsel %vm442_vm1, %v5314_v23, %v12575_v5 }
 0x903   : > { %v5290_v44 = vpack.c.bf16 %v5282_v63, %v5278_v21  ;;  %v5291_v1 = vpack.c.bf16 %v5283_v42, %v5279_v33  ;;  %v5230_v24 = vpop.permute.xlu1 %5229  ;;  %6753 = vrot.lane.b32.xlu0 %v14946_v31, %s14485_s17  ;;  %v5343_v42 = vsel %vm442_vm1, %v12567_v49, %v5314_v23  ;;  %v5381_v33 = vmul.f32 %v11783_v47, %v5339_v58  ;;  %v14949_v23 = vld [vmem:[#allocation23_spill] sm:$0xff]  ;;  %v7674_v58 = vld [vmem:[#allocation2 + $0x48] sm:$0xff] }
 0x904   : > { %v5234_v17 = vsel %vm395_vm2, %v12569_v36, %v5230_v24  ;;  %v5246_v0 = vsel %vm395_vm2, %v5230_v24, %v12561_v28  ;;  %v14948_v24 = vld [vmem:[#allocation22_spill] sm:$0xff]  ;;  %v5380_v28 = vmul.f32 %v11773_v12, %v5343_v42 }
 0x905   : > { %5298 = vst [vmem:[#allocation2 + $0x28] sm:$0xff] %v5290_v44  ;;  %5299 = vst [vmem:[#allocation2 + $0x30] sm:$0xff] %v5291_v1  ;;  %v5281_v21 = vmul.f32 %v11750_v62, %v5246_v0  ;;  %v5284_v57 = vmul.f32 %v11753_v13, %v5234_v17  ;;  %6755 = vrot.lane.b32.xlu1 %v14947_v48, %s14485_s17  ;;  %v5330_v60 = vpop.permute.xlu0 %5329  ;;  %7918 = vmatprep.subr.bf16.mxu0 %v5290_v44 }
 0x906   : > { %v5347_v44 = vsel %vm442_vm1, %v5330_v60, %v12567_v49  ;;  %v5335_v17 = vsel %vm442_vm1, %v12575_v5, %v5330_v60  ;;  %v14950_v49 = vld [vmem:[#allocation25_spill] sm:$0xff]  ;;  %v7676_v60 = vld [vmem:[#allocation2 + $0x58] sm:$0xff] }
 0x907   : > { %v5289_v43 = vpack.c.bf16 %v5281_v21, %v5277_v37  ;;  %v5292_v36 = vpack.c.bf16 %v5284_v57, %v5280_v40  ;;  %v5316_v18 = vpop.permute.xlu1 %5315  ;;  %6761 = vrot.lane.b32.xlu0 %v14948_v24, %s14485_s17 }
 0x908   : > { %v5340_v62 = vsel %vm442_vm1, %v5316_v18, %v12585_v35  ;;  %v5344_v13 = vsel %vm442_vm1, %v12577_v61, %v5316_v18 }
 0x909   : > { %5297 = vst [vmem:[#allocation2 + $0x20] sm:$0xff] %v5289_v43  ;;  %5300 = vst [vmem:[#allocation2 + $0x38] sm:$0xff] %v5292_v36  ;;  %v5384_v37 = vmul.f32 %v11773_v12, %v5344_v13  ;;  %v5385_v63 = vmul.f32 %v11783_v47, %v5340_v62  ;;  %6763 = vrot.lane.b32.xlu1 %v14949_v23, %s14485_s17  ;;  %v5416_v40 = vpop.permute.xlu0 %5415  ;;  %7919 = vmatpush1.bf16.msra.mxu0 %v5289_v43 }
 0x90a   : > { %8082 = vmatprep.subr.bf16.mxu1 %v5292_v36  ;;  %7920 = vmatprep.subr.bf16.mxu0 %v7674_v58  ;;  %v5379_v12 = vmul.f32 %v11799_v32, %v5347_v44  ;;  %v5445_v47 = vsel %vm502_vm4, %v12583_v34, %v5416_v40  ;;  %v5382_v43 = vmul.f32 %v11809_v16, %v5335_v17 }
 0x90b   : > { %v5392_v0 = vpack.c.bf16 %v5384_v37, %v5380_v28  ;;  %v5393_v42 = vpack.c.bf16 %v5385_v63, %v5381_v33  ;;  %v5332_v21 = vpop.permute.xlu1 %5331  ;;  %6769 = vrot.lane.b32.xlu0 %v14950_v49, %s14485_s17  ;;  %8083 = vmatpush1.bf16.msra.mxu1 %v5291_v1  ;;  %v5482_v1 = vmul.f32 %v11834_v56, %v5445_v47 }
 0x90c   : > { %v5336_v57 = vsel %vm442_vm1, %v12585_v35, %v5332_v21  ;;  %v5348_v5 = vsel %vm442_vm1, %v5332_v21, %v12577_v61  ;;  %8084 = vmatprep.subr.bf16.mxu1 %v7676_v60  ;;  %v7673_v35 = vld [vmem:[#allocation2 + $0x40] sm:$0xff]  ;;  %v5441_v61 = vsel %vm502_vm4, %v5416_v40, %v12591_v29  ;;  %vm14997_vm1 = vcmp.lt.s32.totalorder %v8816_v19, 2 }
 0x90d   : > { %5400 = vst [vmem:[#allocation2 + $0x68] sm:$0xff] %v5392_v0  ;;  %5401 = vst [vmem:[#allocation2 + $0x70] sm:$0xff] %v5393_v42  ;;  %v5383_v36 = vmul.f32 %v11799_v32, %v5348_v5  ;;  %v5386_v18 = vmul.f32 %v11809_v16, %v5336_v57  ;;  %6771 = vrot.lane.b32.xlu1 %v11339_v50, %s14485_s17  ;;  %v5432_v28 = vpop.permute.xlu0 %5431  ;;  %7921 = vmatpush1.bf16.msra.mxu0 %v7673_v35  ;;  %v7675_v32 = vld [vmem:[#allocation2 + $0x50] sm:$0xff]  ;;  %v7684_v5 = vld [vmem:[#allocation2 + $0x98] sm:$0xff] }
 0x90e   : > { %v5449_v16 = vsel %vm502_vm4, %v5432_v28, %v12583_v34  ;;  %7922 = vmatprep.subr.bf16.mxu0 %v5392_v0  ;;  %v5483_v63 = vmul.f32 %v11837_v55, %v5441_v61  ;;  %v5437_v17 = vsel %vm502_vm4, %v12591_v29, %v5432_v28  ;;  %vm15000_vm2 = vmmov %vm14997_vm1 }
 0x90f   : > { %v5391_v33 = vpack.c.bf16 %v5383_v36, %v5379_v12  ;;  %v5394_v62 = vpack.c.bf16 %v5386_v18, %v5382_v43  ;;  %v5418_v13 = vpop.permute.xlu1 %5417  ;;  %6749 = vrot.lane.b32.xlu0 %v11350_v52, %s14485_s17  ;;  %8085 = vmatpush1.bf16.msra.mxu1 %v7675_v32  ;;  %v5481_v0 = vmul.f32 %v11860_v9, %v5449_v16 }
 0x910   : > { %v5442_v44 = vsel %vm502_vm4, %v5418_v13, %v12601_v4  ;;  %v5446_v37 = vsel %vm502_vm4, %v12593_v11, %v5418_v13  ;;  %v5484_v60 = vmul.f32 %v11863_v41, %v5437_v17 }
 0x911   : > { %5399 = vst [vmem:[#allocation2 + $0x60] sm:$0xff] %v5391_v33  ;;  %5402 = vst [vmem:[#allocation2 + $0x78] sm:$0xff] %v5394_v62  ;;  %v5486_v40 = vmul.f32 %v11834_v56, %v5446_v37  ;;  %v5487_v58 = vmul.f32 %v11837_v55, %v5442_v44  ;;  %6751 = vrot.lane.b32.xlu1 %v11352_v59, %s14485_s17  ;;  %v5518_v34 = vpop.permute.xlu0 %5517  ;;  %8086 = vmatprep.subr.bf16.mxu1 %v5394_v62  ;;  %v7682_v56 = vld [vmem:[#allocation2 + $0x88] sm:$0xff] }
 0x912   : > { %7923 = vmatpush1.bf16.msra.mxu0 %v5391_v33  ;;  %v5547_v55 = vsel %vm550_vm3, %v12599_v46, %v5518_v34 }
 0x913   : > { %v5494_v21 = vpack.c.bf16 %v5486_v40, %v5482_v1  ;;  %v5495_v12 = vpack.c.bf16 %v5487_v58, %v5483_v63  ;;  %v5434_v47 = vpop.permute.xlu1 %5433  ;;  %6757 = vrot.lane.b32.xlu0 %v14897_v54, %s14485_s17  ;;  %7924 = vmatprep.subr.bf16.mxu0 %v7682_v56 }
 0x914   : > { %v5438_v57 = vsel %vm502_vm4, %v12601_v4, %v5434_v47  ;;  %v5450_v29 = vsel %vm502_vm4, %v5434_v47, %v12593_v11  ;;  %8087 = vmatpush1.bf16.msra.mxu1 %v5393_v42  ;;  %v7681_v4 = vld [vmem:[#allocation2 + $0x80] sm:$0xff]  ;;  %v5543_v11 = vsel %vm550_vm3, %v5518_v34, %v12607_v2  ;;  %v5584_v42 = vmul.f32 %v11889_v39, %v5547_v55  ;;  %v7692_v34 = vld [vmem:[#allocation2 + $0xd8] sm:$0xff]  ;;  %vm15004_vm4 = vmmov %vm14997_vm1 }
 0x915   : > { %5502 = vst [vmem:[#allocation2 + $0xa8] sm:$0xff] %v5494_v21  ;;  %5503 = vst [vmem:[#allocation2 + $0xb0] sm:$0xff] %v5495_v12  ;;  %v5485_v43 = vmul.f32 %v11860_v9, %v5450_v29  ;;  %v5488_v36 = vmul.f32 %v11863_v41, %v5438_v57  ;;  %6759 = vrot.lane.b32.xlu1 %v14899_v25, %s14485_s17  ;;  %v5534_v18 = vpop.permute.xlu0 %5533  ;;  %8088 = vmatprep.subr.bf16.mxu1 %v7684_v5  ;;  %v7683_v9 = vld [vmem:[#allocation2 + $0x90] sm:$0xff] }
 0x916   : > { %7925 = vmatpush1.bf16.msra.mxu0 %v7681_v4  ;;  %v5551_v41 = vsel %vm550_vm3, %v5534_v18, %v12599_v46  ;;  %v5585_v62 = vmul.f32 %v11892_v14, %v5543_v11  ;;  %v5539_v16 = vsel %vm550_vm3, %v12607_v2, %v5534_v18  ;;  %v14952_v11 = vld [vmem:[#allocation52_spill] sm:$0xff] }
 0x917   : > { %v5493_v28 = vpack.c.bf16 %v5485_v43, %v5481_v0  ;;  %v5496_v35 = vpack.c.bf16 %v5488_v36, %v5484_v60  ;;  %v5520_v61 = vpop.permute.xlu1 %5519  ;;  %6765 = vrot.lane.b32.xlu0 %v11370_v26, %s14485_s17  ;;  %7926 = vmatprep.subr.bf16.mxu0 %v5494_v21  ;;  %v5583_v44 = vmul.f32 %v11915_v20, %v5551_v41 }
 0x918   : > { %v5544_v1 = vsel %vm550_vm3, %v5520_v61, %v12617_v3  ;;  %v5548_v33 = vsel %vm550_vm3, %v12609_v22, %v5520_v61  ;;  %8089 = vmatpush1.bf16.msra.mxu1 %v7683_v9  ;;  %v5586_v17 = vmul.f32 %v11918_v10, %v5539_v16  ;;  %v14955_v16 = vld [vmem:[#allocation34_spill] sm:$0xff] }
 0x919   : > { %5501 = vst [vmem:[#allocation2 + $0xa0] sm:$0xff] %v5493_v28  ;;  %5504 = vst [vmem:[#allocation2 + $0xb8] sm:$0xff] %v5496_v35  ;;  %v5588_v13 = vmul.f32 %v11889_v39, %v5548_v33  ;;  %v5589_v32 = vmul.f32 %v11892_v14, %v5544_v1  ;;  %6767 = vrot.lane.b32.xlu1 %v11372_v30, %s14485_s17  ;;  %v5620_v46 = vpop.permute.xlu0 %5619  ;;  %8090 = vmatprep.subr.bf16.mxu1 %v5496_v35  ;;  %v7690_v39 = vld [vmem:[#allocation2 + $0xc8] sm:$0xff]  ;;  %v7700_v1 = vld [vmem:[#allocation2 + $0x118] sm:$0xff] }
 0x91a   : > { %7927 = vmatpush1.bf16.msra.mxu0 %v5493_v28  ;;  %v5649_v14 = vsel %vm610_vm6, %v12615_v53, %v5620_v46  ;;  %v14954_v33 = vld [vmem:[#allocation50_spill] sm:$0xff] }
 0x91b   : > { %v5596_v37 = vpack.c.bf16 %v5588_v13, %v5584_v42  ;;  %v5597_v63 = vpack.c.bf16 %v5589_v32, %v5585_v62  ;;  %v5536_v40 = vpop.permute.xlu1 %5535  ;;  %6773 = vrot.lane.b32.xlu0 %v14898_v51, %s14485_s17  ;;  %7928 = vmatprep.subr.bf16.mxu0 %v7690_v39 }
 0x91c   : > { %v5540_v58 = vsel %vm550_vm3, %v12617_v3, %v5536_v40  ;;  %v5552_v2 = vsel %vm550_vm3, %v5536_v40, %v12609_v22  ;;  %8091 = vmatpush1.bf16.msra.mxu1 %v5495_v12  ;;  %v7689_v3 = vld [vmem:[#allocation2 + $0xc0] sm:$0xff]  ;;  %v5645_v22 = vsel %vm610_vm6, %v5620_v46, %v12623_v15  ;;  %v5686_v12 = vmul.f32 %v11944_v8, %v5649_v14  ;;  %v7699_v14 = vld [vmem:[#allocation2 + $0x110] sm:$0xff]  ;;  %vm15002_vm3 = vmmov %vm14997_vm1 }
 0x91d   : > { %5604 = vst [vmem:[#allocation2 + $0xe8] sm:$0xff] %v5596_v37  ;;  %5605 = vst [vmem:[#allocation2 + $0xf0] sm:$0xff] %v5597_v63  ;;  %v5587_v0 = vmul.f32 %v11915_v20, %v5552_v2  ;;  %v5590_v21 = vmul.f32 %v11918_v10, %v5540_v58  ;;  %6775 = vrot.lane.b32.xlu1 %v14900_v6, %s14485_s17  ;;  %v5636_v47 = vpop.permute.xlu0 %5635  ;;  %8092 = vmatprep.subr.bf16.mxu1 %v7692_v34  ;;  %v7691_v20 = vld [vmem:[#allocation2 + $0xd0] sm:$0xff] }
 0x91e   : > { %7929 = vmatpush1.bf16.msra.mxu0 %v7689_v3  ;;  %v5653_v10 = vsel %vm610_vm6, %v5636_v47, %v12615_v53  ;;  %v5687_v60 = vmul.f32 %v11947_v27, %v5645_v22  ;;  %v14951_v53 = vld [vmem:[#allocation19_spill] sm:$0xff]  ;;  %v5641_v4 = vsel %vm610_vm6, %v12623_v15, %v5636_v47 }
 0x91f   : > { %v5595_v56 = vpack.c.bf16 %v5587_v0, %v5583_v44  ;;  %v5598_v55 = vpack.c.bf16 %v5590_v21, %v5586_v17  ;;  %v5622_v57 = vpop.permute.xlu1 %5621  ;;  %6847 = vrot.lane.b32.xlu0 %v14945_v7, %s14486_s11  ;;  %7930 = vmatprep.subr.bf16.mxu0 %v5596_v37  ;;  %v5685_v42 = vmul.f32 %v14952_v11, %v5653_v10  ;;  %v14956_v44 = vld [vmem:[#allocation53_spill] sm:$0xff]  ;;  %v14957_v2 = vld [vmem:[#allocation39_spill] sm:$0xff] }
 0x920   : > { %v5646_v29 = vsel %vm610_vm6, %v5622_v57, %v12633_v38  ;;  %v5650_v5 = vsel %vm610_vm6, %v12625_v45, %v5622_v57  ;;  %8093 = vmatpush1.bf16.msra.mxu1 %v7691_v20  ;;  %v5688_v62 = vmul.f32 %v14954_v33, %v5641_v4  ;;  %v14958_v17 = vld [vmem:[#allocation41_spill] sm:$0xff]  ;;  %v14959_v21 = vld [vmem:[#allocation51_spill] sm:$0xff]  ;;  %v7708_v4 = vld [vmem:[#allocation2 + $0x158] sm:$0xff] }
 0x921   : > { %5603 = vst [vmem:[#allocation2 + $0xe0] sm:$0xff] %v5595_v56  ;;  %5606 = vst [vmem:[#allocation2 + $0xf8] sm:$0xff] %v5598_v55  ;;  %v5690_v43 = vmul.f32 %v11944_v8, %v5650_v5  ;;  %v5691_v36 = vmul.f32 %v11947_v27, %v5646_v29  ;;  %6849 = vrot.lane.b32.xlu1 %v14951_v53, %s14486_s11  ;;  %v5722_v18 = vpop.permute.xlu0 %5721  ;;  %8094 = vmatprep.subr.bf16.mxu1 %v5598_v55  ;;  %v7698_v8 = vld [vmem:[#allocation2 + $0x108] sm:$0xff]  ;;  %v14953_v27 = vld [vmem:[#allocation35_spill] sm:$0xff] }
 0x922   : > { %7931 = vmatpush1.bf16.msra.mxu0 %v5595_v56  ;;  %v5751_v9 = vsel %vm658_vm5, %v14953_v27, %v5722_v18  ;;  %v14960_v55 = vld [vmem:[#allocation56_spill] sm:$0xff]  ;;  %v7706_v5 = vld [vmem:[#allocation2 + $0x148] sm:$0xff] }
 0x923   : > { %v5698_v28 = vpack.c.bf16 %v5690_v43, %v5686_v12  ;;  %v5699_v35 = vpack.c.bf16 %v5691_v36, %v5687_v60  ;;  %v5638_v61 = vpop.permute.xlu1 %5637  ;;  %6855 = vrot.lane.b32.xlu0 %v14946_v31, %s14486_s11  ;;  %7932 = vmatprep.subr.bf16.mxu0 %v7698_v8  ;;  %v5788_v37 = vmul.f32 %v14956_v44, %v5751_v9  ;;  %v14961_v60 = vld [vmem:[#allocation40_spill] sm:$0xff]  ;;  %v14963_v9 = vld [vmem:[#allocation38_spill] sm:$0xff] }
 0x924   : > { %v5642_v41 = vsel %vm610_vm6, %v12633_v38, %v5638_v61  ;;  %v5654_v15 = vsel %vm610_vm6, %v5638_v61, %v12625_v45  ;;  %8095 = vmatpush1.bf16.msra.mxu1 %v5597_v63  ;;  %v7697_v38 = vld [vmem:[#allocation2 + $0x100] sm:$0xff]  ;;  %v5747_v45 = vsel %vm658_vm5, %v5722_v18, %v14955_v16  ;;  %vm15008_vm6 = vmmov %vm14997_vm1 }
 0x925   : > { %5706 = vst [vmem:[#allocation2 + $0x128] sm:$0xff] %v5698_v28  ;;  %5707 = vst [vmem:[#allocation2 + $0x130] sm:$0xff] %v5699_v35  ;;  %v5689_v13 = vmul.f32 %v14952_v11, %v5654_v15  ;;  %v5692_v32 = vmul.f32 %v14954_v33, %v5642_v41  ;;  %6857 = vrot.lane.b32.xlu1 %v14947_v48, %s14486_s11  ;;  %v5738_v46 = vpop.permute.xlu0 %5737  ;;  %8096 = vmatprep.subr.bf16.mxu1 %v7700_v1  ;;  %v14962_v11 = vld [vmem:[#allocation54_spill] sm:$0xff] }
 0x926   : > { %7933 = vmatpush1.bf16.msra.mxu0 %v7697_v38  ;;  %v5755_v58 = vsel %vm658_vm5, %v5738_v46, %v14953_v27  ;;  %v5789_v47 = vmul.f32 %v14959_v21, %v5747_v45  ;;  %v5743_v56 = vsel %vm658_vm5, %v14955_v16, %v5738_v46  ;;  %v7705_v27 = vld [vmem:[#allocation2 + $0x140] sm:$0xff]  ;;  %v14965_v46 = vld [vmem:[#allocation43_spill] sm:$0xff] }
 0x927   : > { %v5697_v63 = vpack.c.bf16 %v5689_v13, %v5685_v42  ;;  %v5700_v40 = vpack.c.bf16 %v5692_v32, %v5688_v62  ;;  %v5724_v39 = vpop.permute.xlu1 %5723  ;;  %6863 = vrot.lane.b32.xlu0 %v14948_v24, %s14486_s11  ;;  %7934 = vmatprep.subr.bf16.mxu0 %v5698_v28  ;;  %v5787_v57 = vmul.f32 %v14960_v55, %v5755_v58  ;;  %v7707_v13 = vld [vmem:[#allocation2 + $0x150] sm:$0xff]  ;;  %v14966_v16 = vld [vmem:[#allocation45_spill] sm:$0xff]  ;;  %v14968_v58 = vld [vmem:[#allocation60_spill] sm:$0xff] }
 0x928   : > { %v5748_v34 = vsel %vm658_vm5, %v5724_v39, %v14957_v2  ;;  %v5752_v0 = vsel %vm658_vm5, %v14958_v17, %v5724_v39  ;;  %8097 = vmatpush1.bf16.msra.mxu1 %v7699_v14  ;;  %v5790_v42 = vmul.f32 %v14962_v11, %v5743_v56  ;;  %v7716_v56 = vld [vmem:[#allocation2 + $0x198] sm:$0xff] }
 0x929   : > { %5705 = vst [vmem:[#allocation2 + $0x120] sm:$0xff] %v5697_v63  ;;  %5708 = vst [vmem:[#allocation2 + $0x138] sm:$0xff] %v5700_v40  ;;  %v5792_v3 = vmul.f32 %v14956_v44, %v5752_v0  ;;  %v5793_v22 = vmul.f32 %v14959_v21, %v5748_v34  ;;  %6865 = vrot.lane.b32.xlu1 %v14949_v23, %s14486_s11  ;;  %v5824_v12 = vpop.permute.xlu0 %5823  ;;  %8098 = vmatprep.subr.bf16.mxu1 %v5700_v40  ;;  %v14967_v44 = vld [vmem:[#allocation55_spill] sm:$0xff]  ;;  %v7714_v21 = vld [vmem:[#allocation2 + $0x188] sm:$0xff] }
 0x92a   : > { %7935 = vmatpush1.bf16.msra.mxu0 %v5697_v63  ;;  %v5853_v43 = vsel %vm718_vm8, %v14961_v60, %v5824_v12  ;;  %v5849_v41 = vsel %vm718_vm8, %v5824_v12, %v14963_v9 }
 0x92b   : > { %v5800_v20 = vpack.c.bf16 %v5792_v3, %v5788_v37  ;;  %v5801_v10 = vpack.c.bf16 %v5793_v22, %v5789_v47  ;;  %v5740_v29 = vpop.permute.xlu1 %5739  ;;  %6871 = vrot.lane.b32.xlu0 %v14950_v49, %s14486_s11  ;;  %7936 = vmatprep.subr.bf16.mxu0 %v7706_v5  ;;  %v5891_v37 = vmul.f32 %v14967_v44, %v5849_v41  ;;  %v14969_v47 = vld [vmem:[#allocation44_spill] sm:$0xff] }
 0x92c   : > { %v5744_v36 = vsel %vm658_vm5, %v14957_v2, %v5740_v29  ;;  %v5756_v18 = vsel %vm658_vm5, %v5740_v29, %v14958_v17  ;;  %8099 = vmatpush1.bf16.msra.mxu1 %v5699_v35  ;;  %v14964_v35 = vld [vmem:[#allocation57_spill] sm:$0xff]  ;;  %vm15006_vm5 = vmmov %vm14997_vm1 }
 0x92d   : > { %5808 = vst [vmem:[#allocation2 + $0x168] sm:$0xff] %v5800_v20  ;;  %5809 = vst [vmem:[#allocation2 + $0x170] sm:$0xff] %v5801_v10  ;;  %v5791_v28 = vmul.f32 %v14960_v55, %v5756_v18  ;;  %v5794_v61 = vmul.f32 %v14962_v11, %v5744_v36  ;;  %6873 = vrot.lane.b32.xlu1 %v11339_v50, %s14486_s11  ;;  %v5840_v8 = vpop.permute.xlu0 %5839  ;;  %8100 = vmatprep.subr.bf16.mxu1 %v7708_v4  ;;  %v14970_v55 = vld [vmem:[#allocation58_spill] sm:$0xff]  ;;  %v14972_v18 = vld [vmem:[#allocation61_spill] sm:$0xff] }
 0x92e   : > { %7937 = vmatpush1.bf16.msra.mxu0 %v7705_v27  ;;  %v5890_v15 = vmul.f32 %v14964_v35, %v5853_v43  ;;  %v5857_v32 = vsel %vm718_vm8, %v5840_v8, %v14961_v60  ;;  %v5845_v14 = vsel %vm718_vm8, %v14963_v9, %v5840_v8  ;;  %v7713_v60 = vld [vmem:[#allocation2 + $0x180] sm:$0xff]  ;;  %v14971_v43 = vld [vmem:[#allocation42_spill] sm:$0xff]  ;;  %v14973_v8 = vld [vmem:[#allocation27_spill] sm:$0xff] }
 0x92f   : > { %v5799_v1 = vpack.c.bf16 %v5791_v28, %v5787_v57  ;;  %v5802_v33 = vpack.c.bf16 %v5794_v61, %v5790_v42  ;;  %v5826_v62 = vpop.permute.xlu1 %5825  ;;  %6851 = vrot.lane.b32.xlu0 %v11350_v52, %s14486_s11  ;;  %7938 = vmatprep.subr.bf16.mxu0 %v5800_v20  ;;  %v5889_v2 = vmul.f32 %v14968_v58, %v5857_v32  ;;  %v7715_v28 = vld [vmem:[#allocation2 + $0x190] sm:$0xff]  ;;  %v14974_v9 = vld [vmem:[#allocation49_spill] sm:$0xff]  ;;  %v14976_v32 = vld [vmem:[#allocation64_spill] sm:$0xff] }
 0x930   : > { %v5850_v38 = vsel %vm718_vm8, %v5826_v62, %v14965_v46  ;;  %v5854_v45 = vsel %vm718_vm8, %v14966_v16, %v5826_v62  ;;  %8101 = vmatpush1.bf16.msra.mxu1 %v7707_v13  ;;  %v5892_v57 = vmul.f32 %v14970_v55, %v5845_v14  ;;  %v7724_v14 = vld [vmem:[#allocation2 + $0x1d8] sm:$0xff] }
 0x931   : > { %5807 = vst [vmem:[#allocation2 + $0x160] sm:$0xff] %v5799_v1  ;;  %5810 = vst [vmem:[#allocation2 + $0x178] sm:$0xff] %v5802_v33  ;;  %v5894_v63 = vmul.f32 %v14964_v35, %v5854_v45  ;;  %v5895_v40 = vmul.f32 %v14967_v44, %v5850_v38  ;;  %6853 = vrot.lane.b32.xlu1 %v11352_v59, %s14486_s11  ;;  %v5926_v39 = vpop.permute.xlu0 %5925  ;;  %8102 = vmatprep.subr.bf16.mxu1 %v5802_v33  ;;  %v14975_v35 = vld [vmem:[#allocation59_spill] sm:$0xff]  ;;  %v7722_v44 = vld [vmem:[#allocation2 + $0x1c8] sm:$0xff] }
 0x932   : > { %7939 = vmatpush1.bf16.msra.mxu0 %v5799_v1  ;;  %v5955_v3 = vsel %vm766_vm7, %v14969_v47, %v5926_v39  ;;  %v5951_v36 = vsel %vm766_vm7, %v5926_v39, %v14971_v43 }
 0x933   : > { %v5902_v34 = vpack.c.bf16 %v5894_v63, %v5890_v15  ;;  %v5903_v17 = vpack.c.bf16 %v5895_v40, %v5891_v37  ;;  %v5842_v0 = vpop.permute.xlu1 %5841  ;;  %6859 = vrot.lane.b32.xlu0 %v14897_v54, %s14486_s11  ;;  %7940 = vmatprep.subr.bf16.mxu0 %v7714_v21  ;;  %v5993_v15 = vmul.f32 %v14975_v35, %v5951_v36  ;;  %v14977_v37 = vld [vmem:[#allocation47_spill] sm:$0xff] }
 0x934   : > { %v5846_v22 = vsel %vm718_vm8, %v14965_v46, %v5842_v0  ;;  %v5858_v12 = vsel %vm718_vm8, %v5842_v0, %v14966_v16  ;;  %8103 = vmatpush1.bf16.msra.mxu1 %v5801_v10  ;;  %v5992_v10 = vmul.f32 %v14972_v18, %v5955_v3  ;;  %v14979_v3 = vld [vmem:[#allocation26_spill] sm:$0xff]  ;;  %vm15012_vm8 = vmmov %vm14997_vm1 }
 0x935   : > { %v5893_v20 = vmul.f32 %v14968_v58, %v5858_v12  ;;  %v5896_v29 = vmul.f32 %v14970_v55, %v5846_v22  ;;  %6861 = vrot.lane.b32.xlu1 %v14899_v25, %s14486_s11  ;;  %v5942_v5 = vpop.permute.xlu0 %5941  ;;  %8104 = vmatprep.subr.bf16.mxu1 %v7716_v56  ;;  %v14978_v58 = vld [vmem:[#allocation62_spill] sm:$0xff]  ;;  %v14981_v56 = vld [vmem:[#allocation65_spill] sm:$0xff] }
 0x936   : > { %7941 = vmatpush1.bf16.msra.mxu0 %v7713_v60  ;;  %v5959_v61 = vsel %vm766_vm7, %v5942_v5, %v14969_v47  ;;  %v5947_v13 = vsel %vm766_vm7, %v14971_v43, %v5942_v5  ;;  %v7721_v47 = vld [vmem:[#allocation2 + $0x1c0] sm:$0xff]  ;;  %v14980_v12 = vld [vmem:[#allocation46_spill] sm:$0xff]  ;;  %v7723_v5 = vld [vmem:[#allocation2 + $0x1d0] sm:$0xff] }
 0x937   : > { %v5901_v4 = vpack.c.bf16 %v5893_v20, %v5889_v2  ;;  %v5904_v11 = vpack.c.bf16 %v5896_v29, %v5892_v57  ;;  %v5928_v42 = vpop.permute.xlu1 %5927  ;;  %6867 = vrot.lane.b32.xlu0 %v11370_v26, %s14486_s11  ;;  %7942 = vmatprep.subr.bf16.mxu0 %v5902_v34  ;;  %v5991_v46 = vmul.f32 %v14976_v32, %v5959_v61  ;;  %v14982_v43 = vld [vmem:[#allocation78_spill] sm:$0xff] }
 0x938   : > { %v5952_v27 = vsel %vm766_vm7, %v5928_v42, %v14973_v8  ;;  %v5956_v41 = vsel %vm766_vm7, %v14974_v9, %v5928_v42  ;;  %8105 = vmatpush1.bf16.msra.mxu1 %v7715_v28  ;;  %v5994_v2 = vmul.f32 %v14978_v58, %v5947_v13  ;;  %v14987_v13 = vld [vmem:[#allocation5_spill] sm:$0xff] }
 0x939   : > { %v5996_v1 = vmul.f32 %v14972_v18, %v5956_v41  ;;  %v5997_v33 = vmul.f32 %v14975_v35, %v5952_v27  ;;  %6869 = vrot.lane.b32.xlu1 %v11372_v30, %s14486_s11  ;;  %v6028_v62 = vpop.permute.xlu0 %6027  ;;  %8106 = vmatprep.subr.bf16.mxu1 %v5904_v11  ;;  %v14983_v18 = vld [vmem:[#allocation29_spill] sm:$0xff]  ;;  %v14985_v27 = vld [vmem:[#allocation48_spill] sm:$0xff] }
 0x93a   : > { %7943 = vmatpush1.bf16.msra.mxu0 %v5901_v4  ;;  %v6057_v63 = vsel %vm826_vm10, %v14977_v37, %v6028_v62  ;;  %v6053_v22 = vsel %vm826_vm10, %v6028_v62, %v14979_v3  ;;  %v14984_v4 = vld [vmem:[#allocation63_spill] sm:$0xff]  ;;  %v14986_v41 = vld [vmem:[#allocation68_spill] sm:$0xff]  ;;  %v7730_v62 = vld [vmem:[#allocation2 + $0x208] sm:$0xff] }
 0x93b   : > { %v6004_v38 = vpack.c.bf16 %v5996_v1, %v5992_v10  ;;  %v6005_v16 = vpack.c.bf16 %v5997_v33, %v5993_v15  ;;  %v5944_v45 = vpop.permute.xlu1 %5943  ;;  %6875 = vrot.lane.b32.xlu0 %v14898_v51, %s14486_s11  ;;  %7944 = vmatprep.subr.bf16.mxu0 %v7722_v44  ;;  %v6094_v55 = vmul.f32 %v14981_v56, %v6057_v63  ;;  %v14988_v44 = vld [vmem:[#allocation66_spill] sm:$0xff] }
 0x93c   : > { %v5948_v40 = vsel %vm766_vm7, %v14973_v8, %v5944_v45  ;;  %v5960_v39 = vsel %vm766_vm7, %v5944_v45, %v14974_v9  ;;  %8107 = vmatpush1.bf16.msra.mxu1 %v5903_v17  ;;  %v7873_v17 = vcombine.high %v14980_v12, %v14980_v12  ;;  %v13152_v11 = vmul.f32 %v14984_v4, %v6053_v22  ;;  %v7732_v45 = vld [vmem:[#allocation2 + $0x218] sm:$0xff]  ;;  %v7729_v22 = vld [vmem:[#allocation2 + $0x200] sm:$0xff] }
 0x93d   : > { %v5995_v34 = vmul.f32 %v14976_v32, %v5960_v39  ;;  %v5998_v0 = vmul.f32 %v14978_v58, %v5948_v40  ;;  %6877 = vrot.lane.b32.xlu1 %v14900_v6, %s14486_s11  ;;  %v6044_v21 = vpop.permute.xlu0 %6043  ;;  %8108 = vmatprep.subr.bf16.mxu1 %v7724_v14  ;;  %v14989_v14 = vld [vmem:[#allocation79_spill] sm:$0xff]  ;;  %vm15011_vm7 = vcmp.lt.s32.totalorder %v8816_v19, 1 }
 0x93e   : > { %7945 = vmatpush1.bf16.msra.mxu0 %v7721_v47  ;;  %v6061_v60 = vsel %vm826_vm10, %v6044_v21, %v14977_v37  ;;  %v6049_v8 = vsel %vm826_vm10, %v14979_v3, %v6044_v21  ;;  %v13164_v9 = vrot.slane %v7873_v17, %v14985_v27  ;;  %v14992_v17 = vld [vmem:[#allocation82_spill] sm:$0xff]  ;;  %vm15018_vm12 = vmmov %vm15011_vm7 }
 0x93f   : > { %v6003_v57 = vpack.c.bf16 %v5995_v34, %v5991_v46  ;;  %v6006_v20 = vpack.c.bf16 %v5998_v0, %v5994_v2  ;;  %v6030_v29 = vpop.permute.xlu1 %6029  ;;  %6949 = vrot.lane.b32.xlu0 %v14945_v7, %s14487_s18  ;;  %7946 = vmatprep.subr.bf16.mxu0 %v6004_v38  ;;  %v6093_v35 = vmul.f32 %v14986_v41, %v6061_v60  ;;  %v14990_v2 = vld [vmem:[#allocation24_spill] sm:$0xff]  ;;  %v14991_v34 = vld [vmem:[#allocation69_spill] sm:$0xff]  ;;  %vm15020_vm0 = vmmov %vm15011_vm7 }
 0x940   : > { %v6054_v36 = vsel %vm826_vm10, %v6030_v29, %v14982_v43  ;;  %v6058_v10 = vsel %vm826_vm10, %v14983_v18, %v6030_v29  ;;  %8109 = vmatpush1.bf16.msra.mxu1 %v7723_v5  ;;  %v6096_v37 = vmul.f32 %v14988_v44, %v6049_v8  ;;  %vm15022_vm14 = vmmov %vm15020_vm0 }
 0x941   : > { %v6098_v42 = vmul.f32 %v14981_v56, %v6058_v10  ;;  %v13156_v28 = vmul.f32 %v14984_v4, %v6054_v36  ;;  %6951 = vrot.lane.b32.xlu1 %v14951_v53, %s14487_s18  ;;  %v6130_v61 = vpop.permute.xlu0 %6129  ;;  %8110 = vmatprep.subr.bf16.mxu1 %v6006_v20  ;;  %v14994_v20 = vld [vmem:[#allocation67_spill] sm:$0xff]  ;;  %v14995_v10 = vld [vmem:[#allocation72_spill] sm:$0xff]  ;;  %vm15024_vm11 = vmmov %vm15020_vm0 }
 0x942   : > { %7947 = vmatpush1.bf16.msra.mxu0 %v6003_v57  ;;  %v6159_v32 = vsel %vm874_vm9, %v14987_v13, %v6130_v61  ;;  %v6155_v58 = vsel %vm874_vm9, %v6130_v61, %v14989_v14  ;;  %v7731_v36 = vld [vmem:[#allocation2 + $0x210] sm:$0xff]  ;;  %v14996_v61 = vld [vmem:[#allocation81_spill] sm:$0xff] }
 0x943   : > { %v6106_v15 = vpack.c.bf16 %v6098_v42, %v6094_v55  ;;  %v6107_v1 = vpack.c.bf16 %v13156_v28, %v13152_v11  ;;  %v6046_v33 = vpop.permute.xlu1 %6045  ;;  %6957 = vrot.lane.b32.xlu0 %v14946_v31, %s14487_s18  ;;  %7957 = vmatprep.subr.bf16.mxu0 %v7730_v62  ;;  %v6196_v0 = vmul.f32 %v14991_v34, %v6159_v32  ;;  %v14993_v55 = vld [vmem:[#allocation80_spill] sm:$0xff] }
 0x944   : > { %v6050_v46 = vsel %vm826_vm10, %v14982_v43, %v6046_v33  ;;  %v6062_v38 = vsel %vm826_vm10, %v6046_v33, %v14983_v18  ;;  %8111 = vmatpush1.bf16.msra.mxu1 %v6005_v16  ;;  %v7889_v16 = vcombine.high %v13164_v9, %v13164_v9  ;;  %v13205_v29 = vmul.f32 %v14994_v20, %v6155_v58  ;;  %v14998_v33 = vld [vmem:[#allocation70_spill] sm:$0xff]  ;;  %v7737_v58 = vld [vmem:[#allocation2 + $0x240] sm:$0xff]  ;;  %vm15016_vm10 = vmmov %vm15011_vm7 }
 0x945   : > { %v6097_v63 = vmul.f32 %v14986_v41, %v6062_v38  ;;  %v6100_v40 = vmul.f32 %v14988_v44, %v6050_v46  ;;  %6959 = vrot.lane.b32.xlu1 %v14947_v48, %s14487_s18  ;;  %v6146_v39 = vpop.permute.xlu0 %6145  ;;  %8121 = vmatprep.subr.bf16.mxu1 %v7732_v45  ;;  %v14999_v38 = vld [vmem:[#allocation83_spill] sm:$0xff]  ;;  %v15001_v44 = vld [vmem:[#allocation73_spill] sm:$0xff] }
 0x946   : > { %7949 = vmatmul.mubr.bf16.vlgmr.msra.gmra.mrb[16].mxu0 %v14990_v2  ;;  %v6163_v12 = vsel %vm874_vm9, %v6146_v39, %v14987_v13  ;;  %v6151_v18 = vsel %vm874_vm9, %v14989_v14, %v6146_v39  ;;  %v7740_v14 = vld [vmem:[#allocation2 + $0x258] sm:$0xff] }
 0x947   : > { %v6105_v21 = vpack.c.bf16 %v6097_v63, %v6093_v35  ;;  %v6108_v47 = vpack.c.bf16 %v6100_v40, %v6096_v37  ;;  %v6132_v3 = vpop.permute.xlu1 %6131  ;;  %6965 = vrot.lane.b32.xlu0 %v14948_v24, %s14487_s18  ;;  %7958 = vmatpush1.bf16.msra.mxu0 %v7729_v22  ;;  %v6195_v4 = vmul.f32 %v14995_v10, %v6163_v12 }
 0x948   : > { %v6156_v56 = vsel %vm874_vm9, %v6132_v3, %v14992_v17  ;;  %v6160_v57 = vsel %vm874_vm9, %v14993_v55, %v6132_v3  ;;  %8113 = vmatmul.mubr.bf16.vlgmr.msra.gmra.mrb[16].mxu1 %v14990_v2  ;;  %7959 = vmatprep.subr.bf16.mxu0 %v6106_v15  ;;  %v7738_v15 = vld [vmem:[#allocation2 + $0x248] sm:$0xff]  ;;  %v6198_v62 = vmul.f32 %v14998_v33, %v6151_v18 }
 0x949   : > { %v6200_v5 = vmul.f32 %v14991_v34, %v6160_v57  ;;  %v13209_v60 = vmul.f32 %v14994_v20, %v6156_v56  ;;  %6967 = vrot.lane.b32.xlu1 %v14949_v23, %s14487_s18  ;;  %v6232_v43 = vpop.permute.xlu0 %6231  ;;  %8122 = vmatpush1.bf16.msra.mxu1 %v7731_v36  ;;  %v15003_v34 = vld [vmem:[#allocation86_spill] sm:$0xff] }
 0x94a   : > { %7989 = vmatprep.mubr.bf16.mxu0 %v7889_v16  ;;  %v6261_v8 = vsel %vm14997_vm1, %v14996_v61, %v6232_v43  ;;  %8123 = vmatprep.subr.bf16.mxu1 %v6108_v47  ;;  %v6257_v45 = vsel %vm15000_vm2, %v6232_v43, %v14999_v38  ;;  %vm15029_vm2 = vmmov %vm15020_vm0 }
 0x94b   : > { %v6208_v11 = vpack.c.bf16 %v6200_v5, %v6196_v0  ;;  %v6209_v42 = vpack.c.bf16 %v13209_v60, %v13205_v29  ;;  %v6148_v28 = vpop.permute.xlu1 %6147  ;;  %6973 = vrot.lane.b32.xlu0 %v14950_v49, %s14487_s18  ;;  %7960 = vmatpush1.bf16.msra.mxu0 %v6105_v21  ;;  %v6298_v37 = vmul.f32 %v15001_v44, %v6261_v8  ;;  %v15007_v21 = vld [vmem:[#allocation71_spill] sm:$0xff]  ;;  %v15010_v60 = vld [vmem:[#allocation85_spill] sm:$0xff] }
 0x94c   : > { %v6152_v41 = vsel %vm874_vm9, %v14992_v17, %v6148_v28  ;;  %v6164_v35 = vsel %vm874_vm9, %v6148_v28, %v14993_v55  ;;  %7961 = vmatprep.subr.bf16.mxu0 %v7738_v15  ;;  %8153 = vmatprep.mubr.bf16.mxu1 %v7889_v16  ;;  %v13251_v47 = vmul.f32 %v15007_v21, %v6257_v45  ;;  %v7739_v17 = vld [vmem:[#allocation2 + $0x250] sm:$0xff]  ;;  %v15009_v55 = vld [vmem:[#allocation76_spill] sm:$0xff]  ;;  %vm15013_vm9 = vmmov %vm14997_vm1 }
 0x94d   : > { %v6199_v13 = vmul.f32 %v14995_v10, %v6164_v35  ;;  %v6202_v32 = vmul.f32 %v14998_v33, %v6152_v41  ;;  %6975 = vrot.lane.b32.xlu1 %v11339_v50, %s14487_s18  ;;  %v6248_v46 = vpop.permute.xlu0 %6247  ;;  %8124 = vmatpush1.bf16.msra.mxu1 %v6107_v1  ;;  %v15005_v1 = vld [vmem:[#allocation84_spill] sm:$0xff]  ;;  %v7746_v10 = vld [vmem:[#allocation2 + $0x288] sm:$0xff]  ;;  %v15015_v41 = vld [vmem:[#allocation87_spill] sm:$0xff] }
 0x94e   : > { %v6265_v2 = vsel %vm15002_vm3, %v6248_v46, %v14996_v61  ;;  %8125 = vmatprep.subr.bf16.mxu1 %v7740_v14  ;;  %v6253_v56 = vsel %vm15008_vm6, %v14999_v38, %v6248_v46  ;;  %v15017_v15 = vld [vmem:[#allocation77_spill] sm:$0xff]  ;;  %v7748_v46 = vld [vmem:[#allocation2 + $0x298] sm:$0xff]  ;;  %vm15028_vm1 = vmmov %vm15020_vm0 }
 0x94f   : > { %v6207_v63 = vpack.c.bf16 %v6199_v13, %v6195_v4  ;;  %v6210_v40 = vpack.c.bf16 %v6202_v32, %v6198_v62  ;;  %v6234_v39 = vpop.permute.xlu1 %6233  ;;  %6953 = vrot.lane.b32.xlu0 %v11350_v52, %s14487_s18  ;;  %7962 = vmatpush1.bf16.msra.mxu0 %v7737_v58  ;;  %v6297_v57 = vmul.f32 %v15009_v55, %v6265_v2  ;;  %v15014_v4 = vld [vmem:[#allocation74_spill] sm:$0xff]  ;;  %v7745_v38 = vld [vmem:[#allocation2 + $0x280] sm:$0xff]  ;;  %vm15032_vm3 = vmmov %vm15027_vm13 }
 0x950   : > { %v6258_v0 = vsel %vm15004_vm4, %v6234_v39, %v15003_v34  ;;  %v6262_v16 = vsel %vm15006_vm5, %v15005_v1, %v6234_v39  ;;  %7963 = vmatprep.subr.bf16.mxu0 %v6208_v11  ;;  %v6300_v11 = vmul.f32 %v15014_v4, %v6253_v56  ;;  %vm15034_vm4 = vmmov %vm15032_vm3 }
 0x951   : > { %v6302_v3 = vmul.f32 %v15001_v44, %v6262_v16  ;;  %v13255_v22 = vmul.f32 %v15007_v21, %v6258_v0  ;;  %6955 = vrot.lane.b32.xlu1 %v11352_v59, %s14487_s18  ;;  %v6334_v12 = vpop.permute.xlu0 %6333  ;;  %8126 = vmatpush1.bf16.msra.mxu1 %v7739_v17  ;;  %v15019_v44 = vld [vmem:[#allocation90_spill] sm:$0xff]  ;;  %vm15036_vm5 = vmmov %vm15032_vm3 }
 0x952   : > { %v6363_v43 = vsel %vm15011_vm7, %v15010_v60, %v6334_v12  ;;  %8127 = vmatprep.subr.bf16.mxu1 %v6210_v40  ;;  %v6359_v35 = vsel %vm15016_vm10, %v6334_v12, %v15015_v41  ;;  %v15023_v40 = vld [vmem:[#allocation75_spill] sm:$0xff]  ;;  %vm15038_vm6 = vmmov %vm15032_vm3 }
 0x953   : > { %v6310_v20 = vpack.c.bf16 %v6302_v3, %v6298_v37  ;;  %v6311_v29 = vpack.c.bf16 %v13255_v22, %v13251_v47  ;;  %v6250_v5 = vpop.permute.xlu1 %6249  ;;  %6961 = vrot.lane.b32.xlu0 %v14897_v54, %s14487_s18  ;;  %7964 = vmatpush1.bf16.msra.mxu0 %v6207_v63  ;;  %v6400_v33 = vmul.f32 %v15017_v15, %v6363_v43  ;;  %v15021_v63 = vld [vmem:[#allocation88_spill] sm:$0xff]  ;;  %v15026_v22 = vld [vmem:[#allocation89_spill] sm:$0xff]  ;;  %vm15040_vm7 = vmmov %vm15032_vm3 }
 0x954   : > { %v6254_v36 = vsel %vm15012_vm8, %v15003_v34, %v6250_v5  ;;  %v6266_v18 = vsel %vm15013_vm9, %v6250_v5, %v15005_v1  ;;  %7965 = vmatprep.subr.bf16.mxu0 %v7746_v10  ;;  %v13297_v39 = vmul.f32 %v15023_v40, %v6359_v35  ;;  %v7747_v34 = vld [vmem:[#allocation2 + $0x290] sm:$0xff]  ;;  %v15025_v1 = vld [vmem:[#allocation10_spill] sm:$0xff]  ;;  %v15033_v10 = vld [vmem:[#allocation12_spill] sm:$0xff]  ;;  %vm15043_vm8 = vcmp.lt.s32.totalorder %v8816_v19, 126 }
 0x955   : > { %v6301_v28 = vmul.f32 %v15009_v55, %v6266_v18  ;;  %v6304_v61 = vmul.f32 %v15014_v4, %v6254_v36  ;;  %6963 = vrot.lane.b32.xlu1 %v14899_v25, %s14487_s18  ;;  %v6350_v8 = vpop.permute.xlu0 %6349  ;;  %8128 = vmatpush1.bf16.msra.mxu1 %v6209_v42  ;;  %v7754_v55 = vld [vmem:[#allocation2 + $0x2c8] sm:$0xff]  ;;  %v15031_v36 = vld [vmem:[#allocation91_spill] sm:$0xff]  ;;  %vm15044_vm9 = vmmov %vm15032_vm3 }
 0x956   : > { %v6367_v45 = vsel %vm15018_vm12, %v6350_v8, %v15010_v60  ;;  %8129 = vmatprep.subr.bf16.mxu1 %v7748_v46  ;;  %v6355_v0 = vsel %vm15024_vm11, %v15015_v41, %v6350_v8  ;;  %v7756_v8 = vld [vmem:[#allocation2 + $0x2d8] sm:$0xff]  ;;  %v7753_v41 = vld [vmem:[#allocation2 + $0x2c0] sm:$0xff]  ;;  %vm15045_vm10 = vmmov %vm15032_vm3 }
 0x957   : > { %v6309_v62 = vpack.c.bf16 %v6301_v28, %v6297_v57  ;;  %v6312_v13 = vpack.c.bf16 %v6304_v61, %v6300_v11  ;;  %v6336_v32 = vpop.permute.xlu1 %6335  ;;  %6969 = vrot.lane.b32.xlu0 %v11370_v26, %s14487_s18  ;;  %7966 = vmatpush1.bf16.msra.mxu0 %v7745_v38  ;;  %v6399_v16 = vmul.f32 %v15025_v1, %v6367_v45  ;;  %v15030_v57 = vld [vmem:[#allocation11_spill] sm:$0xff]  ;;  %vm15048_vm12 = vmmov %vm15043_vm8 }
 0x958   : > { %v6360_v37 = vsel %vm15020_vm0, %v6336_v32, %v15019_v44  ;;  %v6364_v42 = vsel %vm15022_vm14, %v15021_v63, %v6336_v32  ;;  %7967 = vmatprep.subr.bf16.mxu0 %v6310_v20  ;;  %v6402_v20 = vmul.f32 %v15030_v57, %v6355_v0  ;;  %vm15050_vm0 = vmmov %vm15043_vm8 }
 0x959   : > { %v6404_v14 = vmul.f32 %v15017_v15, %v6364_v42  ;;  %v13301_v58 = vmul.f32 %v15023_v40, %v6360_v37  ;;  %6971 = vrot.lane.b32.xlu1 %v11372_v30, %s14487_s18  ;;  %v6452_v2 = vpop.permute.xlu0 %6451  ;;  %8130 = vmatpush1.bf16.msra.mxu1 %v7747_v34  ;;  %v15035_v15 = vld [vmem:[#allocation94_spill] sm:$0xff]  ;;  %vm15051_vm14 = vmmov %vm15050_vm0 }
 0x95a   : > { %v6481_v12 = vsel %vm15027_vm13, %v15026_v22, %v6452_v2  ;;  %8131 = vmatprep.subr.bf16.mxu1 %v6312_v13  ;;  %v6477_v18 = vsel %vm15032_vm3, %v6452_v2, %v15031_v36  ;;  %v15039_v13 = vld [vmem:[#allocation13_spill] sm:$0xff]  ;;  %vm15053_vm11 = vmmov %vm15050_vm0 }
 0x95b   : > { %v6412_v21 = vpack.c.bf16 %v6404_v14, %v6400_v33  ;;  %v6413_v47 = vpack.c.bf16 %v13301_v58, %v13297_v39  ;;  %v6352_v3 = vpop.permute.xlu1 %6351  ;;  %6977 = vrot.lane.b32.xlu0 %v14898_v51, %s14487_s18  ;;  %7968 = vmatpush1.bf16.msra.mxu0 %v6309_v62  ;;  %v13331_v4 = vmul.f32 %v15033_v10, %v6481_v12  ;;  %v15042_v58 = vld [vmem:[#allocation93_spill] sm:$0xff]  ;;  %v8553_v12 = vld [vmem:[#allocation2 + $0x308] sm:$0xff]  ;;  %vm15055_vm13 = vmmov %vm15050_vm0 }
 0x95c   : > { %v6356_v17 = vsel %vm15028_vm1, %v15019_v44, %v6352_v3  ;;  %v6368_v56 = vsel %vm15029_vm2, %v6352_v3, %v15021_v63  ;;  %7969 = vmatprep.subr.bf16.mxu0 %v7754_v55  ;;  %v13345_v32 = vmul.f32 %v15039_v13, %v6477_v18  ;;  %v7755_v44 = vld [vmem:[#allocation2 + $0x2d0] sm:$0xff]  ;;  %v15041_v63 = vld [vmem:[#allocation28_spill] sm:$0xff]  ;;  %vm15060_vm1 = vcmp.lt.s32.totalorder %v8816_v19, 114  ;;  %vm15061_vm2 = vmmov %vm15050_vm0 }
 0x95d   : > { %v6403_v5 = vmul.f32 %v15025_v1, %v6368_v56  ;;  %v6406_v60 = vmul.f32 %v15030_v57, %v6356_v17  ;;  %6979 = vrot.lane.b32.xlu1 %v14900_v6, %s14487_s18  ;;  %v6468_v43 = vpop.permute.xlu0 %6467  ;;  %8132 = vmatpush1.bf16.msra.mxu1 %v6311_v29  ;;  %v15037_v29 = vld [vmem:[#allocation92_spill] sm:$0xff]  ;;  %v15046_v1 = vld [vmem:[#allocation31_spill] sm:$0xff]  ;;  %vm15062_vm3 = vmmov %vm15050_vm0 }
 0x95e   : > { %v6473_v35 = vsel %vm15034_vm4, %v15031_v36, %v6468_v43  ;;  %8133 = vmatprep.subr.bf16.mxu1 %v7756_v8  ;;  %v6485_v37 = vsel %vm15040_vm7, %v6468_v43, %v15026_v22  ;;  %v15047_v17 = vld [vmem:[#allocation95_spill] sm:$0xff]  ;;  %v15049_v55 = vld [vmem:[#allocation32_spill] sm:$0xff]  ;;  %v15052_v36 = vld [vmem:[#allocation98_spill] sm:$0xff] }
 0x95f   : > { %v6411_v11 = vpack.c.bf16 %v6403_v5, %v6399_v16  ;;  %v6414_v28 = vpack.c.bf16 %v6406_v60, %v6402_v20  ;;  %v6454_v61 = vpop.permute.xlu1 %6453  ;;  %7051 = vrot.lane.b32.xlu0 %v14945_v7, %s14488_s29  ;;  %7970 = vmatpush1.bf16.msra.mxu0 %v7753_v41  ;;  %v13359_v42 = vmul.f32 %v15041_v63, %v6473_v35  ;;  %v15056_v8 = vld [vmem:[#allocation30_spill] sm:$0xff]  ;;  %vm15064_vm4 = vmmov %vm15060_vm1 }
 0x960   : > { %v6478_v33 = vsel %vm15036_vm5, %v6454_v61, %v15035_v15  ;;  %v6482_v62 = vsel %vm15038_vm6, %v15037_v29, %v6454_v61  ;;  %7971 = vmatprep.subr.bf16.mxu0 %v6412_v21  ;;  %v13377_v16 = vmul.f32 %v15046_v1, %v6485_v37  ;;  %v8555_v61 = vld [vmem:[#allocation2 + $0x300] sm:$0xff]  ;;  %vm15068_vm5 = vmmov %vm15060_vm1 }
 0x961   : > { %v13348_v46 = vmul.f32 %v15033_v10, %v6482_v62  ;;  %v13351_v38 = vmul.f32 %v15039_v13, %v6478_v33  ;;  %7053 = vrot.lane.b32.xlu1 %v14951_v53, %s14488_s29  ;;  %v6554_v45 = vpop.permute.xlu0 %6553  ;;  %8134 = vmatpush1.bf16.msra.mxu1 %v7755_v44  ;;  %v15054_v10 = vld [vmem:[#allocation96_spill] sm:$0xff]  ;;  %v8557_v62 = vld [vmem:[#allocation2 + $0x310] sm:$0xff]  ;;  %v15057_v13 = vld [vmem:[#allocation33_spill] sm:$0xff] }
 0x962   : > { %v6583_v2 = vsel %vm15043_vm8, %v15042_v58, %v6554_v45  ;;  %8135 = vmatprep.subr.bf16.mxu1 %v6414_v28  ;;  %v6579_v56 = vsel %vm15048_vm12, %v6554_v45, %v15047_v17  ;;  %v8554_v28 = vld [vmem:[#allocation2 + $0x318] sm:$0xff]  ;;  %vm15070_vm6 = vmmov %vm15060_vm1  ;;  %vm15078_vm12 = vcmp.lt.s32.totalorder %v8816_v19, 113 }
 0x963   : > { %v6529_v40 = vpack.c.bf16 %v13348_v46, %v13331_v4  ;;  %v6530_v39 = vpack.c.bf16 %v13351_v38, %v13345_v32  ;;  %v6470_v14 = vpop.permute.xlu1 %6469  ;;  %7059 = vrot.lane.b32.xlu0 %v14946_v31, %s14488_s29  ;;  %7972 = vmatpush1.bf16.msra.mxu0 %v6411_v11  ;;  %v13391_v57 = vmul.f32 %v15049_v55, %v6583_v2  ;;  %v15058_v44 = vld [vmem:[#allocation16_spill] sm:$0xff]  ;;  %v15059_v2 = vld [vmem:[#allocation97_spill] sm:$0xff]  ;;  %vm15071_vm7 = vmmov %vm15060_vm1 }
 0x964   : > { %v6474_v34 = vsel %vm15044_vm9, %v15035_v15, %v6470_v14  ;;  %v6486_v0 = vsel %vm15045_vm10, %v6470_v14, %v15037_v29  ;;  %7973 = vmatprep.subr.bf16.mxu0 %v8553_v12  ;;  %v13412_v41 = vmul.f32 %v15056_v8, %v6579_v56  ;;  %v8556_v29 = vld [vmem:[#allocation2 + $0x328] sm:$0xff]  ;;  %v8559_v12 = vld [vmem:[#allocation2 + $0x320] sm:$0xff]  ;;  %v15063_v56 = vld [vmem:[#allocation99_spill] sm:$0xff] }
 0x965   : > { %v13380_v21 = vmul.f32 %v15041_v63, %v6474_v34  ;;  %v13383_v3 = vmul.f32 %v15046_v1, %v6486_v0  ;;  %7061 = vrot.lane.b32.xlu1 %v14947_v48, %s14488_s29  ;;  %v6570_v22 = vpop.permute.xlu0 %6569  ;;  %8136 = vmatpush1.bf16.msra.mxu1 %v6413_v47  ;;  %vm15072_vm8 = vmmov %vm15060_vm1  ;;  %v15073_v32 = vld [vmem:[#allocation15_spill] sm:$0xff]  ;;  %v7780_v4 = vld [vmem:[#allocation2 + $0x398] sm:$0xff] }
 0x966   : > { %v6575_v60 = vsel %vm15050_vm0, %v15047_v17, %v6570_v22  ;;  %v6587_v47 = vsel %vm15051_vm14, %v6570_v22, %v15042_v58  ;;  %8137 = vmatprep.subr.bf16.mxu1 %v8554_v28  ;;  %v8558_v22 = vld [vmem:[#allocation2 + $0x338] sm:$0xff]  ;;  %v7770_v17 = vld [vmem:[#allocation2 + $0x348] sm:$0xff]  ;;  %vm15074_vm9 = vmmov %vm15060_vm1 }
 0x967   : > { %v6531_v20 = vpack.c.bf16 %v13380_v21, %v13359_v42  ;;  %v6532_v5 = vpack.c.bf16 %v13383_v3, %v13377_v16  ;;  %v6556_v43 = vpop.permute.xlu1 %6555  ;;  %7067 = vrot.lane.b32.xlu0 %v14948_v24, %s14488_s29  ;;  %7974 = vmatpush1.bf16.msra.mxu0 %v8555_v61  ;;  %v13423_v45 = vmul.f32 %v15057_v13, %v6575_v60  ;;  %vm15075_vm10 = vmmov %vm15060_vm1  ;;  %v7778_v16 = vld [vmem:[#allocation2 + $0x388] sm:$0xff]  ;;  %v15077_v3 = vld [vmem:[#allocation37_spill] sm:$0xff] }
 0x968   : > { %v6580_v18 = vsel %vm15053_vm11, %v6556_v43, %v15052_v36  ;;  %v6584_v11 = vsel %vm15055_vm13, %v15054_v10, %v6556_v43  ;;  %7975 = vmatprep.subr.bf16.mxu0 %v8556_v29  ;;  %v13426_v37 = vmul.f32 %v15058_v44, %v6587_v47  ;;  %v15066_v29 = vld [vmem:[#allocation17_spill] sm:$0xff]  ;;  %vm15080_vm0 = vmmov %vm15078_vm12 }
 0x969   : > { %v13415_v35 = vmul.f32 %v15049_v55, %v6584_v11  ;;  %v13418_v15 = vmul.f32 %v15056_v8, %v6580_v18  ;;  %7069 = vrot.lane.b32.xlu1 %v14949_v23, %s14488_s29  ;;  %v6656_v33 = vpop.permute.xlu0 %6655  ;;  %8138 = vmatpush1.bf16.msra.mxu1 %v8557_v62  ;;  %v15065_v18 = vld [vmem:[#allocation14_spill] sm:$0xff]  ;;  %v7772_v8 = vld [vmem:[#allocation2 + $0x358] sm:$0xff]  ;;  %vm15082_vm14 = vmmov %vm15080_vm0 }
 0x96a   : > { %v6685_v34 = vsel %vm15060_vm1, %v15059_v2, %v6656_v33  ;;  %8139 = vmatprep.subr.bf16.mxu1 %v8558_v22  ;;  %v6681_v55 = vsel %vm15064_vm4, %v6656_v33, %v15063_v56  ;;  %v7769_v33 = vld [vmem:[#allocation2 + $0x340] sm:$0xff]  ;;  %vm15083_vm11 = vmmov %vm15080_vm0 }
 0x96b   : > { %v6631_v63 = vpack.c.bf16 %v13415_v35, %v13391_v57  ;;  %v6632_v14 = vpack.c.bf16 %v13418_v15, %v13412_v41  ;;  %v6572_v58 = vpop.permute.xlu1 %6571  ;;  %7075 = vrot.lane.b32.xlu0 %v14950_v49, %s14488_s29  ;;  %7976 = vmatpush1.bf16.msra.mxu0 %v8559_v12  ;;  %v13464_v62 = vmul.f32 %v15066_v29, %v6681_v55  ;;  %v8424_v12 = vld [vmem:[%s14128_s1 + $0x40] ss:$8 sm:$0xf]  ;;  %vm15086_vm13 = vmmov %vm15080_vm0 }
 0x96c   : > { %v6576_v0 = vsel %vm15061_vm2, %v15052_v36, %v6572_v58  ;;  %v6588_v1 = vsel %vm15062_vm3, %v6572_v58, %v15054_v10  ;;  %7977 = vmatprep.subr.bf16.mxu0 %v7770_v17  ;;  %v8560_v36 = vld [vmem:[#allocation2 + $0x330] sm:$0xff]  ;;  %v13455_v10 = vmul.f32 %v15065_v18, %v6685_v34  ;;  %v15069_v58 = vld [vmem:[#allocation100_spill] sm:$0xff]  ;;  %v7786_v41 = vld [vmem:[#allocation2 + $0x3c8] sm:$0xff] }
 0x96d   : > { %v13447_v60 = vmul.f32 %v15057_v13, %v6576_v0  ;;  %v13450_v43 = vmul.f32 %v15058_v44, %v6588_v1  ;;  %7077 = vrot.lane.b32.xlu1 %v11339_v50, %s14488_s29  ;;  %v6672_v47 = vpop.permute.xlu0 %6671  ;;  %8140 = vmatpush1.bf16.msra.mxu1 %v8560_v36  ;;  %v15067_v13 = vld [vmem:[#allocation101_spill] sm:$0xff]  ;;  %v7771_v17 = vld [vmem:[#allocation2 + $0x350] sm:$0xff]  ;;  %vm15087_vm1 = vmmov %vm15080_vm0 }
 0x96e   : > { %8141 = vmatprep.subr.bf16.mxu1 %v7772_v8  ;;  %v7788_v35 = vld [vmem:[#allocation2 + $0x3d8] sm:$0xff]  ;;  %vm15088_vm2 = vmmov %vm15080_vm0 }
 0x96f   : > { %v6633_v11 = vpack.c.bf16 %v13447_v60, %v13423_v45  ;;  %v6634_v28 = vpack.c.bf16 %v13450_v43, %v13426_v37  ;;  %v6658_v61 = vpop.permute.xlu1 %6657  ;;  %7055 = vrot.lane.b32.xlu0 %v11350_v52, %s14488_s29  ;;  %7978 = vmatpush1.bf16.msra.mxu0 %v7769_v33  ;;  %v6677_v37 = vsel %vm15071_vm7, %v15063_v56, %v6672_v47  ;;  %vm15089_vm3 = vmmov %vm15080_vm0 }
 0x970   : > { %v6682_v44 = vsel %vm15068_vm5, %v6658_v61, %v15067_v13  ;;  %v6686_v34 = vsel %vm15070_vm6, %v15069_v58, %v6658_v61  ;;  %7979 = vmatprep.subr.bf16.mxu0 %v6530_v39  ;;  %v6689_v56 = vsel %vm15072_vm8, %v6672_v47, %v15059_v2  ;;  %v13502_v38 = vmul.f32 %v15073_v32, %v6677_v37  ;;  %v15076_v47 = vld [vmem:[#allocation7_spill] sm:$0xff]  ;;  %vm15090_vm4 = vmmov %vm15080_vm0 }
 0x971   : > { %v13476_v0 = vmul.f32 %v15065_v18, %v6686_v34  ;;  %v13479_v1 = vmul.f32 %v15066_v29, %v6682_v44  ;;  %7057 = vrot.lane.b32.xlu1 %v11352_v59, %s14488_s29  ;;  %v6746_v22 = vpop.permute.xlu0 %6745  ;;  %8142 = vmatpush1.bf16.msra.mxu1 %v7771_v17  ;;  %v13511_v18 = vrot.slane %v8424_v12, %v15076_v47  ;;  %v7777_v44 = vld [vmem:[#allocation2 + $0x380] sm:$0xff]  ;;  %vm15091_vm5 = vmmov %vm15080_vm0 }
 0x972   : > { %8143 = vmatprep.subr.bf16.mxu1 %v6532_v5  ;;  %v13517_v5 = vmul.f32 %v15077_v3, %v6689_v56  ;;  %v7779_v56 = vld [vmem:[#allocation2 + $0x390] sm:$0xff]  ;;  %vm15092_vm6 = vmmov %vm15080_vm0 }
 0x973   : > { %v6733_v55 = vpack.c.bf16 %v13476_v0, %v13455_v10  ;;  %v6734_v43 = vpack.c.bf16 %v13479_v1, %v13464_v62  ;;  %v6674_v36 = vpop.permute.xlu1 %6673  ;;  %7063 = vrot.lane.b32.xlu0 %v14897_v54, %s14488_s29  ;;  %7980 = vmatpush1.bf16.msra.mxu0 %v6529_v40  ;;  %vm15093_vm7 = vmmov %vm15080_vm0 }
 0x974   : > { %v6678_v39 = vsel %vm15074_vm9, %v15067_v13, %v6674_v36  ;;  %v6690_v2 = vsel %vm15075_vm10, %v6674_v36, %v15069_v58  ;;  %7981 = vmatprep.subr.bf16.mxu0 %v7778_v16  ;;  %v15079_v58 = vld [vmem:[#allocation36_spill] sm:$0xff]  ;;  %v15084_v16 = vld [vmem:[#allocation6_spill] sm:$0xff]  ;;  %vm15094_vm8 = vmmov %vm15080_vm0 }
 0x975   : > { %v13520_v61 = vmul.f32 %v15073_v32, %v6678_v39  ;;  %v13523_v8 = vmul.f32 %v15077_v3, %v6690_v2  ;;  %7065 = vrot.lane.b32.xlu1 %v14899_v25, %s14488_s29  ;;  %v6754_v33 = vpop.permute.xlu0 %6753  ;;  %8144 = vmatpush1.bf16.msra.mxu1 %v6531_v20  ;;  %v15081_v20 = vld [vmem:[#allocation9_spill] sm:$0xff]  ;;  %v13564_v3 = vrot.slane %v8424_v12, %v15084_v16  ;;  %vm15095_vm9 = vmmov %vm15080_vm0 }
 0x976   : > { %v6785_v29 = vsel %vm15078_vm12, %v6746_v22, %v6754_v33  ;;  %8145 = vmatprep.subr.bf16.mxu1 %v7780_v4  ;;  %v13550_v37 = vrot.slane %v8424_v12, %v15081_v20  ;;  %vm15096_vm10 = vmmov %vm15080_vm0 }
 0x977   : > { %v6735_v46 = vpack.c.bf16 %v13520_v61, %v13502_v38  ;;  %v6736_v40 = vpack.c.bf16 %v13523_v8, %v13517_v5  ;;  %v6756_v13 = vpop.permute.xlu1 %6755  ;;  %7071 = vrot.lane.b32.xlu0 %v11370_v26, %s14488_s29  ;;  %7982 = vmatpush1.bf16.msra.mxu0 %v7777_v44  ;;  %v13542_v42 = vmul.f32 %v13511_v18, %v6785_v29  ;;  %v15085_v5 = vld [vmem:[#allocation8_spill] sm:$0xff]  ;;  %vm15097_vm12 = vmmov %vm15080_vm0 }
 0x978   : > { %v6786_v34 = vsel %vm15080_vm0, %v15079_v58, %v6756_v13  ;;  %7983 = vmatprep.subr.bf16.mxu0 %v6632_v14  ;;  %vm15098_vm0 = vcmp.lt.s32.totalorder %v8816_v19, 112 }
 0x979   : > { %v13545_v21 = vmul.f32 %v13511_v18, %v6786_v34  ;;  %7073 = vrot.lane.b32.xlu1 %v11372_v30, %s14488_s29  ;;  %v6762_v17 = vpop.permute.xlu0 %6761  ;;  %8146 = vmatpush1.bf16.msra.mxu1 %v7779_v56  ;;  %v7787_v34 = vld [vmem:[#allocation2 + $0x3d0] sm:$0xff] }
 0x97a   : > { %v6781_v36 = vsel %vm15082_vm14, %v6754_v33, %v6762_v17  ;;  %8147 = vmatprep.subr.bf16.mxu1 %v6634_v28  ;;  %v13574_v28 = vrot.slane %v8424_v12, %v15085_v5  ;;  %v7785_v12 = vld [vmem:[#allocation2 + $0x3c0] sm:$0xff]  ;;  %vm15099_vm14 = vmmov %vm15098_vm0 }
 0x97b   : > { %v6831_v32 = vpack.c.bf16 %v13545_v21, %v13542_v42  ;;  %v6764_v39 = vpop.permute.xlu1 %6763  ;;  %7079 = vrot.lane.b32.xlu0 %v14898_v51, %s14488_s29  ;;  %7984 = vmatpush1.bf16.msra.mxu0 %v6631_v63  ;;  %v6816_v15 = vmul.f32 %v13550_v37, %v6781_v36 }
 0x97c   : > { %v6782_v2 = vsel %vm15083_vm11, %v6756_v13, %v6764_v39  ;;  %7985 = vmatprep.subr.bf16.mxu0 %v7786_v41  ;;  %vm15100_vm11 = vmmov %vm15098_vm0 }
 0x97d   : > { %v6820_v14 = vmul.f32 %v13550_v37, %v6782_v2  ;;  %7081 = vrot.lane.b32.xlu1 %v14900_v6, %s14488_s29  ;;  %v6770_v8 = vpop.permute.xlu0 %6769  ;;  %8148 = vmatpush1.bf16.msra.mxu1 %v6633_v11 }
 0x97e   : > { %v6777_v33 = vsel %vm15086_vm13, %v6762_v17, %v6770_v8  ;;  %v6789_v57 = vsel %vm15087_vm1, %v6770_v8, %v6746_v22  ;;  %8149 = vmatprep.subr.bf16.mxu1 %v7788_v35  ;;  %v8425_v35 = vld [vmem:[%s14128_s1 + $0x41] ss:$8 sm:$0xf]  ;;  %vm15101_vm13 = vmmov %vm15098_vm0 }
 0x97f   : > { %v6832_v63 = vpack.c.bf16 %v6820_v14, %v6816_v15  ;;  %v6772_v29 = vpop.permute.xlu1 %6771  ;;  %7153 = vrot.lane.b32.xlu0 %v14945_v7, %s14489_s30  ;;  %v6817_v4 = vmul.f32 %v13564_v3, %v6777_v33  ;;  %7986 = vmatpush1.bf16.msra.mxu0 %v7785_v12  ;;  %v6818_v45 = vmul.f32 %v13574_v28, %v6789_v57  ;;  %vm15102_vm1 = vmmov %vm15098_vm0 }
 0x980   : > { %v6778_v13 = vsel %vm15088_vm2, %v6764_v39, %v6772_v29  ;;  %v6790_v22 = vsel %vm15089_vm3, %v6772_v29, %v15079_v58  ;;  %7987 = vmatprep.subr.bf16.mxu0 %v6734_v43  ;;  %vm15103_vm2 = vmmov %vm15098_vm0 }
 0x981   : > { %v6821_v60 = vmul.f32 %v13564_v3, %v6778_v13  ;;  %v6822_v11 = vmul.f32 %v13574_v28, %v6790_v22  ;;  %7155 = vrot.lane.b32.xlu1 %v14951_v53, %s14489_s30  ;;  %v6750_v44 = vpop.permute.xlu0 %6749  ;;  %8150 = vmatpush1.bf16.msra.mxu1 %v7787_v34  ;;  %vm15104_vm3 = vmmov %vm15098_vm0 }
 0x982   : > { %8151 = vmatprep.subr.bf16.mxu1 %v6736_v40 }
 0x983   : > { %v6833_v42 = vpack.c.bf16 %v6821_v60, %v6817_v4  ;;  %v6834_v21 = vpack.c.bf16 %v6822_v11, %v6818_v45  ;;  %v6752_v58 = vpop.permute.xlu1 %6751  ;;  %7161 = vrot.lane.b32.xlu0 %v14946_v31, %s14489_s30  ;;  %7988 = vmatpush1.bf16.msra.mxu0 %v6733_v55  ;;  %v6904_v11 = vrot.slane %v8425_v35, %v15081_v20 }
 0x984   : > { %7998 = vmatprep.subr.bf16.mxu0 %v6832_v63 }
 0x985   : > { %7163 = vrot.lane.b32.xlu1 %v14947_v48, %s14489_s30  ;;  %v6758_v17 = vpop.permute.xlu0 %6757  ;;  %8152 = vmatpush1.bf16.msra.mxu1 %v6735_v46 }
 0x986   : > { %v6787_v62 = vsel %vm15090_vm4, %v6750_v44, %v6758_v17  ;;  %8162 = vmatprep.subr.bf16.mxu1 %v6834_v21  ;;  %7990 = vmatmul.mubr.bf16.vlgmr.msra.gmra.mrb[16].mxu0 %v13164_v9  ;;  %vm15105_vm4 = vmmov %vm15098_vm0 }
 0x987   : > { %v6760_v1 = vpop.permute.xlu1 %6759  ;;  %7169 = vrot.lane.b32.xlu0 %v14948_v24, %s14489_s30  ;;  %v6823_v0 = vmul.f32 %v13511_v18, %v6787_v62  ;;  %7999 = vmatpush1.bf16.msra.mxu0 %v6831_v32 }
 0x988   : > { %v6788_v10 = vsel %vm15091_vm5, %v6752_v58, %v6760_v1  ;;  %8154 = vmatmul.mubr.bf16.vlgmr.msra.gmra.mrb[16].mxu1 %v13164_v9  ;;  %vm15106_vm5 = vmmov %vm15098_vm0 }
 0x989   : > { %v6827_v55 = vmul.f32 %v13511_v18, %v6788_v10  ;;  %7171 = vrot.lane.b32.xlu1 %v14949_v23, %s14489_s30  ;;  %v6766_v43 = vpop.permute.xlu0 %6765  ;;  %8163 = vmatpush1.bf16.msra.mxu1 %v6833_v42  ;;  %v6912_v10 = vrot.slane %v8425_v35, %v15085_v5 }
 0x98a   : > { %v6783_v38 = vsel %vm15092_vm6, %v6758_v17, %v6766_v43  ;;  %v6908_v17 = vrot.slane %v8425_v35, %v15084_v16  ;;  %vm15107_vm6 = vmmov %vm15098_vm0 }
 0x98b   : > { %v6835_v61 = vpack.c.bf16 %v6827_v55, %v6823_v0  ;;  %v6768_v46 = vpop.permute.xlu1 %6767  ;;  %7177 = vrot.lane.b32.xlu0 %v14950_v49, %s14489_s30  ;;  %v6824_v18 = vmul.f32 %v13550_v37, %v6783_v38 }
 0x98c   : > { %v6784_v40 = vsel %vm15093_vm7, %v6760_v1, %v6768_v46  ;;  %vm15108_vm7 = vmmov %vm15098_vm0 }
 0x98d   : > { %v6828_v56 = vmul.f32 %v13550_v37, %v6784_v40  ;;  %7179 = vrot.lane.b32.xlu1 %v11339_v50, %s14489_s30  ;;  %v6774_v36 = vpop.permute.xlu0 %6773 }
 0x98e   : > { %v6779_v9 = vsel %vm15094_vm8, %v6766_v43, %v6774_v36  ;;  %v6791_v32 = vsel %vm15095_vm9, %v6774_v36, %v6750_v44  ;;  %vm15109_vm8 = vmmov %vm15098_vm0 }
 0x98f   : > { %v6836_v39 = vpack.c.bf16 %v6828_v56, %v6824_v18  ;;  %v6776_v2 = vpop.permute.xlu1 %6775  ;;  %7157 = vrot.lane.b32.xlu0 %v11350_v52, %s14489_s30  ;;  %v6825_v41 = vmul.f32 %v13564_v3, %v6779_v9  ;;  %v6826_v14 = vmul.f32 %v13574_v28, %v6791_v32  ;;  %vm15110_vm9 = vmmov %vm15098_vm0 }
 0x990   : > { %v6780_v37 = vsel %vm15096_vm10, %v6768_v46, %v6776_v2  ;;  %v6792_v15 = vsel %vm15097_vm12, %v6776_v2, %v6752_v58  ;;  %vm15111_vm10 = vmmov %vm15098_vm0 }
 0x991   : > { %v6829_v8 = vmul.f32 %v13564_v3, %v6780_v37  ;;  %v6830_v33 = vmul.f32 %v13574_v28, %v6792_v15  ;;  %7159 = vrot.lane.b32.xlu1 %v11352_v59, %s14489_s30  ;;  %v6848_v57 = vpop.permute.xlu0 %6847  ;;  %8000 = vmatprep.subr.bf16.mxu0 %v6836_v39  ;;  %v6900_v3 = vrot.slane %v8425_v35, %v15076_v47  ;;  %vm15112_vm12 = vmmov %vm15098_vm0 }
 0x992   : > { %8001 = vmatpush1.bf16.msra.mxu0 %v6835_v61 }
 0x993   : > { %v6837_v63 = vpack.c.bf16 %v6829_v8, %v6825_v41  ;;  %v6838_v29 = vpack.c.bf16 %v6830_v33, %v6826_v14  ;;  %v6850_v12 = vpop.permute.xlu1 %6849  ;;  %7165 = vrot.lane.b32.xlu0 %v14897_v54, %s14489_s30 }
 0x995   : > { %7167 = vrot.lane.b32.xlu1 %v14899_v25, %s14489_s30  ;;  %v6856_v28 = vpop.permute.xlu0 %6855  ;;  %8164 = vmatprep.subr.bf16.mxu1 %v6838_v29 }
 0x996   : > { %v6887_v4 = vsel %vm15098_vm0, %v6848_v57, %v6856_v28  ;;  %8165 = vmatpush1.bf16.msra.mxu1 %v6837_v63 }
 0x997   : > { %v6858_v13 = vpop.permute.xlu1 %6857  ;;  %7173 = vrot.lane.b32.xlu0 %v11370_v26, %s14489_s30  ;;  %v6917_v45 = vmul.f32 %v6900_v3, %v6887_v4 }
 0x998   : > { %v6888_v22 = vsel %vm15099_vm14, %v6850_v12, %v6858_v13  ;;  %vm15113_vm14 = vcmp.lt.s32.totalorder %v8816_v19, 111 }
 0x999   : > { %v6921_v60 = vmul.f32 %v6900_v3, %v6888_v22  ;;  %7175 = vrot.lane.b32.xlu1 %v11372_v30, %s14489_s30  ;;  %v6864_v44 = vpop.permute.xlu0 %6863 }
 0x99a   : > { %v6883_v34 = vsel %vm15100_vm11, %v6856_v28, %v6864_v44  ;;  %vm15114_vm11 = vmmov %vm15113_vm14 }
 0x99b   : > { %v6933_v42 = vpack.c.bf16 %v6921_v60, %v6917_v45  ;;  %v6866_v21 = vpop.permute.xlu1 %6865  ;;  %7181 = vrot.lane.b32.xlu0 %v14898_v51, %s14489_s30  ;;  %v6918_v62 = vmul.f32 %v6904_v11, %v6883_v34 }
 0x99c   : > { %v6884_v58 = vsel %vm15101_vm13, %v6858_v13, %v6866_v21  ;;  %vm15115_vm13 = vmmov %vm15114_vm11 }
 0x99d   : > { %v6922_v1 = vmul.f32 %v6904_v11, %v6884_v58  ;;  %7183 = vrot.lane.b32.xlu1 %v14900_v6, %s14489_s30  ;;  %v6872_v0 = vpop.permute.xlu0 %6871 }
 0x99e   : > { %v6879_v55 = vsel %vm15102_vm1, %v6864_v44, %v6872_v0  ;;  %v6891_v43 = vsel %vm15103_vm2, %v6872_v0, %v6848_v57  ;;  %v8426_v0 = vld [vmem:[%s14128_s1 + $0x42] ss:$8 sm:$0xf]  ;;  %vm15116_vm1 = vmmov %vm15114_vm11 }
 0x99f   : > { %v6934_v38 = vpack.c.bf16 %v6922_v1, %v6918_v62  ;;  %v6874_v61 = vpop.permute.xlu1 %6873  ;;  %7255 = vrot.lane.b32.xlu0 %v14945_v7, %s14490_s27  ;;  %v6919_v46 = vmul.f32 %v6908_v17, %v6879_v55  ;;  %v6920_v56 = vmul.f32 %v6912_v10, %v6891_v43  ;;  %vm15117_vm2 = vmmov %vm15116_vm1 }
 0x9a0   : > { %v6880_v40 = vsel %vm15104_vm3, %v6866_v21, %v6874_v61  ;;  %v6892_v18 = vsel %vm15105_vm4, %v6874_v61, %v6850_v12  ;;  %vm15118_vm3 = vmmov %vm15116_vm1 }
 0x9a1   : > { %v6923_v36 = vmul.f32 %v6908_v17, %v6880_v40  ;;  %v6924_v9 = vmul.f32 %v6912_v10, %v6892_v18  ;;  %7257 = vrot.lane.b32.xlu1 %v14951_v53, %s14490_s27  ;;  %v6852_v32 = vpop.permute.xlu0 %6851  ;;  %8002 = vmatprep.subr.bf16.mxu0 %v6934_v38  ;;  %vm15119_vm4 = vmmov %vm15116_vm1 }
 0x9a2   : > { %8003 = vmatpush1.bf16.msra.mxu0 %v6933_v42 }
 0x9a3   : > { %v6935_v39 = vpack.c.bf16 %v6923_v36, %v6919_v46  ;;  %v6936_v2 = vpack.c.bf16 %v6924_v9, %v6920_v56  ;;  %v6854_v41 = vpop.permute.xlu1 %6853  ;;  %7263 = vrot.lane.b32.xlu0 %v14946_v31, %s14490_s27  ;;  %v7006_v36 = vrot.slane %v8426_v0, %v15081_v20 }
 0x9a5   : > { %7265 = vrot.lane.b32.xlu1 %v14947_v48, %s14490_s27  ;;  %v6860_v37 = vpop.permute.xlu0 %6859  ;;  %8166 = vmatprep.subr.bf16.mxu1 %v6936_v2 }
 0x9a6   : > { %v6889_v15 = vsel %vm15106_vm5, %v6852_v32, %v6860_v37  ;;  %8167 = vmatpush1.bf16.msra.mxu1 %v6935_v39  ;;  %vm15120_vm5 = vmmov %vm15116_vm1 }
 0x9a7   : > { %v6862_v14 = vpop.permute.xlu1 %6861  ;;  %7271 = vrot.lane.b32.xlu0 %v14948_v24, %s14490_s27  ;;  %v6925_v33 = vmul.f32 %v6900_v3, %v6889_v15 }
 0x9a8   : > { %v6890_v8 = vsel %vm15107_vm6, %v6854_v41, %v6862_v14  ;;  %vm15121_vm6 = vmmov %vm15116_vm1 }
 0x9a9   : > { %v6929_v57 = vmul.f32 %v6900_v3, %v6890_v8  ;;  %7273 = vrot.lane.b32.xlu1 %v14949_v23, %s14490_s27  ;;  %v6868_v35 = vpop.permute.xlu0 %6867  ;;  %v7014_v8 = vrot.slane %v8426_v0, %v15085_v5 }
 0x9aa   : > { %v6885_v63 = vsel %vm15108_vm7, %v6860_v37, %v6868_v35  ;;  %v7010_v37 = vrot.slane %v8426_v0, %v15084_v16  ;;  %vm15122_vm7 = vmmov %vm15116_vm1 }
 0x9ab   : > { %v6937_v29 = vpack.c.bf16 %v6929_v57, %v6925_v33  ;;  %v6870_v12 = vpop.permute.xlu1 %6869  ;;  %7279 = vrot.lane.b32.xlu0 %v14950_v49, %s14490_s27  ;;  %v6926_v4 = vmul.f32 %v6904_v11, %v6885_v63 }
 0x9ac   : > { %v6886_v28 = vsel %vm15109_vm8, %v6862_v14, %v6870_v12  ;;  %vm15123_vm8 = vmmov %vm15116_vm1 }
 0x9ad   : > { %v6930_v13 = vmul.f32 %v6904_v11, %v6886_v28  ;;  %7281 = vrot.lane.b32.xlu1 %v11339_v50, %s14490_s27  ;;  %v6876_v3 = vpop.permute.xlu0 %6875 }
 0x9ae   : > { %v6881_v22 = vsel %vm15110_vm9, %v6868_v35, %v6876_v3  ;;  %v6893_v45 = vsel %vm15111_vm10, %v6876_v3, %v6852_v32  ;;  %vm15124_vm9 = vmmov %vm15116_vm1 }
 0x9af   : > { %v6938_v60 = vpack.c.bf16 %v6930_v13, %v6926_v4  ;;  %v6878_v44 = vpop.permute.xlu1 %6877  ;;  %7259 = vrot.lane.b32.xlu0 %v11350_v52, %s14490_s27  ;;  %v6927_v34 = vmul.f32 %v6908_v17, %v6881_v22  ;;  %v6928_v21 = vmul.f32 %v6912_v10, %v6893_v45  ;;  %vm15125_vm10 = vmmov %vm15116_vm1 }
 0x9b0   : > { %v6882_v42 = vsel %vm15112_vm12, %v6870_v12, %v6878_v44  ;;  %v6894_v11 = vsel %vm15098_vm0, %v6878_v44, %v6854_v41  ;;  %vm15126_vm12 = vmmov %vm15116_vm1 }
 0x9b1   : > { %v6931_v58 = vmul.f32 %v6908_v17, %v6882_v42  ;;  %v6932_v62 = vmul.f32 %v6912_v10, %v6894_v11  ;;  %7261 = vrot.lane.b32.xlu1 %v11352_v59, %s14490_s27  ;;  %v6950_v1 = vpop.permute.xlu0 %6949  ;;  %8004 = vmatprep.subr.bf16.mxu0 %v6938_v60  ;;  %v7002_v17 = vrot.slane %v8426_v0, %v15076_v47  ;;  %vm15127_vm0 = vmmov %vm15116_vm1 }
 0x9b2   : > { %8005 = vmatpush1.bf16.msra.mxu0 %v6937_v29 }
 0x9b3   : > { %v6939_v55 = vpack.c.bf16 %v6931_v58, %v6927_v34  ;;  %v6940_v43 = vpack.c.bf16 %v6932_v62, %v6928_v21  ;;  %v6952_v38 = vpop.permute.xlu1 %6951  ;;  %7267 = vrot.lane.b32.xlu0 %v14897_v54, %s14490_s27 }
 0x9b5   : > { %7269 = vrot.lane.b32.xlu1 %v14899_v25, %s14490_s27  ;;  %v6958_v10 = vpop.permute.xlu0 %6957  ;;  %8168 = vmatprep.subr.bf16.mxu1 %v6940_v43 }
 0x9b6   : > { %v6989_v61 = vsel %vm15113_vm14, %v6950_v1, %v6958_v10  ;;  %8169 = vmatpush1.bf16.msra.mxu1 %v6939_v55  ;;  %vm15128_vm14 = vmmov %vm15127_vm0 }
 0x9b7   : > { %v6960_v46 = vpop.permute.xlu1 %6959  ;;  %7275 = vrot.lane.b32.xlu0 %v11370_v26, %s14490_s27  ;;  %v7019_v18 = vmul.f32 %v7002_v17, %v6989_v61 }
 0x9b8   : > { %v6990_v40 = vsel %vm15114_vm11, %v6952_v38, %v6960_v46  ;;  %vm15129_vm11 = vcmp.lt.s32.totalorder %v8816_v19, 110 }
 0x9b9   : > { %v7023_v56 = vmul.f32 %v7002_v17, %v6990_v40  ;;  %7277 = vrot.lane.b32.xlu1 %v11372_v30, %s14490_s27  ;;  %v6966_v9 = vpop.permute.xlu0 %6965 }
 0x9ba   : > { %v6985_v32 = vsel %vm15115_vm13, %v6958_v10, %v6966_v9  ;;  %vm15130_vm13 = vmmov %vm15129_vm11 }
 0x9bb   : > { %v7035_v39 = vpack.c.bf16 %v7023_v56, %v7019_v18  ;;  %v6968_v2 = vpop.permute.xlu1 %6967  ;;  %7283 = vrot.lane.b32.xlu0 %v14898_v51, %s14490_s27  ;;  %v7020_v15 = vmul.f32 %v7006_v36, %v6985_v32 }
 0x9bc   : > { %v6986_v41 = vsel %vm15116_vm1, %v6960_v46, %v6968_v2  ;;  %vm15131_vm1 = vmmov %vm15129_vm11 }
 0x9bd   : > { %v7024_v14 = vmul.f32 %v7006_v36, %v6986_v41  ;;  %7285 = vrot.lane.b32.xlu1 %v14900_v6, %s14490_s27  ;;  %v6974_v33 = vpop.permute.xlu0 %6973 }
 0x9be   : > { %v6981_v57 = vsel %vm15117_vm2, %v6966_v9, %v6974_v33  ;;  %v6993_v35 = vsel %vm15118_vm3, %v6974_v33, %v6950_v1  ;;  %v8427_v33 = vld [vmem:[%s14128_s1 + $0x43] ss:$8 sm:$0xf]  ;;  %vm15132_vm2 = vmmov %vm15131_vm1 }
 0x9bf   : > { %v7036_v63 = vpack.c.bf16 %v7024_v14, %v7020_v15  ;;  %v6976_v29 = vpop.permute.xlu1 %6975  ;;  %7357 = vrot.lane.b32.xlu0 %v14945_v7, %s14491_s28  ;;  %v7021_v12 = vmul.f32 %v7010_v37, %v6981_v57  ;;  %v7022_v13 = vmul.f32 %v7014_v8, %v6993_v35  ;;  %vm15133_vm3 = vmmov %vm15131_vm1 }
 0x9c0   : > { %v6982_v28 = vsel %vm15119_vm4, %v6968_v2, %v6976_v29  ;;  %v6994_v4 = vsel %vm15120_vm5, %v6976_v29, %v6952_v38  ;;  %vm15134_vm4 = vmmov %vm15131_vm1 }
 0x9c1   : > { %v7025_v3 = vmul.f32 %v7010_v37, %v6982_v28  ;;  %v7026_v22 = vmul.f32 %v7014_v8, %v6994_v4  ;;  %7359 = vrot.lane.b32.xlu1 %v14951_v53, %s14491_s28  ;;  %v6954_v45 = vpop.permute.xlu0 %6953  ;;  %8006 = vmatprep.subr.bf16.mxu0 %v7036_v63  ;;  %vm15136_vm5 = vmmov %vm15131_vm1 }
 0x9c2   : > { %8007 = vmatpush1.bf16.msra.mxu0 %v7035_v39 }
 0x9c3   : > { %v7037_v60 = vpack.c.bf16 %v7025_v3, %v7021_v12  ;;  %v7038_v44 = vpack.c.bf16 %v7026_v22, %v7022_v13  ;;  %v6956_v34 = vpop.permute.xlu1 %6955  ;;  %7365 = vrot.lane.b32.xlu0 %v14946_v31, %s14491_s28  ;;  %v7108_v3 = vrot.slane %v8427_v33, %v15081_v20 }
 0x9c5   : > { %7367 = vrot.lane.b32.xlu1 %v14947_v48, %s14491_s28  ;;  %v6962_v42 = vpop.permute.xlu0 %6961  ;;  %8170 = vmatprep.subr.bf16.mxu1 %v7038_v44 }
 0x9c6   : > { %v6991_v11 = vsel %vm15121_vm6, %v6954_v45, %v6962_v42  ;;  %8171 = vmatpush1.bf16.msra.mxu1 %v7037_v60  ;;  %vm15137_vm6 = vmmov %vm15131_vm1 }
 0x9c7   : > { %v6964_v21 = vpop.permute.xlu1 %6963  ;;  %7373 = vrot.lane.b32.xlu0 %v14948_v24, %s14491_s28  ;;  %v7027_v62 = vmul.f32 %v7002_v17, %v6991_v11 }
 0x9c8   : > { %v6992_v58 = vsel %vm15122_vm7, %v6956_v34, %v6964_v21  ;;  %vm15138_vm7 = vmmov %vm15131_vm1 }
 0x9c9   : > { %v7031_v1 = vmul.f32 %v7002_v17, %v6992_v58  ;;  %7375 = vrot.lane.b32.xlu1 %v14949_v23, %s14491_s28  ;;  %v6970_v0 = vpop.permute.xlu0 %6969  ;;  %v7116_v58 = vrot.slane %v8427_v33, %v15085_v5 }
 0x9ca   : > { %v6987_v55 = vsel %vm15123_vm8, %v6962_v42, %v6970_v0  ;;  %v7112_v42 = vrot.slane %v8427_v33, %v15084_v16  ;;  %vm15139_vm8 = vmmov %vm15131_vm1 }
 0x9cb   : > { %v7039_v43 = vpack.c.bf16 %v7031_v1, %v7027_v62  ;;  %v6972_v38 = vpop.permute.xlu1 %6971  ;;  %7381 = vrot.lane.b32.xlu0 %v14950_v49, %s14491_s28  ;;  %v7028_v61 = vmul.f32 %v7006_v36, %v6987_v55 }
 0x9cc   : > { %v6988_v10 = vsel %vm15124_vm9, %v6964_v21, %v6972_v38  ;;  %vm15140_vm9 = vmmov %vm15131_vm1 }
 0x9cd   : > { %v7032_v46 = vmul.f32 %v7006_v36, %v6988_v10  ;;  %7383 = vrot.lane.b32.xlu1 %v11339_v50, %s14491_s28  ;;  %v6978_v17 = vpop.permute.xlu0 %6977 }
 0x9ce   : > { %v6983_v40 = vsel %vm15125_vm10, %v6970_v0, %v6978_v17  ;;  %v6995_v18 = vsel %vm15126_vm12, %v6978_v17, %v6954_v45  ;;  %vm15141_vm10 = vmmov %vm15131_vm1 }
 0x9cf   : > { %v7040_v56 = vpack.c.bf16 %v7032_v46, %v7028_v61  ;;  %v6980_v9 = vpop.permute.xlu1 %6979  ;;  %7361 = vrot.lane.b32.xlu0 %v11350_v52, %s14491_s28  ;;  %v7029_v32 = vmul.f32 %v7010_v37, %v6983_v40  ;;  %v7030_v2 = vmul.f32 %v7014_v8, %v6995_v18  ;;  %vm15142_vm12 = vmmov %vm15131_vm1 }
 0x9d0   : > { %v6984_v39 = vsel %vm15127_vm0, %v6972_v38, %v6980_v9  ;;  %v6996_v36 = vsel %vm15128_vm14, %v6980_v9, %v6956_v34  ;;  %vm15143_vm0 = vmmov %vm15131_vm1 }
 0x9d1   : > { %v7033_v41 = vmul.f32 %v7010_v37, %v6984_v39  ;;  %v7034_v15 = vmul.f32 %v7014_v8, %v6996_v36  ;;  %7363 = vrot.lane.b32.xlu1 %v11352_v59, %s14491_s28  ;;  %v7052_v14 = vpop.permute.xlu0 %7051  ;;  %8008 = vmatprep.subr.bf16.mxu0 %v7040_v56  ;;  %v7104_v37 = vrot.slane %v8427_v33, %v15076_v47  ;;  %vm15144_vm14 = vmmov %vm15143_vm0 }
 0x9d2   : > { %8009 = vmatpush1.bf16.msra.mxu0 %v7039_v43 }
 0x9d3   : > { %v7041_v57 = vpack.c.bf16 %v7033_v41, %v7029_v32  ;;  %v7042_v35 = vpack.c.bf16 %v7034_v15, %v7030_v2  ;;  %v7054_v63 = vpop.permute.xlu1 %7053  ;;  %7369 = vrot.lane.b32.xlu0 %v14897_v54, %s14491_s28 }
 0x9d5   : > { %7371 = vrot.lane.b32.xlu1 %v14899_v25, %s14491_s28  ;;  %v7060_v8 = vpop.permute.xlu0 %7059  ;;  %8172 = vmatprep.subr.bf16.mxu1 %v7042_v35 }
 0x9d6   : > { %v7091_v29 = vsel %vm15129_vm11, %v7052_v14, %v7060_v8  ;;  %8173 = vmatpush1.bf16.msra.mxu1 %v7041_v57  ;;  %vm15145_vm11 = vmmov %vm15143_vm0 }
 0x9d7   : > { %v7062_v12 = vpop.permute.xlu1 %7061  ;;  %7377 = vrot.lane.b32.xlu0 %v11370_v26, %s14491_s28  ;;  %v7121_v4 = vmul.f32 %v7104_v37, %v7091_v29 }
 0x9d8   : > { %v7092_v28 = vsel %vm15130_vm13, %v7054_v63, %v7062_v12  ;;  %vm15146_vm13 = vcmp.lt.s32.totalorder %v8816_v19, 98 }
 0x9d9   : > { %v7125_v13 = vmul.f32 %v7104_v37, %v7092_v28  ;;  %7379 = vrot.lane.b32.xlu1 %v11372_v30, %s14491_s28  ;;  %v7068_v22 = vpop.permute.xlu0 %7067 }
 0x9da   : > { %v7087_v45 = vsel %vm15131_vm1, %v7060_v8, %v7068_v22  ;;  %vm15147_vm1 = vmmov %vm15146_vm13 }
 0x9db   : > { %v7137_v60 = vpack.c.bf16 %v7125_v13, %v7121_v4  ;;  %v7070_v44 = vpop.permute.xlu1 %7069  ;;  %7385 = vrot.lane.b32.xlu0 %v14898_v51, %s14491_s28  ;;  %v7122_v11 = vmul.f32 %v7108_v3, %v7087_v45 }
 0x9dc   : > { %v7088_v34 = vsel %vm15132_vm2, %v7062_v12, %v7070_v44  ;;  %vm15148_vm2 = vmmov %vm15147_vm1 }
 0x9dd   : > { %v7126_v21 = vmul.f32 %v7108_v3, %v7088_v34  ;;  %7387 = vrot.lane.b32.xlu1 %v14900_v6, %s14491_s28  ;;  %v7076_v62 = vpop.permute.xlu0 %7075 }
 0x9de   : > { %v7083_v1 = vsel %vm15133_vm3, %v7068_v22, %v7076_v62  ;;  %v7095_v0 = vsel %vm15134_vm4, %v7076_v62, %v7052_v14  ;;  %v8428_v62 = vld [vmem:[%s14128_s1 + $0x44] ss:$8 sm:$0xf]  ;;  %vm15149_vm3 = vmmov %vm15147_vm1 }
 0x9df   : > { %v7138_v55 = vpack.c.bf16 %v7126_v21, %v7122_v11  ;;  %v7078_v43 = vpop.permute.xlu1 %7077  ;;  %7459 = vrot.lane.b32.xlu0 %v14945_v7, %s15135_s24  ;;  %v7123_v38 = vmul.f32 %v7112_v42, %v7083_v1  ;;  %v7124_v46 = vmul.f32 %v7116_v58, %v7095_v0  ;;  %vm15150_vm4 = vmmov %vm15147_vm1 }
 0x9e0   : > { %v7084_v10 = vsel %vm15136_vm5, %v7070_v44, %v7078_v43  ;;  %v7096_v61 = vsel %vm15137_vm6, %v7078_v43, %v7054_v63  ;;  %vm15151_vm5 = vmmov %vm15147_vm1 }
 0x9e1   : > { %v7127_v17 = vmul.f32 %v7112_v42, %v7084_v10  ;;  %v7128_v40 = vmul.f32 %v7116_v58, %v7096_v61  ;;  %7461 = vrot.lane.b32.xlu1 %v14951_v53, %s15135_s24  ;;  %v7056_v18 = vpop.permute.xlu0 %7055  ;;  %8010 = vmatprep.subr.bf16.mxu0 %v7138_v55  ;;  %vm15153_vm6 = vmmov %vm15147_vm1 }
 0x9e2   : > { %8011 = vmatpush1.bf16.msra.mxu0 %v7137_v60 }
 0x9e3   : > { %v7139_v56 = vpack.c.bf16 %v7127_v17, %v7123_v38  ;;  %v7140_v9 = vpack.c.bf16 %v7128_v40, %v7124_v46  ;;  %v7058_v32 = vpop.permute.xlu1 %7057  ;;  %7467 = vrot.lane.b32.xlu0 %v14946_v31, %s15135_s24  ;;  %v7210_v17 = vrot.slane %v8428_v62, %v15081_v20 }
 0x9e5   : > { %7469 = vrot.lane.b32.xlu1 %v14947_v48, %s15135_s24  ;;  %v7064_v39 = vpop.permute.xlu0 %7063  ;;  %8174 = vmatprep.subr.bf16.mxu1 %v7140_v9 }
 0x9e6   : > { %v7093_v36 = vsel %vm15138_vm7, %v7056_v18, %v7064_v39  ;;  %8175 = vmatpush1.bf16.msra.mxu1 %v7139_v56  ;;  %vm15154_vm7 = vmmov %vm15147_vm1 }
 0x9e7   : > { %v7066_v2 = vpop.permute.xlu1 %7065  ;;  %7475 = vrot.lane.b32.xlu0 %v14948_v24, %s15135_s24  ;;  %v7129_v15 = vmul.f32 %v7104_v37, %v7093_v36 }
 0x9e8   : > { %v7094_v41 = vsel %vm15139_vm8, %v7058_v32, %v7066_v2  ;;  %vm15155_vm8 = vmmov %vm15147_vm1 }
 0x9e9   : > { %v7133_v14 = vmul.f32 %v7104_v37, %v7094_v41  ;;  %7477 = vrot.lane.b32.xlu1 %v14949_v23, %s15135_s24  ;;  %v7072_v33 = vpop.permute.xlu0 %7071  ;;  %v7218_v41 = vrot.slane %v8428_v62, %v15085_v5 }
 0x9ea   : > { %v7089_v57 = vsel %vm15140_vm9, %v7064_v39, %v7072_v33  ;;  %v7214_v39 = vrot.slane %v8428_v62, %v15084_v16  ;;  %vm15156_vm9 = vmmov %vm15147_vm1 }
 0x9eb   : > { %v7141_v35 = vpack.c.bf16 %v7133_v14, %v7129_v15  ;;  %v7074_v63 = vpop.permute.xlu1 %7073  ;;  %7483 = vrot.lane.b32.xlu0 %v14950_v49, %s15135_s24  ;;  %v7130_v29 = vmul.f32 %v7108_v3, %v7089_v57 }
 0x9ec   : > { %v7090_v8 = vsel %vm15141_vm10, %v7066_v2, %v7074_v63  ;;  %vm15157_vm10 = vmmov %vm15147_vm1 }
 0x9ed   : > { %v7134_v12 = vmul.f32 %v7108_v3, %v7090_v8  ;;  %7485 = vrot.lane.b32.xlu1 %v11339_v50, %s15135_s24  ;;  %v7080_v37 = vpop.permute.xlu0 %7079 }
 0x9ee   : > { %v7085_v28 = vsel %vm15142_vm12, %v7072_v33, %v7080_v37  ;;  %v7097_v4 = vsel %vm15143_vm0, %v7080_v37, %v7056_v18  ;;  %vm15158_vm12 = vmmov %vm15147_vm1 }
 0x9ef   : > { %v7142_v13 = vpack.c.bf16 %v7134_v12, %v7130_v29  ;;  %v7082_v22 = vpop.permute.xlu1 %7081  ;;  %7463 = vrot.lane.b32.xlu0 %v11350_v52, %s15135_s24  ;;  %v7131_v45 = vmul.f32 %v7112_v42, %v7085_v28  ;;  %v7132_v44 = vmul.f32 %v7116_v58, %v7097_v4  ;;  %vm15159_vm0 = vmmov %vm15147_vm1 }
 0x9f0   : > { %v7086_v60 = vsel %vm15144_vm14, %v7074_v63, %v7082_v22  ;;  %v7098_v3 = vsel %vm15145_vm11, %v7082_v22, %v7058_v32  ;;  %vm15160_vm14 = vmmov %vm15159_vm0 }
 0x9f1   : > { %v7135_v34 = vmul.f32 %v7112_v42, %v7086_v60  ;;  %v7136_v11 = vmul.f32 %v7116_v58, %v7098_v3  ;;  %7465 = vrot.lane.b32.xlu1 %v11352_v59, %s15135_s24  ;;  %v7154_v21 = vpop.permute.xlu0 %7153  ;;  %8012 = vmatprep.subr.bf16.mxu0 %v7142_v13  ;;  %v7206_v42 = vrot.slane %v8428_v62, %v15076_v47  ;;  %v13902_v13 = vld [vmem:[%s14135_s8 + $0x8] sm:$0x3f]  ;;  %vm15161_vm11 = vmmov %vm15159_vm0 }
 0x9f2   : > { %8013 = vmatpush1.bf16.msra.mxu0 %v7141_v35 }
 0x9f3   : > { %v7143_v1 = vpack.c.bf16 %v7135_v34, %v7131_v45  ;;  %v7144_v0 = vpack.c.bf16 %v7136_v11, %v7132_v44  ;;  %v7156_v55 = vpop.permute.xlu1 %7155  ;;  %7471 = vrot.lane.b32.xlu0 %v14897_v54, %s15135_s24 }
 0x9f5   : > { %7473 = vrot.lane.b32.xlu1 %v14899_v25, %s15135_s24  ;;  %v7162_v58 = vpop.permute.xlu0 %7161  ;;  %8176 = vmatprep.subr.bf16.mxu1 %v7144_v0 }
 0x9f6   : > { %v7193_v43 = vsel %vm15146_vm13, %v7154_v21, %v7162_v58  ;;  %8177 = vmatpush1.bf16.msra.mxu1 %v7143_v1  ;;  %vm15162_vm13 = vmmov %vm15159_vm0 }
 0x9f7   : > { %v7164_v38 = vpop.permute.xlu1 %7163  ;;  %7479 = vrot.lane.b32.xlu0 %v11370_v26, %s15135_s24  ;;  %v7223_v61 = vmul.f32 %v7206_v42, %v7193_v43 }
 0x9f8   : > { %v7194_v10 = vsel %vm15147_vm1, %v7156_v55, %v7164_v38  ;;  %vm15163_vm1 = vcmp.lt.s32.totalorder %v8816_v19, 97 }
 0x9f9   : > { %v7227_v46 = vmul.f32 %v7206_v42, %v7194_v10  ;;  %7481 = vrot.lane.b32.xlu1 %v11372_v30, %s15135_s24  ;;  %v7170_v40 = vpop.permute.xlu0 %7169 }
 0x9fa   : > { %v7189_v18 = vsel %vm15148_vm2, %v7162_v58, %v7170_v40  ;;  %vm15164_vm2 = vmmov %vm15163_vm1 }
 0x9fb   : > { %v7239_v56 = vpack.c.bf16 %v7227_v46, %v7223_v61  ;;  %v7172_v9 = vpop.permute.xlu1 %7171  ;;  %7487 = vrot.lane.b32.xlu0 %v14898_v51, %s15135_s24  ;;  %v7224_v36 = vmul.f32 %v7210_v17, %v7189_v18 }
 0x9fc   : > { %v7190_v32 = vsel %vm15149_vm3, %v7164_v38, %v7172_v9  ;;  %vm15165_vm3 = vmmov %vm15163_vm1 }
 0x9fd   : > { %v7228_v2 = vmul.f32 %v7210_v17, %v7190_v32  ;;  %7489 = vrot.lane.b32.xlu1 %v14900_v6, %s15135_s24  ;;  %v7178_v15 = vpop.permute.xlu0 %7177 }
 0x9fe   : > { %v7185_v14 = vsel %vm15150_vm4, %v7170_v40, %v7178_v15  ;;  %v7197_v33 = vsel %vm15151_vm5, %v7178_v15, %v7154_v21  ;;  %vm15166_vm4 = vmmov %vm15163_vm1 }
 0x9ff   : > { %v7240_v57 = vpack.c.bf16 %v7228_v2, %v7224_v36  ;;  %v7180_v35 = vpop.permute.xlu1 %7179  ;;  %7561 = vrot.lane.b32.xlu0 %v14945_v7, %s15152_s15  ;;  %v7225_v63 = vmul.f32 %v7214_v39, %v7185_v14  ;;  %v7226_v12 = vmul.f32 %v7218_v41, %v7197_v33  ;;  %v13906_v7 = vrot.slane %v13902_v13, %v14985_v27  ;;  %vm15168_vm5 = vmmov %vm15163_vm1 }
 0xa00   : > { %v7186_v8 = vsel %vm15153_vm6, %v7172_v9, %v7180_v35  ;;  %v7198_v29 = vsel %vm15154_vm7, %v7180_v35, %v7156_v55  ;;  %vm15169_vm6 = vmmov %vm15163_vm1 }
 0xa01   : > { %v7229_v37 = vmul.f32 %v7214_v39, %v7186_v8  ;;  %v7230_v28 = vmul.f32 %v7218_v41, %v7198_v29  ;;  %7563 = vrot.lane.b32.xlu1 %v14951_v53, %s15152_s15  ;;  %v7158_v4 = vpop.permute.xlu0 %7157  ;;  %8014 = vmatprep.subr.bf16.mxu0 %v7240_v57  ;;  %v7905_v53 = vcombine.high %v13906_v7, %v13906_v7  ;;  %vm15170_vm7 = vmmov %vm15163_vm1 }
 0xa02   : > { %8015 = vmatpush1.bf16.msra.mxu0 %v7239_v56  ;;  %v8429_v56 = vld [vmem:[%s14128_s1 + $0x45] ss:$8 sm:$0xf] }
 0xa03   : > { %v7241_v22 = vpack.c.bf16 %v7229_v37, %v7225_v63  ;;  %v7242_v45 = vpack.c.bf16 %v7230_v28, %v7226_v12  ;;  %v7160_v60 = vpop.permute.xlu1 %7159  ;;  %7569 = vrot.lane.b32.xlu0 %v14946_v31, %s15152_s15  ;;  %8030 = vmatprep.mubr.bf16.mxu0 %v7905_v53  ;;  %v7865_v63 = vld [vmem:[%s15167_s23] sm:$0xf]  ;;  %v7316_v29 = vrot.slane %v8429_v56, %v15084_v16 }
 0xa04   : > { %8194 = vmatprep.mubr.bf16.mxu1 %v7905_v53  ;;  %v7320_v12 = vrot.slane %v8429_v56, %v15085_v5 }
 0xa05   : > { %7571 = vrot.lane.b32.xlu1 %v14947_v48, %s15152_s15  ;;  %v7166_v3 = vpop.permute.xlu0 %7165  ;;  %8178 = vmatprep.subr.bf16.mxu1 %v7242_v45 }
 0xa06   : > { %v7195_v44 = vsel %vm15155_vm8, %v7158_v4, %v7166_v3  ;;  %8179 = vmatpush1.bf16.msra.mxu1 %v7241_v22  ;;  %vm15171_vm8 = vmmov %vm15163_vm1 }
 0xa07   : > { %v7168_v34 = vpop.permute.xlu1 %7167  ;;  %7577 = vrot.lane.b32.xlu0 %v14948_v24, %s15152_s15  ;;  %v7231_v11 = vmul.f32 %v7206_v42, %v7195_v44 }
 0xa08   : > { %v7196_v31 = vsel %vm15156_vm9, %v7160_v60, %v7168_v34  ;;  %vm15172_vm9 = vmmov %vm15163_vm1 }
 0xa09   : > { %v7235_v21 = vmul.f32 %v7206_v42, %v7196_v31  ;;  %7579 = vrot.lane.b32.xlu1 %v14949_v23, %s15152_s15  ;;  %v7174_v48 = vpop.permute.xlu0 %7173 }
 0xa0a   : > { %v7191_v62 = vsel %vm15157_vm10, %v7166_v3, %v7174_v48  ;;  %vm15173_vm10 = vmmov %vm15163_vm1 }
 0xa0b   : > { %v7243_v1 = vpack.c.bf16 %v7235_v21, %v7231_v11  ;;  %v7176_v0 = vpop.permute.xlu1 %7175  ;;  %7585 = vrot.lane.b32.xlu0 %v14950_v49, %s15152_s15  ;;  %v7232_v55 = vmul.f32 %v7210_v17, %v7191_v62 }
 0xa0c   : > { %v7192_v24 = vsel %vm15158_vm12, %v7168_v34, %v7176_v0  ;;  %vm15174_vm12 = vmmov %vm15163_vm1 }
 0xa0d   : > { %v7236_v58 = vmul.f32 %v7210_v17, %v7192_v24  ;;  %7587 = vrot.lane.b32.xlu1 %v11339_v50, %s15152_s15  ;;  %v7182_v42 = vpop.permute.xlu0 %7181 }
 0xa0e   : > { %v7187_v23 = vsel %vm15159_vm0, %v7174_v48, %v7182_v42  ;;  %v7199_v43 = vsel %vm15160_vm14, %v7182_v42, %v7158_v4  ;;  %vm15175_vm0 = vmmov %vm15163_vm1 }
 0xa0f   : > { %v7244_v38 = vpack.c.bf16 %v7236_v58, %v7232_v55  ;;  %v7184_v10 = vpop.permute.xlu1 %7183  ;;  %7565 = vrot.lane.b32.xlu0 %v11350_v52, %s15152_s15  ;;  %v7233_v49 = vmul.f32 %v7214_v39, %v7187_v23  ;;  %v7234_v50 = vmul.f32 %v7218_v41, %v7199_v43  ;;  %vm15176_vm14 = vmmov %vm15175_vm0 }
 0xa10   : > { %v7188_v61 = vsel %vm15161_vm11, %v7176_v0, %v7184_v10  ;;  %v7200_v46 = vsel %vm15162_vm13, %v7184_v10, %v7160_v60  ;;  %vm15177_vm11 = vmmov %vm15175_vm0 }
 0xa11   : > { %v7237_v17 = vmul.f32 %v7214_v39, %v7188_v61  ;;  %v7238_v40 = vmul.f32 %v7218_v41, %v7200_v46  ;;  %7567 = vrot.lane.b32.xlu1 %v11352_v59, %s15152_s15  ;;  %v7256_v18 = vpop.permute.xlu0 %7255  ;;  %8016 = vmatprep.subr.bf16.mxu0 %v7244_v38  ;;  %v7308_v39 = vrot.slane %v8429_v56, %v15076_v47  ;;  %vm15178_vm13 = vmmov %vm15175_vm0 }
 0xa12   : > { %8017 = vmatpush1.bf16.msra.mxu0 %v7243_v1 }
 0xa13   : > { %v7245_v52 = vpack.c.bf16 %v7237_v17, %v7233_v49  ;;  %v7246_v9 = vpack.c.bf16 %v7238_v40, %v7234_v50  ;;  %v7258_v32 = vpop.permute.xlu1 %7257  ;;  %7573 = vrot.lane.b32.xlu0 %v14897_v54, %s15152_s15 }
 0xa15   : > { %7575 = vrot.lane.b32.xlu1 %v14899_v25, %s15152_s15  ;;  %v7264_v36 = vpop.permute.xlu0 %7263  ;;  %8180 = vmatprep.subr.bf16.mxu1 %v7246_v9  ;;  %v7312_v25 = vrot.slane %v8429_v56, %v15081_v20 }
 0xa16   : > { %v7295_v59 = vsel %vm15163_vm1, %v7256_v18, %v7264_v36  ;;  %8181 = vmatpush1.bf16.msra.mxu1 %v7245_v52  ;;  %vm15179_vm1 = vmmov %vm15175_vm0 }
 0xa17   : > { %v7266_v2 = vpop.permute.xlu1 %7265  ;;  %7581 = vrot.lane.b32.xlu0 %v11370_v26, %s15152_s15  ;;  %v7325_v15 = vmul.f32 %v7308_v39, %v7295_v59  ;;  %v8430_v59 = vld [vmem:[%s14128_s1 + $0x46] ss:$8 sm:$0xf] }
 0xa18   : > { %v7296_v41 = vsel %vm15164_vm2, %v7258_v32, %v7266_v2  ;;  %vm15180_vm2 = vcmp.lt.s32.totalorder %v8816_v19, 96 }
 0xa19   : > { %v7329_v54 = vmul.f32 %v7308_v39, %v7296_v41  ;;  %7583 = vrot.lane.b32.xlu1 %v11372_v30, %s15152_s15  ;;  %v7272_v14 = vpop.permute.xlu0 %7271 }
 0xa1a   : > { %v7291_v33 = vsel %vm15165_vm3, %v7264_v36, %v7272_v14  ;;  %vm15181_vm3 = vmmov %vm15180_vm2 }
 0xa1b   : > { %v7341_v57 = vpack.c.bf16 %v7329_v54, %v7325_v15  ;;  %v7274_v35 = vpop.permute.xlu1 %7273  ;;  %7589 = vrot.lane.b32.xlu0 %v14898_v51, %s15152_s15  ;;  %v7326_v8 = vmul.f32 %v7312_v25, %v7291_v33  ;;  %v7410_v54 = vrot.slane %v8430_v59, %v15076_v47 }
 0xa1c   : > { %v7292_v26 = vsel %vm15166_vm4, %v7266_v2, %v7274_v35  ;;  %vm15182_vm4 = vmmov %vm15180_vm2 }
 0xa1d   : > { %v7330_v30 = vmul.f32 %v7312_v25, %v7292_v26  ;;  %7591 = vrot.lane.b32.xlu1 %v14900_v6, %s15152_s15  ;;  %v7280_v37 = vpop.permute.xlu0 %7279 }
 0xa1e   : > { %v7287_v51 = vsel %vm15168_vm5, %v7272_v14, %v7280_v37  ;;  %v7299_v28 = vsel %vm15169_vm6, %v7280_v37, %v7256_v18  ;;  %vm15183_vm5 = vmmov %vm15180_vm2 }
 0xa1f   : > { %v7342_v4 = vpack.c.bf16 %v7330_v30, %v7326_v8  ;;  %v7282_v22 = vpop.permute.xlu1 %7281  ;;  %7868 = vperm.xlu0 %8532, %v7865_v63   ;;  %v7327_v60 = vmul.f32 %v7316_v29, %v7287_v51  ;;  %v7328_v53 = vmul.f32 %v7320_v12, %v7299_v28  ;;  %v7414_v63 = vrot.slane %v8430_v59, %v15081_v20  ;;  %vm15184_vm6 = vmmov %vm15180_vm2 }
 0xa20   : > { %v7288_v45 = vsel %vm15170_vm7, %v7274_v35, %v7282_v22  ;;  %v7300_v6 = vsel %vm15171_vm8, %v7282_v22, %v7258_v32  ;;  %v7422_v22 = vrot.slane %v8430_v59, %v15085_v5  ;;  %vm15185_vm7 = vmmov %vm15180_vm2 }
 0xa21   : > { %v7331_v3 = vmul.f32 %v7316_v29, %v7288_v45  ;;  %v7332_v44 = vmul.f32 %v7320_v12, %v7300_v6  ;;  %v7260_v34 = vpop.permute.xlu0 %7259  ;;  %8018 = vmatprep.subr.bf16.mxu0 %v7342_v4  ;;  %v7418_v4 = vrot.slane %v8430_v59, %v15084_v16  ;;  %vm15186_vm8 = vmmov %vm15180_vm2 }
 0xa22   : > { %8019 = vmatpush1.bf16.msra.mxu0 %v7341_v57 }
 0xa23   : > { %v7343_v31 = vpack.c.bf16 %v7331_v3, %v7327_v60  ;;  %v7344_v11 = vpack.c.bf16 %v7332_v44, %v7328_v53  ;;  %v7262_v21 = vpop.permute.xlu1 %7261 }
 0xa25   : > { %v7268_v48 = vpop.permute.xlu0 %7267  ;;  %8182 = vmatprep.subr.bf16.mxu1 %v7344_v11 }
 0xa26   : > { %v7297_v62 = vsel %vm15172_vm9, %v7260_v34, %v7268_v48  ;;  %8183 = vmatpush1.bf16.msra.mxu1 %v7343_v31  ;;  %vm15187_vm9 = vmmov %vm15180_vm2 }
 0xa27   : > { %v7270_v1 = vpop.permute.xlu1 %7269  ;;  %v7333_v24 = vmul.f32 %v7308_v39, %v7297_v62 }
 0xa28   : > { %v7298_v0 = vsel %vm15173_vm10, %v7262_v21, %v7270_v1  ;;  %vm15188_vm10 = vmmov %vm15180_vm2 }
 0xa29   : > { %v7337_v55 = vmul.f32 %v7308_v39, %v7298_v0  ;;  %v7276_v58 = vpop.permute.xlu0 %7275 }
 0xa2a   : > { %v7293_v42 = vsel %vm15174_vm12, %v7268_v48, %v7276_v58  ;;  %vm15189_vm12 = vmmov %vm15180_vm2 }
 0xa2b   : > { %v7345_v23 = vpack.c.bf16 %v7337_v55, %v7333_v24  ;;  %v7278_v43 = vpop.permute.xlu1 %7277  ;;  %v7334_v10 = vmul.f32 %v7312_v25, %v7293_v42 }
 0xa2c   : > { %v7294_v38 = vsel %vm15175_vm0, %v7270_v1, %v7278_v43  ;;  %vm15190_vm0 = vmmov %vm15180_vm2 }
 0xa2d   : > { %v7338_v49 = vmul.f32 %v7312_v25, %v7294_v38  ;;  %v7284_v61 = vpop.permute.xlu0 %7283 }
 0xa2e   : > { %v7289_v46 = vsel %vm15176_vm14, %v7276_v58, %v7284_v61  ;;  %v7301_v50 = vsel %vm15177_vm11, %v7284_v61, %v7260_v34  ;;  %vm15191_vm14 = vmmov %vm15190_vm0 }
 0xa2f   : > { %v7346_v17 = vpack.c.bf16 %v7338_v49, %v7334_v10  ;;  %v7286_v40 = vpop.permute.xlu1 %7285  ;;  %v7335_v52 = vmul.f32 %v7316_v29, %v7289_v46  ;;  %v7336_v9 = vmul.f32 %v7320_v12, %v7301_v50  ;;  %vm15192_vm11 = vmmov %vm15190_vm0 }
 0xa30   : > { %v7290_v18 = vsel %vm15178_vm13, %v7278_v43, %v7286_v40  ;;  %v7302_v56 = vsel %vm15179_vm1, %v7286_v40, %v7262_v21  ;;  %vm15193_vm13 = vmmov %vm15190_vm0 }
 0xa31   : > { %v7339_v32 = vmul.f32 %v7316_v29, %v7290_v18  ;;  %v7340_v39 = vmul.f32 %v7320_v12, %v7302_v56  ;;  %v7358_v36 = vpop.permute.xlu0 %7357  ;;  %8020 = vmatprep.subr.bf16.mxu0 %v7346_v17  ;;  %vm15194_vm1 = vmmov %vm15190_vm0 }
 0xa32   : > { %8021 = vmatpush1.bf16.msra.mxu0 %v7345_v23 }
 0xa33   : > { %v7347_v2 = vpack.c.bf16 %v7339_v32, %v7335_v52  ;;  %v7348_v41 = vpack.c.bf16 %v7340_v39, %v7336_v9  ;;  %v7360_v15 = vpop.permute.xlu1 %7359 }
 0xa35   : > { %v7366_v25 = vpop.permute.xlu0 %7365  ;;  %8184 = vmatprep.subr.bf16.mxu1 %v7348_v41 }
 0xa36   : > { %v7397_v14 = vsel %vm15180_vm2, %v7358_v36, %v7366_v25  ;;  %8185 = vmatpush1.bf16.msra.mxu1 %v7347_v2  ;;  %vm15195_vm2 = vmmov %vm15190_vm0 }
 0xa37   : > { %v7368_v33 = vpop.permute.xlu1 %7367  ;;  %v7427_v35 = vmul.f32 %v7410_v54, %v7397_v14 }
 0xa38   : > { %v7398_v57 = vsel %vm15181_vm3, %v7360_v15, %v7368_v33  ;;  %vm15196_vm3 = vcmp.lt.s32.totalorder %v8816_v19, 95 }
 0xa39   : > { %v7431_v26 = vmul.f32 %v7410_v54, %v7398_v57  ;;  %v7374_v8 = vpop.permute.xlu0 %7373 }
 0xa3a   : > { %v7393_v30 = vsel %vm15182_vm4, %v7366_v25, %v7374_v8  ;;  %v8431_v25 = vld [vmem:[%s14128_s1 + $0x47] ss:$8 sm:$0xf]  ;;  %vm15197_vm4 = vmmov %vm15196_vm3 }
 0xa3b   : > { %v7443_v29 = vpack.c.bf16 %v7431_v26, %v7427_v35  ;;  %v7376_v12 = vpop.permute.xlu1 %7375  ;;  %v7428_v51 = vmul.f32 %v7414_v63, %v7393_v30  ;;  %v7512_v35 = vrot.slane %v8431_v25, %v15076_v47 }
 0xa3c   : > { %v7394_v37 = vsel %vm15183_vm5, %v7368_v33, %v7376_v12  ;;  %vm15198_vm5 = vmmov %vm15196_vm3 }
 0xa3d   : > { %v7432_v28 = vmul.f32 %v7414_v63, %v7394_v37  ;;  %v7382_v45 = vpop.permute.xlu0 %7381  ;;  %v7516_v37 = vrot.slane %v8431_v25, %v15081_v20 }
 0xa3e   : > { %v7389_v6 = vsel %vm15184_vm6, %v7374_v8, %v7382_v45  ;;  %v7401_v60 = vsel %vm15185_vm7, %v7382_v45, %v7358_v36  ;;  %vm15199_vm6 = vmmov %vm15196_vm3 }
 0xa3f   : > { %v7444_v53 = vpack.c.bf16 %v7432_v28, %v7428_v51  ;;  %v7384_v3 = vpop.permute.xlu1 %7383  ;;  %v7429_v31 = vmul.f32 %v7418_v4, %v7389_v6  ;;  %v7430_v11 = vmul.f32 %v7422_v22, %v7401_v60  ;;  %vm15200_vm7 = vmmov %vm15196_vm3 }
 0xa40   : > { %v7390_v44 = vsel %vm15186_vm8, %v7376_v12, %v7384_v3  ;;  %v7402_v34 = vsel %vm15187_vm9, %v7384_v3, %v7360_v15  ;;  %v7524_v3 = vrot.slane %v8431_v25, %v15085_v5  ;;  %vm15201_vm8 = vmmov %vm15196_vm3 }
 0xa41   : > { %v7433_v21 = vmul.f32 %v7418_v4, %v7390_v44  ;;  %v7434_v48 = vmul.f32 %v7422_v22, %v7402_v34  ;;  %v7362_v62 = vpop.permute.xlu0 %7361  ;;  %8022 = vmatprep.subr.bf16.mxu0 %v7444_v53  ;;  %v7520_v53 = vrot.slane %v8431_v25, %v15084_v16  ;;  %vm15202_vm9 = vmmov %vm15196_vm3 }
 0xa42   : > { %8023 = vmatpush1.bf16.msra.mxu0 %v7443_v29 }
 0xa43   : > { %v7445_v1 = vpack.c.bf16 %v7433_v21, %v7429_v31  ;;  %v7446_v0 = vpack.c.bf16 %v7434_v48, %v7430_v11  ;;  %v7364_v24 = vpop.permute.xlu1 %7363 }
 0xa45   : > { %v7370_v55 = vpop.permute.xlu0 %7369  ;;  %8186 = vmatprep.subr.bf16.mxu1 %v7446_v0 }
 0xa46   : > { %v7399_v58 = vsel %vm15188_vm10, %v7362_v62, %v7370_v55  ;;  %8187 = vmatpush1.bf16.msra.mxu1 %v7445_v1  ;;  %vm15203_vm10 = vmmov %vm15196_vm3 }
 0xa47   : > { %v7372_v42 = vpop.permute.xlu1 %7371  ;;  %v7435_v43 = vmul.f32 %v7410_v54, %v7399_v58 }
 0xa48   : > { %v7400_v23 = vsel %vm15189_vm12, %v7364_v24, %v7372_v42  ;;  %vm15204_vm12 = vmmov %vm15196_vm3 }
 0xa49   : > { %v7439_v38 = vmul.f32 %v7410_v54, %v7400_v23  ;;  %v7378_v10 = vpop.permute.xlu0 %7377 }
 0xa4a   : > { %v7395_v49 = vsel %vm15190_vm0, %v7370_v55, %v7378_v10  ;;  %vm15205_vm0 = vmmov %vm15196_vm3 }
 0xa4b   : > { %v7447_v61 = vpack.c.bf16 %v7439_v38, %v7435_v43  ;;  %v7380_v46 = vpop.permute.xlu1 %7379  ;;  %v7436_v17 = vmul.f32 %v7414_v63, %v7395_v49 }
 0xa4c   : > { %v7396_v50 = vsel %vm15191_vm14, %v7372_v42, %v7380_v46  ;;  %vm15206_vm14 = vmmov %vm15205_vm0 }
 0xa4d   : > { %v7440_v40 = vmul.f32 %v7414_v63, %v7396_v50  ;;  %v7386_v18 = vpop.permute.xlu0 %7385 }
 0xa4e   : > { %v7391_v56 = vsel %vm15192_vm11, %v7378_v10, %v7386_v18  ;;  %v7403_v52 = vsel %vm15193_vm13, %v7386_v18, %v7362_v62  ;;  %vm15207_vm11 = vmmov %vm15205_vm0 }
 0xa4f   : > { %v7448_v9 = vpack.c.bf16 %v7440_v40, %v7436_v17  ;;  %v7388_v32 = vpop.permute.xlu1 %7387  ;;  %v7437_v59 = vmul.f32 %v7418_v4, %v7391_v56  ;;  %v7438_v2 = vmul.f32 %v7422_v22, %v7403_v52  ;;  %vm15208_vm13 = vmmov %vm15205_vm0 }
 0xa50   : > { %v7392_v39 = vsel %vm15194_vm1, %v7380_v46, %v7388_v32  ;;  %v7404_v36 = vsel %vm15195_vm2, %v7388_v32, %v7364_v24  ;;  %vm15209_vm1 = vmmov %vm15205_vm0 }
 0xa51   : > { %v7441_v41 = vmul.f32 %v7418_v4, %v7392_v39  ;;  %v7442_v15 = vmul.f32 %v7422_v22, %v7404_v36  ;;  %v7460_v54 = vpop.permute.xlu0 %7459  ;;  %8024 = vmatprep.subr.bf16.mxu0 %v7448_v9  ;;  %vm15210_vm2 = vmmov %vm15205_vm0 }
 0xa52   : > { %8025 = vmatpush1.bf16.msra.mxu0 %v7447_v61 }
 0xa53   : > { %v7449_v14 = vpack.c.bf16 %v7441_v41, %v7437_v59  ;;  %v7450_v33 = vpack.c.bf16 %v7442_v15, %v7438_v2  ;;  %v7462_v57 = vpop.permute.xlu1 %7461 }
 0xa55   : > { %v7468_v26 = vpop.permute.xlu0 %7467  ;;  %8188 = vmatprep.subr.bf16.mxu1 %v7450_v33 }
 0xa56   : > { %v7499_v63 = vsel %vm15196_vm3, %v7460_v54, %v7468_v26  ;;  %8189 = vmatpush1.bf16.msra.mxu1 %v7449_v14  ;;  %vm15211_vm3 = vmmov %vm15205_vm0 }
 0xa57   : > { %v7470_v8 = vpop.permute.xlu1 %7469  ;;  %v7529_v29 = vmul.f32 %v7512_v35, %v7499_v63 }
 0xa58   : > { %v7500_v30 = vsel %vm15197_vm4, %v7462_v57, %v7470_v8  ;;  %vm7912_vm4 = vcmask 261120  }
 0xa59   : > { %v7533_v12 = vmul.f32 %v7512_v35, %v7500_v30  ;;  %v7476_v51 = vpop.permute.xlu0 %7475 }
 0xa5a   : > { %v7495_v28 = vsel %vm15198_vm5, %v7468_v26, %v7476_v51  ;;  %v8432_v26 = vld [vmem:[%s14128_s1 + $0x60] ss:$8 sm:$0xf] }
 0xa5b   : > { %v7545_v4 = vpack.c.bf16 %v7533_v12, %v7529_v29  ;;  %v7478_v22 = vpop.permute.xlu1 %7477  ;;  %v7530_v6 = vmul.f32 %v7516_v37, %v7495_v28  ;;  %v7614_v29 = vrot.slane %v8432_v26, %v15076_v47 }
 0xa5c   : > { %v7496_v45 = vsel %vm15199_vm6, %v7470_v8, %v7478_v22 }
 0xa5d   : > { %v7534_v60 = vmul.f32 %v7516_v37, %v7496_v45  ;;  %v7484_v44 = vpop.permute.xlu0 %7483 }
 0xa5e   : > { %v7491_v34 = vsel %vm15200_vm7, %v7476_v51, %v7484_v44  ;;  %v7503_v31 = vsel %vm15201_vm8, %v7484_v44, %v7460_v54  ;;  %v15212_v51 = vmov 0  }
 0xa5f   : > { %v7546_v11 = vpack.c.bf16 %v7534_v60, %v7530_v6  ;;  %v7486_v21 = vpop.permute.xlu1 %7485  ;;  %v7531_v1 = vmul.f32 %v7520_v53, %v7491_v34  ;;  %v7532_v0 = vmul.f32 %v7524_v3, %v7503_v31  ;;  %v7618_v6 = vrot.slane %v8432_v26, %v15081_v20 }
 0xa60   : > { %v7492_v48 = vsel %vm15202_vm9, %v7478_v22, %v7486_v21  ;;  %v7504_v62 = vsel %vm15203_vm10, %v7486_v21, %v7462_v57  ;;  %v7626_v21 = vrot.slane %v8432_v26, %v15085_v5 }
 0xa61   : > { %v7535_v24 = vmul.f32 %v7520_v53, %v7492_v48  ;;  %v7536_v55 = vmul.f32 %v7524_v3, %v7504_v62  ;;  %v7464_v58 = vpop.permute.xlu0 %7463  ;;  %8026 = vmatprep.subr.bf16.mxu0 %v7546_v11  ;;  %v7622_v11 = vrot.slane %v8432_v26, %v15084_v16 }
 0xa62   : > { %8027 = vmatpush1.bf16.msra.mxu0 %v7545_v4 }
 0xa63   : > { %v7547_v42 = vpack.c.bf16 %v7535_v24, %v7531_v1  ;;  %v7548_v23 = vpack.c.bf16 %v7536_v55, %v7532_v0  ;;  %v7466_v43 = vpop.permute.xlu1 %7465 }
 0xa65   : > { %v7472_v38 = vpop.permute.xlu0 %7471  ;;  %8190 = vmatprep.subr.bf16.mxu1 %v7548_v23 }
 0xa66   : > { %v7501_v10 = vsel %vm15204_vm12, %v7464_v58, %v7472_v38  ;;  %8191 = vmatpush1.bf16.msra.mxu1 %v7547_v42 }
 0xa67   : > { %v7474_v49 = vpop.permute.xlu1 %7473  ;;  %v7537_v46 = vmul.f32 %v7512_v35, %v7501_v10 }
 0xa68   : > { %v7502_v61 = vsel %vm15205_vm0, %v7466_v43, %v7474_v49 }
 0xa69   : > { %v7541_v50 = vmul.f32 %v7512_v35, %v7502_v61  ;;  %v7480_v17 = vpop.permute.xlu0 %7479 }
 0xa6a   : > { %v7497_v40 = vsel %vm15206_vm14, %v7472_v38, %v7480_v17 }
 0xa6b   : > { %v7549_v18 = vpack.c.bf16 %v7541_v50, %v7537_v46  ;;  %v7482_v56 = vpop.permute.xlu1 %7481  ;;  %v7538_v9 = vmul.f32 %v7516_v37, %v7497_v40 }
 0xa6c   : > { %v7498_v52 = vsel %vm15207_vm11, %v7474_v49, %v7482_v56 }
 0xa6d   : > { %v7542_v32 = vmul.f32 %v7516_v37, %v7498_v52  ;;  %v7488_v39 = vpop.permute.xlu0 %7487 }
 0xa6e   : > { %v7493_v36 = vsel %vm15208_vm13, %v7480_v17, %v7488_v39  ;;  %v7505_v59 = vsel %vm15209_vm1, %v7488_v39, %v7464_v58 }
 0xa6f   : > { %v7550_v2 = vpack.c.bf16 %v7542_v32, %v7538_v9  ;;  %v7490_v41 = vpop.permute.xlu1 %7489  ;;  %v7539_v25 = vmul.f32 %v7520_v53, %v7493_v36  ;;  %v7540_v14 = vmul.f32 %v7524_v3, %v7505_v59  ;;  %v7890_v9 = vcombine.high %v13902_v13, %v13902_v13 }
 0xa70   : > { %v7494_v15 = vsel %vm15210_vm2, %v7482_v56, %v7490_v41  ;;  %v7506_v54 = vsel %vm15211_vm3, %v7490_v41, %v7466_v43 }
 0xa71   : > { %v7543_v33 = vmul.f32 %v7520_v53, %v7494_v15  ;;  %v7544_v57 = vmul.f32 %v7524_v3, %v7506_v54  ;;  %v7562_v35 = vpop.permute.xlu0 %7561  ;;  %8028 = vmatprep.subr.bf16.mxu0 %v7550_v2 }
 0xa72   : > { %8029 = vmatpush1.bf16.msra.mxu0 %v7549_v18 }
 0xa73   : > { %v7551_v63 = vpack.c.bf16 %v7543_v33, %v7539_v25  ;;  %v7552_v8 = vpack.c.bf16 %v7544_v57, %v7540_v14  ;;  %v7564_v30 = vpop.permute.xlu1 %7563  ;;  %v7904_v14 = vrot.slane %v7890_v9, %v14985_v27 }
 0xa75   : > { %v7570_v12 = vpop.permute.xlu0 %7569  ;;  %8192 = vmatprep.subr.bf16.mxu1 %v7552_v8  ;;  %8031 = vmatmul.mubr.bf16.vlgmr.msra.gmra.mrb[16].mxu0 %v13906_v7 }
 0xa76   : > { %v7601_v37 = vsel %vm1650_vm15, %v7562_v35, %v7570_v12  ;;  %8193 = vmatpush1.bf16.msra.mxu1 %v7551_v63  ;;  %8071 = vmatprep.mubr.bf16.mxu0 %v15212_v51 }
 0xa77   : > { %v7572_v28 = vpop.permute.xlu1 %7571  ;;  %v7631_v22 = vmul.f32 %v7614_v29, %v7601_v37 }
 0xa78   : > { %v7602_v4 = vsel %vm1650_vm15, %v7564_v30, %v7572_v28 }
 0xa79   : > { %v7635_v45 = vmul.f32 %v7614_v29, %v7602_v4  ;;  %v7578_v60 = vpop.permute.xlu0 %7577  ;;  %8195 = vmatmul.mubr.bf16.vlgmr.msra.gmra.mrb[16].mxu1 %v13906_v7 }
 0xa7a   : > { %v7597_v47 = vsel %vm1650_vm15, %v7570_v12, %v7578_v60  ;;  %8235 = vmatprep.mubr.bf16.mxu1 %v15212_v51 }
 0xa7b   : > { %v7647_v53 = vpack.c.bf16 %v7635_v45, %v7631_v22  ;;  %v7580_v3 = vpop.permute.xlu1 %7579  ;;  %v7632_v34 = vmul.f32 %v7618_v6, %v7597_v47 }
 0xa7c   : > { %v7598_v44 = vsel %vm1650_vm15, %v7572_v28, %v7580_v3 }
 0xa7d   : > { %v7636_v31 = vmul.f32 %v7618_v6, %v7598_v44  ;;  %v7586_v20 = vpop.permute.xlu0 %7585 }
 0xa7e   : > { %v7593_v7 = vsel %vm1650_vm15, %v7578_v60, %v7586_v20  ;;  %v7605_v48 = vsel %vm1650_vm15, %v7586_v20, %v7562_v35 }
 0xa7f   : > { %v7648_v62 = vpack.c.bf16 %v7636_v31, %v7632_v34  ;;  %v7588_v1 = vpop.permute.xlu1 %7587  ;;  %v7633_v55 = vmul.f32 %v7622_v11, %v7593_v7  ;;  %v7634_v58 = vmul.f32 %v7626_v21, %v7605_v48 }
 0xa80   : > { %v7594_v0 = vsel %vm1650_vm15, %v7580_v3, %v7588_v1  ;;  %v7606_v24 = vsel %vm1650_vm15, %v7588_v1, %v7564_v30 }
 0xa81   : > { %v7637_v16 = vmul.f32 %v7622_v11, %v7594_v0  ;;  %v7638_v42 = vmul.f32 %v7626_v21, %v7606_v24  ;;  %v7566_v5 = vpop.permute.xlu0 %7565  ;;  %8039 = vmatprep.subr.bf16.mxu0 %v7648_v62 }
 0xa82   : > { %8040 = vmatpush1.bf16.msra.mxu0 %v7647_v53 }
 0xa83   : > { %v7649_v23 = vpack.c.bf16 %v7637_v16, %v7633_v55  ;;  %v7650_v43 = vpack.c.bf16 %v7638_v42, %v7634_v58  ;;  %v7568_v38 = vpop.permute.xlu1 %7567 }
 0xa85   : > { %v7574_v10 = vpop.permute.xlu0 %7573  ;;  %8203 = vmatprep.subr.bf16.mxu1 %v7650_v43 }
 0xa86   : > { %v7603_v49 = vsel %vm1650_vm15, %v7566_v5, %v7574_v10  ;;  %8204 = vmatpush1.bf16.msra.mxu1 %v7649_v23 }
 0xa87   : > { %v7576_v61 = vpop.permute.xlu1 %7575  ;;  %v7639_v50 = vmul.f32 %v7614_v29, %v7603_v49 }
 0xa88   : > { %v7604_v46 = vsel %vm1650_vm15, %v7568_v38, %v7576_v61 }
 0xa89   : > { %v7643_v17 = vmul.f32 %v7614_v29, %v7604_v46  ;;  %v7582_v40 = vpop.permute.xlu0 %7581 }
 0xa8a   : > { %v7599_v18 = vsel %vm1650_vm15, %v7574_v10, %v7582_v40 }
 0xa8b   : > { %v7651_v56 = vpack.c.bf16 %v7643_v17, %v7639_v50  ;;  %v7584_v52 = vpop.permute.xlu1 %7583  ;;  %v7640_v39 = vmul.f32 %v7618_v6, %v7599_v18 }
 0xa8c   : > { %v7600_v32 = vsel %vm1650_vm15, %v7576_v61, %v7584_v52 }
 0xa8d   : > { %v7644_v36 = vmul.f32 %v7618_v6, %v7600_v32  ;;  %v7590_v59 = vpop.permute.xlu0 %7589 }
 0xa8e   : > { %v7595_v2 = vsel %vm1650_vm15, %v7582_v40, %v7590_v59  ;;  %v7607_v41 = vsel %vm1650_vm15, %v7590_v59, %v7566_v5 }
 0xa8f   : > { %v7652_v15 = vpack.c.bf16 %v7644_v36, %v7640_v39  ;;  %v7592_v54 = vpop.permute.xlu1 %7591  ;;  %v7641_v33 = vmul.f32 %v7622_v11, %v7595_v2  ;;  %v7642_v57 = vmul.f32 %v7626_v21, %v7607_v41 }
 0xa90   : > { %v7596_v25 = vsel %vm1650_vm15, %v7584_v52, %v7592_v54  ;;  %v7608_v13 = vsel %vm1650_vm15, %v7592_v54, %v7568_v38 }
 0xa91   : > { %v7645_v35 = vmul.f32 %v7622_v11, %v7596_v25  ;;  %v7646_v26 = vmul.f32 %v7626_v21, %v7608_v13  ;;  %8041 = vmatprep.subr.bf16.mxu0 %v7652_v15 }
 0xa92   : > { %8042 = vmatpush1.bf16.msra.mxu0 %v7651_v56 }
 0xa93   : > { %v7653_v63 = vpack.c.bf16 %v7645_v35, %v7641_v33  ;;  %v7654_v8 = vpack.c.bf16 %v7646_v26, %v7642_v57 }
 0xa95   : > { %8433 = vmatmul.mubr.msk.bf16.vlgmr.msra.gmra.mrb[16].mxu0 %vm7912_vm4, %v7904_v14  ;;  %8205 = vmatprep.subr.bf16.mxu1 %v7654_v8 }
 0xa96   : > { %8206 = vmatpush1.bf16.msra.mxu1 %v7653_v63 }
 0xa99   : > { %8434 = vmatmul.mubr.msk.bf16.vlgmr.msra.gmra.mrb[16].mxu1 %vm7912_vm4, %v7904_v14 }
 0xa9e   : > { %v7869_v30 = vpop.permute.xlu0 %7868 }
 0xb68   : > { %v8073_v29 = vpop.f32.mrb[16].mxu0 }
 0xb69   : > { %v8454_v19 = vadd.f32 %v8073_v29, %v7869_v30  ;;  %v8075_v12 = vpop.f32.mrb[17].mxu0 }
 0xb6a   : > { %v8455_v27 = vadd.f32 %v8075_v12, %v7869_v30  ;;  %v8077_v37 = vpop.f32.mrb[18].mxu0 }
 0xb6b   : > { %v8078_v51 = vpop.f32.mrb[19].mxu0 }
 0xb6c   : > { %v8248_v28 = vcombine.low %v8454_v19, %v8455_v27  ;;  %v8237_v4 = vpop.f32.mrb[16].mxu1 }
 0xb6d   : > { %v8456_v22 = vadd.f32 %v8237_v4, %v7869_v30  ;;  %v8239_v45 = vpop.f32.mrb[17].mxu1 }
 0xb6e   : > { %8252 = vst [vmem:[%s356_s5] sm:$0xff] %v8248_v28  ;;  %v8457_v6 = vadd.f32 %v8239_v45, %v7869_v30  ;;  %v8241_v60 = vpop.f32.mrb[18].mxu1 }
 0xb6f   : > { %v8242_v47 = vpop.f32.mrb[19].mxu1 }
 0xb70   : > { %v8249_v53 = vcombine.low %v8456_v22, %v8457_v6 }
 0xb72   : > { %8253 = vst [vmem:[%s356_s5 + $0x8] sm:$0xff] %v8249_v53 }
 0xb73 PF: > { %s15215_s7 = sld [smem:[#allocation3_spill]] }
 0xb79   : > { %s20_s13 = sadd.s32 1, %s15215_s7  }
 0xb7a   : > { %p17_p4 = scmp.ge.s32.totalorder %s20_s13, 4  }
 0xb7c   :  { %19 = sbr.rel (!%p17_p4) target bundleno = 9 (0x9), region = 113 }

</bundles_post_ra>
